<compile_context>
chip_gen: v6e
topology: v6e:2x2x1
jax: 0.10.0
libtpu: 0.0.40
codegen_flags: <defaults>
</compile_context>

<pallas_src>
import functools

import jax
import jax.numpy as jnp
from jax.experimental import pallas as pl
from jax.experimental.pallas import tpu as pltpu


# ----------------------------------------------------------------------------
# small helpers
# ----------------------------------------------------------------------------
def _round_up(x, m):
    return -(-x // m) * m


def _largest_divisor_tile(size, cap, align):
    """Largest multiple of `align` that divides `size` and is <= cap."""
    best = align
    t = align
    while t <= min(cap, size):
        if size % t == 0:
            best = t
        t += align
    return best


def _pad_axis(a, axis, target):
    pad = target - a.shape[axis]
    if pad == 0:
        return a
    widths = [(0, 0)] * a.ndim
    widths[axis] = (0, pad)
    return jnp.pad(a, widths)


def _pick_hw_tile(hw):
    """Spatial tile for the instance-norm kernels (multiple of 8, <= 2048)."""
    if hw <= 2048:
        return hw
    best = None
    t = 8
    while t <= 2048:
        if hw % t == 0:
            best = t
        t += 8
    return best if best is not None else hw


# ----------------------------------------------------------------------------
# Pallas matmul (MXU) — tiled, bf16 operands, f32 accumulator
# ----------------------------------------------------------------------------
_TM_CAP = 256        # M tile cap (parallel axis)
_TN_CAP = 256        # N tile cap (parallel axis)
_TK_CAP = 1024       # K tile cap when the reduction axis is tiled
_K_FULL_MAX = 2048   # take K full-extent (single reduction step) up to this


def _matmul_kernel(a_ref, b_ref, o_ref, acc_ref, *, apply_tanh):
    @pl.when(pl.program_id(2) == 0)
    def _init():
        acc_ref[...] = jnp.zeros_like(acc_ref)

    acc_ref[...] += jnp.dot(a_ref[...], b_ref[...],
                            preferred_element_type=jnp.float32)

    @pl.when(pl.program_id(2) == pl.num_programs(2) - 1)
    def _finalize():
        acc = acc_ref[...]
        if apply_tanh:
            acc = jnp.tanh(acc)
        o_ref[...] = acc.astype(o_ref.dtype)


def pallas_matmul(a, b, *, apply_tanh=False, out_dtype=jnp.bfloat16):
    """(M, K) @ (K, N) on the MXU with a tiled grid + f32 VMEM accumulator."""
    M, K = a.shape
    K2, N = b.shape
    assert K == K2

    a = a.astype(jnp.bfloat16)
    b = b.astype(jnp.bfloat16)

    # ---- tile selection ------------------------------------------------
    if M <= _TM_CAP:
        tm, Mp = M, M
    else:
        tm = _TM_CAP
        Mp = _round_up(M, tm)

    if N <= _TN_CAP:
        tn, Np = N, N
    else:
        Np = _round_up(N, 128)
        tn = _largest_divisor_tile(Np, _TN_CAP, 128)

    Kp = _round_up(K, 128)  # keep the contraction dim lane/sublane aligned
    tk = Kp if Kp <= _K_FULL_MAX else _largest_divisor_tile(Kp, _TK_CAP, 128)

    if (Mp, Kp) != (M, K):
        a = jnp.pad(a, ((0, Mp - M), (0, Kp - K)))
    if (Kp, Np) != (K, N):
        b = jnp.pad(b, ((0, Kp - K), (0, Np - N)))

    grid = (Mp // tm, Np // tn, Kp // tk)
    cost = pl.CostEstimate(
        flops=2 * Mp * Np * Kp,
        transcendentals=Mp * Np if apply_tanh else 0,
        bytes_accessed=2 * (Mp * Kp + Kp * Np)
        + Mp * Np * jnp.dtype(out_dtype).itemsize,
    )

    out = pl.pallas_call(
        functools.partial(_matmul_kernel, apply_tanh=apply_tanh),
        out_shape=jax.ShapeDtypeStruct((Mp, Np), out_dtype),
        grid=grid,
        in_specs=[
            pl.BlockSpec((tm, tk), lambda i, j, k: (i, k)),
            pl.BlockSpec((tk, tn), lambda i, j, k: (k, j)),
        ],
        out_specs=pl.BlockSpec((tm, tn), lambda i, j, k: (i, j)),
        scratch_shapes=[pltpu.VMEM((tm, tn), jnp.float32)],
        compiler_params=pltpu.CompilerParams(
            dimension_semantics=("parallel", "parallel", "arbitrary"),
            vmem_limit_bytes=32 * 1024 * 1024,
        ),
        cost_estimate=cost,
    )(a, b)

    if (Mp, Np) != (M, N):
        out = out[:M, :N]
    return out


# ----------------------------------------------------------------------------
# Instance norm (two-pass, HW-tiled) fused with ReLU / residual add
# ----------------------------------------------------------------------------
def _inorm_stats_kernel(x_ref, g_ref, b_ref, st_ref, *, eps, inv_hw):
    t = pl.program_id(1)

    @pl.when(t == 0)
    def _init():
        st_ref[...] = jnp.zeros_like(st_ref)

    x = x_ref[...].astype(jnp.float32)                       # (1, thw, C)
    st_ref[:, 0:1, :] += jnp.sum(x, axis=1, keepdims=True)   # sum
    st_ref[:, 1:2, :] += jnp.sum(x * x, axis=1, keepdims=True)  # sum of squares

    @pl.when(t == pl.num_programs(1) - 1)
    def _finalize():
        mean = st_ref[:, 0:1, :] * inv_hw
        var = st_ref[:, 1:2, :] * inv_hw - mean * mean       # biased (torch)
        rstd = jax.lax.rsqrt(var + eps)
        scale = g_ref[...] * rstd                            # (1, 1, C)
        bias = b_ref[...] - mean * scale
        st_ref[:, 0:1, :] = scale
        st_ref[:, 1:2, :] = bias


def _inorm_apply_kernel(*refs, relu, add_residual):
    if add_residual:
        x_ref, st_ref, res_ref, o_ref = refs
    else:
        x_ref, st_ref, o_ref = refs
        res_ref = None
    x = x_ref[...].astype(jnp.float32)        # (1, thw, C)
    scale = st_ref[:, 0:1, :]                 # (1, 1, C)
    bias = st_ref[:, 1:2, :]
    y = x * scale + bias
    if relu:
        y = jnp.maximum(y, 0.0)
    if add_residual:
        y = y + res_ref[...].astype(jnp.float32)
    o_ref[...] = y.astype(o_ref.dtype)


def instance_norm(x, gamma, beta, *, relu=False, residual=None, eps=1e-5,
                  out_dtype=jnp.bfloat16):
    """InstanceNorm2d(affine=True), instance statistics, fused ReLU/residual."""
    N, H, W, C = x.shape
    HW = H * W
    thw = _pick_hw_tile(HW)
    T = HW // thw

    x2 = x.reshape(N, HW, C)
    g3 = gamma.reshape(1, 1, C).astype(jnp.float32)
    b3 = beta.reshape(1, 1, C).astype(jnp.float32)

    # pass 1: per-(n, c) scale/bias from a single-sweep sum / sum-of-squares
    stats = pl.pallas_call(
        functools.partial(_inorm_stats_kernel, eps=eps, inv_hw=1.0 / HW),
        out_shape=jax.ShapeDtypeStruct((N, 2, C), jnp.float32),
        grid=(N, T),
        in_specs=[
            pl.BlockSpec((1, thw, C), lambda n, t: (n, t, 0)),
            pl.BlockSpec((1, 1, C), lambda n, t: (0, 0, 0)),
            pl.BlockSpec((1, 1, C), lambda n, t: (0, 0, 0)),
        ],
        out_specs=pl.BlockSpec((1, 2, C), lambda n, t: (n, 0, 0)),
        compiler_params=pltpu.CompilerParams(
            dimension_semantics=("parallel", "arbitrary")),
    )(x2, g3, b3)

    # pass 2: normalize + affine (+ReLU) (+residual), elementwise, fully tiled
    inputs = [x2, stats]
    in_specs = [
        pl.BlockSpec((1, thw, C), lambda n, t: (n, t, 0)),
        pl.BlockSpec((1, 2, C), lambda n, t: (n, 0, 0)),
    ]
    if residual is not None:
        inputs.append(residual.reshape(N, HW, C))
        in_specs.append(pl.BlockSpec((1, thw, C), lambda n, t: (n, t, 0)))

    out = pl.pallas_call(
        functools.partial(_inorm_apply_kernel, relu=relu,
                          add_residual=residual is not None),
        out_shape=jax.ShapeDtypeStruct((N, HW, C), out_dtype),
        grid=(N, T),
        in_specs=in_specs,
        out_specs=pl.BlockSpec((1, thw, C), lambda n, t: (n, t, 0)),
        compiler_params=pltpu.CompilerParams(
            dimension_semantics=("parallel", "parallel")),
    )(*inputs)
    return out.reshape(N, H, W, C)


# ----------------------------------------------------------------------------
# Convolution via im2col + Pallas matmul
# ----------------------------------------------------------------------------
def _im2col(x, kh, kw, stride, padding):
    N, H, W, C = x.shape
    if padding:
        x = jnp.pad(x, ((0, 0), (padding, padding), (padding, padding), (0, 0)))
    Ho = (H + 2 * padding - kh) // stride + 1
    Wo = (W + 2 * padding - kw) // stride + 1
    patches = []
    for i in range(kh):
        for j in range(kw):
            patches.append(
                x[:, i:i + stride * Ho:stride, j:j + stride * Wo:stride, :])
    p = jnp.stack(patches, axis=3)              # (N, Ho, Wo, kh*kw, C)
    return p.reshape(N * Ho * Wo, kh * kw * C), Ho, Wo


def conv2d(x, w, *, stride=1, padding=0, apply_tanh=False,
           out_dtype=jnp.bfloat16):
    """x: (N, H, W, Cin) NHWC;  w: (Cout, Cin, kh, kw) (PyTorch Conv2d layout)."""
    Cout, Cin, kh, kw = w.shape
    cols, Ho, Wo = _im2col(x.astype(jnp.bfloat16), kh, kw, stride, padding)
    wmat = jnp.transpose(w, (2, 3, 1, 0)).reshape(kh * kw * Cin, Cout)
    out = pallas_matmul(cols, wmat, apply_tanh=apply_tanh, out_dtype=out_dtype)
    return out.reshape(x.shape[0], Ho, Wo, Cout)


def conv_transpose2d(x, w, *, stride=2, padding=1):
    """x: (N, H, W, Cin);  w: (Cin, Cout, kh, kw) (PyTorch ConvTranspose2d layout).

    Sub-pixel decomposition: the k=4 / s=2 / p=1 transposed conv equals four
    2x2 stride-1 convolutions on the undilated input (one per output-parity
    class), interleaved afterwards — ~4x fewer flops/bytes than zero-dilation.
    """
    Cin, Cout, kh, kw = w.shape
    assert (kh, kw, stride, padding) == (4, 4, 2, 1)
    N, H, W, _ = x.shape

    subs = []
    for py in range(2):
        ky = [3, 1] if py == 0 else [2, 0]
        for px in range(2):
            kx = [3, 1] if px == 0 else [2, 0]
            wsub = w[:, :, ky, :][:, :, :, kx]            # (Cin, Cout, 2, 2)
            wsub = jnp.transpose(wsub, (1, 0, 2, 3))       # -> Conv2d layout
            xp = jnp.pad(x, ((0, 0), (1 - py, py), (1 - px, px), (0, 0)))
            subs.append(conv2d(xp, wsub, stride=1, padding=0))

    s = jnp.stack(subs, axis=0).reshape(2, 2, N, H, W, Cout)
    # out[n, 2r+py, 2s+px, c] = subs[py][px][n, r, s, c]
    out = jnp.transpose(s, (2, 3, 0, 4, 1, 5)).reshape(N, 2 * H, 2 * W, Cout)
    return out


# ----------------------------------------------------------------------------
# Model
# ----------------------------------------------------------------------------
def residual_block(x, p):
    h = conv2d(x, p["w1"], stride=1, padding=1)
    h = instance_norm(h, p["g1"], p["b1"], relu=True)
    h = conv2d(h, p["w2"], stride=1, padding=1)
    # x + main(x)  (reference computes main(x) twice; deterministic, so once)
    return instance_norm(h, p["g2"], p["b2"], relu=False, residual=x)


def generator_forward(params, x_nchw, c, *, out_channels=3):
    x = jnp.transpose(x_nchw, (0, 2, 3, 1))  # NCHW -> NHWC
    N, H, W, _ = x.shape
    c_map = jnp.broadcast_to(c[:, None, None, :].astype(x.dtype),
                             (N, H, W, c.shape[1]))
    x = jnp.concatenate([x, c_map], axis=-1)

    x = conv2d(x, params["conv1_w"], stride=1, padding=3)
    x = instance_norm(x, params["norm1_g"], params["norm1_b"], relu=True)

    x = conv2d(x, params["conv2_1_w"], stride=2, padding=1)
    x = instance_norm(x, params["norm2_1_g"], params["norm2_1_b"], relu=True)

    x = conv2d(x, params["conv2_2_w"], stride=2, padding=1)
    x = instance_norm(x, params["norm2_2_g"], params["norm2_2_b"], relu=True)

    for p in params["res"]:
        x = residual_block(x, p)

    x = conv_transpose2d(x, params["conv3_1_w"])
    x = instance_norm(x, params["norm3_1_g"], params["norm3_1_b"], relu=True)

    x = conv_transpose2d(x, params["conv3_2_w"])
    x = instance_norm(x, params["norm3_2_g"], params["norm3_2_b"], relu=True)

    x = conv2d(x, params["conv4_w"], stride=1, padding=3,
               apply_tanh=True, out_dtype=jnp.float32)
    x = x[..., :out_channels]                 # drop zero pad channels
    return jnp.transpose(x, (0, 3, 1, 2))     # NHWC -> NCHW


# ----------------------------------------------------------------------------
# Parameters (PyTorch-shaped) + one-time channel padding to lane-dense layout
# ----------------------------------------------------------------------------
def init_params(key, conv_dim, c_dim):
    keys = iter(jax.random.split(key, 64))

    def w(shape, scale=0.05):
        return scale * jax.random.normal(next(keys), shape, jnp.float32)

    cd = conv_dim
    p = {}
    p["conv1_w"] = w((cd, 3 + c_dim, 7, 7))
    p["norm1_g"] = jnp.ones((cd,), jnp.float32) + w((cd,))
    p["norm1_b"] = w((cd,))
    p["conv2_1_w"] = w((cd * 2, cd, 4, 4))
    p["norm2_1_g"] = jnp.ones((cd * 2,), jnp.float32) + w((cd * 2,))
    p["norm2_1_b"] = w((cd * 2,))
    p["conv2_2_w"] = w((cd * 4, cd * 2, 4, 4))
    p["norm2_2_g"] = jnp.ones((cd * 4,), jnp.float32) + w((cd * 4,))
    p["norm2_2_b"] = w((cd * 4,))
    p["res"] = []
    for _ in range(6):
        p["res"].append(
            dict(
                w1=w((cd * 4, cd * 4, 3, 3)),
                g1=jnp.ones((cd * 4,), jnp.float32) + w((cd * 4,)),
                b1=w((cd * 4,)),
                w2=w((cd * 4, cd * 4, 3, 3)),
                g2=jnp.ones((cd * 4,), jnp.float32) + w((cd * 4,)),
                b2=w((cd * 4,)),
            )
        )
    # ConvTranspose2d weights are (Cin, Cout, kh, kw)
    p["conv3_1_w"] = w((cd * 4, cd * 2, 4, 4))
    p["norm3_1_g"] = jnp.ones((cd * 2,), jnp.float32) + w((cd * 2,))
    p["norm3_1_b"] = w((cd * 2,))
    p["conv3_2_w"] = w((cd * 2, cd, 4, 4))
    p["norm3_2_g"] = jnp.ones((cd,), jnp.float32) + w((cd,))
    p["norm3_2_b"] = w((cd,))
    p["conv4_w"] = w((3, cd, 7, 7))
    return p


def pad_params(p):
    """Zero-pad all channel dims to multiples of 128 (lane-dense layout).
    Exact: padded weights / gammas / betas are zero, so padded channels stay
    identically zero through the whole network."""
    def pc(n):
        return _round_up(n, 128)

    def pad_conv(w, pad_cin=True):            # (Cout, Cin, kh, kw)
        w = _pad_axis(w, 0, pc(w.shape[0]))
        if pad_cin:
            w = _pad_axis(w, 1, pc(w.shape[1]))
        return w

    def pad_convT(w):                         # (Cin, Cout, kh, kw)
        return _pad_axis(_pad_axis(w, 0, pc(w.shape[0])), 1, pc(w.shape[1]))

    def pad_vec(v):
        return _pad_axis(v, 0, pc(v.shape[0]))

    return {
        "conv1_w": pad_conv(p["conv1_w"], pad_cin=False),  # real RGB+c input
        "norm1_g": pad_vec(p["norm1_g"]), "norm1_b": pad_vec(p["norm1_b"]),
        "conv2_1_w": pad_conv(p["conv2_1_w"]),
        "norm2_1_g": pad_vec(p["norm2_1_g"]), "norm2_1_b": pad_vec(p["norm2_1_b"]),
        "conv2_2_w": pad_conv(p["conv2_2_w"]),
        "norm2_2_g": pad_vec(p["norm2_2_g"]), "norm2_2_b": pad_vec(p["norm2_2_b"]),
        "res": [
            dict(w1=pad_conv(r["w1"]), g1=pad_vec(r["g1"]), b1=pad_vec(r["b1"]),
                 w2=pad_conv(r["w2"]), g2=pad_vec(r["g2"]), b2=pad_vec(r["b2"]))
            for r in p["res"]
        ],
        "conv3_1_w": pad_convT(p["conv3_1_w"]),
        "norm3_1_g": pad_vec(p["norm3_1_g"]), "norm3_1_b": pad_vec(p["norm3_1_b"]),
        "conv3_2_w": pad_convT(p["conv3_2_w"]),
        "norm3_2_g": pad_vec(p["norm3_2_g"]), "norm3_2_b": pad_vec(p["norm3_2_b"]),
        "conv4_w": pad_conv(p["conv4_w"]),
    }


if __name__ == "__main__":
    conv_dim, c_dim = 8, 4          # small but structurally identical to the module
    N, H, W = 2, 16, 16

    params = pad_params(init_params(jax.random.PRNGKey(0), conv_dim, c_dim))
    kx, kc = jax.random.split(jax.random.PRNGKey(0), 2)
    x = jax.random.normal(kx, (N, 3, H, W), jnp.float32)
    c = jax.random.normal(kc, (N, c_dim), jnp.float32)

    out = jax.jit(generator_forward)(params, x, c)
    out = jax.block_until_ready(out)
    assert out.shape == (N, 3, H, W), out.shape
    assert bool(jnp.all(jnp.isfinite(out)))
    assert bool(jnp.all(jnp.abs(out) <= 1.0))  # tanh output range
    print("KERNEL_OK")
</pallas_src>

<mosaic_0001>
module attributes {stable_mosaic.version = 11 : i64} {
  func.func @_inorm_stats_kernel(%arg0: i32, %arg1: i32, %arg2: memref<1x256x128xbf16, #tpu.memory_space<vmem>>, %arg3: memref<1x1x128xf32, #tpu.memory_space<vmem>>, %arg4: memref<1x1x128xf32, #tpu.memory_space<vmem>>, %arg5: memref<1x2x128xf32, #tpu.memory_space<vmem>>) attributes {dimension_semantics = [#tpu.dimension_semantics<parallel>, #tpu.dimension_semantics<arbitrary>], iteration_bounds = array<i64: 2, 1>, scalar_prefetch = 0 : i64, scratch_operands = 0 : i64, tpu.core_type = #tpu.core_type<tc>, window_params = [{transform_indices = @transform_0, window_bounds = array<i64: 1, 256, 128>}, {pipeline_mode = #tpu.pipeline_mode<synchronous>, transform_indices = @transform_1, window_bounds = array<i64: 1, 1, 128>}, {pipeline_mode = #tpu.pipeline_mode<synchronous>, transform_indices = @transform_2, window_bounds = array<i64: 1, 1, 128>}, {transform_indices = @transform_3, window_bounds = array<i64: 1, 2, 128>}]} {
    %c0_i32 = arith.constant 0 : i32
    %0 = arith.cmpi eq, %arg1, %c0_i32 : i32
    %1 = arith.extui %0 : i1 to i32
    %c0_i32_0 = arith.constant 0 : i32
    %2 = arith.cmpi ne, %1, %c0_i32_0 : i32
    scf.if %2 {
      %cst_17 = arith.constant 0.000000e+00 : f32
      %19 = vector.broadcast %cst_17 : f32 to vector<1x2x128xf32>
      %c0_18 = arith.constant 0 : index
      %c0_19 = arith.constant 0 : index
      %c0_20 = arith.constant 0 : index
      %20 = vector.load %arg5[%c0_18, %c0_19, %c0_20] : memref<1x2x128xf32, #tpu.memory_space<vmem>>, vector<1x2x128xf32>
      tpu.vector_store %arg5[%c0_18, %c0_19, %c0_20], %19 {strides = array<i32>} : memref<1x2x128xf32, #tpu.memory_space<vmem>>, vector<1x2x128xf32>,
    } else {
    }
    %c0 = arith.constant 0 : index
    %c0_1 = arith.constant 0 : index
    %c0_2 = arith.constant 0 : index
    %3 = vector.load %arg2[%c0, %c0_1, %c0_2] : memref<1x256x128xbf16, #tpu.memory_space<vmem>>, vector<1x256x128xbf16>
    %4 = arith.extf %3 : vector<1x256x128xbf16> to vector<1x256x128xf32>
    %c0_3 = arith.constant 0 : index
    %c0_4 = arith.constant 0 : index
    %c0_5 = arith.constant 0 : index
    %5 = vector.load %arg5[%c0_3, %c0_4, %c0_5] : memref<1x2x128xf32, #tpu.memory_space<vmem>>, vector<1x1x128xf32>
    %cst = arith.constant dense<0.000000e+00> : vector<1x128xf32>
    %6 = vector.multi_reduction <add>, %4, %cst [1] : vector<1x256x128xf32> to vector<1x128xf32>
    %7 = vector.shape_cast %6 : vector<1x128xf32> to vector<1x1x128xf32>
    %8 = arith.addf %5, %7 : vector<1x1x128xf32>
    %c0_6 = arith.constant 0 : index
    %c0_7 = arith.constant 0 : index
    %c0_8 = arith.constant 0 : index
    %9 = vector.load %arg5[%c0_6, %c0_7, %c0_8] : memref<1x2x128xf32, #tpu.memory_space<vmem>>, vector<1x1x128xf32>
    tpu.vector_store %arg5[%c0_6, %c0_7, %c0_8], %8 {strides = array<i32>} : memref<1x2x128xf32, #tpu.memory_space<vmem>>, vector<1x1x128xf32>,
    %c0_9 = arith.constant 0 : index
    %c1 = arith.constant 1 : index
    %c0_10 = arith.constant 0 : index
    %10 = vector.load %arg5[%c0_9, %c1, %c0_10] : memref<1x2x128xf32, #tpu.memory_space<vmem>>, vector<1x1x128xf32>
    %11 = arith.mulf %4, %4 : vector<1x256x128xf32>
    %cst_11 = arith.constant dense<0.000000e+00> : vector<1x128xf32>
    %12 = vector.multi_reduction <add>, %11, %cst_11 [1] : vector<1x256x128xf32> to vector<1x128xf32>
    %13 = vector.shape_cast %12 : vector<1x128xf32> to vector<1x1x128xf32>
    %14 = arith.addf %10, %13 : vector<1x1x128xf32>
    %c0_12 = arith.constant 0 : index
    %c1_13 = arith.constant 1 : index
    %c0_14 = arith.constant 0 : index
    %15 = vector.load %arg5[%c0_12, %c1_13, %c0_14] : memref<1x2x128xf32, #tpu.memory_space<vmem>>, vector<1x1x128xf32>
    tpu.vector_store %arg5[%c0_12, %c1_13, %c0_14], %14 {strides = array<i32>} : memref<1x2x128xf32, #tpu.memory_space<vmem>>, vector<1x1x128xf32>,
    %c0_i32_15 = arith.constant 0 : i32
    %16 = arith.cmpi eq, %arg1, %c0_i32_15 : i32
    %17 = arith.extui %16 : i1 to i32
    %c0_i32_16 = arith.constant 0 : i32
    %18 = arith.cmpi ne, %17, %c0_i32_16 : i32
    scf.if %18 {
      %c0_17 = arith.constant 0 : index
      %c0_18 = arith.constant 0 : index
      %c0_19 = arith.constant 0 : index
      %19 = vector.load %arg5[%c0_17, %c0_18, %c0_19] : memref<1x2x128xf32, #tpu.memory_space<vmem>>, vector<1x1x128xf32>
      %cst_20 = arith.constant 3.906250e-03 : f32
      %20 = vector.broadcast %cst_20 : f32 to vector<1x1x128xf32>
      %21 = arith.mulf %19, %20 : vector<1x1x128xf32>
      %c0_21 = arith.constant 0 : index
      %c1_22 = arith.constant 1 : index
      %c0_23 = arith.constant 0 : index
      %22 = vector.load %arg5[%c0_21, %c1_22, %c0_23] : memref<1x2x128xf32, #tpu.memory_space<vmem>>, vector<1x1x128xf32>
      %cst_24 = arith.constant 3.906250e-03 : f32
      %23 = vector.broadcast %cst_24 : f32 to vector<1x1x128xf32>
      %24 = arith.mulf %22, %23 : vector<1x1x128xf32>
      %25 = arith.mulf %21, %21 : vector<1x1x128xf32>
      %26 = arith.subf %24, %25 : vector<1x1x128xf32>
      %cst_25 = arith.constant 9.99999974E-6 : f32
      %27 = vector.broadcast %cst_25 : f32 to vector<1x1x128xf32>
      %28 = arith.addf %26, %27 : vector<1x1x128xf32>
      %29 = math.rsqrt %28 : vector<1x1x128xf32>
      %c0_26 = arith.constant 0 : index
      %c0_27 = arith.constant 0 : index
      %c0_28 = arith.constant 0 : index
      %30 = vector.load %arg3[%c0_26, %c0_27, %c0_28] : memref<1x1x128xf32, #tpu.memory_space<vmem>>, vector<1x1x128xf32>
      %31 = arith.mulf %30, %29 : vector<1x1x128xf32>
      %c0_29 = arith.constant 0 : index
      %c0_30 = arith.constant 0 : index
      %c0_31 = arith.constant 0 : index
      %32 = vector.load %arg4[%c0_29, %c0_30, %c0_31] : memref<1x1x128xf32, #tpu.memory_space<vmem>>, vector<1x1x128xf32>
      %33 = arith.mulf %21, %31 : vector<1x1x128xf32>
      %34 = arith.subf %32, %33 : vector<1x1x128xf32>
      %c0_32 = arith.constant 0 : index
      %c0_33 = arith.constant 0 : index
      %c0_34 = arith.constant 0 : index
      %35 = vector.load %arg5[%c0_32, %c0_33, %c0_34] : memref<1x2x128xf32, #tpu.memory_space<vmem>>, vector<1x1x128xf32>
      tpu.vector_store %arg5[%c0_32, %c0_33, %c0_34], %31 {strides = array<i32>} : memref<1x2x128xf32, #tpu.memory_space<vmem>>, vector<1x1x128xf32>,
      %c0_35 = arith.constant 0 : index
      %c1_36 = arith.constant 1 : index
      %c0_37 = arith.constant 0 : index
      %36 = vector.load %arg5[%c0_35, %c1_36, %c0_37] : memref<1x2x128xf32, #tpu.memory_space<vmem>>, vector<1x1x128xf32>
      tpu.vector_store %arg5[%c0_35, %c1_36, %c0_37], %34 {strides = array<i32>} : memref<1x2x128xf32, #tpu.memory_space<vmem>>, vector<1x1x128xf32>,
    } else {
    }
    return
  }
  func.func @transform_0(%arg0: i32, %arg1: i32) -> (i32, i32, i32) {
    %c0_i32 = arith.constant 0 : i32
    %c0_i32_0 = arith.constant 0 : i32
    return %arg0, %arg1, %c0_i32 : i32, i32, i32
  }
  func.func @transform_1(%arg0: i32, %arg1: i32) -> (i32, i32, i32) {
    %c0_i32 = arith.constant 0 : i32
    %c0_i32_0 = arith.constant 0 : i32
    %c0_i32_1 = arith.constant 0 : i32
    %c0_i32_2 = arith.constant 0 : i32
    return %c0_i32, %c0_i32_0, %c0_i32_1 : i32, i32, i32
  }
  func.func @transform_2(%arg0: i32, %arg1: i32) -> (i32, i32, i32) {
    %c0_i32 = arith.constant 0 : i32
    %c0_i32_0 = arith.constant 0 : i32
    %c0_i32_1 = arith.constant 0 : i32
    %c0_i32_2 = arith.constant 0 : i32
    return %c0_i32, %c0_i32_0, %c0_i32_1 : i32, i32, i32
  }
  func.func @transform_3(%arg0: i32, %arg1: i32) -> (i32, i32, i32) {
    %c0_i32 = arith.constant 0 : i32
    %c0_i32_0 = arith.constant 0 : i32
    %c0_i32_1 = arith.constant 0 : i32
    return %arg0, %c0_i32, %c0_i32_0 : i32, i32, i32
  }
}

module attributes {stable_mosaic.version = 11 : i64} {
  func.func @_matmul_kernel(%arg0: i32, %arg1: i32, %arg2: i32, %arg3: memref<256x384xbf16, #tpu.memory_space<vmem>>, %arg4: memref<384x128xbf16, #tpu.memory_space<vmem>>, %arg5: memref<256x128xbf16, #tpu.memory_space<vmem>>, %arg6: memref<256x128xf32, #tpu.memory_space<vmem>>) attributes {dimension_semantics = [#tpu.dimension_semantics<parallel>, #tpu.dimension_semantics<parallel>, #tpu.dimension_semantics<arbitrary>], iteration_bounds = array<i64: 2, 1, 1>, scalar_prefetch = 0 : i64, scratch_operands = 1 : i64, tpu.core_type = #tpu.core_type<tc>, window_params = [{transform_indices = @transform_0, window_bounds = array<i64: 256, 384>}, {transform_indices = @transform_1, window_bounds = array<i64: 384, 128>}, {transform_indices = @transform_2, window_bounds = array<i64: 256, 128>}]} {
    %c0_i32 = arith.constant 0 : i32
    %0 = arith.cmpi eq, %arg2, %c0_i32 : i32
    %1 = arith.extui %0 : i1 to i32
    %c0_i32_0 = arith.constant 0 : i32
    %2 = arith.cmpi ne, %1, %c0_i32_0 : i32
    scf.if %2 {
      %cst_10 = arith.constant 0.000000e+00 : f32
      %12 = vector.broadcast %cst_10 : f32 to vector<256x128xf32>
      %c0_11 = arith.constant 0 : index
      %c0_12 = arith.constant 0 : index
      %13 = vector.load %arg6[%c0_11, %c0_12] : memref<256x128xf32, #tpu.memory_space<vmem>>, vector<256x128xf32>
      tpu.vector_store %arg6[%c0_11, %c0_12], %12 {strides = array<i32>} : memref<256x128xf32, #tpu.memory_space<vmem>>, vector<256x128xf32>,
    } else {
    }
    %c0 = arith.constant 0 : index
    %c0_1 = arith.constant 0 : index
    %3 = vector.load %arg6[%c0, %c0_1] : memref<256x128xf32, #tpu.memory_space<vmem>>, vector<256x128xf32>
    %c0_2 = arith.constant 0 : index
    %c0_3 = arith.constant 0 : index
    %4 = vector.load %arg3[%c0_2, %c0_3] : memref<256x384xbf16, #tpu.memory_space<vmem>>, vector<256x384xbf16>
    %c0_4 = arith.constant 0 : index
    %c0_5 = arith.constant 0 : index
    %5 = vector.load %arg4[%c0_4, %c0_5] : memref<384x128xbf16, #tpu.memory_space<vmem>>, vector<384x128xbf16>
    %cst = arith.constant dense<0.000000e+00> : vector<256x128xf32>
    %6 = tpu.matmul %4, %5, %cst {dimension_numbers = #tpu.dot_dimension_numbers<[1], [0], [0], [1], [0, 0, 1, 1], [], []>} : vector<256x384xbf16>, vector<384x128xbf16>, vector<256x128xf32> -> vector<256x128xf32>
    %7 = arith.addf %3, %6 : vector<256x128xf32>
    %c0_6 = arith.constant 0 : index
    %c0_7 = arith.constant 0 : index
    %8 = vector.load %arg6[%c0_6, %c0_7] : memref<256x128xf32, #tpu.memory_space<vmem>>, vector<256x128xf32>
    tpu.vector_store %arg6[%c0_6, %c0_7], %7 {strides = array<i32>} : memref<256x128xf32, #tpu.memory_space<vmem>>, vector<256x128xf32>,
    %c0_i32_8 = arith.constant 0 : i32
    %9 = arith.cmpi eq, %arg2, %c0_i32_8 : i32
    %10 = arith.extui %9 : i1 to i32
    %c0_i32_9 = arith.constant 0 : i32
    %11 = arith.cmpi ne, %10, %c0_i32_9 : i32
    scf.if %11 {
      %c0_10 = arith.constant 0 : index
      %c0_11 = arith.constant 0 : index
      %12 = vector.load %arg6[%c0_10, %c0_11] : memref<256x128xf32, #tpu.memory_space<vmem>>, vector<256x128xf32>
      %13 = arith.truncf %12 : vector<256x128xf32> to vector<256x128xbf16>
      %c0_12 = arith.constant 0 : index
      %c0_13 = arith.constant 0 : index
      %14 = vector.load %arg5[%c0_12, %c0_13] : memref<256x128xbf16, #tpu.memory_space<vmem>>, vector<256x128xbf16>
      tpu.vector_store %arg5[%c0_12, %c0_13], %13 {strides = array<i32>} : memref<256x128xbf16, #tpu.memory_space<vmem>>, vector<256x128xbf16>,
    } else {
    }
    return
  }
  func.func @transform_0(%arg0: i32, %arg1: i32, %arg2: i32) -> (i32, i32) {
    %c0_i32 = arith.constant 0 : i32
    return %arg0, %arg2 : i32, i32
  }
  func.func @transform_1(%arg0: i32, %arg1: i32, %arg2: i32) -> (i32, i32) {
    %c0_i32 = arith.constant 0 : i32
    return %arg2, %arg1 : i32, i32
  }
  func.func @transform_2(%arg0: i32, %arg1: i32, %arg2: i32) -> (i32, i32) {
    %c0_i32 = arith.constant 0 : i32
    return %arg0, %arg1 : i32, i32
  }
}

module attributes {stable_mosaic.version = 11 : i64} {
  func.func @_inorm_apply_kernel(%arg0: i32, %arg1: i32, %arg2: memref<1x256x128xbf16, #tpu.memory_space<vmem>>, %arg3: memref<1x2x128xf32, #tpu.memory_space<vmem>>, %arg4: memref<1x256x128xbf16, #tpu.memory_space<vmem>>) attributes {dimension_semantics = [#tpu.dimension_semantics<parallel>, #tpu.dimension_semantics<parallel>], iteration_bounds = array<i64: 2, 1>, scalar_prefetch = 0 : i64, scratch_operands = 0 : i64, tpu.core_type = #tpu.core_type<tc>, window_params = [{transform_indices = @transform_0, window_bounds = array<i64: 1, 256, 128>}, {transform_indices = @transform_1, window_bounds = array<i64: 1, 2, 128>}, {transform_indices = @transform_2, window_bounds = array<i64: 1, 256, 128>}]} {
    %c0 = arith.constant 0 : index
    %c0_0 = arith.constant 0 : index
    %c0_1 = arith.constant 0 : index
    %0 = vector.load %arg2[%c0, %c0_0, %c0_1] : memref<1x256x128xbf16, #tpu.memory_space<vmem>>, vector<1x256x128xbf16>
    %1 = arith.extf %0 : vector<1x256x128xbf16> to vector<1x256x128xf32>
    %c0_2 = arith.constant 0 : index
    %c0_3 = arith.constant 0 : index
    %c0_4 = arith.constant 0 : index
    %2 = vector.load %arg3[%c0_2, %c0_3, %c0_4] : memref<1x2x128xf32, #tpu.memory_space<vmem>>, vector<1x1x128xf32>
    %c0_5 = arith.constant 0 : index
    %c1 = arith.constant 1 : index
    %c0_6 = arith.constant 0 : index
    %3 = vector.load %arg3[%c0_5, %c1, %c0_6] : memref<1x2x128xf32, #tpu.memory_space<vmem>>, vector<1x1x128xf32>
    %4 = vector.broadcast %2 : vector<1x1x128xf32> to vector<1x256x128xf32>
    %5 = arith.mulf %1, %4 : vector<1x256x128xf32>
    %6 = vector.broadcast %3 : vector<1x1x128xf32> to vector<1x256x128xf32>
    %7 = arith.addf %5, %6 : vector<1x256x128xf32>
    %cst = arith.constant 0.000000e+00 : f32
    %8 = vector.broadcast %cst : f32 to vector<1x256x128xf32>
    %9 = arith.maximumf %7, %8 : vector<1x256x128xf32>
    %10 = arith.truncf %9 : vector<1x256x128xf32> to vector<1x256x128xbf16>
    %c0_7 = arith.constant 0 : index
    %c0_8 = arith.constant 0 : index
    %c0_9 = arith.constant 0 : index
    %11 = vector.load %arg4[%c0_7, %c0_8, %c0_9] : memref<1x256x128xbf16, #tpu.memory_space<vmem>>, vector<1x256x128xbf16>
    tpu.vector_store %arg4[%c0_7, %c0_8, %c0_9], %10 {strides = array<i32>} : memref<1x256x128xbf16, #tpu.memory_space<vmem>>, vector<1x256x128xbf16>,
    return
  }
  func.func @transform_0(%arg0: i32, %arg1: i32) -> (i32, i32, i32) {
    %c0_i32 = arith.constant 0 : i32
    %c0_i32_0 = arith.constant 0 : i32
    return %arg0, %arg1, %c0_i32 : i32, i32, i32
  }
  func.func @transform_1(%arg0: i32, %arg1: i32) -> (i32, i32, i32) {
    %c0_i32 = arith.constant 0 : i32
    %c0_i32_0 = arith.constant 0 : i32
    %c0_i32_1 = arith.constant 0 : i32
    return %arg0, %c0_i32, %c0_i32_0 : i32, i32, i32
  }
  func.func @transform_2(%arg0: i32, %arg1: i32) -> (i32, i32, i32) {
    %c0_i32 = arith.constant 0 : i32
    %c0_i32_0 = arith.constant 0 : i32
    return %arg0, %arg1, %c0_i32 : i32, i32, i32
  }
}

module attributes {stable_mosaic.version = 11 : i64} {
  func.func @_matmul_kernel(%arg0: i32, %arg1: i32, %arg2: i32, %arg3: memref<128x2048xbf16, #tpu.memory_space<vmem>>, %arg4: memref<2048x128xbf16, #tpu.memory_space<vmem>>, %arg5: memref<128x128xbf16, #tpu.memory_space<vmem>>, %arg6: memref<128x128xf32, #tpu.memory_space<vmem>>) attributes {dimension_semantics = [#tpu.dimension_semantics<parallel>, #tpu.dimension_semantics<parallel>, #tpu.dimension_semantics<arbitrary>], iteration_bounds = array<i64: 1, 1, 1>, scalar_prefetch = 0 : i64, scratch_operands = 1 : i64, tpu.core_type = #tpu.core_type<tc>, window_params = [{transform_indices = @transform_0, window_bounds = array<i64: 128, 2048>}, {transform_indices = @transform_1, window_bounds = array<i64: 2048, 128>}, {transform_indices = @transform_2, window_bounds = array<i64: 128, 128>}]} {
    %c0_i32 = arith.constant 0 : i32
    %0 = arith.cmpi eq, %arg2, %c0_i32 : i32
    %1 = arith.extui %0 : i1 to i32
    %c0_i32_0 = arith.constant 0 : i32
    %2 = arith.cmpi ne, %1, %c0_i32_0 : i32
    scf.if %2 {
      %cst_10 = arith.constant 0.000000e+00 : f32
      %12 = vector.broadcast %cst_10 : f32 to vector<128x128xf32>
      %c0_11 = arith.constant 0 : index
      %c0_12 = arith.constant 0 : index
      %13 = vector.load %arg6[%c0_11, %c0_12] : memref<128x128xf32, #tpu.memory_space<vmem>>, vector<128x128xf32>
      tpu.vector_store %arg6[%c0_11, %c0_12], %12 {strides = array<i32>} : memref<128x128xf32, #tpu.memory_space<vmem>>, vector<128x128xf32>,
    } else {
    }
    %c0 = arith.constant 0 : index
    %c0_1 = arith.constant 0 : index
    %3 = vector.load %arg6[%c0, %c0_1] : memref<128x128xf32, #tpu.memory_space<vmem>>, vector<128x128xf32>
    %c0_2 = arith.constant 0 : index
    %c0_3 = arith.constant 0 : index
    %4 = vector.load %arg3[%c0_2, %c0_3] : memref<128x2048xbf16, #tpu.memory_space<vmem>>, vector<128x2048xbf16>
    %c0_4 = arith.constant 0 : index
    %c0_5 = arith.constant 0 : index
    %5 = vector.load %arg4[%c0_4, %c0_5] : memref<2048x128xbf16, #tpu.memory_space<vmem>>, vector<2048x128xbf16>
    %cst = arith.constant dense<0.000000e+00> : vector<128x128xf32>
    %6 = tpu.matmul %4, %5, %cst {dimension_numbers = #tpu.dot_dimension_numbers<[1], [0], [0], [1], [0, 0, 1, 1], [], []>} : vector<128x2048xbf16>, vector<2048x128xbf16>, vector<128x128xf32> -> vector<128x128xf32>
    %7 = arith.addf %3, %6 : vector<128x128xf32>
    %c0_6 = arith.constant 0 : index
    %c0_7 = arith.constant 0 : index
    %8 = vector.load %arg6[%c0_6, %c0_7] : memref<128x128xf32, #tpu.memory_space<vmem>>, vector<128x128xf32>
    tpu.vector_store %arg6[%c0_6, %c0_7], %7 {strides = array<i32>} : memref<128x128xf32, #tpu.memory_space<vmem>>, vector<128x128xf32>,
    %c0_i32_8 = arith.constant 0 : i32
    %9 = arith.cmpi eq, %arg2, %c0_i32_8 : i32
    %10 = arith.extui %9 : i1 to i32
    %c0_i32_9 = arith.constant 0 : i32
    %11 = arith.cmpi ne, %10, %c0_i32_9 : i32
    scf.if %11 {
      %c0_10 = arith.constant 0 : index
      %c0_11 = arith.constant 0 : index
      %12 = vector.load %arg6[%c0_10, %c0_11] : memref<128x128xf32, #tpu.memory_space<vmem>>, vector<128x128xf32>
      %13 = arith.truncf %12 : vector<128x128xf32> to vector<128x128xbf16>
      %c0_12 = arith.constant 0 : index
      %c0_13 = arith.constant 0 : index
      %14 = vector.load %arg5[%c0_12, %c0_13] : memref<128x128xbf16, #tpu.memory_space<vmem>>, vector<128x128xbf16>
      tpu.vector_store %arg5[%c0_12, %c0_13], %13 {strides = array<i32>} : memref<128x128xbf16, #tpu.memory_space<vmem>>, vector<128x128xbf16>,
    } else {
    }
    return
  }
  func.func @transform_0(%arg0: i32, %arg1: i32, %arg2: i32) -> (i32, i32) {
    %c0_i32 = arith.constant 0 : i32
    return %arg0, %arg2 : i32, i32
  }
  func.func @transform_1(%arg0: i32, %arg1: i32, %arg2: i32) -> (i32, i32) {
    %c0_i32 = arith.constant 0 : i32
    return %arg2, %arg1 : i32, i32
  }
  func.func @transform_2(%arg0: i32, %arg1: i32, %arg2: i32) -> (i32, i32) {
    %c0_i32 = arith.constant 0 : i32
    return %arg0, %arg1 : i32, i32
  }
}

module attributes {stable_mosaic.version = 11 : i64} {
  func.func @_inorm_stats_kernel(%arg0: i32, %arg1: i32, %arg2: memref<1x64x128xbf16, #tpu.memory_space<vmem>>, %arg3: memref<1x1x128xf32, #tpu.memory_space<vmem>>, %arg4: memref<1x1x128xf32, #tpu.memory_space<vmem>>, %arg5: memref<1x2x128xf32, #tpu.memory_space<vmem>>) attributes {dimension_semantics = [#tpu.dimension_semantics<parallel>, #tpu.dimension_semantics<arbitrary>], iteration_bounds = array<i64: 2, 1>, scalar_prefetch = 0 : i64, scratch_operands = 0 : i64, tpu.core_type = #tpu.core_type<tc>, window_params = [{transform_indices = @transform_0, window_bounds = array<i64: 1, 64, 128>}, {pipeline_mode = #tpu.pipeline_mode<synchronous>, transform_indices = @transform_1, window_bounds = array<i64: 1, 1, 128>}, {pipeline_mode = #tpu.pipeline_mode<synchronous>, transform_indices = @transform_2, window_bounds = array<i64: 1, 1, 128>}, {transform_indices = @transform_3, window_bounds = array<i64: 1, 2, 128>}]} {
    %c0_i32 = arith.constant 0 : i32
    %0 = arith.cmpi eq, %arg1, %c0_i32 : i32
    %1 = arith.extui %0 : i1 to i32
    %c0_i32_0 = arith.constant 0 : i32
    %2 = arith.cmpi ne, %1, %c0_i32_0 : i32
    scf.if %2 {
      %cst_17 = arith.constant 0.000000e+00 : f32
      %19 = vector.broadcast %cst_17 : f32 to vector<1x2x128xf32>
      %c0_18 = arith.constant 0 : index
      %c0_19 = arith.constant 0 : index
      %c0_20 = arith.constant 0 : index
      %20 = vector.load %arg5[%c0_18, %c0_19, %c0_20] : memref<1x2x128xf32, #tpu.memory_space<vmem>>, vector<1x2x128xf32>
      tpu.vector_store %arg5[%c0_18, %c0_19, %c0_20], %19 {strides = array<i32>} : memref<1x2x128xf32, #tpu.memory_space<vmem>>, vector<1x2x128xf32>,
    } else {
    }
    %c0 = arith.constant 0 : index
    %c0_1 = arith.constant 0 : index
    %c0_2 = arith.constant 0 : index
    %3 = vector.load %arg2[%c0, %c0_1, %c0_2] : memref<1x64x128xbf16, #tpu.memory_space<vmem>>, vector<1x64x128xbf16>
    %4 = arith.extf %3 : vector<1x64x128xbf16> to vector<1x64x128xf32>
    %c0_3 = arith.constant 0 : index
    %c0_4 = arith.constant 0 : index
    %c0_5 = arith.constant 0 : index
    %5 = vector.load %arg5[%c0_3, %c0_4, %c0_5] : memref<1x2x128xf32, #tpu.memory_space<vmem>>, vector<1x1x128xf32>
    %cst = arith.constant dense<0.000000e+00> : vector<1x128xf32>
    %6 = vector.multi_reduction <add>, %4, %cst [1] : vector<1x64x128xf32> to vector<1x128xf32>
    %7 = vector.shape_cast %6 : vector<1x128xf32> to vector<1x1x128xf32>
    %8 = arith.addf %5, %7 : vector<1x1x128xf32>
    %c0_6 = arith.constant 0 : index
    %c0_7 = arith.constant 0 : index
    %c0_8 = arith.constant 0 : index
    %9 = vector.load %arg5[%c0_6, %c0_7, %c0_8] : memref<1x2x128xf32, #tpu.memory_space<vmem>>, vector<1x1x128xf32>
    tpu.vector_store %arg5[%c0_6, %c0_7, %c0_8], %8 {strides = array<i32>} : memref<1x2x128xf32, #tpu.memory_space<vmem>>, vector<1x1x128xf32>,
    %c0_9 = arith.constant 0 : index
    %c1 = arith.constant 1 : index
    %c0_10 = arith.constant 0 : index
    %10 = vector.load %arg5[%c0_9, %c1, %c0_10] : memref<1x2x128xf32, #tpu.memory_space<vmem>>, vector<1x1x128xf32>
    %11 = arith.mulf %4, %4 : vector<1x64x128xf32>
    %cst_11 = arith.constant dense<0.000000e+00> : vector<1x128xf32>
    %12 = vector.multi_reduction <add>, %11, %cst_11 [1] : vector<1x64x128xf32> to vector<1x128xf32>
    %13 = vector.shape_cast %12 : vector<1x128xf32> to vector<1x1x128xf32>
    %14 = arith.addf %10, %13 : vector<1x1x128xf32>
    %c0_12 = arith.constant 0 : index
    %c1_13 = arith.constant 1 : index
    %c0_14 = arith.constant 0 : index
    %15 = vector.load %arg5[%c0_12, %c1_13, %c0_14] : memref<1x2x128xf32, #tpu.memory_space<vmem>>, vector<1x1x128xf32>
    tpu.vector_store %arg5[%c0_12, %c1_13, %c0_14], %14 {strides = array<i32>} : memref<1x2x128xf32, #tpu.memory_space<vmem>>, vector<1x1x128xf32>,
    %c0_i32_15 = arith.constant 0 : i32
    %16 = arith.cmpi eq, %arg1, %c0_i32_15 : i32
    %17 = arith.extui %16 : i1 to i32
    %c0_i32_16 = arith.constant 0 : i32
    %18 = arith.cmpi ne, %17, %c0_i32_16 : i32
    scf.if %18 {
      %c0_17 = arith.constant 0 : index
      %c0_18 = arith.constant 0 : index
      %c0_19 = arith.constant 0 : index
      %19 = vector.load %arg5[%c0_17, %c0_18, %c0_19] : memref<1x2x128xf32, #tpu.memory_space<vmem>>, vector<1x1x128xf32>
      %cst_20 = arith.constant 1.562500e-02 : f32
      %20 = vector.broadcast %cst_20 : f32 to vector<1x1x128xf32>
      %21 = arith.mulf %19, %20 : vector<1x1x128xf32>
      %c0_21 = arith.constant 0 : index
      %c1_22 = arith.constant 1 : index
      %c0_23 = arith.constant 0 : index
      %22 = vector.load %arg5[%c0_21, %c1_22, %c0_23] : memref<1x2x128xf32, #tpu.memory_space<vmem>>, vector<1x1x128xf32>
      %cst_24 = arith.constant 1.562500e-02 : f32
      %23 = vector.broadcast %cst_24 : f32 to vector<1x1x128xf32>
      %24 = arith.mulf %22, %23 : vector<1x1x128xf32>
      %25 = arith.mulf %21, %21 : vector<1x1x128xf32>
      %26 = arith.subf %24, %25 : vector<1x1x128xf32>
      %cst_25 = arith.constant 9.99999974E-6 : f32
      %27 = vector.broadcast %cst_25 : f32 to vector<1x1x128xf32>
      %28 = arith.addf %26, %27 : vector<1x1x128xf32>
      %29 = math.rsqrt %28 : vector<1x1x128xf32>
      %c0_26 = arith.constant 0 : index
      %c0_27 = arith.constant 0 : index
      %c0_28 = arith.constant 0 : index
      %30 = vector.load %arg3[%c0_26, %c0_27, %c0_28] : memref<1x1x128xf32, #tpu.memory_space<vmem>>, vector<1x1x128xf32>
      %31 = arith.mulf %30, %29 : vector<1x1x128xf32>
      %c0_29 = arith.constant 0 : index
      %c0_30 = arith.constant 0 : index
      %c0_31 = arith.constant 0 : index
      %32 = vector.load %arg4[%c0_29, %c0_30, %c0_31] : memref<1x1x128xf32, #tpu.memory_space<vmem>>, vector<1x1x128xf32>
      %33 = arith.mulf %21, %31 : vector<1x1x128xf32>
      %34 = arith.subf %32, %33 : vector<1x1x128xf32>
      %c0_32 = arith.constant 0 : index
      %c0_33 = arith.constant 0 : index
      %c0_34 = arith.constant 0 : index
      %35 = vector.load %arg5[%c0_32, %c0_33, %c0_34] : memref<1x2x128xf32, #tpu.memory_space<vmem>>, vector<1x1x128xf32>
      tpu.vector_store %arg5[%c0_32, %c0_33, %c0_34], %31 {strides = array<i32>} : memref<1x2x128xf32, #tpu.memory_space<vmem>>, vector<1x1x128xf32>,
      %c0_35 = arith.constant 0 : index
      %c1_36 = arith.constant 1 : index
      %c0_37 = arith.constant 0 : index
      %36 = vector.load %arg5[%c0_35, %c1_36, %c0_37] : memref<1x2x128xf32, #tpu.memory_space<vmem>>, vector<1x1x128xf32>
      tpu.vector_store %arg5[%c0_35, %c1_36, %c0_37], %34 {strides = array<i32>} : memref<1x2x128xf32, #tpu.memory_space<vmem>>, vector<1x1x128xf32>,
    } else {
    }
    return
  }
  func.func @transform_0(%arg0: i32, %arg1: i32) -> (i32, i32, i32) {
    %c0_i32 = arith.constant 0 : i32
    %c0_i32_0 = arith.constant 0 : i32
    return %arg0, %arg1, %c0_i32 : i32, i32, i32
  }
  func.func @transform_1(%arg0: i32, %arg1: i32) -> (i32, i32, i32) {
    %c0_i32 = arith.constant 0 : i32
    %c0_i32_0 = arith.constant 0 : i32
    %c0_i32_1 = arith.constant 0 : i32
    %c0_i32_2 = arith.constant 0 : i32
    return %c0_i32, %c0_i32_0, %c0_i32_1 : i32, i32, i32
  }
  func.func @transform_2(%arg0: i32, %arg1: i32) -> (i32, i32, i32) {
    %c0_i32 = arith.constant 0 : i32
    %c0_i32_0 = arith.constant 0 : i32
    %c0_i32_1 = arith.constant 0 : i32
    %c0_i32_2 = arith.constant 0 : i32
    return %c0_i32, %c0_i32_0, %c0_i32_1 : i32, i32, i32
  }
  func.func @transform_3(%arg0: i32, %arg1: i32) -> (i32, i32, i32) {
    %c0_i32 = arith.constant 0 : i32
    %c0_i32_0 = arith.constant 0 : i32
    %c0_i32_1 = arith.constant 0 : i32
    return %arg0, %c0_i32, %c0_i32_0 : i32, i32, i32
  }
}

module attributes {stable_mosaic.version = 11 : i64} {
  func.func @_inorm_apply_kernel(%arg0: i32, %arg1: i32, %arg2: memref<1x64x128xbf16, #tpu.memory_space<vmem>>, %arg3: memref<1x2x128xf32, #tpu.memory_space<vmem>>, %arg4: memref<1x64x128xbf16, #tpu.memory_space<vmem>>) attributes {dimension_semantics = [#tpu.dimension_semantics<parallel>, #tpu.dimension_semantics<parallel>], iteration_bounds = array<i64: 2, 1>, scalar_prefetch = 0 : i64, scratch_operands = 0 : i64, tpu.core_type = #tpu.core_type<tc>, window_params = [{transform_indices = @transform_0, window_bounds = array<i64: 1, 64, 128>}, {transform_indices = @transform_1, window_bounds = array<i64: 1, 2, 128>}, {transform_indices = @transform_2, window_bounds = array<i64: 1, 64, 128>}]} {
    %c0 = arith.constant 0 : index
    %c0_0 = arith.constant 0 : index
    %c0_1 = arith.constant 0 : index
    %0 = vector.load %arg2[%c0, %c0_0, %c0_1] : memref<1x64x128xbf16, #tpu.memory_space<vmem>>, vector<1x64x128xbf16>
    %1 = arith.extf %0 : vector<1x64x128xbf16> to vector<1x64x128xf32>
    %c0_2 = arith.constant 0 : index
    %c0_3 = arith.constant 0 : index
    %c0_4 = arith.constant 0 : index
    %2 = vector.load %arg3[%c0_2, %c0_3, %c0_4] : memref<1x2x128xf32, #tpu.memory_space<vmem>>, vector<1x1x128xf32>
    %c0_5 = arith.constant 0 : index
    %c1 = arith.constant 1 : index
    %c0_6 = arith.constant 0 : index
    %3 = vector.load %arg3[%c0_5, %c1, %c0_6] : memref<1x2x128xf32, #tpu.memory_space<vmem>>, vector<1x1x128xf32>
    %4 = vector.broadcast %2 : vector<1x1x128xf32> to vector<1x64x128xf32>
    %5 = arith.mulf %1, %4 : vector<1x64x128xf32>
    %6 = vector.broadcast %3 : vector<1x1x128xf32> to vector<1x64x128xf32>
    %7 = arith.addf %5, %6 : vector<1x64x128xf32>
    %cst = arith.constant 0.000000e+00 : f32
    %8 = vector.broadcast %cst : f32 to vector<1x64x128xf32>
    %9 = arith.maximumf %7, %8 : vector<1x64x128xf32>
    %10 = arith.truncf %9 : vector<1x64x128xf32> to vector<1x64x128xbf16>
    %c0_7 = arith.constant 0 : index
    %c0_8 = arith.constant 0 : index
    %c0_9 = arith.constant 0 : index
    %11 = vector.load %arg4[%c0_7, %c0_8, %c0_9] : memref<1x64x128xbf16, #tpu.memory_space<vmem>>, vector<1x64x128xbf16>
    tpu.vector_store %arg4[%c0_7, %c0_8, %c0_9], %10 {strides = array<i32>} : memref<1x64x128xbf16, #tpu.memory_space<vmem>>, vector<1x64x128xbf16>,
    return
  }
  func.func @transform_0(%arg0: i32, %arg1: i32) -> (i32, i32, i32) {
    %c0_i32 = arith.constant 0 : i32
    %c0_i32_0 = arith.constant 0 : i32
    return %arg0, %arg1, %c0_i32 : i32, i32, i32
  }
  func.func @transform_1(%arg0: i32, %arg1: i32) -> (i32, i32, i32) {
    %c0_i32 = arith.constant 0 : i32
    %c0_i32_0 = arith.constant 0 : i32
    %c0_i32_1 = arith.constant 0 : i32
    return %arg0, %c0_i32, %c0_i32_0 : i32, i32, i32
  }
  func.func @transform_2(%arg0: i32, %arg1: i32) -> (i32, i32, i32) {
    %c0_i32 = arith.constant 0 : i32
    %c0_i32_0 = arith.constant 0 : i32
    return %arg0, %arg1, %c0_i32 : i32, i32, i32
  }
}

module attributes {stable_mosaic.version = 11 : i64} {
  func.func @_matmul_kernel(%arg0: i32, %arg1: i32, %arg2: i32, %arg3: memref<32x2048xbf16, #tpu.memory_space<vmem>>, %arg4: memref<2048x128xbf16, #tpu.memory_space<vmem>>, %arg5: memref<32x128xbf16, #tpu.memory_space<vmem>>, %arg6: memref<32x128xf32, #tpu.memory_space<vmem>>) attributes {dimension_semantics = [#tpu.dimension_semantics<parallel>, #tpu.dimension_semantics<parallel>, #tpu.dimension_semantics<arbitrary>], iteration_bounds = array<i64: 1, 1, 1>, scalar_prefetch = 0 : i64, scratch_operands = 1 : i64, tpu.core_type = #tpu.core_type<tc>, window_params = [{transform_indices = @transform_0, window_bounds = array<i64: 32, 2048>}, {transform_indices = @transform_1, window_bounds = array<i64: 2048, 128>}, {transform_indices = @transform_2, window_bounds = array<i64: 32, 128>}]} {
    %c0_i32 = arith.constant 0 : i32
    %0 = arith.cmpi eq, %arg2, %c0_i32 : i32
    %1 = arith.extui %0 : i1 to i32
    %c0_i32_0 = arith.constant 0 : i32
    %2 = arith.cmpi ne, %1, %c0_i32_0 : i32
    scf.if %2 {
      %cst_10 = arith.constant 0.000000e+00 : f32
      %12 = vector.broadcast %cst_10 : f32 to vector<32x128xf32>
      %c0_11 = arith.constant 0 : index
      %c0_12 = arith.constant 0 : index
      %13 = vector.load %arg6[%c0_11, %c0_12] : memref<32x128xf32, #tpu.memory_space<vmem>>, vector<32x128xf32>
      tpu.vector_store %arg6[%c0_11, %c0_12], %12 {strides = array<i32>} : memref<32x128xf32, #tpu.memory_space<vmem>>, vector<32x128xf32>,
    } else {
    }
    %c0 = arith.constant 0 : index
    %c0_1 = arith.constant 0 : index
    %3 = vector.load %arg6[%c0, %c0_1] : memref<32x128xf32, #tpu.memory_space<vmem>>, vector<32x128xf32>
    %c0_2 = arith.constant 0 : index
    %c0_3 = arith.constant 0 : index
    %4 = vector.load %arg3[%c0_2, %c0_3] : memref<32x2048xbf16, #tpu.memory_space<vmem>>, vector<32x2048xbf16>
    %c0_4 = arith.constant 0 : index
    %c0_5 = arith.constant 0 : index
    %5 = vector.load %arg4[%c0_4, %c0_5] : memref<2048x128xbf16, #tpu.memory_space<vmem>>, vector<2048x128xbf16>
    %cst = arith.constant dense<0.000000e+00> : vector<32x128xf32>
    %6 = tpu.matmul %4, %5, %cst {dimension_numbers = #tpu.dot_dimension_numbers<[1], [0], [0], [1], [0, 0, 1, 1], [], []>} : vector<32x2048xbf16>, vector<2048x128xbf16>, vector<32x128xf32> -> vector<32x128xf32>
    %7 = arith.addf %3, %6 : vector<32x128xf32>
    %c0_6 = arith.constant 0 : index
    %c0_7 = arith.constant 0 : index
    %8 = vector.load %arg6[%c0_6, %c0_7] : memref<32x128xf32, #tpu.memory_space<vmem>>, vector<32x128xf32>
    tpu.vector_store %arg6[%c0_6, %c0_7], %7 {strides = array<i32>} : memref<32x128xf32, #tpu.memory_space<vmem>>, vector<32x128xf32>,
    %c0_i32_8 = arith.constant 0 : i32
    %9 = arith.cmpi eq, %arg2, %c0_i32_8 : i32
    %10 = arith.extui %9 : i1 to i32
    %c0_i32_9 = arith.constant 0 : i32
    %11 = arith.cmpi ne, %10, %c0_i32_9 : i32
    scf.if %11 {
      %c0_10 = arith.constant 0 : index
      %c0_11 = arith.constant 0 : index
      %12 = vector.load %arg6[%c0_10, %c0_11] : memref<32x128xf32, #tpu.memory_space<vmem>>, vector<32x128xf32>
      %13 = arith.truncf %12 : vector<32x128xf32> to vector<32x128xbf16>
      %c0_12 = arith.constant 0 : index
      %c0_13 = arith.constant 0 : index
      %14 = vector.load %arg5[%c0_12, %c0_13] : memref<32x128xbf16, #tpu.memory_space<vmem>>, vector<32x128xbf16>
      tpu.vector_store %arg5[%c0_12, %c0_13], %13 {strides = array<i32>} : memref<32x128xbf16, #tpu.memory_space<vmem>>, vector<32x128xbf16>,
    } else {
    }
    return
  }
  func.func @transform_0(%arg0: i32, %arg1: i32, %arg2: i32) -> (i32, i32) {
    %c0_i32 = arith.constant 0 : i32
    return %arg0, %arg2 : i32, i32
  }
  func.func @transform_1(%arg0: i32, %arg1: i32, %arg2: i32) -> (i32, i32) {
    %c0_i32 = arith.constant 0 : i32
    return %arg2, %arg1 : i32, i32
  }
  func.func @transform_2(%arg0: i32, %arg1: i32, %arg2: i32) -> (i32, i32) {
    %c0_i32 = arith.constant 0 : i32
    return %arg0, %arg1 : i32, i32
  }
}

module attributes {stable_mosaic.version = 11 : i64} {
  func.func @_inorm_stats_kernel(%arg0: i32, %arg1: i32, %arg2: memref<1x16x128xbf16, #tpu.memory_space<vmem>>, %arg3: memref<1x1x128xf32, #tpu.memory_space<vmem>>, %arg4: memref<1x1x128xf32, #tpu.memory_space<vmem>>, %arg5: memref<1x2x128xf32, #tpu.memory_space<vmem>>) attributes {dimension_semantics = [#tpu.dimension_semantics<parallel>, #tpu.dimension_semantics<arbitrary>], iteration_bounds = array<i64: 2, 1>, scalar_prefetch = 0 : i64, scratch_operands = 0 : i64, tpu.core_type = #tpu.core_type<tc>, window_params = [{transform_indices = @transform_0, window_bounds = array<i64: 1, 16, 128>}, {pipeline_mode = #tpu.pipeline_mode<synchronous>, transform_indices = @transform_1, window_bounds = array<i64: 1, 1, 128>}, {pipeline_mode = #tpu.pipeline_mode<synchronous>, transform_indices = @transform_2, window_bounds = array<i64: 1, 1, 128>}, {transform_indices = @transform_3, window_bounds = array<i64: 1, 2, 128>}]} {
    %c0_i32 = arith.constant 0 : i32
    %0 = arith.cmpi eq, %arg1, %c0_i32 : i32
    %1 = arith.extui %0 : i1 to i32
    %c0_i32_0 = arith.constant 0 : i32
    %2 = arith.cmpi ne, %1, %c0_i32_0 : i32
    scf.if %2 {
      %cst_17 = arith.constant 0.000000e+00 : f32
      %19 = vector.broadcast %cst_17 : f32 to vector<1x2x128xf32>
      %c0_18 = arith.constant 0 : index
      %c0_19 = arith.constant 0 : index
      %c0_20 = arith.constant 0 : index
      %20 = vector.load %arg5[%c0_18, %c0_19, %c0_20] : memref<1x2x128xf32, #tpu.memory_space<vmem>>, vector<1x2x128xf32>
      tpu.vector_store %arg5[%c0_18, %c0_19, %c0_20], %19 {strides = array<i32>} : memref<1x2x128xf32, #tpu.memory_space<vmem>>, vector<1x2x128xf32>,
    } else {
    }
    %c0 = arith.constant 0 : index
    %c0_1 = arith.constant 0 : index
    %c0_2 = arith.constant 0 : index
    %3 = vector.load %arg2[%c0, %c0_1, %c0_2] : memref<1x16x128xbf16, #tpu.memory_space<vmem>>, vector<1x16x128xbf16>
    %4 = arith.extf %3 : vector<1x16x128xbf16> to vector<1x16x128xf32>
    %c0_3 = arith.constant 0 : index
    %c0_4 = arith.constant 0 : index
    %c0_5 = arith.constant 0 : index
    %5 = vector.load %arg5[%c0_3, %c0_4, %c0_5] : memref<1x2x128xf32, #tpu.memory_space<vmem>>, vector<1x1x128xf32>
    %cst = arith.constant dense<0.000000e+00> : vector<1x128xf32>
    %6 = vector.multi_reduction <add>, %4, %cst [1] : vector<1x16x128xf32> to vector<1x128xf32>
    %7 = vector.shape_cast %6 : vector<1x128xf32> to vector<1x1x128xf32>
    %8 = arith.addf %5, %7 : vector<1x1x128xf32>
    %c0_6 = arith.constant 0 : index
    %c0_7 = arith.constant 0 : index
    %c0_8 = arith.constant 0 : index
    %9 = vector.load %arg5[%c0_6, %c0_7, %c0_8] : memref<1x2x128xf32, #tpu.memory_space<vmem>>, vector<1x1x128xf32>
    tpu.vector_store %arg5[%c0_6, %c0_7, %c0_8], %8 {strides = array<i32>} : memref<1x2x128xf32, #tpu.memory_space<vmem>>, vector<1x1x128xf32>,
    %c0_9 = arith.constant 0 : index
    %c1 = arith.constant 1 : index
    %c0_10 = arith.constant 0 : index
    %10 = vector.load %arg5[%c0_9, %c1, %c0_10] : memref<1x2x128xf32, #tpu.memory_space<vmem>>, vector<1x1x128xf32>
    %11 = arith.mulf %4, %4 : vector<1x16x128xf32>
    %cst_11 = arith.constant dense<0.000000e+00> : vector<1x128xf32>
    %12 = vector.multi_reduction <add>, %11, %cst_11 [1] : vector<1x16x128xf32> to vector<1x128xf32>
    %13 = vector.shape_cast %12 : vector<1x128xf32> to vector<1x1x128xf32>
    %14 = arith.addf %10, %13 : vector<1x1x128xf32>
    %c0_12 = arith.constant 0 : index
    %c1_13 = arith.constant 1 : index
    %c0_14 = arith.constant 0 : index
    %15 = vector.load %arg5[%c0_12, %c1_13, %c0_14] : memref<1x2x128xf32, #tpu.memory_space<vmem>>, vector<1x1x128xf32>
    tpu.vector_store %arg5[%c0_12, %c1_13, %c0_14], %14 {strides = array<i32>} : memref<1x2x128xf32, #tpu.memory_space<vmem>>, vector<1x1x128xf32>,
    %c0_i32_15 = arith.constant 0 : i32
    %16 = arith.cmpi eq, %arg1, %c0_i32_15 : i32
    %17 = arith.extui %16 : i1 to i32
    %c0_i32_16 = arith.constant 0 : i32
    %18 = arith.cmpi ne, %17, %c0_i32_16 : i32
    scf.if %18 {
      %c0_17 = arith.constant 0 : index
      %c0_18 = arith.constant 0 : index
      %c0_19 = arith.constant 0 : index
      %19 = vector.load %arg5[%c0_17, %c0_18, %c0_19] : memref<1x2x128xf32, #tpu.memory_space<vmem>>, vector<1x1x128xf32>
      %cst_20 = arith.constant 6.250000e-02 : f32
      %20 = vector.broadcast %cst_20 : f32 to vector<1x1x128xf32>
      %21 = arith.mulf %19, %20 : vector<1x1x128xf32>
      %c0_21 = arith.constant 0 : index
      %c1_22 = arith.constant 1 : index
      %c0_23 = arith.constant 0 : index
      %22 = vector.load %arg5[%c0_21, %c1_22, %c0_23] : memref<1x2x128xf32, #tpu.memory_space<vmem>>, vector<1x1x128xf32>
      %cst_24 = arith.constant 6.250000e-02 : f32
      %23 = vector.broadcast %cst_24 : f32 to vector<1x1x128xf32>
      %24 = arith.mulf %22, %23 : vector<1x1x128xf32>
      %25 = arith.mulf %21, %21 : vector<1x1x128xf32>
      %26 = arith.subf %24, %25 : vector<1x1x128xf32>
      %cst_25 = arith.constant 9.99999974E-6 : f32
      %27 = vector.broadcast %cst_25 : f32 to vector<1x1x128xf32>
      %28 = arith.addf %26, %27 : vector<1x1x128xf32>
      %29 = math.rsqrt %28 : vector<1x1x128xf32>
      %c0_26 = arith.constant 0 : index
      %c0_27 = arith.constant 0 : index
      %c0_28 = arith.constant 0 : index
      %30 = vector.load %arg3[%c0_26, %c0_27, %c0_28] : memref<1x1x128xf32, #tpu.memory_space<vmem>>, vector<1x1x128xf32>
      %31 = arith.mulf %30, %29 : vector<1x1x128xf32>
      %c0_29 = arith.constant 0 : index
      %c0_30 = arith.constant 0 : index
      %c0_31 = arith.constant 0 : index
      %32 = vector.load %arg4[%c0_29, %c0_30, %c0_31] : memref<1x1x128xf32, #tpu.memory_space<vmem>>, vector<1x1x128xf32>
      %33 = arith.mulf %21, %31 : vector<1x1x128xf32>
      %34 = arith.subf %32, %33 : vector<1x1x128xf32>
      %c0_32 = arith.constant 0 : index
      %c0_33 = arith.constant 0 : index
      %c0_34 = arith.constant 0 : index
      %35 = vector.load %arg5[%c0_32, %c0_33, %c0_34] : memref<1x2x128xf32, #tpu.memory_space<vmem>>, vector<1x1x128xf32>
      tpu.vector_store %arg5[%c0_32, %c0_33, %c0_34], %31 {strides = array<i32>} : memref<1x2x128xf32, #tpu.memory_space<vmem>>, vector<1x1x128xf32>,
      %c0_35 = arith.constant 0 : index
      %c1_36 = arith.constant 1 : index
      %c0_37 = arith.constant 0 : index
      %36 = vector.load %arg5[%c0_35, %c1_36, %c0_37] : memref<1x2x128xf32, #tpu.memory_space<vmem>>, vector<1x1x128xf32>
      tpu.vector_store %arg5[%c0_35, %c1_36, %c0_37], %34 {strides = array<i32>} : memref<1x2x128xf32, #tpu.memory_space<vmem>>, vector<1x1x128xf32>,
    } else {
    }
    return
  }
  func.func @transform_0(%arg0: i32, %arg1: i32) -> (i32, i32, i32) {
    %c0_i32 = arith.constant 0 : i32
    %c0_i32_0 = arith.constant 0 : i32
    return %arg0, %arg1, %c0_i32 : i32, i32, i32
  }
  func.func @transform_1(%arg0: i32, %arg1: i32) -> (i32, i32, i32) {
    %c0_i32 = arith.constant 0 : i32
    %c0_i32_0 = arith.constant 0 : i32
    %c0_i32_1 = arith.constant 0 : i32
    %c0_i32_2 = arith.constant 0 : i32
    return %c0_i32, %c0_i32_0, %c0_i32_1 : i32, i32, i32
  }
  func.func @transform_2(%arg0: i32, %arg1: i32) -> (i32, i32, i32) {
    %c0_i32 = arith.constant 0 : i32
    %c0_i32_0 = arith.constant 0 : i32
    %c0_i32_1 = arith.constant 0 : i32
    %c0_i32_2 = arith.constant 0 : i32
    return %c0_i32, %c0_i32_0, %c0_i32_1 : i32, i32, i32
  }
  func.func @transform_3(%arg0: i32, %arg1: i32) -> (i32, i32, i32) {
    %c0_i32 = arith.constant 0 : i32
    %c0_i32_0 = arith.constant 0 : i32
    %c0_i32_1 = arith.constant 0 : i32
    return %arg0, %c0_i32, %c0_i32_0 : i32, i32, i32
  }
}

module attributes {stable_mosaic.version = 11 : i64} {
  func.func @_inorm_apply_kernel(%arg0: i32, %arg1: i32, %arg2: memref<1x16x128xbf16, #tpu.memory_space<vmem>>, %arg3: memref<1x2x128xf32, #tpu.memory_space<vmem>>, %arg4: memref<1x16x128xbf16, #tpu.memory_space<vmem>>) attributes {dimension_semantics = [#tpu.dimension_semantics<parallel>, #tpu.dimension_semantics<parallel>], iteration_bounds = array<i64: 2, 1>, scalar_prefetch = 0 : i64, scratch_operands = 0 : i64, tpu.core_type = #tpu.core_type<tc>, window_params = [{transform_indices = @transform_0, window_bounds = array<i64: 1, 16, 128>}, {transform_indices = @transform_1, window_bounds = array<i64: 1, 2, 128>}, {transform_indices = @transform_2, window_bounds = array<i64: 1, 16, 128>}]} {
    %c0 = arith.constant 0 : index
    %c0_0 = arith.constant 0 : index
    %c0_1 = arith.constant 0 : index
    %0 = vector.load %arg2[%c0, %c0_0, %c0_1] : memref<1x16x128xbf16, #tpu.memory_space<vmem>>, vector<1x16x128xbf16>
    %1 = arith.extf %0 : vector<1x16x128xbf16> to vector<1x16x128xf32>
    %c0_2 = arith.constant 0 : index
    %c0_3 = arith.constant 0 : index
    %c0_4 = arith.constant 0 : index
    %2 = vector.load %arg3[%c0_2, %c0_3, %c0_4] : memref<1x2x128xf32, #tpu.memory_space<vmem>>, vector<1x1x128xf32>
    %c0_5 = arith.constant 0 : index
    %c1 = arith.constant 1 : index
    %c0_6 = arith.constant 0 : index
    %3 = vector.load %arg3[%c0_5, %c1, %c0_6] : memref<1x2x128xf32, #tpu.memory_space<vmem>>, vector<1x1x128xf32>
    %4 = vector.broadcast %2 : vector<1x1x128xf32> to vector<1x16x128xf32>
    %5 = arith.mulf %1, %4 : vector<1x16x128xf32>
    %6 = vector.broadcast %3 : vector<1x1x128xf32> to vector<1x16x128xf32>
    %7 = arith.addf %5, %6 : vector<1x16x128xf32>
    %cst = arith.constant 0.000000e+00 : f32
    %8 = vector.broadcast %cst : f32 to vector<1x16x128xf32>
    %9 = arith.maximumf %7, %8 : vector<1x16x128xf32>
    %10 = arith.truncf %9 : vector<1x16x128xf32> to vector<1x16x128xbf16>
    %c0_7 = arith.constant 0 : index
    %c0_8 = arith.constant 0 : index
    %c0_9 = arith.constant 0 : index
    %11 = vector.load %arg4[%c0_7, %c0_8, %c0_9] : memref<1x16x128xbf16, #tpu.memory_space<vmem>>, vector<1x16x128xbf16>
    tpu.vector_store %arg4[%c0_7, %c0_8, %c0_9], %10 {strides = array<i32>} : memref<1x16x128xbf16, #tpu.memory_space<vmem>>, vector<1x16x128xbf16>,
    return
  }
  func.func @transform_0(%arg0: i32, %arg1: i32) -> (i32, i32, i32) {
    %c0_i32 = arith.constant 0 : i32
    %c0_i32_0 = arith.constant 0 : i32
    return %arg0, %arg1, %c0_i32 : i32, i32, i32
  }
  func.func @transform_1(%arg0: i32, %arg1: i32) -> (i32, i32, i32) {
    %c0_i32 = arith.constant 0 : i32
    %c0_i32_0 = arith.constant 0 : i32
    %c0_i32_1 = arith.constant 0 : i32
    return %arg0, %c0_i32, %c0_i32_0 : i32, i32, i32
  }
  func.func @transform_2(%arg0: i32, %arg1: i32) -> (i32, i32, i32) {
    %c0_i32 = arith.constant 0 : i32
    %c0_i32_0 = arith.constant 0 : i32
    return %arg0, %arg1, %c0_i32 : i32, i32, i32
  }
}

module attributes {stable_mosaic.version = 11 : i64} {
  func.func @_matmul_kernel(%arg0: i32, %arg1: i32, %arg2: i32, %arg3: memref<32x1152xbf16, #tpu.memory_space<vmem>>, %arg4: memref<1152x128xbf16, #tpu.memory_space<vmem>>, %arg5: memref<32x128xbf16, #tpu.memory_space<vmem>>, %arg6: memref<32x128xf32, #tpu.memory_space<vmem>>) attributes {dimension_semantics = [#tpu.dimension_semantics<parallel>, #tpu.dimension_semantics<parallel>, #tpu.dimension_semantics<arbitrary>], iteration_bounds = array<i64: 1, 1, 1>, scalar_prefetch = 0 : i64, scratch_operands = 1 : i64, tpu.core_type = #tpu.core_type<tc>, window_params = [{transform_indices = @transform_0, window_bounds = array<i64: 32, 1152>}, {transform_indices = @transform_1, window_bounds = array<i64: 1152, 128>}, {transform_indices = @transform_2, window_bounds = array<i64: 32, 128>}]} {
    %c0_i32 = arith.constant 0 : i32
    %0 = arith.cmpi eq, %arg2, %c0_i32 : i32
    %1 = arith.extui %0 : i1 to i32
    %c0_i32_0 = arith.constant 0 : i32
    %2 = arith.cmpi ne, %1, %c0_i32_0 : i32
    scf.if %2 {
      %cst_10 = arith.constant 0.000000e+00 : f32
      %12 = vector.broadcast %cst_10 : f32 to vector<32x128xf32>
      %c0_11 = arith.constant 0 : index
      %c0_12 = arith.constant 0 : index
      %13 = vector.load %arg6[%c0_11, %c0_12] : memref<32x128xf32, #tpu.memory_space<vmem>>, vector<32x128xf32>
      tpu.vector_store %arg6[%c0_11, %c0_12], %12 {strides = array<i32>} : memref<32x128xf32, #tpu.memory_space<vmem>>, vector<32x128xf32>,
    } else {
    }
    %c0 = arith.constant 0 : index
    %c0_1 = arith.constant 0 : index
    %3 = vector.load %arg6[%c0, %c0_1] : memref<32x128xf32, #tpu.memory_space<vmem>>, vector<32x128xf32>
    %c0_2 = arith.constant 0 : index
    %c0_3 = arith.constant 0 : index
    %4 = vector.load %arg3[%c0_2, %c0_3] : memref<32x1152xbf16, #tpu.memory_space<vmem>>, vector<32x1152xbf16>
    %c0_4 = arith.constant 0 : index
    %c0_5 = arith.constant 0 : index
    %5 = vector.load %arg4[%c0_4, %c0_5] : memref<1152x128xbf16, #tpu.memory_space<vmem>>, vector<1152x128xbf16>
    %cst = arith.constant dense<0.000000e+00> : vector<32x128xf32>
    %6 = tpu.matmul %4, %5, %cst {dimension_numbers = #tpu.dot_dimension_numbers<[1], [0], [0], [1], [0, 0, 1, 1], [], []>} : vector<32x1152xbf16>, vector<1152x128xbf16>, vector<32x128xf32> -> vector<32x128xf32>
    %7 = arith.addf %3, %6 : vector<32x128xf32>
    %c0_6 = arith.constant 0 : index
    %c0_7 = arith.constant 0 : index
    %8 = vector.load %arg6[%c0_6, %c0_7] : memref<32x128xf32, #tpu.memory_space<vmem>>, vector<32x128xf32>
    tpu.vector_store %arg6[%c0_6, %c0_7], %7 {strides = array<i32>} : memref<32x128xf32, #tpu.memory_space<vmem>>, vector<32x128xf32>,
    %c0_i32_8 = arith.constant 0 : i32
    %9 = arith.cmpi eq, %arg2, %c0_i32_8 : i32
    %10 = arith.extui %9 : i1 to i32
    %c0_i32_9 = arith.constant 0 : i32
    %11 = arith.cmpi ne, %10, %c0_i32_9 : i32
    scf.if %11 {
      %c0_10 = arith.constant 0 : index
      %c0_11 = arith.constant 0 : index
      %12 = vector.load %arg6[%c0_10, %c0_11] : memref<32x128xf32, #tpu.memory_space<vmem>>, vector<32x128xf32>
      %13 = arith.truncf %12 : vector<32x128xf32> to vector<32x128xbf16>
      %c0_12 = arith.constant 0 : index
      %c0_13 = arith.constant 0 : index
      %14 = vector.load %arg5[%c0_12, %c0_13] : memref<32x128xbf16, #tpu.memory_space<vmem>>, vector<32x128xbf16>
      tpu.vector_store %arg5[%c0_12, %c0_13], %13 {strides = array<i32>} : memref<32x128xbf16, #tpu.memory_space<vmem>>, vector<32x128xbf16>,
    } else {
    }
    return
  }
  func.func @transform_0(%arg0: i32, %arg1: i32, %arg2: i32) -> (i32, i32) {
    %c0_i32 = arith.constant 0 : i32
    return %arg0, %arg2 : i32, i32
  }
  func.func @transform_1(%arg0: i32, %arg1: i32, %arg2: i32) -> (i32, i32) {
    %c0_i32 = arith.constant 0 : i32
    return %arg2, %arg1 : i32, i32
  }
  func.func @transform_2(%arg0: i32, %arg1: i32, %arg2: i32) -> (i32, i32) {
    %c0_i32 = arith.constant 0 : i32
    return %arg0, %arg1 : i32, i32
  }
}

module attributes {stable_mosaic.version = 11 : i64} {
  func.func @_inorm_apply_kernel(%arg0: i32, %arg1: i32, %arg2: memref<1x16x128xbf16, #tpu.memory_space<vmem>>, %arg3: memref<1x2x128xf32, #tpu.memory_space<vmem>>, %arg4: memref<1x16x128xbf16, #tpu.memory_space<vmem>>, %arg5: memref<1x16x128xbf16, #tpu.memory_space<vmem>>) attributes {dimension_semantics = [#tpu.dimension_semantics<parallel>, #tpu.dimension_semantics<parallel>], iteration_bounds = array<i64: 2, 1>, scalar_prefetch = 0 : i64, scratch_operands = 0 : i64, tpu.core_type = #tpu.core_type<tc>, window_params = [{transform_indices = @transform_0, window_bounds = array<i64: 1, 16, 128>}, {transform_indices = @transform_1, window_bounds = array<i64: 1, 2, 128>}, {transform_indices = @transform_2, window_bounds = array<i64: 1, 16, 128>}, {transform_indices = @transform_3, window_bounds = array<i64: 1, 16, 128>}]} {
    %c0 = arith.constant 0 : index
    %c0_0 = arith.constant 0 : index
    %c0_1 = arith.constant 0 : index
    %0 = vector.load %arg2[%c0, %c0_0, %c0_1] : memref<1x16x128xbf16, #tpu.memory_space<vmem>>, vector<1x16x128xbf16>
    %1 = arith.extf %0 : vector<1x16x128xbf16> to vector<1x16x128xf32>
    %c0_2 = arith.constant 0 : index
    %c0_3 = arith.constant 0 : index
    %c0_4 = arith.constant 0 : index
    %2 = vector.load %arg3[%c0_2, %c0_3, %c0_4] : memref<1x2x128xf32, #tpu.memory_space<vmem>>, vector<1x1x128xf32>
    %c0_5 = arith.constant 0 : index
    %c1 = arith.constant 1 : index
    %c0_6 = arith.constant 0 : index
    %3 = vector.load %arg3[%c0_5, %c1, %c0_6] : memref<1x2x128xf32, #tpu.memory_space<vmem>>, vector<1x1x128xf32>
    %4 = vector.broadcast %2 : vector<1x1x128xf32> to vector<1x16x128xf32>
    %5 = arith.mulf %1, %4 : vector<1x16x128xf32>
    %6 = vector.broadcast %3 : vector<1x1x128xf32> to vector<1x16x128xf32>
    %7 = arith.addf %5, %6 : vector<1x16x128xf32>
    %c0_7 = arith.constant 0 : index
    %c0_8 = arith.constant 0 : index
    %c0_9 = arith.constant 0 : index
    %8 = vector.load %arg4[%c0_7, %c0_8, %c0_9] : memref<1x16x128xbf16, #tpu.memory_space<vmem>>, vector<1x16x128xbf16>
    %9 = arith.extf %8 : vector<1x16x128xbf16> to vector<1x16x128xf32>
    %10 = arith.addf %7, %9 : vector<1x16x128xf32>
    %11 = arith.truncf %10 : vector<1x16x128xf32> to vector<1x16x128xbf16>
    %c0_10 = arith.constant 0 : index
    %c0_11 = arith.constant 0 : index
    %c0_12 = arith.constant 0 : index
    %12 = vector.load %arg5[%c0_10, %c0_11, %c0_12] : memref<1x16x128xbf16, #tpu.memory_space<vmem>>, vector<1x16x128xbf16>
    tpu.vector_store %arg5[%c0_10, %c0_11, %c0_12], %11 {strides = array<i32>} : memref<1x16x128xbf16, #tpu.memory_space<vmem>>, vector<1x16x128xbf16>,
    return
  }
  func.func @transform_0(%arg0: i32, %arg1: i32) -> (i32, i32, i32) {
    %c0_i32 = arith.constant 0 : i32
    %c0_i32_0 = arith.constant 0 : i32
    return %arg0, %arg1, %c0_i32 : i32, i32, i32
  }
  func.func @transform_1(%arg0: i32, %arg1: i32) -> (i32, i32, i32) {
    %c0_i32 = arith.constant 0 : i32
    %c0_i32_0 = arith.constant 0 : i32
    %c0_i32_1 = arith.constant 0 : i32
    return %arg0, %c0_i32, %c0_i32_0 : i32, i32, i32
  }
  func.func @transform_2(%arg0: i32, %arg1: i32) -> (i32, i32, i32) {
    %c0_i32 = arith.constant 0 : i32
    %c0_i32_0 = arith.constant 0 : i32
    return %arg0, %arg1, %c0_i32 : i32, i32, i32
  }
  func.func @transform_3(%arg0: i32, %arg1: i32) -> (i32, i32, i32) {
    %c0_i32 = arith.constant 0 : i32
    %c0_i32_0 = arith.constant 0 : i32
    return %arg0, %arg1, %c0_i32 : i32, i32, i32
  }
}

module attributes {stable_mosaic.version = 11 : i64} {
  func.func @_matmul_kernel(%arg0: i32, %arg1: i32, %arg2: i32, %arg3: memref<32x512xbf16, #tpu.memory_space<vmem>>, %arg4: memref<512x128xbf16, #tpu.memory_space<vmem>>, %arg5: memref<32x128xbf16, #tpu.memory_space<vmem>>, %arg6: memref<32x128xf32, #tpu.memory_space<vmem>>) attributes {dimension_semantics = [#tpu.dimension_semantics<parallel>, #tpu.dimension_semantics<parallel>, #tpu.dimension_semantics<arbitrary>], iteration_bounds = array<i64: 1, 1, 1>, scalar_prefetch = 0 : i64, scratch_operands = 1 : i64, tpu.core_type = #tpu.core_type<tc>, window_params = [{transform_indices = @transform_0, window_bounds = array<i64: 32, 512>}, {transform_indices = @transform_1, window_bounds = array<i64: 512, 128>}, {transform_indices = @transform_2, window_bounds = array<i64: 32, 128>}]} {
    %c0_i32 = arith.constant 0 : i32
    %0 = arith.cmpi eq, %arg2, %c0_i32 : i32
    %1 = arith.extui %0 : i1 to i32
    %c0_i32_0 = arith.constant 0 : i32
    %2 = arith.cmpi ne, %1, %c0_i32_0 : i32
    scf.if %2 {
      %cst_10 = arith.constant 0.000000e+00 : f32
      %12 = vector.broadcast %cst_10 : f32 to vector<32x128xf32>
      %c0_11 = arith.constant 0 : index
      %c0_12 = arith.constant 0 : index
      %13 = vector.load %arg6[%c0_11, %c0_12] : memref<32x128xf32, #tpu.memory_space<vmem>>, vector<32x128xf32>
      tpu.vector_store %arg6[%c0_11, %c0_12], %12 {strides = array<i32>} : memref<32x128xf32, #tpu.memory_space<vmem>>, vector<32x128xf32>,
    } else {
    }
    %c0 = arith.constant 0 : index
    %c0_1 = arith.constant 0 : index
    %3 = vector.load %arg6[%c0, %c0_1] : memref<32x128xf32, #tpu.memory_space<vmem>>, vector<32x128xf32>
    %c0_2 = arith.constant 0 : index
    %c0_3 = arith.constant 0 : index
    %4 = vector.load %arg3[%c0_2, %c0_3] : memref<32x512xbf16, #tpu.memory_space<vmem>>, vector<32x512xbf16>
    %c0_4 = arith.constant 0 : index
    %c0_5 = arith.constant 0 : index
    %5 = vector.load %arg4[%c0_4, %c0_5] : memref<512x128xbf16, #tpu.memory_space<vmem>>, vector<512x128xbf16>
    %cst = arith.constant dense<0.000000e+00> : vector<32x128xf32>
    %6 = tpu.matmul %4, %5, %cst {dimension_numbers = #tpu.dot_dimension_numbers<[1], [0], [0], [1], [0, 0, 1, 1], [], []>} : vector<32x512xbf16>, vector<512x128xbf16>, vector<32x128xf32> -> vector<32x128xf32>
    %7 = arith.addf %3, %6 : vector<32x128xf32>
    %c0_6 = arith.constant 0 : index
    %c0_7 = arith.constant 0 : index
    %8 = vector.load %arg6[%c0_6, %c0_7] : memref<32x128xf32, #tpu.memory_space<vmem>>, vector<32x128xf32>
    tpu.vector_store %arg6[%c0_6, %c0_7], %7 {strides = array<i32>} : memref<32x128xf32, #tpu.memory_space<vmem>>, vector<32x128xf32>,
    %c0_i32_8 = arith.constant 0 : i32
    %9 = arith.cmpi eq, %arg2, %c0_i32_8 : i32
    %10 = arith.extui %9 : i1 to i32
    %c0_i32_9 = arith.constant 0 : i32
    %11 = arith.cmpi ne, %10, %c0_i32_9 : i32
    scf.if %11 {
      %c0_10 = arith.constant 0 : index
      %c0_11 = arith.constant 0 : index
      %12 = vector.load %arg6[%c0_10, %c0_11] : memref<32x128xf32, #tpu.memory_space<vmem>>, vector<32x128xf32>
      %13 = arith.truncf %12 : vector<32x128xf32> to vector<32x128xbf16>
      %c0_12 = arith.constant 0 : index
      %c0_13 = arith.constant 0 : index
      %14 = vector.load %arg5[%c0_12, %c0_13] : memref<32x128xbf16, #tpu.memory_space<vmem>>, vector<32x128xbf16>
      tpu.vector_store %arg5[%c0_12, %c0_13], %13 {strides = array<i32>} : memref<32x128xbf16, #tpu.memory_space<vmem>>, vector<32x128xbf16>,
    } else {
    }
    return
  }
  func.func @transform_0(%arg0: i32, %arg1: i32, %arg2: i32) -> (i32, i32) {
    %c0_i32 = arith.constant 0 : i32
    return %arg0, %arg2 : i32, i32
  }
  func.func @transform_1(%arg0: i32, %arg1: i32, %arg2: i32) -> (i32, i32) {
    %c0_i32 = arith.constant 0 : i32
    return %arg2, %arg1 : i32, i32
  }
  func.func @transform_2(%arg0: i32, %arg1: i32, %arg2: i32) -> (i32, i32) {
    %c0_i32 = arith.constant 0 : i32
    return %arg0, %arg1 : i32, i32
  }
}

module attributes {stable_mosaic.version = 11 : i64} {
  func.func @_matmul_kernel(%arg0: i32, %arg1: i32, %arg2: i32, %arg3: memref<128x512xbf16, #tpu.memory_space<vmem>>, %arg4: memref<512x128xbf16, #tpu.memory_space<vmem>>, %arg5: memref<128x128xbf16, #tpu.memory_space<vmem>>, %arg6: memref<128x128xf32, #tpu.memory_space<vmem>>) attributes {dimension_semantics = [#tpu.dimension_semantics<parallel>, #tpu.dimension_semantics<parallel>, #tpu.dimension_semantics<arbitrary>], iteration_bounds = array<i64: 1, 1, 1>, scalar_prefetch = 0 : i64, scratch_operands = 1 : i64, tpu.core_type = #tpu.core_type<tc>, window_params = [{transform_indices = @transform_0, window_bounds = array<i64: 128, 512>}, {transform_indices = @transform_1, window_bounds = array<i64: 512, 128>}, {transform_indices = @transform_2, window_bounds = array<i64: 128, 128>}]} {
    %c0_i32 = arith.constant 0 : i32
    %0 = arith.cmpi eq, %arg2, %c0_i32 : i32
    %1 = arith.extui %0 : i1 to i32
    %c0_i32_0 = arith.constant 0 : i32
    %2 = arith.cmpi ne, %1, %c0_i32_0 : i32
    scf.if %2 {
      %cst_10 = arith.constant 0.000000e+00 : f32
      %12 = vector.broadcast %cst_10 : f32 to vector<128x128xf32>
      %c0_11 = arith.constant 0 : index
      %c0_12 = arith.constant 0 : index
      %13 = vector.load %arg6[%c0_11, %c0_12] : memref<128x128xf32, #tpu.memory_space<vmem>>, vector<128x128xf32>
      tpu.vector_store %arg6[%c0_11, %c0_12], %12 {strides = array<i32>} : memref<128x128xf32, #tpu.memory_space<vmem>>, vector<128x128xf32>,
    } else {
    }
    %c0 = arith.constant 0 : index
    %c0_1 = arith.constant 0 : index
    %3 = vector.load %arg6[%c0, %c0_1] : memref<128x128xf32, #tpu.memory_space<vmem>>, vector<128x128xf32>
    %c0_2 = arith.constant 0 : index
    %c0_3 = arith.constant 0 : index
    %4 = vector.load %arg3[%c0_2, %c0_3] : memref<128x512xbf16, #tpu.memory_space<vmem>>, vector<128x512xbf16>
    %c0_4 = arith.constant 0 : index
    %c0_5 = arith.constant 0 : index
    %5 = vector.load %arg4[%c0_4, %c0_5] : memref<512x128xbf16, #tpu.memory_space<vmem>>, vector<512x128xbf16>
    %cst = arith.constant dense<0.000000e+00> : vector<128x128xf32>
    %6 = tpu.matmul %4, %5, %cst {dimension_numbers = #tpu.dot_dimension_numbers<[1], [0], [0], [1], [0, 0, 1, 1], [], []>} : vector<128x512xbf16>, vector<512x128xbf16>, vector<128x128xf32> -> vector<128x128xf32>
    %7 = arith.addf %3, %6 : vector<128x128xf32>
    %c0_6 = arith.constant 0 : index
    %c0_7 = arith.constant 0 : index
    %8 = vector.load %arg6[%c0_6, %c0_7] : memref<128x128xf32, #tpu.memory_space<vmem>>, vector<128x128xf32>
    tpu.vector_store %arg6[%c0_6, %c0_7], %7 {strides = array<i32>} : memref<128x128xf32, #tpu.memory_space<vmem>>, vector<128x128xf32>,
    %c0_i32_8 = arith.constant 0 : i32
    %9 = arith.cmpi eq, %arg2, %c0_i32_8 : i32
    %10 = arith.extui %9 : i1 to i32
    %c0_i32_9 = arith.constant 0 : i32
    %11 = arith.cmpi ne, %10, %c0_i32_9 : i32
    scf.if %11 {
      %c0_10 = arith.constant 0 : index
      %c0_11 = arith.constant 0 : index
      %12 = vector.load %arg6[%c0_10, %c0_11] : memref<128x128xf32, #tpu.memory_space<vmem>>, vector<128x128xf32>
      %13 = arith.truncf %12 : vector<128x128xf32> to vector<128x128xbf16>
      %c0_12 = arith.constant 0 : index
      %c0_13 = arith.constant 0 : index
      %14 = vector.load %arg5[%c0_12, %c0_13] : memref<128x128xbf16, #tpu.memory_space<vmem>>, vector<128x128xbf16>
      tpu.vector_store %arg5[%c0_12, %c0_13], %13 {strides = array<i32>} : memref<128x128xbf16, #tpu.memory_space<vmem>>, vector<128x128xbf16>,
    } else {
    }
    return
  }
  func.func @transform_0(%arg0: i32, %arg1: i32, %arg2: i32) -> (i32, i32) {
    %c0_i32 = arith.constant 0 : i32
    return %arg0, %arg2 : i32, i32
  }
  func.func @transform_1(%arg0: i32, %arg1: i32, %arg2: i32) -> (i32, i32) {
    %c0_i32 = arith.constant 0 : i32
    return %arg2, %arg1 : i32, i32
  }
  func.func @transform_2(%arg0: i32, %arg1: i32, %arg2: i32) -> (i32, i32) {
    %c0_i32 = arith.constant 0 : i32
    return %arg0, %arg1 : i32, i32
  }
}

module attributes {stable_mosaic.version = 11 : i64} {
  func.func @_matmul_kernel(%arg0: i32, %arg1: i32, %arg2: i32, %arg3: memref<256x896xbf16, #tpu.memory_space<vmem>>, %arg4: memref<896x128xbf16, #tpu.memory_space<vmem>>, %arg5: memref<256x128xf32, #tpu.memory_space<vmem>>, %arg6: memref<256x128xf32, #tpu.memory_space<vmem>>) attributes {dimension_semantics = [#tpu.dimension_semantics<parallel>, #tpu.dimension_semantics<parallel>, #tpu.dimension_semantics<arbitrary>], iteration_bounds = array<i64: 2, 1, 7>, scalar_prefetch = 0 : i64, scratch_operands = 1 : i64, tpu.core_type = #tpu.core_type<tc>, window_params = [{transform_indices = @transform_0, window_bounds = array<i64: 256, 896>}, {transform_indices = @transform_1, window_bounds = array<i64: 896, 128>}, {transform_indices = @transform_2, window_bounds = array<i64: 256, 128>}]} {
    %c0_i32 = arith.constant 0 : i32
    %0 = arith.cmpi eq, %arg2, %c0_i32 : i32
    %1 = arith.extui %0 : i1 to i32
    %c0_i32_0 = arith.constant 0 : i32
    %2 = arith.cmpi ne, %1, %c0_i32_0 : i32
    scf.if %2 {
      %cst_9 = arith.constant 0.000000e+00 : f32
      %12 = vector.broadcast %cst_9 : f32 to vector<256x128xf32>
      %c0_10 = arith.constant 0 : index
      %c0_11 = arith.constant 0 : index
      %13 = vector.load %arg6[%c0_10, %c0_11] : memref<256x128xf32, #tpu.memory_space<vmem>>, vector<256x128xf32>
      tpu.vector_store %arg6[%c0_10, %c0_11], %12 {strides = array<i32>} : memref<256x128xf32, #tpu.memory_space<vmem>>, vector<256x128xf32>,
    } else {
    }
    %c0 = arith.constant 0 : index
    %c0_1 = arith.constant 0 : index
    %3 = vector.load %arg6[%c0, %c0_1] : memref<256x128xf32, #tpu.memory_space<vmem>>, vector<256x128xf32>
    %c0_2 = arith.constant 0 : index
    %c0_3 = arith.constant 0 : index
    %4 = vector.load %arg3[%c0_2, %c0_3] : memref<256x896xbf16, #tpu.memory_space<vmem>>, vector<256x896xbf16>
    %c0_4 = arith.constant 0 : index
    %c0_5 = arith.constant 0 : index
    %5 = vector.load %arg4[%c0_4, %c0_5] : memref<896x128xbf16, #tpu.memory_space<vmem>>, vector<896x128xbf16>
    %cst = arith.constant dense<0.000000e+00> : vector<256x128xf32>
    %6 = tpu.matmul %4, %5, %cst {dimension_numbers = #tpu.dot_dimension_numbers<[1], [0], [0], [1], [0, 0, 1, 1], [], []>} : vector<256x896xbf16>, vector<896x128xbf16>, vector<256x128xf32> -> vector<256x128xf32>
    %7 = arith.addf %3, %6 : vector<256x128xf32>
    %c0_6 = arith.constant 0 : index
    %c0_7 = arith.constant 0 : index
    %8 = vector.load %arg6[%c0_6, %c0_7] : memref<256x128xf32, #tpu.memory_space<vmem>>, vector<256x128xf32>
    tpu.vector_store %arg6[%c0_6, %c0_7], %7 {strides = array<i32>} : memref<256x128xf32, #tpu.memory_space<vmem>>, vector<256x128xf32>,
    %c6_i32 = arith.constant 6 : i32
    %9 = arith.cmpi eq, %arg2, %c6_i32 : i32
    %10 = arith.extui %9 : i1 to i32
    %c0_i32_8 = arith.constant 0 : i32
    %11 = arith.cmpi ne, %10, %c0_i32_8 : i32
    scf.if %11 {
      %c0_9 = arith.constant 0 : index
      %c0_10 = arith.constant 0 : index
      %12 = vector.load %arg6[%c0_9, %c0_10] : memref<256x128xf32, #tpu.memory_space<vmem>>, vector<256x128xf32>
      %13 = math.tanh %12 : vector<256x128xf32>
      %c0_11 = arith.constant 0 : index
      %c0_12 = arith.constant 0 : index
      %14 = vector.load %arg5[%c0_11, %c0_12] : memref<256x128xf32, #tpu.memory_space<vmem>>, vector<256x128xf32>
      tpu.vector_store %arg5[%c0_11, %c0_12], %13 {strides = array<i32>} : memref<256x128xf32, #tpu.memory_space<vmem>>, vector<256x128xf32>,
    } else {
    }
    return
  }
  func.func @transform_0(%arg0: i32, %arg1: i32, %arg2: i32) -> (i32, i32) {
    %c0_i32 = arith.constant 0 : i32
    return %arg0, %arg2 : i32, i32
  }
  func.func @transform_1(%arg0: i32, %arg1: i32, %arg2: i32) -> (i32, i32) {
    %c0_i32 = arith.constant 0 : i32
    return %arg2, %arg1 : i32, i32
  }
  func.func @transform_2(%arg0: i32, %arg1: i32, %arg2: i32) -> (i32, i32) {
    %c0_i32 = arith.constant 0 : i32
    return %arg0, %arg1 : i32, i32
  }
}

</mosaic_0001>

<bundles_post_ra>
// kernel: generator_forward.59
= control target key start
LH: loop header
LB: loop body
LE: loop exit
PB: predicated region body
PF: predicated region fallthrough
CT: control target
= control target key end

     0   :  { %s625_s12 = smov 0   ;;  %s627_s13 = smov 0   ;;  %s693_s0 = inlined_call_operand.vmem [shape: bf16[2,256,128], index: 0, kind: input, shape index: {}]   ;;  %s694_s1 = inlined_call_operand.vmem [shape: f32[1,1,128], index: 1, kind: input, shape index: {}]   ;;  %s695_s2 = inlined_call_operand.vmem [shape: f32[1,1,128], index: 2, kind: input, shape index: {}]   ;;  %s696_s3 = inlined_call_operand.vmem [shape: f32[2,2,128], index: 3, kind: output, shape index: {}]  }
   0x1   :  { %s629_s14 = smov 0  }
   0x2 LB: > { %s25_s15 = sadd.s32 1, %s598_s13  ;;  %p467_p0 = scmp.ge.s32.totalorder %s602_s14, 1  ;;  %s602_s14 = sphi %s629_s14, %s13_s14   ;;  %s598_s13 = sphi %s627_s13, %s698_s13   ;;  %s594_s12 = sphi %s625_s12, %s697_s12  }
   0x3   : > { %p27_p1 = scmp.ge.s32.totalorder %s25_s15, 2  ;;  %p156_p2 = scmp.lt.s32.totalorder %s602_s14, 3 }
   0x5   : > { %s700_s15 = smov (%p27_p1, %s25_s15), 0  ;;  %p157_p3 = pnand %p467_p0, %p156_p2 }
   0x6   : > { %p184_p4 = scmp.lt.s32.totalorder (!%p157_p3), %s594_s12, 1 }
   0x7   : > { %160 = sbr.rel (%p157_p3) target bundleno = 131 (0x83), region = 32 }
   0xc   : > { %s702_s12 = smov (!%p184_p4, %s594_s12), 1  ;;  %v604_v0 = vmov 0.0  }
   0xd   : > { %s473_s16 = sshll.u32 %s702_s12, 7  ;;  %s470_s17 = sshll.u32 %s702_s12, 1 }
   0xe   : > { %s646_s20 = scalar_lea.vmem %s693_s0, %s473_s16  ;;  %s651_s23 = scalar_lea.vmem %s696_s3, %s470_s17 }
   0xf   : > { %201 = vst [vmem:[%s651_s23] sm:$0x3] %v604_v0  ;;  %v475_v1 = vld [vmem:[%s646_s20] sm:$0xff]   ;;  %v538_v2 = vld [vmem:[%s646_s20 + $0x8] sm:$0xff]   ;;  %v539_v6 = vld [vmem:[%s646_s20 + $0x10] sm:$0xff]  }
  0x10   : > { %v476_v3 = vunpack.c.l.bf16 %v475_v1  ;;  %v477_v4 = vunpack.c.h.bf16 %v475_v1  ;;  %v480_v5 = vunpack.c.l.bf16 %v538_v2  ;;  %v481_v7 = vunpack.c.h.bf16 %v538_v2  ;;  %v540_v11 = vld [vmem:[%s646_s20 + $0x18] sm:$0xff]   ;;  %v541_v18 = vld [vmem:[%s646_s20 + $0x20] sm:$0xff]   ;;  %v542_v26 = vld [vmem:[%s646_s20 + $0x28] sm:$0xff]  }
  0x11   : > { %v484_v9 = vunpack.c.l.bf16 %v539_v6  ;;  %v485_v12 = vunpack.c.h.bf16 %v539_v6  ;;  %v488_v16 = vunpack.c.l.bf16 %v540_v11  ;;  %v489_v20 = vunpack.c.h.bf16 %v540_v11  ;;  %v543_v35 = vld [vmem:[%s646_s20 + $0x30] sm:$0xff]   ;;  %v544_v44 = vld [vmem:[%s646_s20 + $0x38] sm:$0xff]   ;;  %v545_v53 = vld [vmem:[%s646_s20 + $0x40] sm:$0xff]  }
  0x12   : > { %v267_v8 = vadd.f32 %v477_v4, %v476_v3  ;;  %v307_v14 = vmul.f32 %v476_v3, %v476_v3  ;;  %v308_v15 = vmul.f32 %v477_v4, %v477_v4  ;;  %v309_v19 = vmul.f32 %v480_v5, %v480_v5  ;;  %v546_v62 = vld [vmem:[%s646_s20 + $0x48] sm:$0xff]  }
  0x13   : > { %v310_v22 = vmul.f32 %v481_v7, %v481_v7  ;;  %v492_v24 = vunpack.c.l.bf16 %v541_v18  ;;  %v311_v27 = vmul.f32 %v484_v9, %v484_v9  ;;  %v493_v29 = vunpack.c.h.bf16 %v541_v18 }
  0x14   : > { %v268_v10 = vadd.f32 %v480_v5, %v267_v8  ;;  %v339_v23 = vadd.f32 %v308_v15, %v307_v14  ;;  %v312_v31 = vmul.f32 %v485_v12, %v485_v12  ;;  %v496_v33 = vunpack.c.l.bf16 %v542_v26 }
  0x15   : > { %v313_v36 = vmul.f32 %v488_v16, %v488_v16  ;;  %v497_v38 = vunpack.c.h.bf16 %v542_v26  ;;  %v314_v40 = vmul.f32 %v489_v20, %v489_v20  ;;  %v500_v42 = vunpack.c.l.bf16 %v543_v35 }
  0x16   : > { %v269_v13 = vadd.f32 %v481_v7, %v268_v10  ;;  %v340_v28 = vadd.f32 %v339_v23, %v309_v19  ;;  %v315_v45 = vmul.f32 %v492_v24, %v492_v24  ;;  %v501_v47 = vunpack.c.h.bf16 %v543_v35  ;;  %v547_v7 = vld [vmem:[%s646_s20 + $0x50] sm:$0xff]  }
  0x17   : > { %v316_v49 = vmul.f32 %v493_v29, %v493_v29  ;;  %v504_v51 = vunpack.c.l.bf16 %v544_v44  ;;  %v317_v54 = vmul.f32 %v496_v33, %v496_v33  ;;  %v505_v56 = vunpack.c.h.bf16 %v544_v44 }
  0x18   : > { %v270_v17 = vadd.f32 %v484_v9, %v269_v13  ;;  %v341_v32 = vadd.f32 %v340_v28, %v310_v22  ;;  %v318_v58 = vmul.f32 %v497_v38, %v497_v38  ;;  %v508_v60 = vunpack.c.l.bf16 %v545_v53 }
  0x19   : > { %v319_v63 = vmul.f32 %v500_v42, %v500_v42  ;;  %v509_v1 = vunpack.c.h.bf16 %v545_v53  ;;  %v320_v3 = vmul.f32 %v501_v47, %v501_v47  ;;  %v512_v5 = vunpack.c.l.bf16 %v546_v62 }
  0x1a   : > { %v271_v21 = vadd.f32 %v485_v12, %v270_v17  ;;  %v342_v37 = vadd.f32 %v341_v32, %v311_v27  ;;  %v321_v8 = vmul.f32 %v504_v51, %v504_v51  ;;  %v513_v10 = vunpack.c.h.bf16 %v546_v62 }
  0x1b   : > { %v322_v12 = vmul.f32 %v505_v56, %v505_v56  ;;  %v516_v14 = vunpack.c.l.bf16 %v547_v7  ;;  %v323_v17 = vmul.f32 %v508_v60, %v508_v60  ;;  %v517_v19 = vunpack.c.h.bf16 %v547_v7 }
  0x1c   : > { %v272_v25 = vadd.f32 %v488_v16, %v271_v21  ;;  %v343_v41 = vadd.f32 %v342_v37, %v312_v31  ;;  %v548_v16 = vld [vmem:[%s646_s20 + $0x58] sm:$0xff]   ;;  %v324_v21 = vmul.f32 %v509_v1, %v509_v1  ;;  %v325_v26 = vmul.f32 %v512_v5, %v512_v5 }
  0x1d   : > { %v520_v23 = vunpack.c.l.bf16 %v548_v16  ;;  %v521_v28 = vunpack.c.h.bf16 %v548_v16  ;;  %v327_v35 = vmul.f32 %v516_v14, %v516_v14 }
  0x1e   : > { %v273_v30 = vadd.f32 %v489_v20, %v272_v25  ;;  %v344_v46 = vadd.f32 %v343_v41, %v313_v36  ;;  %v549_v25 = vld [vmem:[%s646_s20 + $0x60] sm:$0xff]  }
  0x1f   : > { %v524_v32 = vunpack.c.l.bf16 %v549_v25  ;;  %v525_v37 = vunpack.c.h.bf16 %v549_v25  ;;  %v329_v44 = vmul.f32 %v520_v23, %v520_v23 }
  0x20   : > { %v274_v34 = vadd.f32 %v492_v24, %v273_v30  ;;  %v345_v50 = vadd.f32 %v344_v46, %v314_v40  ;;  %v326_v30 = vmul.f32 %v513_v10, %v513_v10 }
  0x21   : > { %v331_v53 = vmul.f32 %v524_v32, %v524_v32 }
  0x22   : > { %v275_v39 = vadd.f32 %v493_v29, %v274_v34  ;;  %v346_v55 = vadd.f32 %v345_v50, %v315_v45  ;;  %v550_v34 = vld [vmem:[%s646_s20 + $0x68] sm:$0xff]  }
  0x23   : > { %v528_v41 = vunpack.c.l.bf16 %v550_v34  ;;  %v529_v46 = vunpack.c.h.bf16 %v550_v34 }
  0x24   : > { %v276_v43 = vadd.f32 %v496_v33, %v275_v39  ;;  %v347_v59 = vadd.f32 %v346_v55, %v316_v49  ;;  %v328_v39 = vmul.f32 %v517_v19, %v517_v19 }
  0x26   : > { %v277_v48 = vadd.f32 %v497_v38, %v276_v43  ;;  %v348_v0 = vadd.f32 %v347_v59, %v317_v54  ;;  %v551_v43 = vld [vmem:[%s646_s20 + $0x70] sm:$0xff]  }
  0x27   : > { %v532_v50 = vunpack.c.l.bf16 %v551_v43  ;;  %v533_v55 = vunpack.c.h.bf16 %v551_v43 }
  0x28   : > { %v278_v52 = vadd.f32 %v500_v42, %v277_v48  ;;  %v349_v4 = vadd.f32 %v348_v0, %v318_v58  ;;  %v330_v48 = vmul.f32 %v521_v28, %v521_v28 }
  0x29   : > { %v336_v7 = vmul.f32 %v533_v55, %v533_v55 }
  0x2a   : > { %v279_v57 = vadd.f32 %v501_v47, %v278_v52  ;;  %v350_v9 = vadd.f32 %v349_v4, %v319_v63  ;;  %v552_v52 = vld [vmem:[%s646_s20 + $0x78] sm:$0xff]   ;;  %v335_v4 = vmul.f32 %v532_v50, %v532_v50 }
  0x2b   : > { %v536_v59 = vunpack.c.l.bf16 %v552_v52  ;;  %v537_v63 = vunpack.c.h.bf16 %v552_v52 }
  0x2c   : > { %v280_v61 = vadd.f32 %v504_v51, %v279_v57  ;;  %v351_v13 = vadd.f32 %v350_v9, %v320_v3  ;;  %v332_v57 = vmul.f32 %v525_v37, %v525_v37 }
  0x2e   : > { %v281_v2 = vadd.f32 %v505_v56, %v280_v61  ;;  %v352_v18 = vadd.f32 %v351_v13, %v321_v8  ;;  %v333_v61 = vmul.f32 %v528_v41, %v528_v41  ;;  %v338_v13 = vmul.f32 %v537_v63, %v537_v63 }
  0x30   : > { %v282_v6 = vadd.f32 %v508_v60, %v281_v2  ;;  %v353_v22 = vadd.f32 %v352_v18, %v322_v12 }
  0x32   : > { %v283_v11 = vadd.f32 %v509_v1, %v282_v6  ;;  %v354_v27 = vadd.f32 %v353_v22, %v323_v17  ;;  %v334_v1 = vmul.f32 %v529_v46, %v529_v46 }
  0x34   : > { %v284_v15 = vadd.f32 %v512_v5, %v283_v11  ;;  %v355_v31 = vadd.f32 %v354_v27, %v324_v21 }
  0x36   : > { %v285_v20 = vadd.f32 %v513_v10, %v284_v15  ;;  %v356_v36 = vadd.f32 %v355_v31, %v325_v26  ;;  %v337_v10 = vmul.f32 %v536_v59, %v536_v59 }
  0x38   : > { %v286_v24 = vadd.f32 %v516_v14, %v285_v20  ;;  %v357_v40 = vadd.f32 %v356_v36, %v326_v30  ;;  %v266_v20 = vld [vmem:[%s651_s23] sm:$0x1] }
  0x3a   : > { %v287_v29 = vadd.f32 %v517_v19, %v286_v24  ;;  %v358_v45 = vadd.f32 %v357_v40, %v327_v35 }
  0x3c   : > { %v288_v33 = vadd.f32 %v520_v23, %v287_v29  ;;  %v359_v49 = vadd.f32 %v358_v45, %v328_v39  ;;  %v306_v29 = vld [vmem:[%s651_s23 + $0x1] sm:$0x1] }
  0x3e   : > { %v289_v38 = vadd.f32 %v521_v28, %v288_v33  ;;  %v360_v54 = vadd.f32 %v359_v49, %v329_v44 }
  0x40   : > { %v290_v42 = vadd.f32 %v524_v32, %v289_v38  ;;  %v361_v58 = vadd.f32 %v360_v54, %v330_v48  ;;  %v389_v38 = vld [vmem:[%s694_s1] sm:$0x1] }
  0x42   : > { %v291_v47 = vadd.f32 %v525_v37, %v290_v42  ;;  %v362_v62 = vadd.f32 %v361_v58, %v331_v53 }
  0x44   : > { %v292_v51 = vadd.f32 %v528_v41, %v291_v47  ;;  %v363_v2 = vadd.f32 %v362_v62, %v332_v57  ;;  %v391_v41 = vld [vmem:[%s695_s2] sm:$0x1] }
  0x46   : > { %v293_v56 = vadd.f32 %v529_v46, %v292_v51  ;;  %v364_v5 = vadd.f32 %v363_v2, %v333_v61 }
  0x48   : > { %v294_v60 = vadd.f32 %v532_v50, %v293_v56  ;;  %v365_v8 = vadd.f32 %v364_v5, %v334_v1 }
  0x4a   : > { %v295_v0 = vadd.f32 %v533_v55, %v294_v60  ;;  %v366_v11 = vadd.f32 %v365_v8, %v335_v4 }
  0x4c   : > { %v296_v3 = vadd.f32 %v536_v59, %v295_v0  ;;  %v367_v14 = vadd.f32 %v366_v11, %v336_v7 }
  0x4e   : > { %v297_v6 = vadd.f32 %v537_v63, %v296_v3  ;;  %v368_v16 = vadd.f32 %v367_v14, %v337_v10 }
  0x50   : > { %v298_v9 = vrot.slane %v297_v6, 4  ;;  %v369_v18 = vadd.f32 %v368_v16, %v338_v13 }
  0x52   : > { %v299_v12 = vadd.f32 %v298_v9, %v297_v6  ;;  %v370_v21 = vrot.slane %v369_v18, 4 }
  0x54   : > { %v300_v15 = vrot.slane %v299_v12, 2  ;;  %v371_v23 = vadd.f32 %v370_v21, %v369_v18 }
  0x56   : > { %v301_v17 = vadd.f32 %v300_v15, %v299_v12  ;;  %v372_v25 = vrot.slane %v371_v23, 2 }
  0x58   : > { %v302_v19 = vrot.slane %v301_v17, 1  ;;  %v373_v26 = vadd.f32 %v372_v25, %v371_v23 }
  0x5a   : > { %v303_v22 = vadd.f32 %v302_v19, %v301_v17  ;;  %v374_v27 = vrot.slane %v373_v26, 1 }
  0x5c   : > { %v304_v24 = vadd.f32 %v303_v22, %v266_v20  ;;  %v375_v28 = vadd.f32 %v374_v27, %v373_v26 }
  0x5e   : > { %305 = vst [vmem:[%s651_s23] sm:$0x1] %v304_v24  ;;  %v376_v30 = vadd.f32 %v375_v28, %v306_v29 }
  0x60   : > { %377 = vst [vmem:[%s651_s23 + $0x1] sm:$0x1] %v376_v30 }
  0x65   : > { %v381_v31 = vld [vmem:[%s651_s23] sm:$0x1] }
  0x66   : > { %v382_v32 = vmul.f32 0.00390625, %v381_v31 }
  0x67   : > { %v383_v34 = vld [vmem:[%s651_s23 + $0x1] sm:$0x1] }
  0x68   : > { %v385_v33 = vmul.f32 %v382_v32, %v382_v32  ;;  %v384_v35 = vmul.f32 0.00390625, %v383_v34 }
  0x6a   : > { %v386_v36 = vsub.f32 %v384_v35, %v385_v33 }
  0x6c   : > { %v387_v37 = vadd.f32 1e-05, %v386_v36 }
  0x6e   : > { %578 = vrsqrt.f32 %v387_v37 }
  0x7b   : > { %v579_v39 = vpop.eup %578 }
  0x7c   : > { %v390_v40 = vmul.f32 %v579_v39, %v389_v38 }
  0x7e   : > { %v392_v42 = vmul.f32 %v390_v40, %v382_v32  ;;  %394 = vst [vmem:[%s651_s23] sm:$0x1] %v390_v40 }
  0x80   : > { %v393_v43 = vsub.f32 %v391_v41, %v392_v42 }
  0x82   : > { %395 = vst [vmem:[%s651_s23 + $0x1] sm:$0x1] %v393_v43 }
  0x83 PF: > { %s13_s14 = sadd.s32 1, %s602_s14   ;;  %s697_s12 = smov %s598_s13 }
  0x84   : > { %p10_p5 = scmp.ge.s32.totalorder %s13_s14, 4   ;;  %s698_s13 = smov %s700_s15 }
  0x86   :  { %12 = sbr.rel (!%p10_p5) target bundleno = 2 (0x2), region = 70 }

// kernel: generator_forward.58
= control target key start
LH: loop header
LB: loop body
LE: loop exit
PB: predicated region body
PF: predicated region fallthrough
CT: control target
= control target key end

     0   :  { %s2085_s9 = smov 0   ;;  %s2087_s10 = smov 0   ;;  %s2289_s0 = inlined_call_operand.vmem [shape: bf16[512,384], index: 0, kind: input, shape index: {}]   ;;  %s2290_s1 = inlined_call_operand.vmem [shape: bf16[384,128], index: 1, kind: input, shape index: {}]   ;;  %s2291_s2 = inlined_call_operand.vmem [shape: bf16[512,128], index: 2, kind: output, shape index: {}]  }
   0x1   :  { %s2089_s11 = smov 0  }
   0x2 LB: > { %s31_s12 = sadd.s32 1, %s2064_s10  ;;  %p1495_p0 = scmp.ge.s32.totalorder %s2068_s11, 1  ;;  %s2068_s11 = sphi %s2089_s11, %s12_s11   ;;  %s2064_s10 = sphi %s2087_s10, %s2293_s10   ;;  %s2060_s9 = sphi %s2085_s9, %s2292_s9  }
   0x3   : > { %p33_p1 = scmp.ge.s32.totalorder %s31_s12, 2  ;;  %p158_p2 = scmp.lt.s32.totalorder %s2068_s11, 3 }
   0x5   : > { %s2295_s12 = smov (%p33_p1, %s31_s12), 0  ;;  %p159_p3 = pnand %p1495_p0, %p158_p2 }
   0x6   : > { %s1496_s15 = sshll.u32 (!%p159_p3), %s2060_s9, 5 }
   0x7   : > { %162 = sbr.rel (%p159_p3) target bundleno = 339 (0x153), region = 28  ;;  %p198_p4 = scmp.lt.s32.totalorder (!%p159_p3), %s1496_s15, 63 }
   0xc   : > { %v1958_v0 = vld [vmem:[%s2290_s1 + $0x78] sm:$0xff]   ;;  %v1960_v2 = vld [vmem:[%s2290_s1 + $0x70] sm:$0xff]   ;;  %v1962_v4 = vld [vmem:[%s2290_s1 + $0x68] sm:$0xff]   ;;  %s2297_s15 = smov (!%p198_p4, %s1496_s15), 63 }
   0xd   : > { %v1959_v1 = vld [vmem:[%s2290_s1 + $0x38] sm:$0xff]   ;;  %1733 = vmatprep.subr.bf16.mxu0 %v1958_v0  ;;  %1917 = vmatprep.subr.bf16.mxu1 %v1958_v0  ;;  %v1961_v3 = vld [vmem:[%s2290_s1 + $0x30] sm:$0xff]   ;;  %v1963_v5 = vld [vmem:[%s2290_s1 + $0x28] sm:$0xff]   ;;  %s1933_s28 = smul.u32 12, %s2297_s15 }
   0xe   : > { %1734 = vmatpush3.bf16.msra.mxu0 %v1959_v1  ;;  %1925 = vmatpush3.bf16.msra.mxu1 %v1959_v1  ;;  %v1964_v6 = vld [vmem:[%s2290_s1 + $0x60] sm:$0xff]   ;;  %v1966_v8 = vld [vmem:[%s2290_s1 + $0x58] sm:$0xff]   ;;  %v1968_v10 = vld [vmem:[%s2290_s1 + $0x50] sm:$0xff]  }
   0xf   : > { %1735 = vmatprep.subr.bf16.mxu0 %v1960_v2  ;;  %1918 = vmatprep.subr.bf16.mxu1 %v1960_v2  ;;  %v1965_v7 = vld [vmem:[%s2290_s1 + $0x20] sm:$0xff]   ;;  %s2136_s7 = scalar_lea.vmem %s2289_s0, %s1933_s28  ;;  %v1967_v9 = vld [vmem:[%s2290_s1 + $0x18] sm:$0xff]   ;;  %v1969_v13 = vld [vmem:[%s2290_s1 + $0x10] sm:$0xff]  }
  0x10   : > { %v1976_v11 = vld [vmem:[%s2136_s7 + $0x4] ss:$12 sps:$4 sm:$0xff]   ;;  %v1970_v14 = vld [vmem:[%s2290_s1 + $0x48] sm:$0xff]   ;;  %v1980_v18 = vld [vmem:[%s2290_s1 + $0xb8] sm:$0xff]  }
  0x11   : > { %v1979_v12 = vld [vmem:[%s2136_s7 + $0x124] ss:$12 sps:$4 sm:$0xff]   ;;  %839 = vmatprep.mubr.bf16.mxu0 %v1976_v11  ;;  %v1971_v15 = vld [vmem:[%s2290_s1 + $0x8] sm:$0xff]   ;;  %v1990_v28 = vld [vmem:[%s2136_s7 + $0x34] ss:$12 sps:$4 sm:$0xff]  }
  0x12   : > { %1736 = vmatpush3.bf16.msra.mxu0 %v1961_v3  ;;  %1926 = vmatpush3.bf16.msra.mxu1 %v1961_v3  ;;  %v1972_v16 = vld [vmem:[%s2290_s1 + $0x40] sm:$0xff]   ;;  %v1982_v21 = vld [vmem:[%s2136_s7 + $0x1c] ss:$12 sps:$4 sm:$0xff]   ;;  %v1981_v22 = vld [vmem:[%s2290_s1 + $0xb0] sm:$0xff]  }
  0x13   : > { %1737 = vmatprep.subr.bf16.mxu0 %v1962_v4  ;;  %1919 = vmatprep.subr.bf16.mxu1 %v1962_v4  ;;  %v1973_v17 = vld [vmem:[%s2290_s1] sm:$0xff]   ;;  %v1984_v23 = vld [vmem:[%s2136_s7 + $0x13c] ss:$12 sps:$4 sm:$0xff]   ;;  %v1997_v33 = vld [vmem:[%s2290_s1 + $0x90] sm:$0xff]  }
  0x14   : > { %935 = vmatprep.mubr.bf16.mxu1 %v1979_v12  ;;  %v1974_v19 = vld [vmem:[%s2136_s7] ss:$12 sps:$4 sm:$0xff]   ;;  %v1986_v24 = vld [vmem:[%s2136_s7 + $0x18] ss:$12 sps:$4 sm:$0xff]   ;;  %v1994_v31 = vld [vmem:[%s2136_s7 + $0x30] ss:$12 sps:$4 sm:$0xff]  }
  0x15   : > { %v1977_v20 = vld [vmem:[%s2136_s7 + $0x120] ss:$12 sps:$4 sm:$0xff]   ;;  %v1987_v26 = vld [vmem:[%s2136_s7 + $0x138] ss:$12 sps:$4 sm:$0xff]   ;;  %v1995_v32 = vld [vmem:[%s2136_s7 + $0x150] ss:$12 sps:$4 sm:$0xff]  }
  0x16   : > { %1738 = vmatpush3.bf16.msra.mxu0 %v1963_v5  ;;  %1927 = vmatpush3.bf16.msra.mxu1 %v1963_v5  ;;  %v1988_v25 = vld [vmem:[%s2290_s1 + $0xa8] sm:$0xff]   ;;  %v1989_v27 = vld [vmem:[%s2290_s1 + $0xa0] sm:$0xff]   ;;  %v1996_v30 = vld [vmem:[%s2290_s1 + $0x98] sm:$0xff]  }
  0x17   : > { %1739 = vmatprep.subr.bf16.mxu0 %v1964_v6  ;;  %1920 = vmatprep.subr.bf16.mxu1 %v1964_v6  ;;  %v1992_v29 = vld [vmem:[%s2136_s7 + $0x154] ss:$12 sps:$4 sm:$0xff]   ;;  %v1998_v34 = vld [vmem:[%s2136_s7 + $0x4c] ss:$12 sps:$4 sm:$0xff]   ;;  %v2006_v39 = vld [vmem:[%s2136_s7 + $0x64] ss:$12 sps:$4 sm:$0xff]  }
  0x18   : > { %v2000_v35 = vld [vmem:[%s2136_s7 + $0x16c] ss:$12 sps:$4 sm:$0xff]   ;;  %v2002_v37 = vld [vmem:[%s2136_s7 + $0x48] ss:$12 sps:$4 sm:$0xff]   ;;  %v2005_v40 = vld [vmem:[%s2290_s1 + $0x80] sm:$0xff]  }
  0x19   : > { %v2004_v36 = vld [vmem:[%s2290_s1 + $0x88] sm:$0xff]   ;;  %v2013_v45 = vld [vmem:[%s2136_s7 + $0x38] ss:$12 sps:$4 sm:$0xff]   ;;  %v2015_v47 = vld [vmem:[%s2136_s7 + $0x50] ss:$12 sps:$4 sm:$0xff]  }
  0x1a   : > { %1740 = vmatpush3.bf16.msra.mxu0 %v1965_v7  ;;  %1928 = vmatpush3.bf16.msra.mxu1 %v1965_v7  ;;  %v2003_v38 = vld [vmem:[%s2136_s7 + $0x168] ss:$12 sps:$4 sm:$0xff]   ;;  %v2009_v42 = vld [vmem:[%s2136_s7 + $0x60] ss:$12 sps:$4 sm:$0xff]   ;;  %v2014_v46 = vld [vmem:[%s2136_s7 + $0x78] ss:$12 sps:$4 sm:$0xff]  }
  0x1b   : > { %1741 = vmatprep.subr.bf16.mxu0 %v1966_v8  ;;  %1921 = vmatprep.subr.bf16.mxu1 %v1966_v8  ;;  %v2008_v41 = vld [vmem:[%s2136_s7 + $0x8] ss:$12 sps:$4 sm:$0xff]   ;;  %v2010_v43 = vld [vmem:[%s2136_s7 + $0x20] ss:$12 sps:$4 sm:$0xff]   ;;  %v2019_v50 = vld [vmem:[%s2136_s7 + $0x90] ss:$12 sps:$4 sm:$0xff]  }
  0x1c   : > { %v2011_v44 = vld [vmem:[%s2136_s7 + $0x7c] ss:$12 sps:$4 sm:$0xff]   ;;  %v2016_v48 = vld [vmem:[%s2136_s7 + $0x94] ss:$12 sps:$4 sm:$0xff]   ;;  %v2021_v52 = vld [vmem:[%s2136_s7 + $0xac] ss:$12 sps:$4 sm:$0xff]  }
  0x1d   : > { %v2018_v49 = vld [vmem:[%s2136_s7 + $0x68] ss:$12 sps:$4 sm:$0xff]   ;;  %v2020_v51 = vld [vmem:[%s2136_s7 + $0x80] ss:$12 sps:$4 sm:$0xff]   ;;  %v2023_v53 = vld [vmem:[%s2136_s7 + $0x98] ss:$12 sps:$4 sm:$0xff]  }
  0x1e   : > { %1742 = vmatpush3.bf16.msra.mxu0 %v1967_v9  ;;  %1929 = vmatpush3.bf16.msra.mxu1 %v1967_v9  ;;  %v2024_v54 = vld [vmem:[%s2136_s7 + $0xa8] ss:$12 sps:$4 sm:$0xff]   ;;  %v2025_v55 = vld [vmem:[%s2136_s7 + $0xb0] ss:$12 sps:$4 sm:$0xff]   ;;  %v2029_v58 = vld [vmem:[%s2136_s7 + $0xc0] ss:$12 sps:$4 sm:$0xff]  }
  0x1f   : > { %1743 = vmatprep.subr.bf16.mxu0 %v1968_v10  ;;  %1922 = vmatprep.subr.bf16.mxu1 %v1968_v10  ;;  %v2026_v56 = vld [vmem:[%s2136_s7 + $0xc4] ss:$12 sps:$4 sm:$0xff]   ;;  %v2028_v57 = vld [vmem:[%s2136_s7 + $0xc8] ss:$12 sps:$4 sm:$0xff]   ;;  %v2030_v59 = vld [vmem:[%s2136_s7 + $0xe0] ss:$12 sps:$4 sm:$0xff]  }
  0x20   : > { %v2031_v60 = vld [vmem:[%s2136_s7 + $0xdc] ss:$12 sps:$4 sm:$0xff]   ;;  %v2033_v61 = vld [vmem:[%s2136_s7 + $0xf8] ss:$12 sps:$4 sm:$0xff]   ;;  %v2036_v0 = vld [vmem:[%s2136_s7 + $0xf4] ss:$12 sps:$4 sm:$0xff]  }
  0x21   : > { %v2034_v62 = vld [vmem:[%s2136_s7 + $0xd8] ss:$12 sps:$4 sm:$0xff]   ;;  %v2035_v63 = vld [vmem:[%s2136_s7 + $0x110] ss:$12 sps:$4 sm:$0xff]   ;;  %v2038_v1 = vld [vmem:[%s2136_s7 + $0x128] ss:$12 sps:$4 sm:$0xff]  }
  0x22   : > { %1744 = vmatpush3.bf16.msra.mxu0 %v1969_v13  ;;  %1930 = vmatpush3.bf16.msra.mxu1 %v1969_v13  ;;  %v2039_v2 = vld [vmem:[%s2136_s7 + $0xf0] ss:$12 sps:$4 sm:$0xff]   ;;  %v2040_v3 = vld [vmem:[%s2136_s7 + $0x140] ss:$12 sps:$4 sm:$0xff]   ;;  %v2043_v5 = vld [vmem:[%s2136_s7 + $0x158] ss:$12 sps:$4 sm:$0xff]  }
  0x23   : > { %1745 = vmatprep.subr.bf16.mxu0 %v1970_v14  ;;  %1923 = vmatprep.subr.bf16.mxu1 %v1970_v14  ;;  %v2041_v4 = vld [vmem:[%s2136_s7 + $0x10c] ss:$12 sps:$4 sm:$0xff]   ;;  %v2044_v6 = vld [vmem:[%s2136_s7 + $0x108] ss:$12 sps:$4 sm:$0xff]   ;;  %v2045_v7 = vld [vmem:[%s2136_s7 + $0x170] ss:$12 sps:$4 sm:$0xff]  }
  0x24   : > { %s1499_s7 = sshll.u32 %s2297_s15, 2 }
  0x25   : > { %s2253_s21 = scalar_lea.vmem %s2291_s2, %s1499_s7 }
  0x26   : > { %1746 = vmatpush3.bf16.msra.mxu0 %v1971_v15  ;;  %1931 = vmatpush3.bf16.msra.mxu1 %v1971_v15 }
  0x27   : > { %1747 = vmatprep.subr.bf16.mxu0 %v1972_v16  ;;  %1924 = vmatprep.subr.bf16.mxu1 %v1972_v16 }
  0x2a   : > { %1748 = vmatpush3.bf16.msra.mxu0 %v1973_v17  ;;  %1932 = vmatpush3.bf16.msra.mxu1 %v1973_v17 }
  0x2b   : > { %1869 = vmatprep.subr.bf16.mxu1 %v1980_v18 }
  0x2d   : > { %840 = vmatmul.mubr.bf16.vlgmr.msra.gmra.mxu0 %v1974_v19  ;;  %936 = vmatmul.mubr.bf16.vlgmr.msra.gmra.mxu1 %v1977_v20 }
  0x2e   : > { %1870 = vmatpush3.bf16.msra.mxu1 %v1980_v18  ;;  %847 = vmatprep.mubr.bf16.mxu0 %v1982_v21 }
  0x2f   : > { %1871 = vmatprep.subr.bf16.mxu1 %v1981_v22  ;;  %943 = vmatprep.mubr.bf16.mxu1 %v1984_v23 }
  0x32   : > { %1872 = vmatpush3.bf16.msra.mxu1 %v1981_v22 }
  0x33   : > { %1873 = vmatprep.subr.bf16.mxu1 %v1988_v25 }
  0x35   : > { %848 = vmatmul.mubr.bf16.gmra.mxu0 %v1986_v24  ;;  %944 = vmatmul.mubr.bf16.gmra.mxu1 %v1987_v26 }
  0x36   : > { %1874 = vmatpush3.bf16.msra.mxu1 %v1988_v25  ;;  %855 = vmatprep.mubr.bf16.mxu0 %v1990_v28 }
  0x37   : > { %1875 = vmatprep.subr.bf16.mxu1 %v1989_v27  ;;  %951 = vmatprep.mubr.bf16.mxu1 %v1992_v29 }
  0x3a   : > { %1876 = vmatpush3.bf16.msra.mxu1 %v1989_v27 }
  0x3b   : > { %1877 = vmatprep.subr.bf16.mxu1 %v1996_v30 }
  0x3d   : > { %856 = vmatmul.mubr.bf16.gmra.mxu0 %v1994_v31  ;;  %952 = vmatmul.mubr.bf16.gmra.mxu1 %v1995_v32 }
  0x3e   : > { %1878 = vmatpush3.bf16.msra.mxu1 %v1996_v30  ;;  %863 = vmatprep.mubr.bf16.mxu0 %v1998_v34 }
  0x3f   : > { %1879 = vmatprep.subr.bf16.mxu1 %v1997_v33  ;;  %959 = vmatprep.mubr.bf16.mxu1 %v2000_v35 }
  0x42   : > { %1880 = vmatpush3.bf16.msra.mxu1 %v1997_v33 }
  0x43   : > { %1881 = vmatprep.subr.bf16.mxu1 %v2004_v36 }
  0x45   : > { %864 = vmatmul.mubr.bf16.gmra.mxu0 %v2002_v37  ;;  %960 = vmatmul.mubr.bf16.gmra.mxu1 %v2003_v38 }
  0x46   : > { %1882 = vmatpush3.bf16.msra.mxu1 %v2004_v36  ;;  %871 = vmatprep.mubr.bf16.mxu0 %v2006_v39 }
  0x47   : > { %1883 = vmatprep.subr.bf16.mxu1 %v2005_v40  ;;  %1885 = vmatprep.mubr.bf16.mxu1 %v2008_v41 }
  0x4a   : > { %1884 = vmatpush3.bf16.msra.mxu1 %v2005_v40 }
  0x4d   : > { %872 = vmatmul.mubr.bf16.gmra.mxu0 %v2009_v42  ;;  %1886 = vmatmul.mubr.bf16.vlgmr.msra.gmra.mxu1 %v2010_v43 }
  0x4e   : > { %879 = vmatprep.mubr.bf16.mxu0 %v2011_v44  ;;  %1889 = vmatprep.mubr.bf16.mxu1 %v2013_v45 }
  0x55   : > { %880 = vmatmul.mubr.bf16.gmra.mxu0 %v2014_v46  ;;  %1890 = vmatmul.mubr.bf16.gmra.mxu1 %v2015_v47 }
  0x56   : > { %887 = vmatprep.mubr.bf16.mxu0 %v2016_v48  ;;  %1893 = vmatprep.mubr.bf16.mxu1 %v2018_v49 }
  0x5d   : > { %888 = vmatmul.mubr.bf16.gmra.mxu0 %v2019_v50  ;;  %1894 = vmatmul.mubr.bf16.gmra.mxu1 %v2020_v51 }
  0x5e   : > { %895 = vmatprep.mubr.bf16.mxu0 %v2021_v52  ;;  %1897 = vmatprep.mubr.bf16.mxu1 %v2023_v53 }
  0x65   : > { %896 = vmatmul.mubr.bf16.gmra.mxu0 %v2024_v54  ;;  %1898 = vmatmul.mubr.bf16.gmra.mxu1 %v2025_v55 }
  0x66   : > { %903 = vmatprep.mubr.bf16.mxu0 %v2026_v56  ;;  %1901 = vmatprep.mubr.bf16.mxu1 %v2028_v57 }
  0x6d   : > { %904 = vmatmul.mubr.bf16.gmra.mxu0 %v2029_v58  ;;  %1902 = vmatmul.mubr.bf16.gmra.mxu1 %v2030_v59 }
  0x6e   : > { %911 = vmatprep.mubr.bf16.mxu0 %v2031_v60  ;;  %1905 = vmatprep.mubr.bf16.mxu1 %v2033_v61 }
  0x75   : > { %912 = vmatmul.mubr.bf16.gmra.mxu0 %v2034_v62  ;;  %1906 = vmatmul.mubr.bf16.gmra.mxu1 %v2035_v63 }
  0x76   : > { %919 = vmatprep.mubr.bf16.mxu0 %v2036_v0  ;;  %1909 = vmatprep.mubr.bf16.mxu1 %v2038_v1 }
  0x7d   : > { %920 = vmatmul.mubr.bf16.gmra.mxu0 %v2039_v2  ;;  %1910 = vmatmul.mubr.bf16.gmra.mxu1 %v2040_v3 }
  0x7e   : > { %927 = vmatprep.mubr.bf16.mxu0 %v2041_v4  ;;  %1913 = vmatprep.mubr.bf16.mxu1 %v2043_v5 }
  0x85   : > { %928 = vmatmul.mubr.bf16.gmra.mxu0 %v2044_v6  ;;  %1914 = vmatmul.mubr.bf16.gmra.mxu1 %v2045_v7 }
  0xed   : > { %v1749_v8 = vpop.f32.mrf.mxu0  ;;  %v1821_v9 = vpop.f32.mrf.mxu1 }
  0xef   : > { %v1750_v10 = vpop.f32.mrf.mxu0  ;;  %v1822_v11 = vpop.f32.mrf.mxu1 }
  0xf0   : > { %v2231_v12 = vadd.f32 %v1822_v11, %v1821_v9  ;;  %v1751_v55 = vadd.f32 %v1750_v10, %v1749_v8 }
  0xf1   : > { %v1752_v13 = vpop.f32.mrf.mxu0  ;;  %v1824_v14 = vpop.f32.mrf.mxu1 }
  0xf3   : > { %v1753_v15 = vpop.f32.mrf.mxu0  ;;  %v1825_v16 = vpop.f32.mrf.mxu1 }
  0xf4   : > { %v2233_v17 = vadd.f32 %v1825_v16, %v1824_v14  ;;  %v1754_v56 = vadd.f32 %v1753_v15, %v1752_v13 }
  0xf5   : > { %v1755_v18 = vpop.f32.mrf.mxu0  ;;  %v1827_v19 = vpop.f32.mrf.mxu1 }
  0xf7   : > { %v1756_v20 = vpop.f32.mrf.mxu0  ;;  %v1828_v21 = vpop.f32.mrf.mxu1 }
  0xf8   : > { %v2235_v22 = vadd.f32 %v1828_v21, %v1827_v19  ;;  %v1757_v51 = vadd.f32 %v1756_v20, %v1755_v18 }
  0xf9   : > { %v1758_v23 = vpop.f32.mrf.mxu0  ;;  %v1830_v24 = vpop.f32.mrf.mxu1 }
  0xfb   : > { %v1759_v25 = vpop.f32.mrf.mxu0  ;;  %v1831_v26 = vpop.f32.mrf.mxu1 }
  0xfc   : > { %v2237_v27 = vadd.f32 %v1831_v26, %v1830_v24  ;;  %v1760_v52 = vadd.f32 %v1759_v25, %v1758_v23 }
  0xfd   : > { %v1761_v28 = vpop.f32.mrf.mxu0  ;;  %v1833_v29 = vpop.f32.mrf.mxu1 }
  0xff   : > { %v1762_v30 = vpop.f32.mrf.mxu0  ;;  %v1834_v31 = vpop.f32.mrf.mxu1 }
 0x100   : > { %v2239_v32 = vadd.f32 %v1834_v31, %v1833_v29  ;;  %v1763_v9 = vadd.f32 %v1762_v30, %v1761_v28 }
 0x101   : > { %v1764_v33 = vpop.f32.mrf.mxu0  ;;  %v1836_v34 = vpop.f32.mrf.mxu1 }
 0x103   : > { %v1765_v35 = vpop.f32.mrf.mxu0  ;;  %v1837_v36 = vpop.f32.mrf.mxu1 }
 0x104   : > { %v2241_v37 = vadd.f32 %v1837_v36, %v1836_v34  ;;  %v1766_v10 = vadd.f32 %v1765_v35, %v1764_v33 }
 0x105   : > { %v1767_v38 = vpop.f32.mrf.mxu0  ;;  %v1839_v39 = vpop.f32.mrf.mxu1 }
 0x107   : > { %v1768_v40 = vpop.f32.mrf.mxu0  ;;  %v1840_v41 = vpop.f32.mrf.mxu1 }
 0x108   : > { %v2243_v42 = vadd.f32 %v1840_v41, %v1839_v39  ;;  %v1769_v5 = vadd.f32 %v1768_v40, %v1767_v38 }
 0x109   : > { %v1770_v43 = vpop.f32.mrf.mxu0  ;;  %v2245_v44 = vpop.f32.mrf.mxu1 }
 0x10b   : > { %v1771_v45 = vpop.f32.mrf.mxu0  ;;  %v2247_v46 = vpop.f32.mrf.mxu1 }
 0x10c   : > { %v1772_v6 = vadd.f32 %v1771_v45, %v1770_v43 }
 0x10d   : > { %v1773_v47 = vpop.f32.mrf.mxu0  ;;  %v1887_v48 = vpop.f32.mrf.mxu1 }
 0x10e   : > { %v1011_v57 = vadd.f32 %v1887_v48, %v1757_v51 }
 0x10f   : > { %v1774_v49 = vpop.f32.mrf.mxu0  ;;  %v1002_v50 = vpop.f32.mrf.mxu1 }
 0x110   : > { %v1003_v61 = vadd.f32 %v1751_v55, %v1002_v50  ;;  %v1775_v31 = vadd.f32 %v1774_v49, %v1773_v47 }
 0x111   : > { %v1776_v53 = vpop.f32.mrf.mxu0  ;;  %v1888_v54 = vpop.f32.mrf.mxu1 }
 0x112   : > { %v1014_v58 = vadd.f32 %v1888_v54, %v1760_v52 }
 0x113   : > { %v1777_v59 = vpop.f32.mrf.mxu0  ;;  %v1005_v60 = vpop.f32.mrf.mxu1 }
 0x114   : > { %v1646_v62 = vpack.c.bf16 %v1014_v58, %v1011_v57  ;;  %v1006_v63 = vadd.f32 %v1754_v56, %v1005_v60  ;;  %v1778_v33 = vadd.f32 %v1777_v59, %v1776_v53 }
 0x115   : > { %v1779_v0 = vpop.f32.mrf.mxu0  ;;  %v1891_v1 = vpop.f32.mrf.mxu1 }
 0x116   : > { %1718 = vst [vmem:[%s2253_s21 + $0x8] sm:$0xff] %v1646_v62   ;;  %v1641_v2 = vpack.c.bf16 %v1006_v63, %v1003_v61  ;;  %v1027_v11 = vadd.f32 %v1891_v1, %v1769_v5 }
 0x117   : > { %v1780_v3 = vpop.f32.mrf.mxu0  ;;  %v1018_v4 = vpop.f32.mrf.mxu1 }
 0x118   : > { %1642 = vst [vmem:[%s2253_s21] sm:$0xff] %v1641_v2   ;;  %v1019_v16 = vadd.f32 %v1763_v9, %v1018_v4  ;;  %v1781_v26 = vadd.f32 %v1780_v3, %v1779_v0 }
 0x119   : > { %v1782_v7 = vpop.f32.mrf.mxu0  ;;  %v1892_v8 = vpop.f32.mrf.mxu1 }
 0x11a   : > { %v1030_v13 = vadd.f32 %v1892_v8, %v1772_v6 }
 0x11b   : > { %v1783_v14 = vpop.f32.mrf.mxu0  ;;  %v1021_v15 = vpop.f32.mrf.mxu1 }
 0x11c   : > { %v1656_v18 = vpack.c.bf16 %v1030_v13, %v1027_v11  ;;  %v1022_v19 = vadd.f32 %v1766_v10, %v1021_v15  ;;  %v1784_v29 = vadd.f32 %v1783_v14, %v1782_v7 }
 0x11d   : > { %v1785_v20 = vpop.f32.mrf.mxu0  ;;  %v1895_v21 = vpop.f32.mrf.mxu1 }
 0x11e   : > { %1720 = vst [vmem:[%s2253_s21 + $0x18] sm:$0xff] %v1656_v18   ;;  %v1651_v23 = vpack.c.bf16 %v1022_v19, %v1019_v16  ;;  %v1043_v34 = vadd.f32 %v1895_v21, %v1781_v26 }
 0x11f   : > { %v1786_v24 = vpop.f32.mrf.mxu0  ;;  %v1034_v25 = vpop.f32.mrf.mxu1 }
 0x120   : > { %1719 = vst [vmem:[%s2253_s21 + $0x10] sm:$0xff] %v1651_v23   ;;  %v1035_v39 = vadd.f32 %v1775_v31, %v1034_v25  ;;  %v1787_v55 = vadd.f32 %v1786_v24, %v1785_v20 }
 0x121   : > { %v1788_v28 = vpop.f32.mrf.mxu0  ;;  %v1896_v30 = vpop.f32.mrf.mxu1 }
 0x122   : > { %v1046_v35 = vadd.f32 %v1896_v30, %v1784_v29 }
 0x123   : > { %v1789_v36 = vpop.f32.mrf.mxu0  ;;  %v1037_v38 = vpop.f32.mrf.mxu1 }
 0x124   : > { %v1666_v40 = vpack.c.bf16 %v1046_v35, %v1043_v34  ;;  %v1038_v41 = vadd.f32 %v1778_v33, %v1037_v38  ;;  %v1790_v47 = vadd.f32 %v1789_v36, %v1788_v28 }
 0x125   : > { %v1791_v43 = vpop.f32.mrf.mxu0  ;;  %v1899_v45 = vpop.f32.mrf.mxu1 }
 0x126   : > { %1722 = vst [vmem:[%s2253_s21 + $0x28] sm:$0xff] %v1666_v40   ;;  %v1661_v48 = vpack.c.bf16 %v1038_v41, %v1035_v39 }
 0x127   : > { %v1792_v50 = vpop.f32.mrf.mxu0  ;;  %v1050_v51 = vpop.f32.mrf.mxu1 }
 0x128   : > { %1721 = vst [vmem:[%s2253_s21 + $0x20] sm:$0xff] %v1661_v48   ;;  %v1793_v49 = vadd.f32 %v1792_v50, %v1791_v43  ;;  %v1051_v57 = vadd.f32 %v1787_v55, %v1050_v51 }
 0x129   : > { %v1794_v52 = vpop.f32.mrf.mxu0  ;;  %v1900_v54 = vpop.f32.mrf.mxu1 }
 0x12a   : > { %v1059_v62 = vadd.f32 %v1899_v45, %v1793_v49 }
 0x12b   : > { %v1795_v53 = vpop.f32.mrf.mxu0  ;;  %v1053_v56 = vpop.f32.mrf.mxu1 }
 0x12c   : > { %v1796_v58 = vadd.f32 %v1795_v53, %v1794_v52  ;;  %v1054_v59 = vadd.f32 %v1790_v47, %v1053_v56 }
 0x12d   : > { %v1797_v60 = vpop.f32.mrf.mxu0  ;;  %v1903_v61 = vpop.f32.mrf.mxu1 }
 0x12e   : > { %v1062_v63 = vadd.f32 %v1900_v54, %v1796_v58  ;;  %v1671_v0 = vpack.c.bf16 %v1054_v59, %v1051_v57 }
 0x12f   : > { %v1798_v1 = vpop.f32.mrf.mxu0  ;;  %v1066_v2 = vpop.f32.mrf.mxu1 }
 0x130   : > { %v1676_v3 = vpack.c.bf16 %v1062_v63, %v1059_v62  ;;  %1723 = vst [vmem:[%s2253_s21 + $0x30] sm:$0xff] %v1671_v0   ;;  %v1799_v6 = vadd.f32 %v1798_v1, %v1797_v60 }
 0x131   : > { %v1800_v4 = vpop.f32.mrf.mxu0  ;;  %v1904_v5 = vpop.f32.mrf.mxu1 }
 0x132   : > { %1724 = vst [vmem:[%s2253_s21 + $0x38] sm:$0xff] %v1676_v3   ;;  %v1067_v13 = vadd.f32 %v1799_v6, %v1066_v2 }
 0x133   : > { %v1801_v7 = vpop.f32.mrf.mxu0  ;;  %v1069_v8 = vpop.f32.mrf.mxu1 }
 0x134   : > { %v1802_v9 = vadd.f32 %v1801_v7, %v1800_v4 }
 0x135   : > { %v1803_v10 = vpop.f32.mrf.mxu0  ;;  %v1907_v11 = vpop.f32.mrf.mxu1 }
 0x136   : > { %v1070_v14 = vadd.f32 %v1802_v9, %v1069_v8 }
 0x137   : > { %v1804_v15 = vpop.f32.mrf.mxu0  ;;  %v1082_v16 = vpop.f32.mrf.mxu1 }
 0x138   : > { %v1681_v18 = vpack.c.bf16 %v1070_v14, %v1067_v13  ;;  %v1805_v21 = vadd.f32 %v1804_v15, %v1803_v10 }
 0x139   : > { %v1806_v19 = vpop.f32.mrf.mxu0  ;;  %v1908_v20 = vpop.f32.mrf.mxu1 }
 0x13a   : > { %1725 = vst [vmem:[%s2253_s21 + $0x40] sm:$0xff] %v1681_v18   ;;  %v1075_v28 = vadd.f32 %v1903_v61, %v1805_v21 }
 0x13b   : > { %v1807_v23 = vpop.f32.mrf.mxu0  ;;  %v1085_v24 = vpop.f32.mrf.mxu1 }
 0x13c   : > { %v1808_v25 = vadd.f32 %v1807_v23, %v1806_v19 }
 0x13d   : > { %v1809_v26 = vpop.f32.mrf.mxu0  ;;  %v1911_v29 = vpop.f32.mrf.mxu1 }
 0x13e   : > { %v1078_v30 = vadd.f32 %v1904_v5, %v1808_v25  ;;  %v1107_v38 = vadd.f32 %v1911_v29, %v2235_v22 }
 0x13f   : > { %v1810_v31 = vpop.f32.mrf.mxu0  ;;  %v1098_v33 = vpop.f32.mrf.mxu1 }
 0x140   : > { %v1686_v34 = vpack.c.bf16 %v1078_v30, %v1075_v28  ;;  %v1811_v39 = vadd.f32 %v1810_v31, %v1809_v26  ;;  %v1099_v45 = vadd.f32 %v2231_v12, %v1098_v33 }
 0x141   : > { %v1812_v35 = vpop.f32.mrf.mxu0  ;;  %v1912_v36 = vpop.f32.mrf.mxu1 }
 0x142   : > { %1726 = vst [vmem:[%s2253_s21 + $0x48] sm:$0xff] %v1686_v34   ;;  %v1110_v40 = vadd.f32 %v1912_v36, %v2237_v27  ;;  %v1083_v55 = vadd.f32 %v1811_v39, %v1082_v16  ;;  %v1844_v27 = vadd.f32 %v2247_v46, %v2245_v44 }
 0x143   : > { %v1813_v41 = vpop.f32.mrf.mxu0  ;;  %v1101_v43 = vpop.f32.mrf.mxu1 }
 0x144   : > { %v1706_v48 = vpack.c.bf16 %v1110_v40, %v1107_v38  ;;  %v1814_v50 = vadd.f32 %v1813_v41, %v1812_v35  ;;  %v1102_v51 = vadd.f32 %v2233_v17, %v1101_v43 }
 0x145   : > { %v1815_v52 = vpop.f32.mrf.mxu0  ;;  %v1915_v54 = vpop.f32.mrf.mxu1 }
 0x146   : > { %1730 = vst [vmem:[%s2253_s21 + $0x68] sm:$0xff] %v1706_v48   ;;  %v1086_v47 = vadd.f32 %v1814_v50, %v1085_v24  ;;  %v1701_v49 = vpack.c.bf16 %v1102_v51, %v1099_v45  ;;  %v1123_v17 = vadd.f32 %v1915_v54, %v2243_v42 }
 0x147   : > { %v1816_v22 = vpop.f32.mrf.mxu0  ;;  %v1114_v53 = vpop.f32.mrf.mxu1 }
 0x148   : > { %v1691_v56 = vpack.c.bf16 %v1086_v47, %v1083_v55  ;;  %1729 = vst [vmem:[%s2253_s21 + $0x60] sm:$0xff] %v1701_v49   ;;  %v1817_v58 = vadd.f32 %v1816_v22, %v1815_v52  ;;  %v1115_v62 = vadd.f32 %v2239_v32, %v1114_v53 }
 0x149   : > { %v1818_v12 = vpop.f32.mrf.mxu0  ;;  %v1916_v57 = vpop.f32.mrf.mxu1 }
 0x14a   : > { %1727 = vst [vmem:[%s2253_s21 + $0x50] sm:$0xff] %v1691_v56   ;;  %v1126_v59 = vadd.f32 %v1916_v57, %v1844_v27  ;;  %v1091_v46 = vadd.f32 %v1907_v11, %v1817_v58 }
 0x14b   : > { %v1819_v60 = vpop.f32.mrf.mxu0  ;;  %v1117_v61 = vpop.f32.mrf.mxu1 }
 0x14c   : > { %v1716_v63 = vpack.c.bf16 %v1126_v59, %v1123_v17  ;;  %v1820_v0 = vadd.f32 %v1819_v60, %v1818_v12  ;;  %v1118_v44 = vadd.f32 %v2241_v37, %v1117_v61 }
 0x14e   : > { %1732 = vst [vmem:[%s2253_s21 + $0x78] sm:$0xff] %v1716_v63   ;;  %v1094_v1 = vadd.f32 %v1908_v20, %v1820_v0  ;;  %v1711_v2 = vpack.c.bf16 %v1118_v44, %v1115_v62 }
 0x150   : > { %v1696_v3 = vpack.c.bf16 %v1094_v1, %v1091_v46  ;;  %1731 = vst [vmem:[%s2253_s21 + $0x70] sm:$0xff] %v1711_v2  }
 0x152   : > { %1728 = vst [vmem:[%s2253_s21 + $0x58] sm:$0xff] %v1696_v3  }
 0x153 PF: > { %s12_s11 = sadd.s32 1, %s2068_s11   ;;  %s2292_s9 = smov %s2064_s10 }
 0x154   : > { %p9_p5 = scmp.ge.s32.totalorder %s12_s11, 4   ;;  %s2293_s10 = smov %s2295_s12 }
 0x156   :  { %11 = sbr.rel (!%p9_p5) target bundleno = 2 (0x2), region = 69 }

// kernel: generator_forward.60
= control target key start
LH: loop header
LB: loop body
LE: loop exit
PB: predicated region body
PF: predicated region fallthrough
CT: control target
= control target key end

     0   :  { %s946_s9 = smov 0   ;;  %s948_s10 = smov 0   ;;  %s1094_s0 = inlined_call_operand.vmem [shape: bf16[2,256,128], index: 0, kind: input, shape index: {}]   ;;  %s1095_s1 = inlined_call_operand.vmem [shape: f32[2,2,128], index: 1, kind: input, shape index: {}]   ;;  %s1096_s2 = inlined_call_operand.vmem [shape: bf16[2,256,128], index: 2, kind: output, shape index: {}]  }
   0x1   :  { %s950_s11 = smov 0  }
   0x2 LB: > { %s24_s12 = sadd.s32 1, %s925_s10  ;;  %p633_p0 = scmp.ge.s32.totalorder %s929_s11, 1  ;;  %s929_s11 = sphi %s950_s11, %s12_s11   ;;  %s925_s10 = sphi %s948_s10, %s1098_s10   ;;  %s921_s9 = sphi %s946_s9, %s1097_s9  }
   0x3   : > { %p26_p1 = scmp.ge.s32.totalorder %s24_s12, 2  ;;  %p142_p2 = scmp.lt.s32.totalorder %s929_s11, 3 }
   0x5   : > { %s1100_s12 = smov (%p26_p1, %s24_s12), 0  ;;  %p143_p3 = pnand %p633_p0, %p142_p2 }
   0x6   : > { %p177_p4 = scmp.lt.s32.totalorder (!%p143_p3), %s921_s9, 1 }
   0x7   : > { %146 = sbr.rel (%p143_p3) target bundleno = 58 (0x3a), region = 28 }
   0xc   : > { %s1102_s9 = smov (!%p177_p4, %s921_s9), 1 }
   0xd   : > { %s675_s13 = sshll.u32 %s1102_s9, 7  ;;  %s636_s14 = sshll.u32 %s1102_s9, 1 }
   0xe   : > { %s973_s17 = scalar_lea.vmem %s1094_s0, %s675_s13  ;;  %s189_s20 = scalar_lea.vmem %s1095_s1, %s636_s14 }
   0xf   : > { %v710_v0 = vld [vmem:[%s973_s17] sm:$0xff]   ;;  %v853_v4 = vld [vmem:[%s973_s17 + $0x8] sm:$0xff]   ;;  %v854_v5 = vld [vmem:[%s973_s17 + $0x10] sm:$0xff]   ;;  %s1009_s23 = scalar_lea.vmem %s1096_s2, %s675_s13 }
  0x10   : > { %v979_v1 = vld [vmem:[%s189_s20] ss:$0 sm:$0xff]  ;;  %v711_v2 = vunpack.c.l.bf16 %v710_v0  ;;  %v712_v3 = vunpack.c.h.bf16 %v710_v0  ;;  %v855_v6 = vld [vmem:[%s973_s17 + $0x18] sm:$0xff]   ;;  %v984_v7 = vld [vmem:[%s189_s20 + $0x1] ss:$0 sm:$0xff]  ;;  %v715_v8 = vunpack.c.l.bf16 %v853_v4  ;;  %v716_v9 = vunpack.c.h.bf16 %v853_v4 }
  0x11   : > { %v719_v10 = vunpack.c.l.bf16 %v854_v5  ;;  %v720_v11 = vunpack.c.h.bf16 %v854_v5  ;;  %v723_v14 = vunpack.c.l.bf16 %v855_v6  ;;  %v724_v15 = vunpack.c.h.bf16 %v855_v6  ;;  %v856_v28 = vld [vmem:[%s973_s17 + $0x20] sm:$0xff]   ;;  %v857_v33 = vld [vmem:[%s973_s17 + $0x28] sm:$0xff]   ;;  %v858_v38 = vld [vmem:[%s973_s17 + $0x30] sm:$0xff]  }
  0x12   : > { %v270_v12 = vmul.f32 %v711_v2, %v979_v1  ;;  %v271_v13 = vmul.f32 %v712_v3, %v979_v1  ;;  %v272_v16 = vmul.f32 %v715_v8, %v979_v1  ;;  %v273_v17 = vmul.f32 %v716_v9, %v979_v1  ;;  %v859_v43 = vld [vmem:[%s973_s17 + $0x38] sm:$0xff]   ;;  %v860_v0 = vld [vmem:[%s973_s17 + $0x40] sm:$0xff]  }
  0x13   : > { %v274_v18 = vmul.f32 %v719_v10, %v979_v1  ;;  %v275_v19 = vmul.f32 %v720_v11, %v979_v1  ;;  %v276_v22 = vmul.f32 %v723_v14, %v979_v1  ;;  %v277_v23 = vmul.f32 %v724_v15, %v979_v1  ;;  %v861_v11 = vld [vmem:[%s973_s17 + $0x48] sm:$0xff]  }
  0x14   : > { %v306_v20 = vadd.f32 %v984_v7, %v270_v12  ;;  %v307_v21 = vadd.f32 %v984_v7, %v271_v13  ;;  %v308_v24 = vadd.f32 %v984_v7, %v272_v16  ;;  %v309_v25 = vadd.f32 %v984_v7, %v273_v17  ;;  %v862_v16 = vld [vmem:[%s973_s17 + $0x50] sm:$0xff]  }
  0x15   : > { %v310_v26 = vadd.f32 %v984_v7, %v274_v18  ;;  %v311_v27 = vadd.f32 %v984_v7, %v275_v19  ;;  %v312_v31 = vadd.f32 %v984_v7, %v276_v22  ;;  %v313_v32 = vadd.f32 %v984_v7, %v277_v23 }
  0x16   : > { %v338_v29 = vmax.f32 %v306_v20, 0.0  ;;  %v339_v30 = vmax.f32 %v307_v21, 0.0  ;;  %v340_v34 = vmax.f32 %v308_v24, 0.0  ;;  %v341_v35 = vmax.f32 %v309_v25, 0.0  ;;  %v863_v25 = vld [vmem:[%s973_s17 + $0x58] sm:$0xff]  }
  0x17   : > { %v342_v36 = vmax.f32 %v310_v26, 0.0  ;;  %v343_v37 = vmax.f32 %v311_v27, 0.0  ;;  %v344_v40 = vmax.f32 %v312_v31, 0.0  ;;  %v345_v41 = vmax.f32 %v313_v32, 0.0 }
  0x18   : > { %v776_v39 = vpack.c.bf16 %v339_v30, %v338_v29  ;;  %v727_v42 = vunpack.c.l.bf16 %v856_v28  ;;  %v781_v44 = vpack.c.bf16 %v341_v35, %v340_v34  ;;  %v728_v46 = vunpack.c.h.bf16 %v856_v28 }
  0x19   : > { %v786_v45 = vpack.c.bf16 %v343_v37, %v342_v36  ;;  %v731_v47 = vunpack.c.l.bf16 %v857_v33  ;;  %v791_v48 = vpack.c.bf16 %v345_v41, %v344_v40  ;;  %v732_v50 = vunpack.c.h.bf16 %v857_v33 }
  0x1a   : > { %777 = vst [vmem:[%s1009_s23] sm:$0xff] %v776_v39   ;;  %v278_v49 = vmul.f32 %v727_v42, %v979_v1  ;;  %v735_v51 = vunpack.c.l.bf16 %v858_v38  ;;  %868 = vst [vmem:[%s1009_s23 + $0x8] sm:$0xff] %v781_v44   ;;  %v279_v52 = vmul.f32 %v728_v46, %v979_v1  ;;  %v736_v54 = vunpack.c.h.bf16 %v858_v38  ;;  %v864_v38 = vld [vmem:[%s973_s17 + $0x60] sm:$0xff]  }
  0x1b   : > { %869 = vst [vmem:[%s1009_s23 + $0x10] sm:$0xff] %v786_v45   ;;  %v280_v53 = vmul.f32 %v731_v47, %v979_v1  ;;  %v739_v55 = vunpack.c.l.bf16 %v859_v43  ;;  %870 = vst [vmem:[%s1009_s23 + $0x18] sm:$0xff] %v791_v48   ;;  %v281_v57 = vmul.f32 %v732_v50, %v979_v1  ;;  %v740_v59 = vunpack.c.h.bf16 %v859_v43 }
  0x1c   : > { %v314_v56 = vadd.f32 %v984_v7, %v278_v49  ;;  %v282_v58 = vmul.f32 %v735_v51, %v979_v1  ;;  %v315_v60 = vadd.f32 %v984_v7, %v279_v52  ;;  %v283_v62 = vmul.f32 %v736_v54, %v979_v1  ;;  %v865_v51 = vld [vmem:[%s973_s17 + $0x68] sm:$0xff]  }
  0x1d   : > { %v316_v61 = vadd.f32 %v984_v7, %v280_v53  ;;  %v284_v63 = vmul.f32 %v739_v55, %v979_v1  ;;  %v317_v3 = vadd.f32 %v984_v7, %v281_v57  ;;  %v285_v5 = vmul.f32 %v740_v59, %v979_v1 }
  0x1e   : > { %v346_v2 = vmax.f32 %v314_v56, 0.0  ;;  %v318_v4 = vadd.f32 %v984_v7, %v282_v58  ;;  %v347_v6 = vmax.f32 %v315_v60, 0.0  ;;  %v319_v9 = vadd.f32 %v984_v7, %v283_v62  ;;  %v866_v60 = vld [vmem:[%s973_s17 + $0x70] sm:$0xff]  }
  0x1f   : > { %v348_v8 = vmax.f32 %v316_v61, 0.0  ;;  %v320_v10 = vadd.f32 %v984_v7, %v284_v63  ;;  %v349_v12 = vmax.f32 %v317_v3, 0.0  ;;  %v321_v14 = vadd.f32 %v984_v7, %v285_v5 }
  0x20   : > { %v350_v13 = vmax.f32 %v318_v4, 0.0  ;;  %v743_v15 = vunpack.c.l.bf16 %v860_v0  ;;  %v796_v17 = vpack.c.bf16 %v347_v6, %v346_v2  ;;  %v351_v18 = vmax.f32 %v319_v9, 0.0  ;;  %v867_v2 = vld [vmem:[%s973_s17 + $0x78] sm:$0xff]  }
  0x21   : > { %v352_v19 = vmax.f32 %v320_v10, 0.0  ;;  %v744_v20 = vunpack.c.h.bf16 %v860_v0  ;;  %v801_v21 = vpack.c.bf16 %v349_v12, %v348_v8  ;;  %v353_v22 = vmax.f32 %v321_v14, 0.0 }
  0x22   : > { %v286_v23 = vmul.f32 %v743_v15, %v979_v1  ;;  %v747_v24 = vunpack.c.l.bf16 %v861_v11  ;;  %871 = vst [vmem:[%s1009_s23 + $0x20] sm:$0xff] %v796_v17   ;;  %v806_v26 = vpack.c.bf16 %v351_v18, %v350_v13  ;;  %v748_v28 = vunpack.c.h.bf16 %v861_v11 }
  0x23   : > { %v287_v27 = vmul.f32 %v744_v20, %v979_v1  ;;  %v751_v29 = vunpack.c.l.bf16 %v862_v16  ;;  %872 = vst [vmem:[%s1009_s23 + $0x28] sm:$0xff] %v801_v21   ;;  %v811_v30 = vpack.c.bf16 %v353_v22, %v352_v19  ;;  %v752_v33 = vunpack.c.h.bf16 %v862_v16 }
  0x24   : > { %v322_v31 = vadd.f32 %v984_v7, %v286_v23  ;;  %v288_v32 = vmul.f32 %v747_v24, %v979_v1  ;;  %873 = vst [vmem:[%s1009_s23 + $0x30] sm:$0xff] %v806_v26   ;;  %v289_v35 = vmul.f32 %v748_v28, %v979_v1  ;;  %v755_v37 = vunpack.c.l.bf16 %v863_v25 }
  0x25   : > { %v323_v34 = vadd.f32 %v984_v7, %v287_v27  ;;  %v290_v36 = vmul.f32 %v751_v29, %v979_v1  ;;  %874 = vst [vmem:[%s1009_s23 + $0x38] sm:$0xff] %v811_v30   ;;  %v291_v41 = vmul.f32 %v752_v33, %v979_v1  ;;  %v756_v42 = vunpack.c.h.bf16 %v863_v25 }
  0x26   : > { %v354_v39 = vmax.f32 %v322_v31, 0.0  ;;  %v324_v40 = vadd.f32 %v984_v7, %v288_v32  ;;  %v325_v44 = vadd.f32 %v984_v7, %v289_v35  ;;  %v292_v46 = vmul.f32 %v755_v37, %v979_v1 }
  0x27   : > { %v355_v43 = vmax.f32 %v323_v34, 0.0  ;;  %v326_v45 = vadd.f32 %v984_v7, %v290_v36  ;;  %v327_v48 = vadd.f32 %v984_v7, %v291_v41  ;;  %v293_v49 = vmul.f32 %v756_v42, %v979_v1 }
  0x28   : > { %v356_v47 = vmax.f32 %v324_v40, 0.0  ;;  %v759_v50 = vunpack.c.l.bf16 %v864_v38  ;;  %v357_v53 = vmax.f32 %v325_v44, 0.0  ;;  %v328_v55 = vadd.f32 %v984_v7, %v292_v46 }
  0x29   : > { %v816_v52 = vpack.c.bf16 %v355_v43, %v354_v39  ;;  %v358_v54 = vmax.f32 %v326_v45, 0.0  ;;  %v359_v56 = vmax.f32 %v327_v48, 0.0  ;;  %v329_v57 = vadd.f32 %v984_v7, %v293_v49 }
  0x2a   : > { %v760_v58 = vunpack.c.h.bf16 %v864_v38  ;;  %v294_v59 = vmul.f32 %v759_v50, %v979_v1  ;;  %v821_v61 = vpack.c.bf16 %v357_v53, %v356_v47  ;;  %v360_v62 = vmax.f32 %v328_v55, 0.0 }
  0x2b   : > { %875 = vst [vmem:[%s1009_s23 + $0x40] sm:$0xff] %v816_v52   ;;  %v763_v63 = vunpack.c.l.bf16 %v865_v51  ;;  %v764_v0 = vunpack.c.h.bf16 %v865_v51  ;;  %v826_v3 = vpack.c.bf16 %v359_v56, %v358_v54  ;;  %v361_v4 = vmax.f32 %v329_v57, 0.0 }
  0x2c   : > { %v295_v5 = vmul.f32 %v760_v58, %v979_v1  ;;  %v330_v6 = vadd.f32 %v984_v7, %v294_v59  ;;  %876 = vst [vmem:[%s1009_s23 + $0x48] sm:$0xff] %v821_v61   ;;  %v767_v10 = vunpack.c.l.bf16 %v866_v60  ;;  %v768_v11 = vunpack.c.h.bf16 %v866_v60 }
  0x2d   : > { %v296_v8 = vmul.f32 %v763_v63, %v979_v1  ;;  %v297_v9 = vmul.f32 %v764_v0, %v979_v1  ;;  %877 = vst [vmem:[%s1009_s23 + $0x50] sm:$0xff] %v826_v3   ;;  %v831_v12 = vpack.c.bf16 %v361_v4, %v360_v62  ;;  %v771_v15 = vunpack.c.l.bf16 %v867_v2 }
  0x2e   : > { %v331_v13 = vadd.f32 %v984_v7, %v295_v5  ;;  %v362_v14 = vmax.f32 %v330_v6, 0.0  ;;  %v298_v18 = vmul.f32 %v767_v10, %v979_v1  ;;  %v299_v19 = vmul.f32 %v768_v11, %v979_v1 }
  0x2f   : > { %v332_v16 = vadd.f32 %v984_v7, %v296_v8  ;;  %v333_v17 = vadd.f32 %v984_v7, %v297_v9  ;;  %878 = vst [vmem:[%s1009_s23 + $0x58] sm:$0xff] %v831_v12   ;;  %v772_v21 = vunpack.c.h.bf16 %v867_v2  ;;  %v300_v22 = vmul.f32 %v771_v15, %v979_v1 }
  0x30   : > { %v363_v20 = vmax.f32 %v331_v13, 0.0  ;;  %v334_v25 = vadd.f32 %v984_v7, %v298_v18  ;;  %v335_v26 = vadd.f32 %v984_v7, %v299_v19 }
  0x31   : > { %v364_v23 = vmax.f32 %v332_v16, 0.0  ;;  %v365_v24 = vmax.f32 %v333_v17, 0.0  ;;  %v301_v28 = vmul.f32 %v772_v21, %v979_v1  ;;  %v336_v29 = vadd.f32 %v984_v7, %v300_v22 }
  0x32   : > { %v836_v27 = vpack.c.bf16 %v363_v20, %v362_v14  ;;  %v366_v31 = vmax.f32 %v334_v25, 0.0  ;;  %v367_v32 = vmax.f32 %v335_v26, 0.0 }
  0x33   : > { %v841_v30 = vpack.c.bf16 %v365_v24, %v364_v23  ;;  %v337_v33 = vadd.f32 %v984_v7, %v301_v28  ;;  %v368_v34 = vmax.f32 %v336_v29, 0.0 }
  0x34   : > { %879 = vst [vmem:[%s1009_s23 + $0x60] sm:$0xff] %v836_v27   ;;  %v846_v35 = vpack.c.bf16 %v367_v32, %v366_v31 }
  0x35   : > { %880 = vst [vmem:[%s1009_s23 + $0x68] sm:$0xff] %v841_v30   ;;  %v369_v36 = vmax.f32 %v337_v33, 0.0 }
  0x36   : > { %881 = vst [vmem:[%s1009_s23 + $0x70] sm:$0xff] %v846_v35  }
  0x37   : > { %v851_v37 = vpack.c.bf16 %v369_v36, %v368_v34 }
  0x39   : > { %882 = vst [vmem:[%s1009_s23 + $0x78] sm:$0xff] %v851_v37  }
  0x3a PF: > { %s12_s11 = sadd.s32 1, %s929_s11   ;;  %s1097_s9 = smov %s925_s10 }
  0x3b   : > { %p9_p5 = scmp.ge.s32.totalorder %s12_s11, 4   ;;  %s1098_s10 = smov %s1100_s12 }
  0x3d   :  { %11 = sbr.rel (!%p9_p5) target bundleno = 2 (0x2), region = 61 }

// kernel: generator_forward.62
= control target key start
LH: loop header
LB: loop body
LE: loop exit
PB: predicated region body
PF: predicated region fallthrough
CT: control target
= control target key end

     0   :  { %s445_s12 = smov 0   ;;  %s447_s13 = smov 0   ;;  %s495_s0 = inlined_call_operand.vmem [shape: bf16[2,64,128], index: 0, kind: input, shape index: {}]   ;;  %s496_s1 = inlined_call_operand.vmem [shape: f32[1,1,128], index: 1, kind: input, shape index: {}]   ;;  %s497_s2 = inlined_call_operand.vmem [shape: f32[1,1,128], index: 2, kind: input, shape index: {}]   ;;  %s498_s3 = inlined_call_operand.vmem [shape: f32[2,2,128], index: 3, kind: output, shape index: {}]  }
   0x1   :  { %s449_s14 = smov 0  }
   0x2 LB: > { %s25_s15 = sadd.s32 1, %s418_s13  ;;  %p347_p0 = scmp.ge.s32.totalorder %s422_s14, 1  ;;  %s422_s14 = sphi %s449_s14, %s13_s14   ;;  %s418_s13 = sphi %s447_s13, %s500_s13   ;;  %s414_s12 = sphi %s445_s12, %s499_s12  }
   0x3   : > { %p27_p1 = scmp.ge.s32.totalorder %s25_s15, 2  ;;  %p156_p2 = scmp.lt.s32.totalorder %s422_s14, 3 }
   0x5   : > { %s502_s15 = smov (%p27_p1, %s25_s15), 0  ;;  %p157_p3 = pnand %p347_p0, %p156_p2 }
   0x6   : > { %p184_p4 = scmp.lt.s32.totalorder (!%p157_p3), %s414_s12, 1 }
   0x7   : > { %160 = sbr.rel (%p157_p3) target bundleno = 83 (0x53), region = 32 }
   0xc   : > { %s504_s12 = smov (!%p184_p4, %s414_s12), 1  ;;  %v424_v0 = vmov 0.0   ;;  %v269_v58 = vld [vmem:[%s496_s1] sm:$0x1] }
   0xd   : > { %s350_s16 = sshll.u32 %s504_s12, 1  ;;  %s353_s17 = sshll.u32 %s504_s12, 5  ;;  %v271_v61 = vld [vmem:[%s497_s2] sm:$0x1] }
   0xe   : > { %s466_s20 = scalar_lea.vmem %s498_s3, %s350_s16  ;;  %s191_s23 = scalar_lea.vmem %s495_s0, %s353_s17 }
   0xf   : > { %201 = vst [vmem:[%s466_s20] sm:$0x3] %v424_v0  ;;  %v355_v1 = vld [vmem:[%s191_s23] sm:$0xff]   ;;  %v370_v2 = vld [vmem:[%s191_s23 + $0x8] sm:$0xff]   ;;  %v371_v3 = vld [vmem:[%s191_s23 + $0x10] sm:$0xff]  }
  0x10   : > { %v356_v4 = vunpack.c.l.bf16 %v355_v1  ;;  %v357_v5 = vunpack.c.h.bf16 %v355_v1  ;;  %v360_v6 = vunpack.c.l.bf16 %v370_v2  ;;  %v361_v7 = vunpack.c.h.bf16 %v370_v2  ;;  %v372_v13 = vld [vmem:[%s191_s23 + $0x18] sm:$0xff]  }
  0x11   : > { %v364_v8 = vunpack.c.l.bf16 %v371_v3  ;;  %v365_v14 = vunpack.c.h.bf16 %v371_v3  ;;  %v368_v18 = vunpack.c.l.bf16 %v372_v13  ;;  %v369_v22 = vunpack.c.h.bf16 %v372_v13 }
  0x12   : > { %v219_v9 = vadd.f32 %v357_v5, %v356_v4  ;;  %v235_v10 = vmul.f32 %v356_v4, %v356_v4  ;;  %v236_v11 = vmul.f32 %v357_v5, %v357_v5  ;;  %v237_v12 = vmul.f32 %v360_v6, %v360_v6 }
  0x13   : > { %v238_v16 = vmul.f32 %v361_v7, %v361_v7  ;;  %v239_v20 = vmul.f32 %v364_v8, %v364_v8  ;;  %v240_v24 = vmul.f32 %v365_v14, %v365_v14  ;;  %v241_v27 = vmul.f32 %v368_v18, %v368_v18 }
  0x14   : > { %v220_v15 = vadd.f32 %v360_v6, %v219_v9  ;;  %v243_v17 = vadd.f32 %v236_v11, %v235_v10  ;;  %v242_v30 = vmul.f32 %v369_v22, %v369_v22 }
  0x16   : > { %v221_v19 = vadd.f32 %v361_v7, %v220_v15  ;;  %v244_v21 = vadd.f32 %v243_v17, %v237_v12  ;;  %v218_v44 = vld [vmem:[%s466_s20] sm:$0x1]  ;;  %v234_v49 = vld [vmem:[%s466_s20 + $0x1] sm:$0x1] }
  0x18   : > { %v222_v23 = vadd.f32 %v364_v8, %v221_v19  ;;  %v245_v25 = vadd.f32 %v244_v21, %v238_v16 }
  0x1a   : > { %v223_v26 = vadd.f32 %v365_v14, %v222_v23  ;;  %v246_v28 = vadd.f32 %v245_v25, %v239_v20 }
  0x1c   : > { %v224_v29 = vadd.f32 %v368_v18, %v223_v26  ;;  %v247_v31 = vadd.f32 %v246_v28, %v240_v24 }
  0x1e   : > { %v225_v32 = vadd.f32 %v369_v22, %v224_v29  ;;  %v248_v33 = vadd.f32 %v247_v31, %v241_v27 }
  0x20   : > { %v226_v34 = vrot.slane %v225_v32, 4  ;;  %v249_v35 = vadd.f32 %v248_v33, %v242_v30 }
  0x22   : > { %v227_v36 = vadd.f32 %v226_v34, %v225_v32  ;;  %v250_v37 = vrot.slane %v249_v35, 4 }
  0x24   : > { %v228_v38 = vrot.slane %v227_v36, 2  ;;  %v251_v39 = vadd.f32 %v250_v37, %v249_v35 }
  0x26   : > { %v229_v40 = vadd.f32 %v228_v38, %v227_v36  ;;  %v252_v41 = vrot.slane %v251_v39, 2 }
  0x28   : > { %v230_v42 = vrot.slane %v229_v40, 1  ;;  %v253_v43 = vadd.f32 %v252_v41, %v251_v39 }
  0x2a   : > { %v231_v45 = vadd.f32 %v230_v42, %v229_v40  ;;  %v254_v46 = vrot.slane %v253_v43, 1 }
  0x2c   : > { %v232_v47 = vadd.f32 %v231_v45, %v218_v44  ;;  %v255_v48 = vadd.f32 %v254_v46, %v253_v43 }
  0x2e   : > { %233 = vst [vmem:[%s466_s20] sm:$0x1] %v232_v47  ;;  %v256_v50 = vadd.f32 %v255_v48, %v234_v49 }
  0x30   : > { %257 = vst [vmem:[%s466_s20 + $0x1] sm:$0x1] %v256_v50 }
  0x35   : > { %v261_v51 = vld [vmem:[%s466_s20] sm:$0x1] }
  0x36   : > { %v262_v52 = vmul.f32 0.015625, %v261_v51 }
  0x37   : > { %v263_v53 = vld [vmem:[%s466_s20 + $0x1] sm:$0x1] }
  0x38   : > { %v264_v54 = vmul.f32 0.015625, %v263_v53  ;;  %v265_v55 = vmul.f32 %v262_v52, %v262_v52 }
  0x3a   : > { %v266_v56 = vsub.f32 %v264_v54, %v265_v55 }
  0x3c   : > { %v267_v57 = vadd.f32 1e-05, %v266_v56 }
  0x3e   : > { %398 = vrsqrt.f32 %v267_v57 }
  0x4b   : > { %v399_v59 = vpop.eup %398 }
  0x4c   : > { %v270_v60 = vmul.f32 %v399_v59, %v269_v58 }
  0x4e   : > { %v272_v62 = vmul.f32 %v270_v60, %v262_v52  ;;  %274 = vst [vmem:[%s466_s20] sm:$0x1] %v270_v60 }
  0x50   : > { %v273_v63 = vsub.f32 %v271_v61, %v272_v62 }
  0x52   : > { %275 = vst [vmem:[%s466_s20 + $0x1] sm:$0x1] %v273_v63 }
  0x53 PF: > { %s13_s14 = sadd.s32 1, %s422_s14   ;;  %s499_s12 = smov %s418_s13 }
  0x54   : > { %p10_p5 = scmp.ge.s32.totalorder %s13_s14, 4   ;;  %s500_s13 = smov %s502_s15 }
  0x56   :  { %12 = sbr.rel (!%p10_p5) target bundleno = 2 (0x2), region = 70 }

// kernel: generator_forward.63
= control target key start
LH: loop header
LB: loop body
LE: loop exit
PB: predicated region body
PF: predicated region fallthrough
CT: control target
= control target key end

     0   :  { %s526_s9 = smov 0   ;;  %s528_s10 = smov 0   ;;  %s570_s0 = inlined_call_operand.vmem [shape: bf16[2,64,128], index: 0, kind: input, shape index: {}]   ;;  %s571_s1 = inlined_call_operand.vmem [shape: f32[2,2,128], index: 1, kind: input, shape index: {}]   ;;  %s572_s2 = inlined_call_operand.vmem [shape: bf16[2,64,128], index: 2, kind: output, shape index: {}]  }
   0x1   :  { %s530_s11 = smov 0  }
   0x2 LB: > { %s24_s12 = sadd.s32 1, %s505_s10  ;;  %p393_p0 = scmp.ge.s32.totalorder %s509_s11, 1  ;;  %s509_s11 = sphi %s530_s11, %s12_s11   ;;  %s505_s10 = sphi %s528_s10, %s574_s10   ;;  %s501_s9 = sphi %s526_s9, %s573_s9  }
   0x3   : > { %p26_p1 = scmp.ge.s32.totalorder %s24_s12, 2  ;;  %p142_p2 = scmp.lt.s32.totalorder %s509_s11, 3 }
   0x5   : > { %s576_s12 = smov (%p26_p1, %s24_s12), 0  ;;  %p143_p3 = pnand %p393_p0, %p142_p2 }
   0x6   : > { %p177_p4 = scmp.lt.s32.totalorder (!%p143_p3), %s501_s9, 1 }
   0x7   : > { %146 = sbr.rel (%p143_p3) target bundleno = 28 (0x1c), region = 28 }
   0xc   : > { %s578_s9 = smov (!%p177_p4, %s501_s9), 1 }
   0xd   : > { %s411_s13 = sshll.u32 %s578_s9, 5  ;;  %s396_s14 = sshll.u32 %s578_s9, 1 }
   0xe   : > { %s184_s17 = scalar_lea.vmem %s570_s0, %s411_s13  ;;  %s189_s20 = scalar_lea.vmem %s571_s1, %s396_s14 }
   0xf   : > { %v422_v0 = vld [vmem:[%s184_s17] sm:$0xff]   ;;  %v457_v4 = vld [vmem:[%s184_s17 + $0x8] sm:$0xff]   ;;  %v458_v5 = vld [vmem:[%s184_s17 + $0x10] sm:$0xff]   ;;  %s198_s23 = scalar_lea.vmem %s572_s2, %s411_s13 }
  0x10   : > { %v399_v1 = vld [vmem:[%s189_s20] ss:$0 sm:$0xff]  ;;  %v423_v2 = vunpack.c.l.bf16 %v422_v0  ;;  %v424_v3 = vunpack.c.h.bf16 %v422_v0  ;;  %v459_v6 = vld [vmem:[%s184_s17 + $0x18] sm:$0xff]   ;;  %v400_v7 = vld [vmem:[%s189_s20 + $0x1] ss:$0 sm:$0xff]  ;;  %v427_v8 = vunpack.c.l.bf16 %v457_v4  ;;  %v428_v9 = vunpack.c.h.bf16 %v457_v4 }
  0x11   : > { %v431_v10 = vunpack.c.l.bf16 %v458_v5  ;;  %v432_v11 = vunpack.c.h.bf16 %v458_v5  ;;  %v435_v14 = vunpack.c.l.bf16 %v459_v6  ;;  %v436_v15 = vunpack.c.h.bf16 %v459_v6 }
  0x12   : > { %v222_v12 = vmul.f32 %v423_v2, %v399_v1  ;;  %v223_v13 = vmul.f32 %v424_v3, %v399_v1  ;;  %v224_v16 = vmul.f32 %v427_v8, %v399_v1  ;;  %v225_v17 = vmul.f32 %v428_v9, %v399_v1 }
  0x13   : > { %v226_v18 = vmul.f32 %v431_v10, %v399_v1  ;;  %v227_v19 = vmul.f32 %v432_v11, %v399_v1  ;;  %v228_v22 = vmul.f32 %v435_v14, %v399_v1  ;;  %v229_v23 = vmul.f32 %v436_v15, %v399_v1 }
  0x14   : > { %v234_v20 = vadd.f32 %v400_v7, %v222_v12  ;;  %v235_v21 = vadd.f32 %v400_v7, %v223_v13  ;;  %v236_v24 = vadd.f32 %v400_v7, %v224_v16  ;;  %v237_v25 = vadd.f32 %v400_v7, %v225_v17 }
  0x15   : > { %v238_v26 = vadd.f32 %v400_v7, %v226_v18  ;;  %v239_v27 = vadd.f32 %v400_v7, %v227_v19  ;;  %v240_v30 = vadd.f32 %v400_v7, %v228_v22  ;;  %v241_v31 = vadd.f32 %v400_v7, %v229_v23 }
  0x16   : > { %v242_v28 = vmax.f32 %v234_v20, 0.0  ;;  %v243_v29 = vmax.f32 %v235_v21, 0.0  ;;  %v244_v32 = vmax.f32 %v236_v24, 0.0  ;;  %v245_v33 = vmax.f32 %v237_v25, 0.0 }
  0x17   : > { %v246_v34 = vmax.f32 %v238_v26, 0.0  ;;  %v247_v35 = vmax.f32 %v239_v27, 0.0  ;;  %v248_v37 = vmax.f32 %v240_v30, 0.0  ;;  %v249_v38 = vmax.f32 %v241_v31, 0.0 }
  0x18   : > { %v440_v36 = vpack.c.bf16 %v243_v29, %v242_v28  ;;  %v445_v39 = vpack.c.bf16 %v245_v33, %v244_v32 }
  0x19   : > { %v450_v40 = vpack.c.bf16 %v247_v35, %v246_v34  ;;  %v455_v41 = vpack.c.bf16 %v249_v38, %v248_v37 }
  0x1a   : > { %441 = vst [vmem:[%s198_s23] sm:$0xff] %v440_v36   ;;  %460 = vst [vmem:[%s198_s23 + $0x8] sm:$0xff] %v445_v39  }
  0x1b   : > { %461 = vst [vmem:[%s198_s23 + $0x10] sm:$0xff] %v450_v40   ;;  %462 = vst [vmem:[%s198_s23 + $0x18] sm:$0xff] %v455_v41  }
  0x1c PF: > { %s12_s11 = sadd.s32 1, %s509_s11   ;;  %s573_s9 = smov %s505_s10 }
  0x1d   : > { %p9_p5 = scmp.ge.s32.totalorder %s12_s11, 4   ;;  %s574_s10 = smov %s576_s12 }
  0x1f   :  { %11 = sbr.rel (!%p9_p5) target bundleno = 2 (0x2), region = 61 }

// kernel: generator_forward.61
= control target key start
LH: loop header
LB: loop body
LE: loop exit
PB: predicated region body
PF: predicated region fallthrough
CT: control target
= control target key end

     0   :  { %s4749_s1 = inlined_call_operand.vmem [shape: bf16[2048,128], index: 1, kind: input, shape index: {}]   ;;  %s4750_s0 = inlined_call_operand.vmem [shape: bf16[128,2048], index: 0, kind: input, shape index: {}]   ;;  %s4751_s2 = inlined_call_operand.vmem [shape: bf16[128,128], index: 2, kind: output, shape index: {}]  }
   0x1   :  { %v3598_v0 = vld [vmem:[%s4749_s1 + $0x78] sm:$0xff]   ;;  %v3602_v4 = vld [vmem:[%s4749_s1 + $0x70] sm:$0xff]   ;;  %v3606_v8 = vld [vmem:[%s4749_s1 + $0x68] sm:$0xff]  }
   0x2   :  { %v3599_v1 = vld [vmem:[%s4749_s1 + $0xf8] sm:$0xff]   ;;  %3086 = vmatprep.subr.bf16.mxu0 %v3598_v0  ;;  %v3603_v5 = vld [vmem:[%s4749_s1 + $0xf0] sm:$0xff]   ;;  %v3607_v9 = vld [vmem:[%s4749_s1 + $0xe8] sm:$0xff]  }
   0x3   :  { %v3600_v2 = vld [vmem:[%s4749_s1 + $0x38] sm:$0xff]   ;;  %3150 = vmatprep.subr.bf16.mxu1 %v3599_v1  ;;  %v3604_v6 = vld [vmem:[%s4749_s1 + $0x30] sm:$0xff]   ;;  %v3608_v10 = vld [vmem:[%s4749_s1 + $0x28] sm:$0xff]  }
   0x4   :  { %v3601_v3 = vld [vmem:[%s4749_s1 + $0xb8] sm:$0xff]   ;;  %3087 = vmatpush3.bf16.msra.mxu0 %v3600_v2  ;;  %v3605_v7 = vld [vmem:[%s4749_s1 + $0xb0] sm:$0xff]   ;;  %v3609_v11 = vld [vmem:[%s4749_s1 + $0xa8] sm:$0xff]  }
   0x5   :  { %3151 = vmatpush3.bf16.msra.mxu1 %v3601_v3  ;;  %3088 = vmatprep.subr.bf16.mxu0 %v3602_v4  ;;  %v3610_v12 = vld [vmem:[%s4749_s1 + $0x60] sm:$0xff]   ;;  %v3614_v16 = vld [vmem:[%s4749_s1 + $0x58] sm:$0xff]   ;;  %v3618_v20 = vld [vmem:[%s4749_s1 + $0x50] sm:$0xff]  }
   0x6   :  { %3152 = vmatprep.subr.bf16.mxu1 %v3603_v5  ;;  %v3611_v13 = vld [vmem:[%s4749_s1 + $0xe0] sm:$0xff]   ;;  %v3615_v17 = vld [vmem:[%s4749_s1 + $0xd8] sm:$0xff]   ;;  %v3619_v21 = vld [vmem:[%s4749_s1 + $0xd0] sm:$0xff]  }
   0x7   :  { %v3612_v14 = vld [vmem:[%s4749_s1 + $0x20] sm:$0xff]   ;;  %v3616_v18 = vld [vmem:[%s4749_s1 + $0x18] sm:$0xff]   ;;  %v3620_v22 = vld [vmem:[%s4749_s1 + $0x10] sm:$0xff]  }
   0x8   :  { %3089 = vmatpush3.bf16.msra.mxu0 %v3604_v6  ;;  %v3613_v15 = vld [vmem:[%s4749_s1 + $0xa0] sm:$0xff]   ;;  %v3617_v19 = vld [vmem:[%s4749_s1 + $0x98] sm:$0xff]   ;;  %v3621_v23 = vld [vmem:[%s4749_s1 + $0x90] sm:$0xff]  }
   0x9   :  { %3153 = vmatpush3.bf16.msra.mxu1 %v3605_v7  ;;  %3090 = vmatprep.subr.bf16.mxu0 %v3606_v8  ;;  %v3622_v24 = vld [vmem:[%s4749_s1 + $0x48] sm:$0xff]   ;;  %v3626_v28 = vld [vmem:[%s4749_s1 + $0x40] sm:$0xff]   ;;  %v3630_v40 = vld [vmem:[%s4749_s1 + $0x178] sm:$0xff]  }
   0xa   :  { %3154 = vmatprep.subr.bf16.mxu1 %v3607_v9  ;;  %v3623_v25 = vld [vmem:[%s4749_s1 + $0xc8] sm:$0xff]   ;;  %v3627_v29 = vld [vmem:[%s4749_s1 + $0xc0] sm:$0xff]   ;;  %v3631_v41 = vld [vmem:[%s4749_s1 + $0x138] sm:$0xff]  }
   0xb   :  { %v3624_v26 = vld [vmem:[%s4749_s1 + $0x8] sm:$0xff]   ;;  %v3628_v30 = vld [vmem:[%s4749_s1] sm:$0xff]   ;;  %v3632_v42 = vld [vmem:[%s4749_s1 + $0x1f8] sm:$0xff]  }
   0xc   :  { %3091 = vmatpush3.bf16.msra.mxu0 %v3608_v10  ;;  %v3625_v27 = vld [vmem:[%s4749_s1 + $0x88] sm:$0xff]   ;;  %v3629_v31 = vld [vmem:[%s4749_s1 + $0x80] sm:$0xff]   ;;  %v3633_v43 = vld [vmem:[%s4749_s1 + $0x1b8] sm:$0xff]  }
   0xd   :  { %3155 = vmatpush3.bf16.msra.mxu1 %v3609_v11  ;;  %3092 = vmatprep.subr.bf16.mxu0 %v3610_v12  ;;  %v48_v32 = vld [vmem:[%s4750_s0] sm:$0xff]  ;;  %v49_v34 = vld [vmem:[%s4750_s0 + $0x8] sm:$0xff]  ;;  %v3634_v50 = vld [vmem:[%s4749_s1 + $0x170] sm:$0xff]  }
   0xe   :  { %3156 = vmatprep.subr.bf16.mxu1 %v3611_v13  ;;  %v56_v33 = vld [vmem:[%s4750_s0 + $0x40] sm:$0xff]  ;;  %v57_v37 = vld [vmem:[%s4750_s0 + $0x48] sm:$0xff]  ;;  %v3635_v52 = vld [vmem:[%s4749_s1 + $0x130] sm:$0xff]  }
   0xf   :  { %v2751_v35 = vcombine.low %v48_v32, %v56_v33  ;;  %v2752_v36 = vcombine.high %v48_v32, %v56_v33  ;;  %v2753_v38 = vcombine.low %v49_v34, %v57_v37  ;;  %v2754_v39 = vcombine.high %v49_v34, %v57_v37  ;;  %v64_v44 = vld [vmem:[%s4750_s0 + $0x80] sm:$0xff]  ;;  %v65_v47 = vld [vmem:[%s4750_s0 + $0x88] sm:$0xff]  ;;  %v3636_v54 = vld [vmem:[%s4749_s1 + $0x1f0] sm:$0xff]  }
  0x10   :  { %3093 = vmatpush3.bf16.msra.mxu0 %v3612_v14  ;;  %v72_v45 = vld [vmem:[%s4750_s0 + $0xc0] sm:$0xff]  ;;  %v73_v48 = vld [vmem:[%s4750_s0 + $0xc8] sm:$0xff]  ;;  %v3637_v55 = vld [vmem:[%s4749_s1 + $0x1b0] sm:$0xff]  }
  0x11   :  { %3157 = vmatpush3.bf16.msra.mxu1 %v3613_v15  ;;  %3094 = vmatprep.subr.bf16.mxu0 %v3614_v16  ;;  %v2768_v46 = vcombine.high %v64_v44, %v72_v45  ;;  %v2770_v49 = vcombine.high %v65_v47, %v73_v48  ;;  %v2767_v51 = vcombine.low %v64_v44, %v72_v45  ;;  %v80_v56 = vld [vmem:[%s4750_s0 + $0x100] sm:$0xff]  ;;  %v81_v58 = vld [vmem:[%s4750_s0 + $0x108] sm:$0xff]  ;;  %v3652_v32 = vld [vmem:[%s4749_s1 + $0x1d0] sm:$0xff]  }
  0x12   :  { %3158 = vmatprep.subr.bf16.mxu1 %v3615_v17  ;;  %1872 = vmatprep.mubr.bf16.mxu0 %v2752_v36  ;;  %v2769_v53 = vcombine.low %v65_v47, %v73_v48  ;;  %v88_v57 = vld [vmem:[%s4750_s0 + $0x140] sm:$0xff]  ;;  %v89_v59 = vld [vmem:[%s4750_s0 + $0x148] sm:$0xff]  ;;  %v3653_v33 = vld [vmem:[%s4749_s1 + $0x190] sm:$0xff]  }
  0x13   :  { %1969 = vmatprep.mubr.bf16.mxu1 %v2754_v39  ;;  %v2784_v60 = vcombine.high %v80_v56, %v88_v57  ;;  %v2786_v61 = vcombine.high %v81_v58, %v89_v59  ;;  %v3638_v62 = vld [vmem:[%s4749_s1 + $0x168] sm:$0xff]   ;;  %v2783_v2 = vcombine.low %v80_v56, %v88_v57  ;;  %v96_v3 = vld [vmem:[%s4750_s0 + $0x180] sm:$0xff]  ;;  %v2785_v6 = vcombine.low %v81_v58, %v89_v59  ;;  %v3662_v56 = vld [vmem:[%s4749_s1 + $0x278] sm:$0xff]  }
  0x14   :  { %3095 = vmatpush3.bf16.msra.mxu0 %v3616_v18  ;;  %v3639_v63 = vld [vmem:[%s4749_s1 + $0x128] sm:$0xff]   ;;  %v104_v4 = vld [vmem:[%s4750_s0 + $0x1c0] sm:$0xff]  ;;  %v3646_v18 = vld [vmem:[%s4749_s1 + $0x158] sm:$0xff]  }
  0x15   :  { %3159 = vmatpush3.bf16.msra.mxu1 %v3617_v19  ;;  %3096 = vmatprep.subr.bf16.mxu0 %v3618_v20  ;;  %v3640_v0 = vld [vmem:[%s4749_s1 + $0x1e8] sm:$0xff]   ;;  %v2800_v7 = vcombine.high %v96_v3, %v104_v4  ;;  %v3642_v10 = vld [vmem:[%s4749_s1 + $0x160] sm:$0xff]   ;;  %v2799_v19 = vcombine.low %v96_v3, %v104_v4  ;;  %v3647_v20 = vld [vmem:[%s4749_s1 + $0x118] sm:$0xff]  }
  0x16   :  { %3160 = vmatprep.subr.bf16.mxu1 %v3619_v21  ;;  %v3641_v1 = vld [vmem:[%s4749_s1 + $0x1a8] sm:$0xff]   ;;  %v3643_v11 = vld [vmem:[%s4749_s1 + $0x120] sm:$0xff]   ;;  %v3664_v58 = vld [vmem:[%s4749_s1 + $0x2f8] sm:$0xff]  }
  0x17   :  { %v97_v5 = vld [vmem:[%s4750_s0 + $0x188] sm:$0xff]  ;;  %v3644_v12 = vld [vmem:[%s4749_s1 + $0x1e0] sm:$0xff]   ;;  %v59_v3 = vld [vmem:[%s4750_s0 + $0x58] sm:$0xff] }
  0x18   :  { %3097 = vmatpush3.bf16.msra.mxu0 %v3620_v22  ;;  %v105_v8 = vld [vmem:[%s4750_s0 + $0x1c8] sm:$0xff]  ;;  %v3645_v13 = vld [vmem:[%s4749_s1 + $0x1a0] sm:$0xff]  }
  0x19   :  { %3161 = vmatpush3.bf16.msra.mxu1 %v3621_v23  ;;  %3098 = vmatprep.subr.bf16.mxu0 %v3622_v24  ;;  %v2802_v9 = vcombine.high %v97_v5, %v105_v8  ;;  %v112_v14 = vld [vmem:[%s4750_s0 + $0x200] sm:$0xff]  ;;  %v113_v16 = vld [vmem:[%s4750_s0 + $0x208] sm:$0xff]  ;;  %v2801_v21 = vcombine.low %v97_v5, %v105_v8  ;;  %v3648_v23 = vld [vmem:[%s4749_s1 + $0x1d8] sm:$0xff]  }
  0x1a   :  { %3162 = vmatprep.subr.bf16.mxu1 %v3623_v25  ;;  %v120_v15 = vld [vmem:[%s4750_s0 + $0x240] sm:$0xff]  ;;  %v121_v17 = vld [vmem:[%s4750_s0 + $0x248] sm:$0xff]  ;;  %v3649_v25 = vld [vmem:[%s4749_s1 + $0x198] sm:$0xff]  }
  0x1b   :  { %v2816_v22 = vcombine.high %v112_v14, %v120_v15  ;;  %v2818_v24 = vcombine.high %v113_v16, %v121_v17  ;;  %v2815_v34 = vcombine.low %v112_v14, %v120_v15  ;;  %v3655_v39 = vld [vmem:[%s4749_s1 + $0x108] sm:$0xff]   ;;  %v3659_v48 = vld [vmem:[%s4749_s1 + $0x100] sm:$0xff]   ;;  %v66_v8 = vld [vmem:[%s4750_s0 + $0x90] sm:$0xff] }
  0x1c   :  { %3099 = vmatpush3.bf16.msra.mxu0 %v3624_v26  ;;  %v128_v26 = vld [vmem:[%s4750_s0 + $0x280] sm:$0xff]  ;;  %v145_v44 = vld [vmem:[%s4750_s0 + $0x308] sm:$0xff]  ;;  %v3665_v15 = vld [vmem:[%s4749_s1 + $0x2b8] sm:$0xff]  }
  0x1d   :  { %3163 = vmatpush3.bf16.msra.mxu1 %v3625_v27  ;;  %3100 = vmatprep.subr.bf16.mxu0 %v3626_v28  ;;  %v136_v27 = vld [vmem:[%s4750_s0 + $0x2c0] sm:$0xff]  ;;  %v3650_v28 = vld [vmem:[%s4749_s1 + $0x150] sm:$0xff]   ;;  %v153_v45 = vld [vmem:[%s4750_s0 + $0x348] sm:$0xff] }
  0x1e   :  { %3164 = vmatprep.subr.bf16.mxu1 %v3627_v29  ;;  %v129_v29 = vld [vmem:[%s4750_s0 + $0x288] sm:$0xff]  ;;  %v2832_v36 = vcombine.high %v128_v26, %v136_v27  ;;  %v2831_v47 = vcombine.low %v128_v26, %v136_v27 }
  0x1f   :  { %v161_v57 = vld [vmem:[%s4750_s0 + $0x388] sm:$0xff] }
  0x20   :  { %3101 = vmatpush3.bf16.msra.mxu0 %v3628_v30  ;;  %v137_v30 = vld [vmem:[%s4750_s0 + $0x2c8] sm:$0xff] }
  0x21   :  { %3165 = vmatpush3.bf16.msra.mxu1 %v3629_v31  ;;  %3214 = vmatprep.subr.bf16.mxu0 %v3630_v40  ;;  %v3651_v31 = vld [vmem:[%s4749_s1 + $0x110] sm:$0xff]   ;;  %v2834_v37 = vcombine.high %v129_v29, %v137_v30  ;;  %v3656_v40 = vld [vmem:[%s4749_s1 + $0x1c8] sm:$0xff]  }
  0x22   :  { %3278 = vmatprep.subr.bf16.mxu1 %v3632_v42  ;;  %v152_v42 = vld [vmem:[%s4750_s0 + $0x340] sm:$0xff]  ;;  %v169_v59 = vld [vmem:[%s4750_s0 + $0x3c8] sm:$0xff] }
  0x23   :  { %1873 = vmatmul.mubr.bf16.vlgmr.msra.gmra.mxu0 %v2751_v35  ;;  %v2817_v35 = vcombine.low %v113_v16, %v121_v17  ;;  %v2865_v5 = vcombine.low %v161_v57, %v169_v59  ;;  %v3666_v17 = vld [vmem:[%s4749_s1 + $0x270] sm:$0xff]   ;;  %v3670_v26 = vld [vmem:[%s4749_s1 + $0x268] sm:$0xff]  }
  0x24   :  { %1970 = vmatmul.mubr.bf16.vlgmr.msra.gmra.mxu1 %v2753_v38  ;;  %3215 = vmatpush3.bf16.msra.mxu0 %v3631_v41  ;;  %v3654_v38 = vld [vmem:[%s4749_s1 + $0x148] sm:$0xff]   ;;  %v144_v41 = vld [vmem:[%s4750_s0 + $0x300] sm:$0xff] }
  0x25   :  { %3279 = vmatpush3.bf16.msra.mxu1 %v3633_v43  ;;  %1880 = vmatprep.mubr.bf16.mxu0 %v2768_v46  ;;  %v3657_v43 = vld [vmem:[%s4749_s1 + $0x188] sm:$0xff]   ;;  %v3658_v46 = vld [vmem:[%s4749_s1 + $0x140] sm:$0xff]  }
  0x26   :  { %1977 = vmatprep.mubr.bf16.mxu1 %v2770_v49  ;;  %3216 = vmatprep.subr.bf16.mxu0 %v3634_v50  ;;  %v2833_v49 = vcombine.low %v129_v29, %v137_v30  ;;  %v2848_v50 = vcombine.high %v144_v41, %v152_v42  ;;  %v3672_v27 = vld [vmem:[%s4749_s1 + $0x2e8] sm:$0xff]  }
  0x27   :  { %3280 = vmatprep.subr.bf16.mxu1 %v3636_v54  ;;  %v160_v54 = vld [vmem:[%s4750_s0 + $0x380] sm:$0xff] }
  0x28   :  { %3217 = vmatpush3.bf16.msra.mxu0 %v3635_v52  ;;  %v2850_v52 = vcombine.high %v145_v44, %v153_v45 }
  0x29   :  { %3281 = vmatpush3.bf16.msra.mxu1 %v3637_v55  ;;  %3218 = vmatprep.subr.bf16.mxu0 %v3638_v62  ;;  %v168_v55 = vld [vmem:[%s4750_s0 + $0x3c0] sm:$0xff] }
  0x2a   :  { %3282 = vmatprep.subr.bf16.mxu1 %v3640_v0  ;;  %v2864_v62 = vcombine.high %v160_v54, %v168_v55  ;;  %v50_v0 = vld [vmem:[%s4750_s0 + $0x10] sm:$0xff]  ;;  %v2863_v4 = vcombine.low %v160_v54, %v168_v55  ;;  %v115_v54 = vld [vmem:[%s4750_s0 + $0x218] sm:$0xff] }
  0x2b   :  { %1881 = vmatmul.mubr.bf16.gmra.mxu0 %v2767_v51  ;;  %v3660_v51 = vld [vmem:[%s4749_s1 + $0x1c0] sm:$0xff]   ;;  %v123_v55 = vld [vmem:[%s4750_s0 + $0x258] sm:$0xff] }
  0x2c   :  { %1978 = vmatmul.mubr.bf16.gmra.mxu1 %v2769_v53  ;;  %1888 = vmatprep.mubr.bf16.mxu0 %v2784_v60  ;;  %v3661_v53 = vld [vmem:[%s4749_s1 + $0x180] sm:$0xff]   ;;  %v2847_v60 = vcombine.low %v144_v41, %v152_v42  ;;  %v3678_v42 = vld [vmem:[%s4749_s1 + $0x258] sm:$0xff]  }
  0x2d   :  { %1985 = vmatprep.mubr.bf16.mxu1 %v2786_v61  ;;  %3219 = vmatpush3.bf16.msra.mxu0 %v3639_v63  ;;  %v2849_v61 = vcombine.low %v145_v44, %v153_v45  ;;  %v2866_v63 = vcombine.high %v161_v57, %v169_v59  ;;  %v3677_v41 = vld [vmem:[%s4749_s1 + $0x2a0] sm:$0xff]   ;;  %v3680_v44 = vld [vmem:[%s4749_s1 + $0x2d8] sm:$0xff]   ;;  %v3685_v57 = vld [vmem:[%s4749_s1 + $0x290] sm:$0xff]  }
  0x2e   :  { %3283 = vmatpush3.bf16.msra.mxu1 %v3641_v1  ;;  %3220 = vmatprep.subr.bf16.mxu0 %v3642_v10  ;;  %v58_v1 = vld [vmem:[%s4750_s0 + $0x50] sm:$0xff] }
  0x2f   :  { %3284 = vmatprep.subr.bf16.mxu1 %v3644_v12  ;;  %v2755_v10 = vcombine.low %v50_v0, %v58_v1  ;;  %v67_v12 = vld [vmem:[%s4750_s0 + $0x98] sm:$0xff] }
  0x31   :  { %3221 = vmatpush3.bf16.msra.mxu0 %v3643_v11  ;;  %v3663_v11 = vld [vmem:[%s4749_s1 + $0x238] sm:$0xff]  }
  0x32   :  { %3285 = vmatpush3.bf16.msra.mxu1 %v3645_v13  ;;  %3222 = vmatprep.subr.bf16.mxu0 %v3646_v18  ;;  %v75_v13 = vld [vmem:[%s4750_s0 + $0xd8] sm:$0xff] }
  0x33   :  { %1889 = vmatmul.mubr.bf16.gmra.mxu0 %v2783_v2  ;;  %3286 = vmatprep.subr.bf16.mxu1 %v3648_v23  ;;  %v51_v2 = vld [vmem:[%s4750_s0 + $0x18] sm:$0xff]  ;;  %v2774_v18 = vcombine.high %v67_v12, %v75_v13  ;;  %v90_v23 = vld [vmem:[%s4750_s0 + $0x150] sm:$0xff]  ;;  %v2773_v29 = vcombine.low %v67_v12, %v75_v13  ;;  %v2821_v13 = vcombine.low %v115_v54, %v123_v55 }
  0x34   :  { %1986 = vmatmul.mubr.bf16.gmra.mxu1 %v2785_v6  ;;  %1896 = vmatprep.mubr.bf16.mxu0 %v2800_v7  ;;  %v2756_v6 = vcombine.high %v50_v0, %v58_v1  ;;  %v2758_v7 = vcombine.high %v51_v2, %v59_v3  ;;  %v2757_v14 = vcombine.low %v51_v2, %v59_v3  ;;  %v3687_v0 = vld [vmem:[%s4749_s1 + $0x208] sm:$0xff]   ;;  %v3690_v2 = vld [vmem:[%s4749_s1 + $0x240] sm:$0xff]   ;;  %v130_v3 = vld [vmem:[%s4750_s0 + $0x290] sm:$0xff] }
  0x35   :  { %1993 = vmatprep.mubr.bf16.mxu1 %v2802_v9  ;;  %3223 = vmatpush3.bf16.msra.mxu0 %v3647_v20  ;;  %v74_v9 = vld [vmem:[%s4750_s0 + $0xd0] sm:$0xff]  ;;  %v3689_v1 = vld [vmem:[%s4749_s1 + $0x288] sm:$0xff]   ;;  %v3696_v12 = vld [vmem:[%s4749_s1 + $0x3f8] sm:$0xff]  }
  0x36   :  { %3287 = vmatpush3.bf16.msra.mxu1 %v3649_v25  ;;  %3224 = vmatprep.subr.bf16.mxu0 %v3650_v28  ;;  %v2772_v16 = vcombine.high %v66_v8, %v74_v9  ;;  %v3668_v20 = vld [vmem:[%s4749_s1 + $0x2f0] sm:$0xff]   ;;  %v91_v25 = vld [vmem:[%s4750_s0 + $0x158] sm:$0xff]  ;;  %v2771_v28 = vcombine.low %v66_v8, %v74_v9  ;;  %v3691_v8 = vld [vmem:[%s4749_s1 + $0x200] sm:$0xff]  }
  0x37   :  { %3288 = vmatprep.subr.bf16.mxu1 %v3652_v32  ;;  %v3671_v32 = vld [vmem:[%s4749_s1 + $0x228] sm:$0xff]   ;;  %v3693_v9 = vld [vmem:[%s4749_s1 + $0x280] sm:$0xff]  }
  0x39   :  { %3225 = vmatpush3.bf16.msra.mxu0 %v3651_v31 }
  0x3a   :  { %3289 = vmatpush3.bf16.msra.mxu1 %v3653_v33  ;;  %3226 = vmatprep.subr.bf16.mxu0 %v3654_v38  ;;  %v3673_v33 = vld [vmem:[%s4749_s1 + $0x2a8] sm:$0xff]   ;;  %v99_v38 = vld [vmem:[%s4750_s0 + $0x198] sm:$0xff] }
  0x3b   :  { %1897 = vmatmul.mubr.bf16.gmra.mxu0 %v2799_v19  ;;  %3290 = vmatprep.subr.bf16.mxu1 %v3656_v40  ;;  %v3667_v19 = vld [vmem:[%s4749_s1 + $0x230] sm:$0xff]   ;;  %v3675_v40 = vld [vmem:[%s4749_s1 + $0x220] sm:$0xff]  }
  0x3c   :  { %1994 = vmatmul.mubr.bf16.gmra.mxu1 %v2801_v21  ;;  %1904 = vmatprep.mubr.bf16.mxu0 %v2816_v22  ;;  %v3669_v21 = vld [vmem:[%s4749_s1 + $0x2b0] sm:$0xff]  }
  0x3d   :  { %2001 = vmatprep.mubr.bf16.mxu1 %v2818_v24  ;;  %3227 = vmatpush3.bf16.msra.mxu0 %v3655_v39  ;;  %v82_v22 = vld [vmem:[%s4750_s0 + $0x110] sm:$0xff]  ;;  %v83_v24 = vld [vmem:[%s4750_s0 + $0x118] sm:$0xff] }
  0x3e   :  { %3291 = vmatpush3.bf16.msra.mxu1 %v3657_v43  ;;  %3228 = vmatprep.subr.bf16.mxu0 %v3658_v46  ;;  %v2788_v30 = vcombine.high %v82_v22, %v90_v23  ;;  %v2790_v31 = vcombine.high %v83_v24, %v91_v25  ;;  %v107_v39 = vld [vmem:[%s4750_s0 + $0x1d8] sm:$0xff]  ;;  %v2787_v43 = vcombine.low %v82_v22, %v90_v23 }
  0x3f   :  { %3292 = vmatprep.subr.bf16.mxu1 %v3660_v51  ;;  %v2789_v45 = vcombine.low %v83_v24, %v91_v25  ;;  %v114_v51 = vld [vmem:[%s4750_s0 + $0x210] sm:$0xff] }
  0x40   :  { %v162_v24 = vld [vmem:[%s4750_s0 + $0x390] sm:$0xff] }
  0x41   :  { %3229 = vmatpush3.bf16.msra.mxu0 %v3659_v48  ;;  %v2806_v48 = vcombine.high %v99_v38, %v107_v39  ;;  %v170_v25 = vld [vmem:[%s4750_s0 + $0x3d0] sm:$0xff] }
  0x42   :  { %3293 = vmatpush3.bf16.msra.mxu1 %v3661_v53  ;;  %3342 = vmatprep.subr.bf16.mxu0 %v3662_v56  ;;  %v122_v53 = vld [vmem:[%s4750_s0 + $0x250] sm:$0xff] }
  0x43   :  { %1905 = vmatmul.mubr.bf16.gmra.mxu0 %v2815_v34  ;;  %3406 = vmatprep.subr.bf16.mxu1 %v3664_v58  ;;  %v3674_v34 = vld [vmem:[%s4749_s1 + $0x260] sm:$0xff]   ;;  %v3683_v56 = vld [vmem:[%s4749_s1 + $0x210] sm:$0xff]   ;;  %v3686_v58 = vld [vmem:[%s4749_s1 + $0x248] sm:$0xff]  }
  0x44   :  { %2002 = vmatmul.mubr.bf16.gmra.mxu1 %v2817_v35  ;;  %1912 = vmatprep.mubr.bf16.mxu0 %v2832_v36  ;;  %v98_v35 = vld [vmem:[%s4750_s0 + $0x190] sm:$0xff] }
  0x45   :  { %2009 = vmatprep.mubr.bf16.mxu1 %v2834_v37  ;;  %v106_v36 = vld [vmem:[%s4750_s0 + $0x1d0] sm:$0xff]  ;;  %v3676_v37 = vld [vmem:[%s4749_s1 + $0x2e0] sm:$0xff]  }
  0x46   :  { %v2804_v46 = vcombine.high %v98_v35, %v106_v36  ;;  %v2803_v59 = vcombine.low %v98_v35, %v106_v36  ;;  %v61_v35 = vld [vmem:[%s4750_s0 + $0x68] sm:$0xff]  ;;  %v2867_v36 = vcombine.low %v162_v24, %v170_v25 }
  0x4b   :  { %1913 = vmatmul.mubr.bf16.gmra.mxu0 %v2831_v47  ;;  %v3679_v47 = vld [vmem:[%s4749_s1 + $0x218] sm:$0xff]  }
  0x4c   :  { %2010 = vmatmul.mubr.bf16.gmra.mxu1 %v2833_v49  ;;  %1920 = vmatprep.mubr.bf16.mxu0 %v2848_v50  ;;  %v3681_v49 = vld [vmem:[%s4749_s1 + $0x298] sm:$0xff]   ;;  %v3682_v50 = vld [vmem:[%s4749_s1 + $0x250] sm:$0xff]  }
  0x4d   :  { %2017 = vmatprep.mubr.bf16.mxu1 %v2850_v52  ;;  %v3684_v52 = vld [vmem:[%s4749_s1 + $0x2d0] sm:$0xff]  }
  0x53   :  { %1921 = vmatmul.mubr.bf16.gmra.mxu0 %v2847_v60  ;;  %v3688_v60 = vld [vmem:[%s4749_s1 + $0x2c8] sm:$0xff]  }
  0x54   :  { %2018 = vmatmul.mubr.bf16.gmra.mxu1 %v2849_v61  ;;  %1928 = vmatprep.mubr.bf16.mxu0 %v2864_v62  ;;  %v2805_v61 = vcombine.low %v99_v38, %v107_v39  ;;  %v2820_v62 = vcombine.high %v114_v51, %v122_v53 }
  0x55   :  { %2025 = vmatprep.mubr.bf16.mxu1 %v2866_v63  ;;  %v2822_v63 = vcombine.high %v115_v54, %v123_v55  ;;  %v84_v54 = vld [vmem:[%s4750_s0 + $0x120] sm:$0xff] }
  0x56   :  { %v92_v55 = vld [vmem:[%s4750_s0 + $0x160] sm:$0xff] }
  0x5b   :  { %1929 = vmatmul.mubr.bf16.gmra.mxu0 %v2863_v4  ;;  %v138_v4 = vld [vmem:[%s4750_s0 + $0x2d0] sm:$0xff] }
  0x5c   :  { %2026 = vmatmul.mubr.bf16.gmra.mxu1 %v2865_v5  ;;  %2066 = vmatprep.mubr.bf16.mxu0 %v2756_v6  ;;  %v3692_v5 = vld [vmem:[%s4749_s1 + $0x2c0] sm:$0xff]   ;;  %v131_v6 = vld [vmem:[%s4750_s0 + $0x298] sm:$0xff] }
  0x5d   :  { %2163 = vmatprep.mubr.bf16.mxu1 %v2758_v7  ;;  %v139_v7 = vld [vmem:[%s4750_s0 + $0x2d8] sm:$0xff] }
  0x63   :  { %2067 = vmatmul.mubr.bf16.vlgmr.msra.gmra.mxu0 %v2755_v10  ;;  %v3694_v10 = vld [vmem:[%s4749_s1 + $0x378] sm:$0xff]  }
  0x64   :  { %2164 = vmatmul.mubr.bf16.vlgmr.msra.gmra.mxu1 %v2757_v14  ;;  %3343 = vmatpush3.bf16.msra.mxu0 %v3663_v11  ;;  %v2819_v11 = vcombine.low %v114_v51, %v122_v53  ;;  %v2836_v14 = vcombine.high %v130_v3, %v138_v4  ;;  %v3700_v51 = vld [vmem:[%s4749_s1 + $0x3f0] sm:$0xff]  }
  0x65   :  { %3407 = vmatpush3.bf16.msra.mxu1 %v3665_v15  ;;  %2074 = vmatprep.mubr.bf16.mxu0 %v2772_v16  ;;  %v2838_v15 = vcombine.high %v131_v6, %v139_v7  ;;  %v146_v16 = vld [vmem:[%s4750_s0 + $0x310] sm:$0xff] }
  0x66   :  { %2171 = vmatprep.mubr.bf16.mxu1 %v2774_v18  ;;  %3344 = vmatprep.subr.bf16.mxu0 %v3666_v17  ;;  %v154_v17 = vld [vmem:[%s4750_s0 + $0x350] sm:$0xff]  ;;  %v147_v18 = vld [vmem:[%s4750_s0 + $0x318] sm:$0xff] }
  0x67   :  { %3408 = vmatprep.subr.bf16.mxu1 %v3668_v20  ;;  %v2835_v20 = vcombine.low %v130_v3, %v138_v4  ;;  %v2852_v22 = vcombine.high %v146_v16, %v154_v17  ;;  %v3701_v53 = vld [vmem:[%s4749_s1 + $0x3b0] sm:$0xff]   ;;  %v3708_v3 = vld [vmem:[%s4749_s1 + $0x3e0] sm:$0xff]  }
  0x68   :  { %3345 = vmatpush3.bf16.msra.mxu0 %v3667_v19  ;;  %v155_v19 = vld [vmem:[%s4750_s0 + $0x358] sm:$0xff]  ;;  %v100_v4 = vld [vmem:[%s4750_s0 + $0x1a0] sm:$0xff] }
  0x69   :  { %3409 = vmatpush3.bf16.msra.mxu1 %v3669_v21  ;;  %3346 = vmatprep.subr.bf16.mxu0 %v3670_v26  ;;  %v2837_v21 = vcombine.low %v131_v6, %v139_v7  ;;  %v2854_v23 = vcombine.high %v147_v18, %v155_v19  ;;  %v163_v26 = vld [vmem:[%s4750_s0 + $0x398] sm:$0xff]  ;;  %v101_v6 = vld [vmem:[%s4750_s0 + $0x1a8] sm:$0xff]  ;;  %v3707_v7 = vld [vmem:[%s4749_s1 + $0x320] sm:$0xff]  }
  0x6a   :  { %3410 = vmatprep.subr.bf16.mxu1 %v3672_v27  ;;  %v171_v27 = vld [vmem:[%s4750_s0 + $0x3d8] sm:$0xff] }
  0x6b   :  { %2075 = vmatmul.mubr.bf16.gmra.mxu0 %v2771_v28  ;;  %v2851_v28 = vcombine.low %v146_v16, %v154_v17  ;;  %v3711_v16 = vld [vmem:[%s4749_s1 + $0x318] sm:$0xff]  }
  0x6c   :  { %2172 = vmatmul.mubr.bf16.gmra.mxu1 %v2773_v29  ;;  %2082 = vmatprep.mubr.bf16.mxu0 %v2788_v30  ;;  %v2853_v29 = vcombine.low %v147_v18, %v155_v19  ;;  %v2868_v30 = vcombine.high %v162_v24, %v170_v25  ;;  %v3713_v17 = vld [vmem:[%s4749_s1 + $0x398] sm:$0xff]   ;;  %v3714_v18 = vld [vmem:[%s4749_s1 + $0x350] sm:$0xff]   ;;  %v125_v24 = vld [vmem:[%s4750_s0 + $0x268] sm:$0xff] }
  0x6d   :  { %2179 = vmatprep.mubr.bf16.mxu1 %v2790_v31  ;;  %3347 = vmatpush3.bf16.msra.mxu0 %v3671_v32  ;;  %v2870_v31 = vcombine.high %v163_v26, %v171_v27  ;;  %v52_v32 = vld [vmem:[%s4750_s0 + $0x20] sm:$0xff]  ;;  %v3716_v19 = vld [vmem:[%s4749_s1 + $0x3d0] sm:$0xff]  }
  0x6e   :  { %3411 = vmatpush3.bf16.msra.mxu1 %v3673_v33  ;;  %3348 = vmatprep.subr.bf16.mxu0 %v3674_v34  ;;  %v60_v33 = vld [vmem:[%s4750_s0 + $0x60] sm:$0xff]  ;;  %v53_v34 = vld [vmem:[%s4750_s0 + $0x28] sm:$0xff]  ;;  %v3717_v25 = vld [vmem:[%s4749_s1 + $0x390] sm:$0xff]  }
  0x6f   :  { %3412 = vmatprep.subr.bf16.mxu1 %v3676_v37  ;;  %v2869_v37 = vcombine.low %v163_v26, %v171_v27  ;;  %v2760_v38 = vcombine.high %v52_v32, %v60_v33  ;;  %v2762_v39 = vcombine.high %v53_v34, %v61_v35  ;;  %v3718_v26 = vld [vmem:[%s4749_s1 + $0x348] sm:$0xff]  }
  0x71   :  { %3349 = vmatpush3.bf16.msra.mxu0 %v3675_v40  ;;  %v68_v40 = vld [vmem:[%s4750_s0 + $0xa0] sm:$0xff] }
  0x72   :  { %3413 = vmatpush3.bf16.msra.mxu1 %v3677_v41  ;;  %3350 = vmatprep.subr.bf16.mxu0 %v3678_v42  ;;  %v76_v41 = vld [vmem:[%s4750_s0 + $0xe0] sm:$0xff]  ;;  %v2759_v42 = vcombine.low %v52_v32, %v60_v33  ;;  %v3719_v32 = vld [vmem:[%s4749_s1 + $0x308] sm:$0xff]  }
  0x73   :  { %2083 = vmatmul.mubr.bf16.gmra.mxu0 %v2787_v43  ;;  %3414 = vmatprep.subr.bf16.mxu1 %v3680_v44  ;;  %v69_v43 = vld [vmem:[%s4750_s0 + $0xa8] sm:$0xff] }
  0x74   :  { %2180 = vmatmul.mubr.bf16.gmra.mxu1 %v2789_v45  ;;  %2090 = vmatprep.mubr.bf16.mxu0 %v2804_v46  ;;  %v77_v44 = vld [vmem:[%s4750_s0 + $0xe8] sm:$0xff]  ;;  %v2761_v45 = vcombine.low %v53_v34, %v61_v35  ;;  %v3695_v46 = vld [vmem:[%s4749_s1 + $0x338] sm:$0xff]   ;;  %v3722_v34 = vld [vmem:[%s4749_s1 + $0x340] sm:$0xff]  }
  0x75   :  { %2187 = vmatprep.mubr.bf16.mxu1 %v2806_v48  ;;  %3351 = vmatpush3.bf16.msra.mxu0 %v3679_v47  ;;  %v3697_v47 = vld [vmem:[%s4749_s1 + $0x3b8] sm:$0xff]   ;;  %v2776_v48 = vcombine.high %v68_v40, %v76_v41  ;;  %v3721_v33 = vld [vmem:[%s4749_s1 + $0x388] sm:$0xff]   ;;  %v3724_v35 = vld [vmem:[%s4749_s1 + $0x3c0] sm:$0xff]  }
  0x76   :  { %3415 = vmatpush3.bf16.msra.mxu1 %v3681_v49  ;;  %3352 = vmatprep.subr.bf16.mxu0 %v3682_v50  ;;  %v2778_v49 = vcombine.high %v69_v43, %v77_v44  ;;  %v3698_v50 = vld [vmem:[%s4749_s1 + $0x370] sm:$0xff]  }
  0x77   :  { %3416 = vmatprep.subr.bf16.mxu1 %v3684_v52  ;;  %v3699_v52 = vld [vmem:[%s4749_s1 + $0x330] sm:$0xff]  }
  0x79   :  { %3353 = vmatpush3.bf16.msra.mxu0 %v3683_v56  ;;  %v3702_v56 = vld [vmem:[%s4749_s1 + $0x368] sm:$0xff]  }
  0x7a   :  { %3417 = vmatpush3.bf16.msra.mxu1 %v3685_v57  ;;  %3354 = vmatprep.subr.bf16.mxu0 %v3686_v58  ;;  %v85_v57 = vld [vmem:[%s4750_s0 + $0x128] sm:$0xff] }
  0x7b   :  { %2091 = vmatmul.mubr.bf16.gmra.mxu0 %v2803_v59  ;;  %3418 = vmatprep.subr.bf16.mxu1 %v3688_v60  ;;  %v93_v58 = vld [vmem:[%s4750_s0 + $0x168] sm:$0xff]  ;;  %v2775_v60 = vcombine.low %v68_v40, %v76_v41  ;;  %v3725_v41 = vld [vmem:[%s4749_s1 + $0x380] sm:$0xff]  }
  0x7c   :  { %2188 = vmatmul.mubr.bf16.gmra.mxu1 %v2805_v61  ;;  %2098 = vmatprep.mubr.bf16.mxu0 %v2820_v62  ;;  %v3704_v59 = vld [vmem:[%s4749_s1 + $0x3e8] sm:$0xff]   ;;  %v2777_v61 = vcombine.low %v69_v43, %v77_v44  ;;  %v2792_v62 = vcombine.high %v84_v54, %v92_v55 }
  0x7d   :  { %2195 = vmatprep.mubr.bf16.mxu1 %v2822_v63  ;;  %3355 = vmatpush3.bf16.msra.mxu0 %v3687_v0  ;;  %v2794_v63 = vcombine.high %v85_v57, %v93_v58  ;;  %v3703_v0 = vld [vmem:[%s4749_s1 + $0x328] sm:$0xff]  }
  0x7e   :  { %3419 = vmatpush3.bf16.msra.mxu1 %v3689_v1  ;;  %3356 = vmatprep.subr.bf16.mxu0 %v3690_v2  ;;  %v3705_v1 = vld [vmem:[%s4749_s1 + $0x3a8] sm:$0xff]   ;;  %v3706_v2 = vld [vmem:[%s4749_s1 + $0x360] sm:$0xff]  }
  0x7f   :  { %3420 = vmatprep.subr.bf16.mxu1 %v3692_v5  ;;  %v108_v5 = vld [vmem:[%s4750_s0 + $0x1e0] sm:$0xff]  ;;  %v141_v40 = vld [vmem:[%s4750_s0 + $0x2e8] sm:$0xff] }
  0x80   :  { %v2807_v27 = vcombine.low %v100_v4, %v108_v5 }
  0x81   :  { %3357 = vmatpush3.bf16.msra.mxu0 %v3691_v8  ;;  %v109_v8 = vld [vmem:[%s4750_s0 + $0x1e8] sm:$0xff] }
  0x82   :  { %3421 = vmatpush3.bf16.msra.mxu1 %v3693_v9  ;;  %3470 = vmatprep.subr.bf16.mxu0 %v3694_v10  ;;  %v3709_v9 = vld [vmem:[%s4749_s1 + $0x3a0] sm:$0xff]   ;;  %v3710_v10 = vld [vmem:[%s4749_s1 + $0x358] sm:$0xff]  }
  0x83   :  { %2099 = vmatmul.mubr.bf16.gmra.mxu0 %v2819_v11  ;;  %3534 = vmatprep.subr.bf16.mxu1 %v3696_v12  ;;  %v2791_v11 = vcombine.low %v84_v54, %v92_v55  ;;  %v3712_v12 = vld [vmem:[%s4749_s1 + $0x3d8] sm:$0xff]   ;;  %v164_v54 = vld [vmem:[%s4750_s0 + $0x3a0] sm:$0xff] }
  0x84   :  { %2196 = vmatmul.mubr.bf16.gmra.mxu1 %v2821_v13  ;;  %2106 = vmatprep.mubr.bf16.mxu0 %v2836_v14  ;;  %v2793_v13 = vcombine.low %v85_v57, %v93_v58  ;;  %v2808_v14 = vcombine.high %v100_v4, %v108_v5  ;;  %v172_v55 = vld [vmem:[%s4750_s0 + $0x3e0] sm:$0xff]  ;;  %v173_v57 = vld [vmem:[%s4750_s0 + $0x3e8] sm:$0xff] }
  0x85   :  { %2203 = vmatprep.mubr.bf16.mxu1 %v2838_v15  ;;  %v2810_v15 = vcombine.high %v101_v6, %v109_v8 }
  0x8b   :  { %2107 = vmatmul.mubr.bf16.gmra.mxu0 %v2835_v20  ;;  %v116_v20 = vld [vmem:[%s4750_s0 + $0x220] sm:$0xff] }
  0x8c   :  { %2204 = vmatmul.mubr.bf16.gmra.mxu1 %v2837_v21  ;;  %2114 = vmatprep.mubr.bf16.mxu0 %v2852_v22  ;;  %v124_v21 = vld [vmem:[%s4750_s0 + $0x260] sm:$0xff]  ;;  %v117_v22 = vld [vmem:[%s4750_s0 + $0x228] sm:$0xff] }
  0x8d   :  { %2211 = vmatprep.mubr.bf16.mxu1 %v2854_v23  ;;  %v3715_v23 = vld [vmem:[%s4749_s1 + $0x310] sm:$0xff]   ;;  %v2825_v43 = vcombine.low %v117_v22, %v125_v24 }
  0x93   :  { %2115 = vmatmul.mubr.bf16.gmra.mxu0 %v2851_v28  ;;  %v3720_v28 = vld [vmem:[%s4749_s1 + $0x3c8] sm:$0xff]  }
  0x94   :  { %2212 = vmatmul.mubr.bf16.gmra.mxu1 %v2853_v29  ;;  %2122 = vmatprep.mubr.bf16.mxu0 %v2868_v30  ;;  %v2809_v29 = vcombine.low %v101_v6, %v109_v8  ;;  %v2824_v30 = vcombine.high %v116_v20, %v124_v21  ;;  %v70_v6 = vld [vmem:[%s4750_s0 + $0xb0] sm:$0xff]  ;;  %v71_v8 = vld [vmem:[%s4750_s0 + $0xb8] sm:$0xff] }
  0x95   :  { %2219 = vmatprep.mubr.bf16.mxu1 %v2870_v31  ;;  %v2826_v31 = vcombine.high %v117_v22, %v125_v24  ;;  %v95_v22 = vld [vmem:[%s4750_s0 + $0x178] sm:$0xff] }
  0x9b   :  { %2123 = vmatmul.mubr.bf16.gmra.mxu0 %v2867_v36  ;;  %v132_v36 = vld [vmem:[%s4750_s0 + $0x2a0] sm:$0xff] }
  0x9c   :  { %2220 = vmatmul.mubr.bf16.gmra.mxu1 %v2869_v37  ;;  %2260 = vmatprep.mubr.bf16.mxu0 %v2760_v38  ;;  %v140_v37 = vld [vmem:[%s4750_s0 + $0x2e0] sm:$0xff] }
  0x9d   :  { %2357 = vmatprep.mubr.bf16.mxu1 %v2762_v39  ;;  %v3723_v38 = vld [vmem:[%s4749_s1 + $0x300] sm:$0xff]   ;;  %v133_v39 = vld [vmem:[%s4750_s0 + $0x2a8] sm:$0xff]  ;;  %v2840_v44 = vcombine.high %v132_v36, %v140_v37 }
  0xa3   :  { %2261 = vmatmul.mubr.bf16.vlgmr.msra.gmra.mxu0 %v2759_v42  ;;  %v2823_v42 = vcombine.low %v116_v20, %v124_v21  ;;  %v87_v21 = vld [vmem:[%s4750_s0 + $0x138] sm:$0xff] }
  0xa4   :  { %2358 = vmatmul.mubr.bf16.vlgmr.msra.gmra.mxu1 %v2761_v45  ;;  %3471 = vmatpush3.bf16.msra.mxu0 %v3695_v46  ;;  %v2842_v45 = vcombine.high %v133_v39, %v141_v40  ;;  %v148_v46 = vld [vmem:[%s4750_s0 + $0x320] sm:$0xff] }
  0xa5   :  { %3535 = vmatpush3.bf16.msra.mxu1 %v3697_v47  ;;  %2268 = vmatprep.mubr.bf16.mxu0 %v2776_v48  ;;  %v156_v47 = vld [vmem:[%s4750_s0 + $0x360] sm:$0xff]  ;;  %v149_v48 = vld [vmem:[%s4750_s0 + $0x328] sm:$0xff] }
  0xa6   :  { %2365 = vmatprep.mubr.bf16.mxu1 %v2778_v49  ;;  %3472 = vmatprep.subr.bf16.mxu0 %v3698_v50  ;;  %v157_v49 = vld [vmem:[%s4750_s0 + $0x368] sm:$0xff]  ;;  %v2839_v50 = vcombine.low %v132_v36, %v140_v37  ;;  %v2855_v58 = vcombine.low %v148_v46, %v156_v47 }
  0xa7   :  { %3536 = vmatprep.subr.bf16.mxu1 %v3700_v51  ;;  %v2841_v51 = vcombine.low %v133_v39, %v141_v40  ;;  %v102_v39 = vld [vmem:[%s4750_s0 + $0x1b0] sm:$0xff] }
  0xa8   :  { %3473 = vmatpush3.bf16.msra.mxu0 %v3699_v52  ;;  %v2856_v52 = vcombine.high %v148_v46, %v156_v47  ;;  %v110_v40 = vld [vmem:[%s4750_s0 + $0x1f0] sm:$0xff] }
  0xa9   :  { %3537 = vmatpush3.bf16.msra.mxu1 %v3701_v53  ;;  %3474 = vmatprep.subr.bf16.mxu0 %v3702_v56  ;;  %v2858_v53 = vcombine.high %v149_v48, %v157_v49  ;;  %v165_v56 = vld [vmem:[%s4750_s0 + $0x3a8] sm:$0xff] }
  0xaa   :  { %3538 = vmatprep.subr.bf16.mxu1 %v3704_v59  ;;  %v2857_v59 = vcombine.low %v149_v48, %v157_v49  ;;  %v2797_v49 = vcombine.low %v87_v21, %v95_v22 }
  0xab   :  { %2269 = vmatmul.mubr.bf16.gmra.mxu0 %v2775_v60  ;;  %v2872_v60 = vcombine.high %v164_v54, %v172_v55 }
  0xac   :  { %2366 = vmatmul.mubr.bf16.gmra.mxu1 %v2777_v61  ;;  %2276 = vmatprep.mubr.bf16.mxu0 %v2792_v62  ;;  %v2874_v61 = vcombine.high %v165_v56, %v173_v57  ;;  %v54_v62 = vld [vmem:[%s4750_s0 + $0x30] sm:$0xff] }
  0xad   :  { %2373 = vmatprep.mubr.bf16.mxu1 %v2794_v63  ;;  %3475 = vmatpush3.bf16.msra.mxu0 %v3703_v0  ;;  %v62_v63 = vld [vmem:[%s4750_s0 + $0x70] sm:$0xff]  ;;  %v55_v0 = vld [vmem:[%s4750_s0 + $0x38] sm:$0xff] }
  0xae   :  { %3539 = vmatpush3.bf16.msra.mxu1 %v3705_v1  ;;  %3476 = vmatprep.subr.bf16.mxu0 %v3706_v2  ;;  %v63_v1 = vld [vmem:[%s4750_s0 + $0x78] sm:$0xff]  ;;  %v2871_v2 = vcombine.low %v164_v54, %v172_v55  ;;  %v2764_v4 = vcombine.high %v54_v62, %v62_v63 }
  0xaf   :  { %3540 = vmatprep.subr.bf16.mxu1 %v3708_v3  ;;  %v2873_v3 = vcombine.low %v165_v56, %v173_v57  ;;  %v2766_v5 = vcombine.high %v55_v0, %v63_v1 }
  0xb1   :  { %3477 = vmatpush3.bf16.msra.mxu0 %v3707_v7  ;;  %v78_v7 = vld [vmem:[%s4750_s0 + $0xf0] sm:$0xff] }
  0xb2   :  { %3541 = vmatpush3.bf16.msra.mxu1 %v3709_v9  ;;  %3478 = vmatprep.subr.bf16.mxu0 %v3710_v10  ;;  %v79_v9 = vld [vmem:[%s4750_s0 + $0xf8] sm:$0xff]  ;;  %v2763_v10 = vcombine.low %v54_v62, %v62_v63  ;;  %v126_v62 = vld [vmem:[%s4750_s0 + $0x270] sm:$0xff] }
  0xb3   :  { %2277 = vmatmul.mubr.bf16.gmra.mxu0 %v2791_v11  ;;  %3542 = vmatprep.subr.bf16.mxu1 %v3712_v12  ;;  %v2765_v11 = vcombine.low %v55_v0, %v63_v1  ;;  %v2780_v12 = vcombine.high %v70_v6, %v78_v7  ;;  %v119_v1 = vld [vmem:[%s4750_s0 + $0x238] sm:$0xff] }
  0xb4   :  { %2374 = vmatmul.mubr.bf16.gmra.mxu1 %v2793_v13  ;;  %2284 = vmatprep.mubr.bf16.mxu0 %v2808_v14  ;;  %v2782_v13 = vcombine.high %v71_v8, %v79_v9 }
  0xb5   :  { %2381 = vmatprep.mubr.bf16.mxu1 %v2810_v15  ;;  %3479 = vmatpush3.bf16.msra.mxu0 %v3711_v16 }
  0xb6   :  { %3543 = vmatpush3.bf16.msra.mxu1 %v3713_v17  ;;  %3480 = vmatprep.subr.bf16.mxu0 %v3714_v18  ;;  %v86_v17 = vld [vmem:[%s4750_s0 + $0x130] sm:$0xff] }
  0xb7   :  { %3544 = vmatprep.subr.bf16.mxu1 %v3716_v19  ;;  %v94_v18 = vld [vmem:[%s4750_s0 + $0x170] sm:$0xff] }
  0xb8   :  { %v2795_v47 = vcombine.low %v86_v17, %v94_v18 }
  0xb9   :  { %3481 = vmatpush3.bf16.msra.mxu0 %v3715_v23 }
  0xba   :  { %3545 = vmatpush3.bf16.msra.mxu1 %v3717_v25  ;;  %3482 = vmatprep.subr.bf16.mxu0 %v3718_v26  ;;  %v2779_v25 = vcombine.low %v70_v6, %v78_v7 }
  0xbb   :  { %2285 = vmatmul.mubr.bf16.gmra.mxu0 %v2807_v27  ;;  %3546 = vmatprep.subr.bf16.mxu1 %v3720_v28  ;;  %v2781_v27 = vcombine.low %v71_v8, %v79_v9  ;;  %v2796_v28 = vcombine.high %v86_v17, %v94_v18 }
  0xbc   :  { %2382 = vmatmul.mubr.bf16.gmra.mxu1 %v2809_v29  ;;  %2292 = vmatprep.mubr.bf16.mxu0 %v2824_v30 }
  0xbd   :  { %2389 = vmatprep.mubr.bf16.mxu1 %v2826_v31  ;;  %3483 = vmatpush3.bf16.msra.mxu0 %v3719_v32  ;;  %v2798_v31 = vcombine.high %v87_v21, %v95_v22 }
  0xbe   :  { %3547 = vmatpush3.bf16.msra.mxu1 %v3721_v33  ;;  %3484 = vmatprep.subr.bf16.mxu0 %v3722_v34 }
  0xbf   :  { %3548 = vmatprep.subr.bf16.mxu1 %v3724_v35 }
  0xc1   :  { %3485 = vmatpush3.bf16.msra.mxu0 %v3723_v38 }
  0xc2   :  { %3549 = vmatpush3.bf16.msra.mxu1 %v3725_v41 }
  0xc3   :  { %2293 = vmatmul.mubr.bf16.gmra.mxu0 %v2823_v42 }
  0xc4   :  { %2390 = vmatmul.mubr.bf16.gmra.mxu1 %v2825_v43  ;;  %2300 = vmatprep.mubr.bf16.mxu0 %v2840_v44  ;;  %v103_v43 = vld [vmem:[%s4750_s0 + $0x1b8] sm:$0xff] }
  0xc5   :  { %2397 = vmatprep.mubr.bf16.mxu1 %v2842_v45  ;;  %v111_v44 = vld [vmem:[%s4750_s0 + $0x1f8] sm:$0xff] }
  0xc6   :  { %v2813_v7 = vcombine.low %v103_v43, %v111_v44 }
  0xcb   :  { %2301 = vmatmul.mubr.bf16.gmra.mxu0 %v2839_v50  ;;  %v2812_v50 = vcombine.high %v102_v39, %v110_v40 }
  0xcc   :  { %2398 = vmatmul.mubr.bf16.gmra.mxu1 %v2841_v51  ;;  %2308 = vmatprep.mubr.bf16.mxu0 %v2856_v52 }
  0xcd   :  { %2405 = vmatprep.mubr.bf16.mxu1 %v2858_v53  ;;  %v2814_v53 = vcombine.high %v103_v43, %v111_v44  ;;  %v150_v43 = vld [vmem:[%s4750_s0 + $0x330] sm:$0xff] }
  0xce   :  { %v158_v44 = vld [vmem:[%s4750_s0 + $0x370] sm:$0xff] }
  0xd3   :  { %2309 = vmatmul.mubr.bf16.gmra.mxu0 %v2855_v58 }
  0xd4   :  { %2406 = vmatmul.mubr.bf16.gmra.mxu1 %v2857_v59  ;;  %2316 = vmatprep.mubr.bf16.mxu0 %v2872_v60 }
  0xd5   :  { %2413 = vmatprep.mubr.bf16.mxu1 %v2874_v61  ;;  %v118_v61 = vld [vmem:[%s4750_s0 + $0x230] sm:$0xff] }
  0xd6   :  { %v2828_v8 = vcombine.high %v118_v61, %v126_v62 }
  0xdb   :  { %2317 = vmatmul.mubr.bf16.gmra.mxu0 %v2871_v2  ;;  %v127_v2 = vld [vmem:[%s4750_s0 + $0x278] sm:$0xff] }
  0xdc   :  { %2414 = vmatmul.mubr.bf16.gmra.mxu1 %v2873_v3  ;;  %2454 = vmatprep.mubr.bf16.mxu0 %v2764_v4 }
  0xdd   :  { %2551 = vmatprep.mubr.bf16.mxu1 %v2766_v5  ;;  %v2811_v5 = vcombine.low %v102_v39, %v110_v40 }
  0xe3   :  { %v3102_v14 = vpop.f32.mrf.mxu0  ;;  %2455 = vmatmul.mubr.bf16.vlgmr.msra.gmra.mxu0 %v2763_v10 }
  0xe4   :  { %v3166_v15 = vpop.f32.mrf.mxu1  ;;  %2552 = vmatmul.mubr.bf16.vlgmr.msra.gmra.mxu1 %v2765_v11  ;;  %2462 = vmatprep.mubr.bf16.mxu0 %v2780_v12  ;;  %v2830_v11 = vcombine.high %v119_v1, %v127_v2 }
  0xe5   :  { %v3103_v16 = vpop.f32.mrf.mxu0  ;;  %2559 = vmatprep.mubr.bf16.mxu1 %v2782_v13 }
  0xe6   :  { %v3104_v19 = vadd.f32 %v3103_v16, %v3102_v14  ;;  %v3167_v20 = vpop.f32.mrf.mxu1 }
  0xe7   :  { %v3168_v23 = vadd.f32 %v3167_v20, %v3166_v15  ;;  %v3105_v24 = vpop.f32.mrf.mxu0  ;;  %v142_v20 = vld [vmem:[%s4750_s0 + $0x2f0] sm:$0xff] }
  0xe8   :  { %v3169_v26 = vpop.f32.mrf.mxu1 }
  0xe9   :  { %v4449_v29 = vadd.f32 %v3168_v23, %v3104_v19  ;;  %v3106_v30 = vpop.f32.mrf.mxu0  ;;  %v134_v19 = vld [vmem:[%s4750_s0 + $0x2b0] sm:$0xff]  ;;  %v135_v23 = vld [vmem:[%s4750_s0 + $0x2b8] sm:$0xff] }
  0xea   :  { %v3107_v32 = vadd.f32 %v3106_v30, %v3105_v24  ;;  %v3170_v33 = vpop.f32.mrf.mxu1  ;;  %v143_v24 = vld [vmem:[%s4750_s0 + $0x2f8] sm:$0xff]  ;;  %v2829_v30 = vcombine.low %v119_v1, %v127_v2 }
  0xeb   :  { %v3171_v34 = vadd.f32 %v3170_v33, %v3169_v26  ;;  %v3108_v35 = vpop.f32.mrf.mxu0  ;;  %2463 = vmatmul.mubr.bf16.gmra.mxu0 %v2779_v25 }
  0xec   :  { %v3172_v36 = vpop.f32.mrf.mxu1  ;;  %2560 = vmatmul.mubr.bf16.gmra.mxu1 %v2781_v27  ;;  %2470 = vmatprep.mubr.bf16.mxu0 %v2796_v28  ;;  %v2827_v27 = vcombine.low %v118_v61, %v126_v62 }
  0xed   :  { %v4451_v37 = vadd.f32 %v3171_v34, %v3107_v32  ;;  %v3109_v38 = vpop.f32.mrf.mxu0  ;;  %2567 = vmatprep.mubr.bf16.mxu1 %v2798_v31  ;;  %v2844_v31 = vcombine.high %v134_v19, %v142_v20  ;;  %v2846_v34 = vcombine.high %v135_v23, %v143_v24 }
  0xee   :  { %v3110_v41 = vadd.f32 %v3109_v38, %v3108_v35  ;;  %v3173_v42 = vpop.f32.mrf.mxu1 }
  0xef   :  { %v3174_v45 = vadd.f32 %v3173_v42, %v3172_v36  ;;  %v3111_v46 = vpop.f32.mrf.mxu0 }
  0xf0   :  { %v3175_v48 = vpop.f32.mrf.mxu1 }
  0xf1   :  { %v4465_v51 = vadd.f32 %v3174_v45, %v3110_v41  ;;  %v3112_v52 = vpop.f32.mrf.mxu0 }
  0xf2   :  { %v3113_v54 = vadd.f32 %v3112_v52, %v3111_v46  ;;  %v3176_v55 = vpop.f32.mrf.mxu1  ;;  %v2843_v52 = vcombine.low %v134_v19, %v142_v20 }
  0xf3   :  { %v3177_v56 = vadd.f32 %v3176_v55, %v3175_v48  ;;  %v3114_v57 = vpop.f32.mrf.mxu0  ;;  %2471 = vmatmul.mubr.bf16.gmra.mxu0 %v2795_v47  ;;  %v151_v47 = vld [vmem:[%s4750_s0 + $0x338] sm:$0xff]  ;;  %v2860_v55 = vcombine.high %v150_v43, %v158_v44 }
  0xf4   :  { %v3178_v58 = vpop.f32.mrf.mxu1  ;;  %2568 = vmatmul.mubr.bf16.gmra.mxu1 %v2797_v49  ;;  %2478 = vmatprep.mubr.bf16.mxu0 %v2812_v50  ;;  %v159_v48 = vld [vmem:[%s4750_s0 + $0x378] sm:$0xff] }
  0xf5   :  { %v4467_v59 = vadd.f32 %v3177_v56, %v3113_v54  ;;  %v3115_v60 = vpop.f32.mrf.mxu0  ;;  %2575 = vmatprep.mubr.bf16.mxu1 %v2814_v53  ;;  %v2845_v54 = vcombine.low %v135_v23, %v143_v24 }
  0xf6   :  { %v3116_v63 = vadd.f32 %v3115_v60, %v3114_v57  ;;  %v3179_v0 = vpop.f32.mrf.mxu1 }
  0xf7   :  { %v3180_v3 = vadd.f32 %v3179_v0, %v3178_v58  ;;  %v3117_v4 = vpop.f32.mrf.mxu0  ;;  %v2862_v58 = vcombine.high %v151_v47, %v159_v48 }
  0xf8   :  { %v3181_v6 = vpop.f32.mrf.mxu1 }
  0xf9   :  { %v4481_v9 = vadd.f32 %v3180_v3, %v3116_v63  ;;  %v3118_v10 = vpop.f32.mrf.mxu0  ;;  %v166_v3 = vld [vmem:[%s4750_s0 + $0x3b0] sm:$0xff] }
  0xfa   :  { %v3119_v12 = vadd.f32 %v3118_v10, %v3117_v4  ;;  %v3182_v13 = vpop.f32.mrf.mxu1  ;;  %v174_v4 = vld [vmem:[%s4750_s0 + $0x3f0] sm:$0xff] }
  0xfb   :  { %v3183_v14 = vadd.f32 %v3182_v13, %v3181_v6  ;;  %v3120_v15 = vpop.f32.mrf.mxu0  ;;  %2479 = vmatmul.mubr.bf16.gmra.mxu0 %v2811_v5 }
  0xfc   :  { %v3184_v16 = vpop.f32.mrf.mxu1  ;;  %2576 = vmatmul.mubr.bf16.gmra.mxu1 %v2813_v7  ;;  %2486 = vmatprep.mubr.bf16.mxu0 %v2828_v8  ;;  %v167_v7 = vld [vmem:[%s4750_s0 + $0x3b8] sm:$0xff] }
  0xfd   :  { %v4483_v17 = vadd.f32 %v3183_v14, %v3119_v12  ;;  %v3121_v18 = vpop.f32.mrf.mxu0  ;;  %2583 = vmatprep.mubr.bf16.mxu1 %v2830_v11  ;;  %v175_v8 = vld [vmem:[%s4750_s0 + $0x3f8] sm:$0xff]  ;;  %v2859_v12 = vcombine.low %v150_v43, %v158_v44  ;;  %v2861_v14 = vcombine.low %v151_v47, %v159_v48 }
  0xfe   :  { %v3122_v21 = vadd.f32 %v3121_v18, %v3120_v15  ;;  %v3185_v22 = vpop.f32.mrf.mxu1  ;;  %v2876_v15 = vcombine.high %v166_v3, %v174_v4  ;;  %v2878_v19 = vcombine.high %v167_v7, %v175_v8 }
  0xff   :  { %v3186_v25 = vadd.f32 %v3185_v22, %v3184_v16  ;;  %v3123_v26 = vpop.f32.mrf.mxu0 }
 0x100   :  { %v3187_v28 = vpop.f32.mrf.mxu1 }
 0x101   :  { %v4497_v32 = vadd.f32 %v3186_v25, %v3122_v21  ;;  %v3124_v33 = vpop.f32.mrf.mxu0 }
 0x102   :  { %v3125_v35 = vadd.f32 %v3124_v33, %v3123_v26  ;;  %v3188_v36 = vpop.f32.mrf.mxu1  ;;  %v2875_v33 = vcombine.low %v166_v3, %v174_v4 }
 0x103   :  { %v3189_v38 = vadd.f32 %v3188_v36, %v3187_v28  ;;  %v3126_v39 = vpop.f32.mrf.mxu0  ;;  %2487 = vmatmul.mubr.bf16.gmra.mxu0 %v2827_v27 }
 0x104   :  { %v3190_v40 = vpop.f32.mrf.mxu1  ;;  %2584 = vmatmul.mubr.bf16.gmra.mxu1 %v2829_v30  ;;  %2494 = vmatprep.mubr.bf16.mxu0 %v2844_v31 }
 0x105   :  { %v4499_v41 = vadd.f32 %v3189_v38, %v3125_v35  ;;  %v3127_v42 = vpop.f32.mrf.mxu0  ;;  %2591 = vmatprep.mubr.bf16.mxu1 %v2846_v34  ;;  %v2877_v35 = vcombine.low %v167_v7, %v175_v8 }
 0x106   :  { %v3128_v45 = vadd.f32 %v3127_v42, %v3126_v39  ;;  %v3191_v46 = vpop.f32.mrf.mxu1 }
 0x107   :  { %v3192_v49 = vadd.f32 %v3191_v46, %v3190_v40  ;;  %v3129_v50 = vpop.f32.mrf.mxu0 }
 0x108   :  { %v3193_v53 = vpop.f32.mrf.mxu1 }
 0x109   :  { %v4513_v56 = vadd.f32 %v3192_v49, %v3128_v45  ;;  %v3130_v57 = vpop.f32.mrf.mxu0 }
 0x10a   :  { %v3131_v60 = vadd.f32 %v3130_v57, %v3129_v50  ;;  %v3194_v61 = vpop.f32.mrf.mxu1 }
 0x10b   :  { %v3195_v62 = vadd.f32 %v3194_v61, %v3193_v53  ;;  %v3132_v63 = vpop.f32.mrf.mxu0  ;;  %2495 = vmatmul.mubr.bf16.gmra.mxu0 %v2843_v52 }
 0x10c   :  { %v3196_v0 = vpop.f32.mrf.mxu1  ;;  %2592 = vmatmul.mubr.bf16.gmra.mxu1 %v2845_v54  ;;  %2502 = vmatprep.mubr.bf16.mxu0 %v2860_v55 }
 0x10d   :  { %v4515_v1 = vadd.f32 %v3195_v62, %v3131_v60  ;;  %v3133_v2 = vpop.f32.mrf.mxu0  ;;  %2599 = vmatprep.mubr.bf16.mxu1 %v2862_v58 }
 0x10e   :  { %v3134_v5 = vadd.f32 %v3133_v2, %v3132_v63  ;;  %v3197_v6 = vpop.f32.mrf.mxu1 }
 0x10f   :  { %v3198_v10 = vadd.f32 %v3197_v6, %v3196_v0  ;;  %v3135_v11 = vpop.f32.mrf.mxu0 }
 0x110   :  { %v3199_v13 = vpop.f32.mrf.mxu1 }
 0x111   :  { %v4529_v16 = vadd.f32 %v3198_v10, %v3134_v5  ;;  %v3136_v18 = vpop.f32.mrf.mxu0 }
 0x112   :  { %v3137_v20 = vadd.f32 %v3136_v18, %v3135_v11  ;;  %v3200_v21 = vpop.f32.mrf.mxu1 }
 0x113   :  { %v3201_v22 = vadd.f32 %v3200_v21, %v3199_v13  ;;  %v3138_v23 = vpop.f32.mrf.mxu0  ;;  %2503 = vmatmul.mubr.bf16.gmra.mxu0 %v2859_v12 }
 0x114   :  { %v3202_v24 = vpop.f32.mrf.mxu1  ;;  %2600 = vmatmul.mubr.bf16.gmra.mxu1 %v2861_v14  ;;  %2510 = vmatprep.mubr.bf16.mxu0 %v2876_v15 }
 0x115   :  { %v4531_v25 = vadd.f32 %v3201_v22, %v3137_v20  ;;  %v3139_v26 = vpop.f32.mrf.mxu0  ;;  %2607 = vmatprep.mubr.bf16.mxu1 %v2878_v19 }
 0x116   :  { %v3140_v27 = vadd.f32 %v3139_v26, %v3138_v23  ;;  %v3203_v28 = vpop.f32.mrf.mxu1 }
 0x117   :  { %v3204_v30 = vadd.f32 %v3203_v28, %v3202_v24  ;;  %v3141_v31 = vpop.f32.mrf.mxu0 }
 0x118   :  { %v3205_v34 = vpop.f32.mrf.mxu1 }
 0x119   :  { %v4533_v36 = vadd.f32 %v3204_v30, %v3140_v27  ;;  %v3142_v38 = vpop.f32.mrf.mxu0 }
 0x11a   :  { %v3143_v39 = vadd.f32 %v3142_v38, %v3141_v31  ;;  %v3206_v40 = vpop.f32.mrf.mxu1 }
 0x11b   :  { %v3207_v42 = vadd.f32 %v3206_v40, %v3205_v34  ;;  %v3144_v43 = vpop.f32.mrf.mxu0  ;;  %2511 = vmatmul.mubr.bf16.gmra.mxu0 %v2875_v33 }
 0x11c   :  { %v3208_v44 = vpop.f32.mrf.mxu1  ;;  %2608 = vmatmul.mubr.bf16.gmra.mxu1 %v2877_v35 }
 0x11d   :  { %v4535_v45 = vadd.f32 %v3207_v42, %v3143_v39  ;;  %v3145_v46 = vpop.f32.mrf.mxu0 }
 0x11e   :  { %v3146_v47 = vadd.f32 %v3145_v46, %v3144_v43  ;;  %v3209_v48 = vpop.f32.mrf.mxu1 }
 0x11f   :  { %v3210_v49 = vadd.f32 %v3209_v48, %v3208_v44  ;;  %v3147_v50 = vpop.f32.mrf.mxu0 }
 0x120   :  { %v3211_v52 = vpop.f32.mrf.mxu1 }
 0x121   :  { %v4537_v53 = vadd.f32 %v3210_v49, %v3146_v47  ;;  %v3148_v54 = vpop.f32.mrf.mxu0 }
 0x122   :  { %v3149_v55 = vadd.f32 %v3148_v54, %v3147_v50  ;;  %v3212_v57 = vpop.f32.mrf.mxu1 }
 0x123   :  { %v3213_v58 = vadd.f32 %v3212_v57, %v3211_v52  ;;  %v3230_v60 = vpop.f32.mrf.mxu0 }
 0x124   :  { %v3294_v61 = vpop.f32.mrf.mxu1 }
 0x125   :  { %v4539_v62 = vadd.f32 %v3213_v58, %v3149_v55  ;;  %v3231_v63 = vpop.f32.mrf.mxu0 }
 0x126   :  { %v3232_v0 = vadd.f32 %v3231_v63, %v3230_v60  ;;  %v3295_v2 = vpop.f32.mrf.mxu1 }
 0x127   :  { %v3296_v3 = vadd.f32 %v3295_v2, %v3294_v61  ;;  %v3233_v4 = vpop.f32.mrf.mxu0 }
 0x128   :  { %v2069_v5 = vadd.f32 %v3232_v0, %v4449_v29  ;;  %v3297_v6 = vpop.f32.mrf.mxu1 }
 0x129   :  { %v3234_v7 = vpop.f32.mrf.mxu0 }
 0x12a   :  { %v4542_v8 = vadd.f32 %v3296_v3, %v2069_v5  ;;  %v3235_v10 = vadd.f32 %v3234_v7, %v3233_v4  ;;  %v3298_v11 = vpop.f32.mrf.mxu1 }
 0x12b   :  { %v3299_v12 = vadd.f32 %v3298_v11, %v3297_v6  ;;  %v3236_v13 = vpop.f32.mrf.mxu0 }
 0x12c   :  { %v2072_v14 = vadd.f32 %v3235_v10, %v4451_v37  ;;  %v3300_v15 = vpop.f32.mrf.mxu1 }
 0x12d   :  { %v3237_v18 = vpop.f32.mrf.mxu0 }
 0x12e   :  { %v4545_v19 = vadd.f32 %v3299_v12, %v2072_v14  ;;  %v3238_v20 = vadd.f32 %v3237_v18, %v3236_v13  ;;  %v3301_v21 = vpop.f32.mrf.mxu1 }
 0x12f   :  { %v3302_v22 = vadd.f32 %v3301_v21, %v3300_v15  ;;  %v3239_v23 = vpop.f32.mrf.mxu0 }
 0x130   :  { %v2077_v29 = vadd.f32 %v3238_v20, %v4465_v51  ;;  %v3303_v24 = vpop.f32.mrf.mxu1 }
 0x131   :  { %v3240_v26 = vpop.f32.mrf.mxu0 }
 0x132   :  { %v4548_v27 = vadd.f32 %v3302_v22, %v2077_v29  ;;  %v3241_v28 = vadd.f32 %v3240_v26, %v3239_v23  ;;  %v3304_v30 = vpop.f32.mrf.mxu1 }
 0x133   :  { %v3305_v31 = vadd.f32 %v3304_v30, %v3303_v24  ;;  %v3242_v33 = vpop.f32.mrf.mxu0 }
 0x134   :  { %v2080_v37 = vadd.f32 %v3241_v28, %v4467_v59  ;;  %v3306_v34 = vpop.f32.mrf.mxu1 }
 0x135   :  { %v3243_v35 = vpop.f32.mrf.mxu0 }
 0x136   :  { %v4551_v38 = vadd.f32 %v3305_v31, %v2080_v37  ;;  %v3244_v39 = vadd.f32 %v3243_v35, %v3242_v33  ;;  %v3307_v40 = vpop.f32.mrf.mxu1 }
 0x137   :  { %v3308_v42 = vadd.f32 %v3307_v40, %v3306_v34  ;;  %v3245_v43 = vpop.f32.mrf.mxu0 }
 0x138   :  { %v2085_v51 = vadd.f32 %v3244_v39, %v4481_v9  ;;  %v3309_v44 = vpop.f32.mrf.mxu1 }
 0x139   :  { %v3246_v46 = vpop.f32.mrf.mxu0 }
 0x13a   :  { %v4554_v47 = vadd.f32 %v3308_v42, %v2085_v51  ;;  %v3247_v48 = vadd.f32 %v3246_v46, %v3245_v43  ;;  %v3310_v49 = vpop.f32.mrf.mxu1 }
 0x13b   :  { %v3311_v50 = vadd.f32 %v3310_v49, %v3309_v44  ;;  %v3248_v52 = vpop.f32.mrf.mxu0 }
 0x13c   :  { %v2088_v59 = vadd.f32 %v3247_v48, %v4483_v17  ;;  %v3312_v54 = vpop.f32.mrf.mxu1 }
 0x13d   :  { %v3249_v55 = vpop.f32.mrf.mxu0 }
 0x13e   :  { %v4557_v57 = vadd.f32 %v3311_v50, %v2088_v59  ;;  %v3250_v58 = vadd.f32 %v3249_v55, %v3248_v52  ;;  %v3313_v60 = vpop.f32.mrf.mxu1 }
 0x13f   :  { %v3314_v61 = vadd.f32 %v3313_v60, %v3312_v54  ;;  %v3251_v63 = vpop.f32.mrf.mxu0 }
 0x140   :  { %v2093_v9 = vadd.f32 %v3250_v58, %v4497_v32  ;;  %v3315_v0 = vpop.f32.mrf.mxu1 }
 0x141   :  { %v3252_v2 = vpop.f32.mrf.mxu0 }
 0x142   :  { %v4560_v3 = vadd.f32 %v3314_v61, %v2093_v9  ;;  %v3253_v4 = vadd.f32 %v3252_v2, %v3251_v63  ;;  %v3316_v5 = vpop.f32.mrf.mxu1 }
 0x143   :  { %v3317_v6 = vadd.f32 %v3316_v5, %v3315_v0  ;;  %v3254_v7 = vpop.f32.mrf.mxu0 }
 0x144   :  { %v2096_v17 = vadd.f32 %v3253_v4, %v4499_v41  ;;  %v3318_v10 = vpop.f32.mrf.mxu1 }
 0x145   :  { %v3255_v11 = vpop.f32.mrf.mxu0 }
 0x146   :  { %v4563_v12 = vadd.f32 %v3317_v6, %v2096_v17  ;;  %v3256_v13 = vadd.f32 %v3255_v11, %v3254_v7  ;;  %v3319_v14 = vpop.f32.mrf.mxu1 }
 0x147   :  { %v3320_v15 = vadd.f32 %v3319_v14, %v3318_v10  ;;  %v3257_v18 = vpop.f32.mrf.mxu0 }
 0x148   :  { %v2101_v32 = vadd.f32 %v3256_v13, %v4513_v56  ;;  %v3321_v20 = vpop.f32.mrf.mxu1 }
 0x149   :  { %v3258_v21 = vpop.f32.mrf.mxu0 }
 0x14a   :  { %v4566_v22 = vadd.f32 %v3320_v15, %v2101_v32  ;;  %v3259_v23 = vadd.f32 %v3258_v21, %v3257_v18  ;;  %v3322_v29 = vpop.f32.mrf.mxu1 }
 0x14b   :  { %v3323_v24 = vadd.f32 %v3322_v29, %v3321_v20  ;;  %v3260_v26 = vpop.f32.mrf.mxu0 }
 0x14c   :  { %v2104_v41 = vadd.f32 %v3259_v23, %v4515_v1  ;;  %v3324_v28 = vpop.f32.mrf.mxu1 }
 0x14d   :  { %v3261_v30 = vpop.f32.mrf.mxu0 }
 0x14e   :  { %v4569_v31 = vadd.f32 %v3323_v24, %v2104_v41  ;;  %v3262_v33 = vadd.f32 %v3261_v30, %v3260_v26  ;;  %v3325_v37 = vpop.f32.mrf.mxu1 }
 0x14f   :  { %v3326_v34 = vadd.f32 %v3325_v37, %v3324_v28  ;;  %v3263_v35 = vpop.f32.mrf.mxu0 }
 0x150   :  { %v2109_v56 = vadd.f32 %v3262_v33, %v4529_v16  ;;  %v3327_v39 = vpop.f32.mrf.mxu1 }
 0x151   :  { %v3264_v40 = vpop.f32.mrf.mxu0 }
 0x152   :  { %v4572_v42 = vadd.f32 %v3326_v34, %v2109_v56  ;;  %v3265_v43 = vadd.f32 %v3264_v40, %v3263_v35  ;;  %v3328_v51 = vpop.f32.mrf.mxu1 }
 0x153   :  { %v3329_v44 = vadd.f32 %v3328_v51, %v3327_v39  ;;  %v3266_v46 = vpop.f32.mrf.mxu0 }
 0x154   :  { %v2112_v1 = vadd.f32 %v3265_v43, %v4531_v25  ;;  %v3330_v48 = vpop.f32.mrf.mxu1 }
 0x155   :  { %v3267_v49 = vpop.f32.mrf.mxu0 }
 0x156   :  { %v4575_v50 = vadd.f32 %v3329_v44, %v2112_v1  ;;  %v3268_v52 = vadd.f32 %v3267_v49, %v3266_v46  ;;  %v3331_v59 = vpop.f32.mrf.mxu1 }
 0x157   :  { %v3332_v54 = vadd.f32 %v3331_v59, %v3330_v48  ;;  %v3269_v55 = vpop.f32.mrf.mxu0 }
 0x158   :  { %v2117_v16 = vadd.f32 %v3268_v52, %v4533_v36  ;;  %v3333_v58 = vpop.f32.mrf.mxu1 }
 0x159   :  { %v3270_v60 = vpop.f32.mrf.mxu0 }
 0x15a   :  { %v4578_v61 = vadd.f32 %v3332_v54, %v2117_v16  ;;  %v3271_v63 = vadd.f32 %v3270_v60, %v3269_v55  ;;  %v3334_v9 = vpop.f32.mrf.mxu1 }
 0x15b   :  { %v3335_v0 = vadd.f32 %v3334_v9, %v3333_v58  ;;  %v3272_v2 = vpop.f32.mrf.mxu0 }
 0x15c   :  { %v2120_v25 = vadd.f32 %v3271_v63, %v4535_v45  ;;  %v3336_v4 = vpop.f32.mrf.mxu1 }
 0x15d   :  { %v3273_v5 = vpop.f32.mrf.mxu0 }
 0x15e   :  { %v4581_v6 = vadd.f32 %v3335_v0, %v2120_v25  ;;  %v3274_v7 = vadd.f32 %v3273_v5, %v3272_v2  ;;  %v3337_v17 = vpop.f32.mrf.mxu1 }
 0x15f   :  { %v3338_v10 = vadd.f32 %v3337_v17, %v3336_v4  ;;  %v3275_v11 = vpop.f32.mrf.mxu0 }
 0x160   :  { %v2125_v36 = vadd.f32 %v3274_v7, %v4537_v53  ;;  %v3339_v13 = vpop.f32.mrf.mxu1 }
 0x161   :  { %v3276_v14 = vpop.f32.mrf.mxu0 }
 0x162   :  { %v4584_v15 = vadd.f32 %v3338_v10, %v2125_v36  ;;  %v3277_v18 = vadd.f32 %v3276_v14, %v3275_v11  ;;  %v3340_v32 = vpop.f32.mrf.mxu1 }
 0x163   :  { %v3341_v20 = vadd.f32 %v3340_v32, %v3339_v13  ;;  %v3358_v21 = vpop.f32.mrf.mxu0 }
 0x164   :  { %v2128_v45 = vadd.f32 %v3277_v18, %v4539_v62  ;;  %v3422_v23 = vpop.f32.mrf.mxu1 }
 0x165   :  { %v3359_v29 = vpop.f32.mrf.mxu0 }
 0x166   :  { %v4587_v24 = vadd.f32 %v3341_v20, %v2128_v45  ;;  %v3360_v26 = vadd.f32 %v3359_v29, %v3358_v21  ;;  %v3423_v41 = vpop.f32.mrf.mxu1 }
 0x167   :  { %v3424_v28 = vadd.f32 %v3423_v41, %v3422_v23  ;;  %v4589_v30 = vpop.f32.mrf.mxu0 }
 0x168   :  { %v2263_v53 = vadd.f32 %v3360_v26, %v4542_v8  ;;  %v4592_v33 = vpop.f32.mrf.mxu1 }
 0x169   :  { %v4594_v37 = vpop.f32.mrf.mxu0 }
 0x16a   :  { %v4596_v34 = vadd.f32 %v3424_v28, %v2263_v53  ;;  %v4598_v35 = vpop.f32.mrf.mxu1 }
 0x16b   :  { %v3364_v62 = vpop.f32.mrf.mxu0 }
 0x16c   :  { %v3428_v56 = vpop.f32.mrf.mxu1 }
 0x16d   :  { %v3365_v39 = vpop.f32.mrf.mxu0 }
 0x16e   :  { %v3366_v40 = vadd.f32 %v3365_v39, %v3364_v62  ;;  %v3429_v43 = vpop.f32.mrf.mxu1 }
 0x16f   :  { %v3430_v51 = vadd.f32 %v3429_v43, %v3428_v56  ;;  %v4600_v44 = vpop.f32.mrf.mxu0 }
 0x170   :  { %v2271_v46 = vadd.f32 %v3366_v40, %v4548_v27  ;;  %v4603_v1 = vpop.f32.mrf.mxu1 }
 0x171   :  { %v4605_v8 = vpop.f32.mrf.mxu0 }
 0x172   :  { %v4607_v48 = vadd.f32 %v3430_v51, %v2271_v46  ;;  %v4609_v49 = vpop.f32.mrf.mxu1 }
 0x173   :  { %v3370_v52 = vpop.f32.mrf.mxu0 }
 0x174   :  { %v3434_v59 = vpop.f32.mrf.mxu1 }
 0x175   :  { %v3371_v54 = vpop.f32.mrf.mxu0 }
 0x176   :  { %v3372_v55 = vadd.f32 %v3371_v54, %v3370_v52  ;;  %v3435_v16 = vpop.f32.mrf.mxu1 }
 0x177   :  { %v3436_v58 = vadd.f32 %v3435_v16, %v3434_v59  ;;  %v4611_v60 = vpop.f32.mrf.mxu0 }
 0x178   :  { %v2279_v63 = vadd.f32 %v3372_v55, %v4554_v47  ;;  %v4614_v9 = vpop.f32.mrf.mxu1 }
 0x179   :  { %v4616_v27 = vpop.f32.mrf.mxu0 }
 0x17a   :  { %v4618_v0 = vadd.f32 %v3436_v58, %v2279_v63  ;;  %v4620_v2 = vpop.f32.mrf.mxu1 }
 0x17b   :  { %v3376_v25 = vpop.f32.mrf.mxu0 }
 0x17c   :  { %v3440_v4 = vpop.f32.mrf.mxu1 }
 0x17d   :  { %v3377_v5 = vpop.f32.mrf.mxu0 }
 0x17e   :  { %v3378_v7 = vadd.f32 %v3377_v5, %v3376_v25  ;;  %v3441_v17 = vpop.f32.mrf.mxu1 }
 0x17f   :  { %v3442_v10 = vadd.f32 %v3441_v17, %v3440_v4  ;;  %v4622_v11 = vpop.f32.mrf.mxu0 }
 0x180   :  { %v2287_v36 = vadd.f32 %v3378_v7, %v4560_v3  ;;  %v4625_v13 = vpop.f32.mrf.mxu1 }
 0x181   :  { %v4627_v47 = vpop.f32.mrf.mxu0 }
 0x182   :  { %v4629_v14 = vadd.f32 %v3442_v10, %v2287_v36  ;;  %v4631_v18 = vpop.f32.mrf.mxu1 }
 0x183   :  { %v3382_v32 = vpop.f32.mrf.mxu0 }
 0x184   :  { %v3446_v20 = vpop.f32.mrf.mxu1 }
 0x185   :  { %v3383_v21 = vpop.f32.mrf.mxu0 }
 0x186   :  { %v3384_v45 = vadd.f32 %v3383_v21, %v3382_v32  ;;  %v3447_v23 = vpop.f32.mrf.mxu1 }
 0x187   :  { %v3448_v29 = vadd.f32 %v3447_v23, %v3446_v20  ;;  %v4633_v26 = vpop.f32.mrf.mxu0 }
 0x188   :  { %v2295_v41 = vadd.f32 %v3384_v45, %v4566_v22  ;;  %v4636_v28 = vpop.f32.mrf.mxu1 }
 0x189   :  { %v4638_v3 = vpop.f32.mrf.mxu0 }
 0x18a   :  { %v4640_v53 = vadd.f32 %v3448_v29, %v2295_v41  ;;  %v4642_v62 = vpop.f32.mrf.mxu1 }
 0x18b   :  { %v3388_v56 = vpop.f32.mrf.mxu0 }
 0x18c   :  { %v3452_v39 = vpop.f32.mrf.mxu1 }
 0x18d   :  { %v3389_v40 = vpop.f32.mrf.mxu0 }
 0x18e   :  { %v3390_v43 = vadd.f32 %v3389_v40, %v3388_v56  ;;  %v3453_v51 = vpop.f32.mrf.mxu1 }
 0x18f   :  { %v3454_v46 = vadd.f32 %v3453_v51, %v3452_v39  ;;  %v4644_v52 = vpop.f32.mrf.mxu0  ;;  %v3363_v51 = vadd.f32 %v4594_v37, %v4589_v30  ;;  %v3369_v30 = vadd.f32 %v4605_v8, %v4600_v44  ;;  %v3433_v44 = vadd.f32 %v4609_v49, %v4603_v1 }
 0x190   :  { %v2303_v59 = vadd.f32 %v3390_v43, %v4572_v42  ;;  %v4647_v54 = vpop.f32.mrf.mxu1 }
 0x191   :  { %v4649_v22 = vpop.f32.mrf.mxu0 }
 0x192   :  { %v4651_v55 = vadd.f32 %v3454_v46, %v2303_v59  ;;  %v4653_v16 = vpop.f32.mrf.mxu1 }
 0x193   :  { %v3394_v58 = vpop.f32.mrf.mxu0 }
 0x194   :  { %v3458_v63 = vpop.f32.mrf.mxu1 }
 0x195   :  { %v3395_v25 = vpop.f32.mrf.mxu0 }
 0x196   :  { %v3396_v4 = vadd.f32 %v3395_v25, %v3394_v58  ;;  %v3459_v5 = vpop.f32.mrf.mxu1 }
 0x197   :  { %v3460_v7 = vadd.f32 %v3459_v5, %v3458_v63  ;;  %v4655_v17 = vpop.f32.mrf.mxu0 }
 0x198   :  { %v2311_v10 = vadd.f32 %v3396_v4, %v4578_v61  ;;  %v4658_v36 = vpop.f32.mrf.mxu1  ;;  %v2266_v4 = vadd.f32 %v3363_v51, %v4545_v19 }
 0x199   :  { %v4660_v42 = vpop.f32.mrf.mxu0 }
 0x19a   :  { %v4662_v32 = vadd.f32 %v3460_v7, %v2311_v10  ;;  %v4664_v20 = vpop.f32.mrf.mxu1 }
 0x19b   :  { %v3400_v21 = vpop.f32.mrf.mxu0 }
 0x19c   :  { %v3464_v45 = vpop.f32.mrf.mxu1 }
 0x19d   :  { %v3401_v23 = vpop.f32.mrf.mxu0 }
 0x19e   :  { %v3402_v29 = vadd.f32 %v3401_v23, %v3400_v21  ;;  %v3465_v41 = vpop.f32.mrf.mxu1 }
 0x19f   :  { %v3466_v56 = vadd.f32 %v3465_v41, %v3464_v45  ;;  %v4666_v39 = vpop.f32.mrf.mxu0 }
 0x1a0   :  { %v2319_v40 = vadd.f32 %v3402_v29, %v4584_v15  ;;  %v4669_v43 = vpop.f32.mrf.mxu1  ;;  %v3427_v15 = vadd.f32 %v4598_v35, %v4592_v33 }
 0x1a1   :  { %4752 = vst [vmem:[#allocation3_spill] sm:$0xff] %v4669_v43  ;;  %v4671_v61 = vpop.f32.mrf.mxu0 }
 0x1a2   :  { %v4675_v46 = vadd.f32 %v3466_v56, %v2319_v40  ;;  %v4677_v59 = vpop.f32.mrf.mxu1  ;;  %v2363_v23 = vadd.f32 %v3427_v15, %v2266_v4 }
 0x1a3   :  { %4754 = vst [vmem:[#allocation5_spill] sm:$0xff] %v4677_v59  ;;  %v3486_v58 = vpop.f32.mrf.mxu0 }
 0x1a4   :  { %4753 = vst [vmem:[#allocation4_spill] sm:$0xff] %v4675_v46  ;;  %v3550_v63 = vpop.f32.mrf.mxu1 }
 0x1a5   :  { %v3487_v25 = vpop.f32.mrf.mxu0 }
 0x1a6   :  { %v3488_v5 = vadd.f32 %v3487_v25, %v3486_v58  ;;  %v3551_v7 = vpop.f32.mrf.mxu1  ;;  %v2274_v25 = vadd.f32 %v3369_v30, %v4551_v38 }
 0x1a7   :  { %v3489_v10 = vpop.f32.mrf.mxu0  ;;  %v3552_v40 = vadd.f32 %v3551_v7, %v3550_v63  ;;  %v3375_v63 = vadd.f32 %v4616_v27, %v4611_v60 }
 0x1a8   :  { %v3553_v21 = vpop.f32.mrf.mxu1  ;;  %v2457_v37 = vadd.f32 %v3488_v5, %v4596_v34 }
 0x1a9   :  { %v3490_v45 = vpop.f32.mrf.mxu0 }
 0x1aa   :  { %v3491_v29 = vadd.f32 %v3490_v45, %v3489_v10  ;;  %v3554_v41 = vpop.f32.mrf.mxu1  ;;  %v2554_v59 = vadd.f32 %v3552_v40, %v2457_v37  ;;  %v2371_v10 = vadd.f32 %v3433_v44, %v2274_v25 }
 0x1ab   :  { %v3492_v56 = vpop.f32.mrf.mxu0  ;;  %v3555_v19 = vadd.f32 %v3554_v41, %v3553_v21  ;;  %v3439_v41 = vadd.f32 %v4620_v2, %v4614_v9 }
 0x1ac   :  { %v2460_v46 = vadd.f32 %v3491_v29, %v2363_v23  ;;  %v3556_v51 = vpop.f32.mrf.mxu1 }
 0x1ad   :  { %v3493_v58 = vpop.f32.mrf.mxu0 }
 0x1ae   :  { %v2557_v33 = vadd.f32 %v3555_v19, %v2460_v46  ;;  %v3494_v35 = vadd.f32 %v3493_v58, %v3492_v56  ;;  %v3557_v43 = vpop.f32.mrf.mxu1 }
 0x1af   :  { %v3495_v4 = vpop.f32.mrf.mxu0  ;;  %v3558_v21 = vadd.f32 %v3557_v43, %v3556_v51  ;;  %v3381_v43 = vadd.f32 %v4627_v47, %v4622_v11 }
 0x1b0   :  { %v3042_v8 = vpack.c.bf16 %v2557_v33, %v2554_v59  ;;  %v3559_v34 = vpop.f32.mrf.mxu1  ;;  %v2465_v38 = vadd.f32 %v3494_v35, %v4607_v48  ;;  %v2282_v59 = vadd.f32 %v3375_v63, %v4557_v57 }
 0x1b1   :  { %v3496_v5 = vpop.f32.mrf.mxu0  ;;  %v2290_v44 = vadd.f32 %v3381_v43, %v4563_v12 }
 0x1b2   :  { %3043 = vst [vmem:[%s4751_s2] sm:$0xff] %v3042_v8   ;;  %v3497_v46 = vadd.f32 %v3496_v5, %v3495_v4  ;;  %v3560_v7 = vpop.f32.mrf.mxu1  ;;  %v2562_v30 = vadd.f32 %v3558_v21, %v2465_v38  ;;  %v2379_v19 = vadd.f32 %v3439_v41, %v2282_v59 }
 0x1b3   :  { %v3498_v15 = vpop.f32.mrf.mxu0  ;;  %v3561_v23 = vadd.f32 %v3560_v7, %v3559_v34  ;;  %v3387_v7 = vadd.f32 %v4638_v3, %v4633_v26 }
 0x1b4   :  { %v2468_v45 = vadd.f32 %v3497_v46, %v2371_v10  ;;  %v3562_v1 = vpop.f32.mrf.mxu1  ;;  %v3445_v10 = vadd.f32 %v4631_v18, %v4625_v13 }
 0x1b5   :  { %v3499_v49 = vpop.f32.mrf.mxu0  ;;  %v2298_v59 = vadd.f32 %v3387_v7, %v4569_v31 }
 0x1b6   :  { %v2565_v37 = vadd.f32 %v3561_v23, %v2468_v45  ;;  %v3500_v29 = vadd.f32 %v3499_v49, %v3498_v15  ;;  %v3563_v60 = vpop.f32.mrf.mxu1  ;;  %v2387_v46 = vadd.f32 %v3445_v10, %v2290_v44 }
 0x1b7   :  { %v3501_v27 = vpop.f32.mrf.mxu0  ;;  %v3564_v33 = vadd.f32 %v3563_v60, %v3562_v1  ;;  %v3451_v60 = vadd.f32 %v4642_v62, %v4636_v28 }
 0x1b8   :  { %v3047_v56 = vpack.c.bf16 %v2565_v37, %v2562_v30  ;;  %v3565_v48 = vpop.f32.mrf.mxu1  ;;  %v2473_v57 = vadd.f32 %v3500_v29, %v4618_v0 }
 0x1b9   :  { %v3502_v40 = vpop.f32.mrf.mxu0 }
 0x1ba   :  { %3079 = vst [vmem:[%s4751_s2 + $0x8] sm:$0xff] %v3047_v56   ;;  %v3503_v51 = vadd.f32 %v3502_v40, %v3501_v27  ;;  %v3566_v58 = vpop.f32.mrf.mxu1  ;;  %v2570_v8 = vadd.f32 %v3564_v33, %v2473_v57  ;;  %v2395_v56 = vadd.f32 %v3451_v60, %v2298_v59 }
 0x1bb   :  { %v3504_v25 = vpop.f32.mrf.mxu0  ;;  %v3567_v4 = vadd.f32 %v3566_v58, %v3565_v48  ;;  %v3393_v48 = vadd.f32 %v4649_v22, %v4644_v52 }
 0x1bc   :  { %v2476_v35 = vadd.f32 %v3503_v51, %v2379_v19  ;;  %v3568_v9 = vpop.f32.mrf.mxu1 }
 0x1bd   :  { %v3505_v2 = vpop.f32.mrf.mxu0 }
 0x1be   :  { %v2573_v34 = vadd.f32 %v3567_v4, %v2476_v35  ;;  %v3506_v5 = vadd.f32 %v3505_v2, %v3504_v25  ;;  %v3569_v11 = vpop.f32.mrf.mxu1  ;;  %v2306_v25 = vadd.f32 %v3393_v48, %v4575_v50 }
 0x1bf   :  { %v3507_v47 = vpop.f32.mrf.mxu0  ;;  %v3570_v23 = vadd.f32 %v3569_v11, %v3568_v9  ;;  %v3457_v9 = vadd.f32 %v4653_v16, %v4647_v54 }
 0x1c0   :  { %v3052_v63 = vpack.c.bf16 %v2573_v34, %v2570_v8  ;;  %v3571_v0 = vpop.f32.mrf.mxu1  ;;  %v2481_v12 = vadd.f32 %v3506_v5, %v4629_v14  ;;  %v3399_v34 = vadd.f32 %v4660_v42, %v4655_v17 }
 0x1c1   :  { %v3508_v38 = vpop.f32.mrf.mxu0  ;;  %v2403_v8 = vadd.f32 %v3457_v9, %v2306_v25 }
 0x1c2   :  { %3080 = vst [vmem:[%s4751_s2 + $0x10] sm:$0xff] %v3052_v63   ;;  %v3509_v15 = vadd.f32 %v3508_v38, %v3507_v47  ;;  %v3572_v21 = vpop.f32.mrf.mxu1  ;;  %v2578_v30 = vadd.f32 %v3570_v23, %v2481_v12  ;;  %v2314_v38 = vadd.f32 %v3399_v34, %v4581_v6 }
 0x1c3   :  { %v3510_v45 = vpop.f32.mrf.mxu0  ;;  %v3573_v49 = vadd.f32 %v3572_v21, %v3571_v0 }
 0x1c4   :  { %v2484_v1 = vadd.f32 %v3509_v15, %v2387_v46  ;;  %v3574_v13 = vpop.f32.mrf.mxu1  ;;  %v3463_v15 = vadd.f32 %v4664_v20, %v4658_v36 }
 0x1c5   :  { %v3511_v18 = vpop.f32.mrf.mxu0 }
 0x1c6   :  { %v2581_v37 = vadd.f32 %v3573_v49, %v2484_v1  ;;  %v3512_v29 = vadd.f32 %v3511_v18, %v3510_v45  ;;  %v3575_v26 = vpop.f32.mrf.mxu1  ;;  %v2411_v23 = vadd.f32 %v3463_v15, %v2314_v38  ;;  %v3405_v1 = vadd.f32 %v4671_v61, %v4666_v39 }
 0x1c7   :  { %v3513_v3 = vpop.f32.mrf.mxu0  ;;  %v3576_v57 = vadd.f32 %v3575_v26, %v3574_v13 }
 0x1c8   :  { %v3057_v27 = vpack.c.bf16 %v2581_v37, %v2578_v30  ;;  %v3577_v14 = vpop.f32.mrf.mxu1  ;;  %v2489_v31 = vadd.f32 %v3512_v29, %v4640_v53  ;;  %v2322_v29 = vadd.f32 %v3405_v1, %v4587_v24 }
 0x1c9   :  { %v3514_v41 = vpop.f32.mrf.mxu0 }
 0x1ca   :  { %3081 = vst [vmem:[%s4751_s2 + $0x18] sm:$0xff] %v3057_v27   ;;  %v3515_v40 = vadd.f32 %v3514_v41, %v3513_v3  ;;  %v3578_v19 = vpop.f32.mrf.mxu1  ;;  %v2586_v33 = vadd.f32 %v3576_v57, %v2489_v31  ;;  %v4755_v27 = vld [vmem:[#allocation3_spill] sm:$0xff] }
 0x1cb   :  { %v3516_v43 = vpop.f32.mrf.mxu0  ;;  %v3579_v58 = vadd.f32 %v3578_v19, %v3577_v14  ;;  %v4756_v14 = vld [vmem:[#allocation5_spill] sm:$0xff] }
 0x1cc   :  { %v2492_v51 = vadd.f32 %v3515_v40, %v2395_v56  ;;  %v3580_v28 = vpop.f32.mrf.mxu1  ;;  %v3469_v41 = vadd.f32 %v4756_v14, %v4755_v27  ;;  %v4757_v40 = vld [vmem:[#allocation4_spill] sm:$0xff] }
 0x1cd   :  { %v3517_v62 = vpop.f32.mrf.mxu0 }
 0x1ce   :  { %v2589_v35 = vadd.f32 %v3579_v58, %v2492_v51  ;;  %v3518_v4 = vadd.f32 %v3517_v62, %v3516_v43  ;;  %v3581_v52 = vpop.f32.mrf.mxu1  ;;  %v2419_v31 = vadd.f32 %v3469_v41, %v2322_v29 }
 0x1cf   :  { %v3519_v22 = vpop.f32.mrf.mxu0  ;;  %v3582_v10 = vadd.f32 %v3581_v52, %v3580_v28 }
 0x1d0   :  { %v3062_v2 = vpack.c.bf16 %v2589_v35, %v2586_v33  ;;  %v3583_v53 = vpop.f32.mrf.mxu1  ;;  %v2497_v50 = vadd.f32 %v3518_v4, %v4651_v55 }
 0x1d1   :  { %v3520_v44 = vpop.f32.mrf.mxu0 }
 0x1d2   :  { %3082 = vst [vmem:[%s4751_s2 + $0x20] sm:$0xff] %v3062_v2   ;;  %v3521_v5 = vadd.f32 %v3520_v44, %v3519_v22  ;;  %v3584_v11 = vpop.f32.mrf.mxu1  ;;  %v2594_v46 = vadd.f32 %v3582_v10, %v2497_v50 }
 0x1d3   :  { %v3522_v47 = vpop.f32.mrf.mxu0  ;;  %v3585_v0 = vadd.f32 %v3584_v11, %v3583_v53 }
 0x1d4   :  { %v2500_v63 = vadd.f32 %v3521_v5, %v2403_v8  ;;  %v3586_v54 = vpop.f32.mrf.mxu1 }
 0x1d5   :  { %v3523_v16 = vpop.f32.mrf.mxu0 }
 0x1d6   :  { %v2597_v7 = vadd.f32 %v3585_v0, %v2500_v63  ;;  %v3524_v12 = vadd.f32 %v3523_v16, %v3522_v47  ;;  %v3587_v17 = vpop.f32.mrf.mxu1 }
 0x1d7   :  { %v3525_v42 = vpop.f32.mrf.mxu0  ;;  %v3588_v59 = vadd.f32 %v3587_v17, %v3586_v54 }
 0x1d8   :  { %v3067_v21 = vpack.c.bf16 %v2597_v7, %v2594_v46  ;;  %v3589_v55 = vpop.f32.mrf.mxu1  ;;  %v2505_v6 = vadd.f32 %v3524_v12, %v4662_v32 }
 0x1d9   :  { %v3526_v45 = vpop.f32.mrf.mxu0 }
 0x1da   :  { %3083 = vst [vmem:[%s4751_s2 + $0x28] sm:$0xff] %v3067_v21   ;;  %v3527_v49 = vadd.f32 %v3526_v45, %v3525_v42  ;;  %v3590_v13 = vpop.f32.mrf.mxu1  ;;  %v2602_v26 = vadd.f32 %v3588_v59, %v2505_v6 }
 0x1db   :  { %v3528_v18 = vpop.f32.mrf.mxu0  ;;  %v3591_v37 = vadd.f32 %v3590_v13, %v3589_v55 }
 0x1dc   :  { %v2508_v30 = vadd.f32 %v3527_v49, %v2411_v23  ;;  %v3592_v36 = vpop.f32.mrf.mxu1 }
 0x1dd   :  { %v3529_v20 = vpop.f32.mrf.mxu0 }
 0x1de   :  { %v2605_v3 = vadd.f32 %v3591_v37, %v2508_v30  ;;  %v3530_v60 = vadd.f32 %v3529_v20, %v3528_v18  ;;  %v3593_v39 = vpop.f32.mrf.mxu1 }
 0x1df   :  { %v3531_v61 = vpop.f32.mrf.mxu0  ;;  %v3594_v57 = vadd.f32 %v3593_v39, %v3592_v36 }
 0x1e0   :  { %v3072_v56 = vpack.c.bf16 %v2605_v3, %v2602_v26  ;;  %v3595_v32 = vpop.f32.mrf.mxu1  ;;  %v2513_v19 = vadd.f32 %v3530_v60, %v4757_v40 }
 0x1e1   :  { %v3532_v48 = vpop.f32.mrf.mxu0 }
 0x1e2   :  { %3084 = vst [vmem:[%s4751_s2 + $0x30] sm:$0xff] %v3072_v56   ;;  %v3533_v43 = vadd.f32 %v3532_v48, %v3531_v61  ;;  %v3596_v24 = vpop.f32.mrf.mxu1  ;;  %v2610_v28 = vadd.f32 %v3594_v57, %v2513_v19 }
 0x1e3   :  { %v3597_v58 = vadd.f32 %v3596_v24, %v3595_v32 }
 0x1e4   :  { %v2516_v51 = vadd.f32 %v3533_v43, %v2419_v31 }
 0x1e6   :  { %v2613_v62 = vadd.f32 %v3597_v58, %v2516_v51 }
 0x1e8   :  { %v3077_v25 = vpack.c.bf16 %v2613_v62, %v2610_v28 }
 0x1ea   :  { %3085 = vst [vmem:[%s4751_s2 + $0x38] sm:$0xff] %v3077_v25  }

// kernel: generator_forward.65
= control target key start
LH: loop header
LB: loop body
LE: loop exit
PB: predicated region body
PF: predicated region fallthrough
CT: control target
= control target key end

     0   :  { %s400_s12 = smov 0   ;;  %s402_s13 = smov 0   ;;  %s450_s0 = inlined_call_operand.vmem [shape: bf16[2,16,128], index: 0, kind: input, shape index: {}]   ;;  %s451_s1 = inlined_call_operand.vmem [shape: f32[1,1,128], index: 1, kind: input, shape index: {}]   ;;  %s452_s2 = inlined_call_operand.vmem [shape: f32[1,1,128], index: 2, kind: input, shape index: {}]   ;;  %s453_s3 = inlined_call_operand.vmem [shape: f32[2,2,128], index: 3, kind: output, shape index: {}]  }
   0x1   :  { %s404_s14 = smov 0  }
   0x2 LB: > { %s25_s15 = sadd.s32 1, %s373_s13  ;;  %p317_p0 = scmp.ge.s32.totalorder %s377_s14, 1  ;;  %s377_s14 = sphi %s404_s14, %s13_s14   ;;  %s373_s13 = sphi %s402_s13, %s455_s13   ;;  %s369_s12 = sphi %s400_s12, %s454_s12  }
   0x3   : > { %p27_p1 = scmp.ge.s32.totalorder %s25_s15, 2  ;;  %p156_p2 = scmp.lt.s32.totalorder %s377_s14, 3 }
   0x5   : > { %s457_s15 = smov (%p27_p1, %s25_s15), 0  ;;  %p157_p3 = pnand %p317_p0, %p156_p2 }
   0x6   : > { %p184_p4 = scmp.lt.s32.totalorder (!%p157_p3), %s369_s12, 1 }
   0x7   : > { %160 = sbr.rel (%p157_p3) target bundleno = 71 (0x47), region = 32 }
   0xc   : > { %s459_s12 = smov (!%p184_p4, %s369_s12), 1  ;;  %v379_v0 = vmov 0.0   ;;  %v239_v31 = vld [vmem:[%s451_s1] sm:$0x1] }
   0xd   : > { %s320_s16 = sshll.u32 %s459_s12, 1  ;;  %s323_s17 = sshll.u32 %s459_s12, 3  ;;  %v241_v34 = vld [vmem:[%s452_s2] sm:$0x1] }
   0xe   : > { %s421_s20 = scalar_lea.vmem %s453_s3, %s320_s16  ;;  %s191_s23 = scalar_lea.vmem %s450_s0, %s323_s17 }
   0xf   : > { %201 = vst [vmem:[%s421_s20] sm:$0x3] %v379_v0  ;;  %v325_v1 = vld [vmem:[%s191_s23] sm:$0xff]  }
  0x10   : > { %v326_v2 = vunpack.c.l.bf16 %v325_v1  ;;  %v327_v3 = vunpack.c.h.bf16 %v325_v1 }
  0x12   : > { %v207_v4 = vadd.f32 %v327_v3, %v326_v2  ;;  %v217_v5 = vmul.f32 %v326_v2, %v326_v2  ;;  %v218_v6 = vmul.f32 %v327_v3, %v327_v3 }
  0x14   : > { %v208_v7 = vrot.slane %v207_v4, 4  ;;  %v219_v8 = vadd.f32 %v218_v6, %v217_v5 }
  0x16   : > { %v209_v9 = vadd.f32 %v208_v7, %v207_v4  ;;  %v220_v10 = vrot.slane %v219_v8, 4  ;;  %v206_v17 = vld [vmem:[%s421_s20] sm:$0x1]  ;;  %v216_v22 = vld [vmem:[%s421_s20 + $0x1] sm:$0x1] }
  0x18   : > { %v210_v11 = vrot.slane %v209_v9, 2  ;;  %v221_v12 = vadd.f32 %v220_v10, %v219_v8 }
  0x1a   : > { %v211_v13 = vadd.f32 %v210_v11, %v209_v9  ;;  %v222_v14 = vrot.slane %v221_v12, 2 }
  0x1c   : > { %v212_v15 = vrot.slane %v211_v13, 1  ;;  %v223_v16 = vadd.f32 %v222_v14, %v221_v12 }
  0x1e   : > { %v213_v18 = vadd.f32 %v212_v15, %v211_v13  ;;  %v224_v19 = vrot.slane %v223_v16, 1 }
  0x20   : > { %v214_v20 = vadd.f32 %v213_v18, %v206_v17  ;;  %v225_v21 = vadd.f32 %v224_v19, %v223_v16 }
  0x22   : > { %215 = vst [vmem:[%s421_s20] sm:$0x1] %v214_v20  ;;  %v226_v23 = vadd.f32 %v225_v21, %v216_v22 }
  0x24   : > { %227 = vst [vmem:[%s421_s20 + $0x1] sm:$0x1] %v226_v23 }
  0x29   : > { %v231_v24 = vld [vmem:[%s421_s20] sm:$0x1] }
  0x2a   : > { %v232_v25 = vmul.f32 0.0625, %v231_v24 }
  0x2b   : > { %v233_v26 = vld [vmem:[%s421_s20 + $0x1] sm:$0x1] }
  0x2c   : > { %v234_v27 = vmul.f32 0.0625, %v233_v26  ;;  %v235_v28 = vmul.f32 %v232_v25, %v232_v25 }
  0x2e   : > { %v236_v29 = vsub.f32 %v234_v27, %v235_v28 }
  0x30   : > { %v237_v30 = vadd.f32 1e-05, %v236_v29 }
  0x32   : > { %353 = vrsqrt.f32 %v237_v30 }
  0x3f   : > { %v354_v32 = vpop.eup %353 }
  0x40   : > { %v240_v33 = vmul.f32 %v354_v32, %v239_v31 }
  0x42   : > { %v242_v35 = vmul.f32 %v240_v33, %v232_v25  ;;  %244 = vst [vmem:[%s421_s20] sm:$0x1] %v240_v33 }
  0x44   : > { %v243_v36 = vsub.f32 %v241_v34, %v242_v35 }
  0x46   : > { %245 = vst [vmem:[%s421_s20 + $0x1] sm:$0x1] %v243_v36 }
  0x47 PF: > { %s13_s14 = sadd.s32 1, %s377_s14   ;;  %s454_s12 = smov %s373_s13 }
  0x48   : > { %p10_p5 = scmp.ge.s32.totalorder %s13_s14, 4   ;;  %s455_s13 = smov %s457_s15 }
  0x4a   :  { %12 = sbr.rel (!%p10_p5) target bundleno = 2 (0x2), region = 70 }

// kernel: generator_forward.66
= control target key start
LH: loop header
LB: loop body
LE: loop exit
PB: predicated region body
PF: predicated region fallthrough
CT: control target
= control target key end

     0   :  { %s421_s9 = smov 0   ;;  %s423_s10 = smov 0   ;;  %s454_s0 = inlined_call_operand.vmem [shape: bf16[2,16,128], index: 0, kind: input, shape index: {}]   ;;  %s455_s1 = inlined_call_operand.vmem [shape: f32[2,2,128], index: 1, kind: input, shape index: {}]   ;;  %s456_s2 = inlined_call_operand.vmem [shape: bf16[2,16,128], index: 2, kind: output, shape index: {}]  }
   0x1   :  { %s425_s11 = smov 0  }
   0x2 LB: > { %s24_s12 = sadd.s32 1, %s400_s10  ;;  %p333_p0 = scmp.ge.s32.totalorder %s404_s11, 1  ;;  %s404_s11 = sphi %s425_s11, %s12_s11   ;;  %s400_s10 = sphi %s423_s10, %s458_s10   ;;  %s396_s9 = sphi %s421_s9, %s457_s9  }
   0x3   : > { %p26_p1 = scmp.ge.s32.totalorder %s24_s12, 2  ;;  %p142_p2 = scmp.lt.s32.totalorder %s404_s11, 3 }
   0x5   : > { %s460_s12 = smov (%p26_p1, %s24_s12), 0  ;;  %p143_p3 = pnand %p333_p0, %p142_p2 }
   0x6   : > { %p177_p4 = scmp.lt.s32.totalorder (!%p143_p3), %s396_s9, 1 }
   0x7   : > { %146 = sbr.rel (%p143_p3) target bundleno = 27 (0x1b), region = 28 }
   0xc   : > { %s462_s9 = smov (!%p177_p4, %s396_s9), 1 }
   0xd   : > { %s345_s13 = sshll.u32 %s462_s9, 3  ;;  %s336_s14 = sshll.u32 %s462_s9, 1 }
   0xe   : > { %s184_s17 = scalar_lea.vmem %s454_s0, %s345_s13  ;;  %s189_s20 = scalar_lea.vmem %s455_s1, %s336_s14 }
   0xf   : > { %v350_v0 = vld [vmem:[%s184_s17] sm:$0xff]   ;;  %s198_s23 = scalar_lea.vmem %s456_s2, %s345_s13 }
  0x10   : > { %v339_v1 = vld [vmem:[%s189_s20] ss:$0 sm:$0xff]  ;;  %v351_v2 = vunpack.c.l.bf16 %v350_v0  ;;  %v352_v3 = vunpack.c.h.bf16 %v350_v0  ;;  %v340_v4 = vld [vmem:[%s189_s20 + $0x1] ss:$0 sm:$0xff] }
  0x12   : > { %v210_v5 = vmul.f32 %v351_v2, %v339_v1  ;;  %v211_v6 = vmul.f32 %v352_v3, %v339_v1 }
  0x14   : > { %v216_v7 = vadd.f32 %v340_v4, %v210_v5  ;;  %v217_v8 = vadd.f32 %v340_v4, %v211_v6 }
  0x16   : > { %v218_v9 = vmax.f32 %v216_v7, 0.0  ;;  %v219_v10 = vmax.f32 %v217_v8, 0.0 }
  0x18   : > { %v356_v11 = vpack.c.bf16 %v219_v10, %v218_v9 }
  0x1a   : > { %357 = vst [vmem:[%s198_s23] sm:$0xff] %v356_v11  }
  0x1b PF: > { %s12_s11 = sadd.s32 1, %s404_s11   ;;  %s457_s9 = smov %s400_s10 }
  0x1c   : > { %p9_p5 = scmp.ge.s32.totalorder %s12_s11, 4   ;;  %s458_s10 = smov %s460_s12 }
  0x1e   :  { %11 = sbr.rel (!%p9_p5) target bundleno = 2 (0x2), region = 61 }

// kernel: generator_forward.64
= control target key start
LH: loop header
LB: loop body
LE: loop exit
PB: predicated region body
PF: predicated region fallthrough
CT: control target
= control target key end

     0   :  { %s2703_s1 = inlined_call_operand.vmem [shape: bf16[2048,128], index: 1, kind: input, shape index: {}]   ;;  %s2704_s0 = inlined_call_operand.vmem [shape: bf16[32,2048], index: 0, kind: input, shape index: {}]   ;;  %s2705_s2 = inlined_call_operand.vmem [shape: bf16[32,128], index: 2, kind: output, shape index: {}]  }
   0x1   :  { %v2074_v0 = vld [vmem:[%s2703_s1 + $0x78] sm:$0xff]   ;;  %v2078_v4 = vld [vmem:[%s2703_s1 + $0x70] sm:$0xff]   ;;  %v2082_v8 = vld [vmem:[%s2703_s1 + $0x68] sm:$0xff]  }
   0x2   :  { %v2075_v1 = vld [vmem:[%s2703_s1 + $0xf8] sm:$0xff]   ;;  %1850 = vmatprep.subr.bf16.mxu0 %v2074_v0  ;;  %v2079_v5 = vld [vmem:[%s2703_s1 + $0xf0] sm:$0xff]   ;;  %v2083_v9 = vld [vmem:[%s2703_s1 + $0xe8] sm:$0xff]  }
   0x3   :  { %v2076_v2 = vld [vmem:[%s2703_s1 + $0x38] sm:$0xff]   ;;  %1878 = vmatprep.subr.bf16.mxu1 %v2075_v1  ;;  %v2080_v6 = vld [vmem:[%s2703_s1 + $0x30] sm:$0xff]   ;;  %v2084_v10 = vld [vmem:[%s2703_s1 + $0x28] sm:$0xff]  }
   0x4   :  { %v2077_v3 = vld [vmem:[%s2703_s1 + $0xb8] sm:$0xff]   ;;  %1851 = vmatpush3.bf16.msra.mxu0 %v2076_v2  ;;  %v2081_v7 = vld [vmem:[%s2703_s1 + $0xb0] sm:$0xff]   ;;  %v2085_v11 = vld [vmem:[%s2703_s1 + $0xa8] sm:$0xff]  }
   0x5   :  { %1879 = vmatpush3.bf16.msra.mxu1 %v2077_v3  ;;  %1852 = vmatprep.subr.bf16.mxu0 %v2078_v4  ;;  %v2086_v12 = vld [vmem:[%s2703_s1 + $0x60] sm:$0xff]   ;;  %v2090_v16 = vld [vmem:[%s2703_s1 + $0x58] sm:$0xff]   ;;  %v2094_v20 = vld [vmem:[%s2703_s1 + $0x50] sm:$0xff]  }
   0x6   :  { %1880 = vmatprep.subr.bf16.mxu1 %v2079_v5  ;;  %v2087_v13 = vld [vmem:[%s2703_s1 + $0xe0] sm:$0xff]   ;;  %v2091_v17 = vld [vmem:[%s2703_s1 + $0xd8] sm:$0xff]   ;;  %v2095_v21 = vld [vmem:[%s2703_s1 + $0xd0] sm:$0xff]  }
   0x7   :  { %v2088_v14 = vld [vmem:[%s2703_s1 + $0x20] sm:$0xff]   ;;  %v2092_v18 = vld [vmem:[%s2703_s1 + $0x18] sm:$0xff]   ;;  %v2096_v22 = vld [vmem:[%s2703_s1 + $0x10] sm:$0xff]  }
   0x8   :  { %1853 = vmatpush3.bf16.msra.mxu0 %v2080_v6  ;;  %v2089_v15 = vld [vmem:[%s2703_s1 + $0xa0] sm:$0xff]   ;;  %v2093_v19 = vld [vmem:[%s2703_s1 + $0x98] sm:$0xff]   ;;  %v2097_v23 = vld [vmem:[%s2703_s1 + $0x90] sm:$0xff]  }
   0x9   :  { %1881 = vmatpush3.bf16.msra.mxu1 %v2081_v7  ;;  %1854 = vmatprep.subr.bf16.mxu0 %v2082_v8  ;;  %v2098_v24 = vld [vmem:[%s2703_s1 + $0x48] sm:$0xff]   ;;  %v2102_v28 = vld [vmem:[%s2703_s1 + $0x40] sm:$0xff]   ;;  %v2106_v40 = vld [vmem:[%s2703_s1 + $0x178] sm:$0xff]  }
   0xa   :  { %1882 = vmatprep.subr.bf16.mxu1 %v2083_v9  ;;  %v2099_v25 = vld [vmem:[%s2703_s1 + $0xc8] sm:$0xff]   ;;  %v2103_v29 = vld [vmem:[%s2703_s1 + $0xc0] sm:$0xff]   ;;  %v2107_v41 = vld [vmem:[%s2703_s1 + $0x1f8] sm:$0xff]  }
   0xb   :  { %v2100_v26 = vld [vmem:[%s2703_s1 + $0x8] sm:$0xff]   ;;  %v2104_v30 = vld [vmem:[%s2703_s1] sm:$0xff]   ;;  %v2108_v42 = vld [vmem:[%s2703_s1 + $0x138] sm:$0xff]  }
   0xc   :  { %1855 = vmatpush3.bf16.msra.mxu0 %v2084_v10  ;;  %v2101_v27 = vld [vmem:[%s2703_s1 + $0x88] sm:$0xff]   ;;  %v2105_v31 = vld [vmem:[%s2703_s1 + $0x80] sm:$0xff]   ;;  %v2109_v43 = vld [vmem:[%s2703_s1 + $0x1b8] sm:$0xff]  }
   0xd   :  { %1883 = vmatpush3.bf16.msra.mxu1 %v2085_v11  ;;  %1856 = vmatprep.subr.bf16.mxu0 %v2086_v12  ;;  %v24_v32 = vld [vmem:[%s2704_s0] sm:$0xff]  ;;  %v25_v34 = vld [vmem:[%s2704_s0 + $0x8] sm:$0xff]  ;;  %v2110_v44 = vld [vmem:[%s2703_s1 + $0x170] sm:$0xff]  }
   0xe   :  { %1884 = vmatprep.subr.bf16.mxu1 %v2087_v13  ;;  %v32_v33 = vld [vmem:[%s2704_s0 + $0x40] sm:$0xff]  ;;  %v33_v37 = vld [vmem:[%s2704_s0 + $0x48] sm:$0xff]  ;;  %v2111_v45 = vld [vmem:[%s2703_s1 + $0x1f0] sm:$0xff]  }
   0xf   :  { %v1671_v35 = vcombine.low %v24_v32, %v32_v33  ;;  %v1672_v36 = vcombine.high %v24_v32, %v32_v33  ;;  %v1673_v38 = vcombine.low %v25_v34, %v33_v37  ;;  %v1674_v39 = vcombine.high %v25_v34, %v33_v37  ;;  %v2112_v46 = vld [vmem:[%s2703_s1 + $0x130] sm:$0xff]   ;;  %v2114_v48 = vld [vmem:[%s2703_s1 + $0x168] sm:$0xff]   ;;  %v2118_v52 = vld [vmem:[%s2703_s1 + $0x160] sm:$0xff]  }
  0x10   :  { %1857 = vmatpush3.bf16.msra.mxu0 %v2088_v14  ;;  %v2113_v47 = vld [vmem:[%s2703_s1 + $0x1b0] sm:$0xff]   ;;  %v2115_v49 = vld [vmem:[%s2703_s1 + $0x1e8] sm:$0xff]   ;;  %v2119_v53 = vld [vmem:[%s2703_s1 + $0x1e0] sm:$0xff]  }
  0x11   :  { %1885 = vmatpush3.bf16.msra.mxu1 %v2089_v15  ;;  %1858 = vmatprep.subr.bf16.mxu0 %v2090_v16  ;;  %v2116_v50 = vld [vmem:[%s2703_s1 + $0x128] sm:$0xff]   ;;  %v2120_v54 = vld [vmem:[%s2703_s1 + $0x120] sm:$0xff]   ;;  %v2122_v56 = vld [vmem:[%s2703_s1 + $0x158] sm:$0xff]  }
  0x12   :  { %1886 = vmatprep.subr.bf16.mxu1 %v2091_v17  ;;  %1272 = vmatprep.mubr.bf16.mxu0 %v1672_v36  ;;  %v2117_v51 = vld [vmem:[%s2703_s1 + $0x1a8] sm:$0xff]   ;;  %v2121_v55 = vld [vmem:[%s2703_s1 + $0x1a0] sm:$0xff]   ;;  %v2123_v57 = vld [vmem:[%s2703_s1 + $0x1d8] sm:$0xff]  }
  0x13   :  { %1321 = vmatprep.mubr.bf16.mxu1 %v1674_v39  ;;  %v2124_v58 = vld [vmem:[%s2703_s1 + $0x118] sm:$0xff]   ;;  %v40_v60 = vld [vmem:[%s2704_s0 + $0x80] sm:$0xff]  ;;  %v41_v63 = vld [vmem:[%s2704_s0 + $0x88] sm:$0xff] }
  0x14   :  { %1859 = vmatpush3.bf16.msra.mxu0 %v2092_v18  ;;  %v2125_v59 = vld [vmem:[%s2703_s1 + $0x198] sm:$0xff]   ;;  %v48_v61 = vld [vmem:[%s2704_s0 + $0xc0] sm:$0xff]  ;;  %v49_v0 = vld [vmem:[%s2704_s0 + $0xc8] sm:$0xff] }
  0x15   :  { %1887 = vmatpush3.bf16.msra.mxu1 %v2093_v19  ;;  %1860 = vmatprep.subr.bf16.mxu0 %v2094_v20  ;;  %v1688_v62 = vcombine.high %v40_v60, %v48_v61  ;;  %v1687_v1 = vcombine.low %v40_v60, %v48_v61  ;;  %v1690_v2 = vcombine.high %v41_v63, %v49_v0  ;;  %v2126_v4 = vld [vmem:[%s2703_s1 + $0x150] sm:$0xff]   ;;  %v2130_v8 = vld [vmem:[%s2703_s1 + $0x148] sm:$0xff]   ;;  %v2134_v12 = vld [vmem:[%s2703_s1 + $0x140] sm:$0xff]  }
  0x16   :  { %1888 = vmatprep.subr.bf16.mxu1 %v2095_v21  ;;  %v1689_v3 = vcombine.low %v41_v63, %v49_v0  ;;  %v2127_v5 = vld [vmem:[%s2703_s1 + $0x1d0] sm:$0xff]   ;;  %v2131_v9 = vld [vmem:[%s2703_s1 + $0x1c8] sm:$0xff]   ;;  %v2135_v13 = vld [vmem:[%s2703_s1 + $0x1c0] sm:$0xff]  }
  0x17   :  { %v2128_v6 = vld [vmem:[%s2703_s1 + $0x110] sm:$0xff]   ;;  %v2132_v10 = vld [vmem:[%s2703_s1 + $0x108] sm:$0xff]   ;;  %v2136_v14 = vld [vmem:[%s2703_s1 + $0x100] sm:$0xff]  }
  0x18   :  { %1861 = vmatpush3.bf16.msra.mxu0 %v2096_v22  ;;  %v2129_v7 = vld [vmem:[%s2703_s1 + $0x190] sm:$0xff]   ;;  %v2133_v11 = vld [vmem:[%s2703_s1 + $0x188] sm:$0xff]   ;;  %v2137_v15 = vld [vmem:[%s2703_s1 + $0x180] sm:$0xff]  }
  0x19   :  { %1889 = vmatpush3.bf16.msra.mxu1 %v2097_v23  ;;  %1862 = vmatprep.subr.bf16.mxu0 %v2098_v24  ;;  %v26_v16 = vld [vmem:[%s2704_s0 + $0x10] sm:$0xff]  ;;  %v27_v18 = vld [vmem:[%s2704_s0 + $0x18] sm:$0xff]  ;;  %v2146_v36 = vld [vmem:[%s2703_s1 + $0x268] sm:$0xff]  }
  0x1a   :  { %1890 = vmatprep.subr.bf16.mxu1 %v2099_v25  ;;  %v34_v17 = vld [vmem:[%s2704_s0 + $0x50] sm:$0xff]  ;;  %v35_v19 = vld [vmem:[%s2704_s0 + $0x58] sm:$0xff]  ;;  %v2147_v37 = vld [vmem:[%s2703_s1 + $0x2e8] sm:$0xff]  }
  0x1b   :  { %v1675_v20 = vcombine.low %v26_v16, %v34_v17  ;;  %v1676_v21 = vcombine.high %v26_v16, %v34_v17  ;;  %v1677_v22 = vcombine.low %v27_v18, %v35_v19  ;;  %v1678_v23 = vcombine.high %v27_v18, %v35_v19  ;;  %v2138_v24 = vld [vmem:[%s2703_s1 + $0x278] sm:$0xff]   ;;  %v42_v32 = vld [vmem:[%s2704_s0 + $0x90] sm:$0xff]  ;;  %v2166_v60 = vld [vmem:[%s2703_s1 + $0x240] sm:$0xff]  }
  0x1c   :  { %1863 = vmatpush3.bf16.msra.mxu0 %v2100_v26  ;;  %v2139_v25 = vld [vmem:[%s2703_s1 + $0x2f8] sm:$0xff]   ;;  %v50_v33 = vld [vmem:[%s2704_s0 + $0xd0] sm:$0xff]  ;;  %v2167_v61 = vld [vmem:[%s2703_s1 + $0x2c0] sm:$0xff]  }
  0x1d   :  { %1891 = vmatpush3.bf16.msra.mxu1 %v2101_v27  ;;  %1864 = vmatprep.subr.bf16.mxu0 %v2102_v28  ;;  %v2140_v26 = vld [vmem:[%s2703_s1 + $0x238] sm:$0xff]   ;;  %v2142_v28 = vld [vmem:[%s2703_s1 + $0x270] sm:$0xff]   ;;  %v1692_v34 = vcombine.high %v42_v32, %v50_v33  ;;  %v2169_v63 = vld [vmem:[%s2703_s1 + $0x280] sm:$0xff]  }
  0x1e   :  { %1892 = vmatprep.subr.bf16.mxu1 %v2103_v29  ;;  %v2141_v27 = vld [vmem:[%s2703_s1 + $0x2b8] sm:$0xff]   ;;  %v2143_v29 = vld [vmem:[%s2703_s1 + $0x2f0] sm:$0xff]   ;;  %v28_v0 = vld [vmem:[%s2704_s0 + $0x20] sm:$0xff] }
  0x1f   :  { %v51_v39 = vld [vmem:[%s2704_s0 + $0xd8] sm:$0xff]  ;;  %v44_v16 = vld [vmem:[%s2704_s0 + $0xa0] sm:$0xff] }
  0x20   :  { %1865 = vmatpush3.bf16.msra.mxu0 %v2104_v30  ;;  %v2144_v30 = vld [vmem:[%s2703_s1 + $0x230] sm:$0xff]   ;;  %v52_v17 = vld [vmem:[%s2704_s0 + $0xe0] sm:$0xff] }
  0x21   :  { %1893 = vmatpush3.bf16.msra.mxu1 %v2105_v31  ;;  %1906 = vmatprep.subr.bf16.mxu0 %v2106_v40  ;;  %v2145_v31 = vld [vmem:[%s2703_s1 + $0x2b0] sm:$0xff]   ;;  %v1696_v18 = vcombine.high %v44_v16, %v52_v17  ;;  %v1695_v19 = vcombine.low %v44_v16, %v52_v17 }
  0x22   :  { %1934 = vmatprep.subr.bf16.mxu1 %v2107_v41  ;;  %v2148_v41 = vld [vmem:[%s2703_s1 + $0x228] sm:$0xff]  }
  0x23   :  { %1273 = vmatmul.mubr.bf16.vlgmr.msra.gmra.mxu0 %v1671_v35  ;;  %v1691_v35 = vcombine.low %v42_v32, %v50_v33  ;;  %v2186_v32 = vld [vmem:[%s2703_s1 + $0x358] sm:$0xff]  }
  0x24   :  { %1322 = vmatmul.mubr.bf16.vlgmr.msra.gmra.mxu1 %v1673_v38  ;;  %1907 = vmatpush3.bf16.msra.mxu0 %v2108_v42  ;;  %v43_v38 = vld [vmem:[%s2704_s0 + $0x98] sm:$0xff] }
  0x25   :  { %1935 = vmatpush3.bf16.msra.mxu1 %v2109_v43  ;;  %1908 = vmatprep.subr.bf16.mxu0 %v2110_v44  ;;  %v1694_v40 = vcombine.high %v43_v38, %v51_v39  ;;  %v1693_v42 = vcombine.low %v43_v38, %v51_v39  ;;  %v2149_v43 = vld [vmem:[%s2703_s1 + $0x2a8] sm:$0xff]   ;;  %v2150_v44 = vld [vmem:[%s2703_s1 + $0x260] sm:$0xff]   ;;  %v2187_v33 = vld [vmem:[%s2703_s1 + $0x3d8] sm:$0xff]  }
  0x26   :  { %1936 = vmatprep.subr.bf16.mxu1 %v2111_v45  ;;  %1280 = vmatprep.mubr.bf16.mxu0 %v1688_v62  ;;  %v2151_v45 = vld [vmem:[%s2703_s1 + $0x2e0] sm:$0xff]   ;;  %v2192_v38 = vld [vmem:[%s2703_s1 + $0x310] sm:$0xff]  }
  0x27   :  { %1329 = vmatprep.mubr.bf16.mxu1 %v1690_v2  ;;  %v2168_v62 = vld [vmem:[%s2703_s1 + $0x200] sm:$0xff]   ;;  %v2193_v39 = vld [vmem:[%s2703_s1 + $0x390] sm:$0xff]  }
  0x28   :  { %1909 = vmatpush3.bf16.msra.mxu0 %v2112_v46  ;;  %v2152_v46 = vld [vmem:[%s2703_s1 + $0x220] sm:$0xff]  }
  0x29   :  { %1937 = vmatpush3.bf16.msra.mxu1 %v2113_v47  ;;  %1910 = vmatprep.subr.bf16.mxu0 %v2114_v48  ;;  %v2153_v47 = vld [vmem:[%s2703_s1 + $0x2a0] sm:$0xff]   ;;  %v2154_v48 = vld [vmem:[%s2703_s1 + $0x258] sm:$0xff]  }
  0x2a   :  { %1938 = vmatprep.subr.bf16.mxu1 %v2115_v49  ;;  %v2155_v49 = vld [vmem:[%s2703_s1 + $0x2d8] sm:$0xff]  }
  0x2b   :  { %1281 = vmatmul.mubr.bf16.gmra.mxu0 %v1687_v1  ;;  %v36_v1 = vld [vmem:[%s2704_s0 + $0x60] sm:$0xff] }
  0x2c   :  { %1911 = vmatpush3.bf16.msra.mxu0 %v2116_v50  ;;  %1330 = vmatmul.mubr.bf16.gmra.mxu1 %v1689_v3  ;;  %v2156_v50 = vld [vmem:[%s2703_s1 + $0x218] sm:$0xff]   ;;  %v1679_v2 = vcombine.low %v28_v0, %v36_v1  ;;  %v1680_v3 = vcombine.high %v28_v0, %v36_v1 }
  0x2d   :  { %1939 = vmatpush3.bf16.msra.mxu1 %v2117_v51  ;;  %1912 = vmatprep.subr.bf16.mxu0 %v2118_v52  ;;  %v2157_v51 = vld [vmem:[%s2703_s1 + $0x298] sm:$0xff]   ;;  %v2158_v52 = vld [vmem:[%s2703_s1 + $0x250] sm:$0xff]  }
  0x2e   :  { %1940 = vmatprep.subr.bf16.mxu1 %v2119_v53  ;;  %1370 = vmatprep.mubr.bf16.mxu0 %v1676_v21  ;;  %v2159_v53 = vld [vmem:[%s2703_s1 + $0x2d0] sm:$0xff]   ;;  %v2179_v21 = vld [vmem:[%s2703_s1 + $0x3e8] sm:$0xff]  }
  0x2f   :  { %1419 = vmatprep.mubr.bf16.mxu1 %v1678_v23  ;;  %v53_v23 = vld [vmem:[%s2704_s0 + $0xe8] sm:$0xff] }
  0x30   :  { %1913 = vmatpush3.bf16.msra.mxu0 %v2120_v54  ;;  %v2160_v54 = vld [vmem:[%s2703_s1 + $0x210] sm:$0xff]  }
  0x31   :  { %1941 = vmatpush3.bf16.msra.mxu1 %v2121_v55  ;;  %1914 = vmatprep.subr.bf16.mxu0 %v2122_v56  ;;  %v2161_v55 = vld [vmem:[%s2703_s1 + $0x290] sm:$0xff]   ;;  %v2162_v56 = vld [vmem:[%s2703_s1 + $0x248] sm:$0xff]  }
  0x32   :  { %1942 = vmatprep.subr.bf16.mxu1 %v2123_v57  ;;  %v2163_v57 = vld [vmem:[%s2703_s1 + $0x2c8] sm:$0xff]  }
  0x34   :  { %1915 = vmatpush3.bf16.msra.mxu0 %v2124_v58  ;;  %v2164_v58 = vld [vmem:[%s2703_s1 + $0x208] sm:$0xff]  }
  0x35   :  { %1943 = vmatpush3.bf16.msra.mxu1 %v2125_v59  ;;  %1916 = vmatprep.subr.bf16.mxu0 %v2126_v4  ;;  %v2165_v59 = vld [vmem:[%s2703_s1 + $0x288] sm:$0xff]  }
  0x36   :  { %1944 = vmatprep.subr.bf16.mxu1 %v2127_v5  ;;  %v29_v4 = vld [vmem:[%s2704_s0 + $0x28] sm:$0xff] }
  0x37   :  { %v37_v5 = vld [vmem:[%s2704_s0 + $0x68] sm:$0xff] }
  0x38   :  { %1917 = vmatpush3.bf16.msra.mxu0 %v2128_v6  ;;  %v1681_v6 = vcombine.low %v29_v4, %v37_v5 }
  0x39   :  { %1945 = vmatpush3.bf16.msra.mxu1 %v2129_v7  ;;  %1918 = vmatprep.subr.bf16.mxu0 %v2130_v8  ;;  %v1682_v7 = vcombine.high %v29_v4, %v37_v5  ;;  %v2170_v8 = vld [vmem:[%s2703_s1 + $0x378] sm:$0xff]  }
  0x3a   :  { %1946 = vmatprep.subr.bf16.mxu1 %v2131_v9  ;;  %v2171_v9 = vld [vmem:[%s2703_s1 + $0x3f8] sm:$0xff]  }
  0x3c   :  { %1919 = vmatpush3.bf16.msra.mxu0 %v2132_v10  ;;  %v2172_v10 = vld [vmem:[%s2703_s1 + $0x338] sm:$0xff]  }
  0x3d   :  { %1947 = vmatpush3.bf16.msra.mxu1 %v2133_v11  ;;  %1920 = vmatprep.subr.bf16.mxu0 %v2134_v12  ;;  %v2173_v11 = vld [vmem:[%s2703_s1 + $0x3b8] sm:$0xff]   ;;  %v2174_v12 = vld [vmem:[%s2703_s1 + $0x370] sm:$0xff]  }
  0x3e   :  { %1948 = vmatprep.subr.bf16.mxu1 %v2135_v13  ;;  %v2175_v13 = vld [vmem:[%s2703_s1 + $0x3f0] sm:$0xff]  }
  0x40   :  { %1921 = vmatpush3.bf16.msra.mxu0 %v2136_v14  ;;  %v2176_v14 = vld [vmem:[%s2703_s1 + $0x330] sm:$0xff]  }
  0x41   :  { %1949 = vmatpush3.bf16.msra.mxu1 %v2137_v15  ;;  %1962 = vmatprep.subr.bf16.mxu0 %v2138_v24  ;;  %v2177_v15 = vld [vmem:[%s2703_s1 + $0x3b0] sm:$0xff]  }
  0x42   :  { %1990 = vmatprep.subr.bf16.mxu1 %v2139_v25  ;;  %v2180_v25 = vld [vmem:[%s2703_s1 + $0x328] sm:$0xff]  }
  0x43   :  { %1371 = vmatmul.mubr.bf16.vlgmr.msra.gmra.mxu0 %v1675_v20  ;;  %v2178_v20 = vld [vmem:[%s2703_s1 + $0x368] sm:$0xff]  }
  0x44   :  { %1420 = vmatmul.mubr.bf16.vlgmr.msra.gmra.mxu1 %v1677_v22  ;;  %1963 = vmatpush3.bf16.msra.mxu0 %v2140_v26  ;;  %v45_v22 = vld [vmem:[%s2704_s0 + $0xa8] sm:$0xff] }
  0x45   :  { %1991 = vmatpush3.bf16.msra.mxu1 %v2141_v27  ;;  %1964 = vmatprep.subr.bf16.mxu0 %v2142_v28  ;;  %v1698_v24 = vcombine.high %v45_v22, %v53_v23  ;;  %v1697_v26 = vcombine.low %v45_v22, %v53_v23  ;;  %v2181_v27 = vld [vmem:[%s2703_s1 + $0x3a8] sm:$0xff]   ;;  %v2182_v28 = vld [vmem:[%s2703_s1 + $0x360] sm:$0xff]  }
  0x46   :  { %1992 = vmatprep.subr.bf16.mxu1 %v2143_v29  ;;  %1378 = vmatprep.mubr.bf16.mxu0 %v1692_v34  ;;  %v2183_v29 = vld [vmem:[%s2703_s1 + $0x3e0] sm:$0xff]   ;;  %v2188_v34 = vld [vmem:[%s2703_s1 + $0x318] sm:$0xff]  }
  0x47   :  { %1427 = vmatprep.mubr.bf16.mxu1 %v1694_v40  ;;  %v2194_v40 = vld [vmem:[%s2703_s1 + $0x348] sm:$0xff]  }
  0x48   :  { %1965 = vmatpush3.bf16.msra.mxu0 %v2144_v30  ;;  %v2184_v30 = vld [vmem:[%s2703_s1 + $0x320] sm:$0xff]  }
  0x49   :  { %1993 = vmatpush3.bf16.msra.mxu1 %v2145_v31  ;;  %1966 = vmatprep.subr.bf16.mxu0 %v2146_v36  ;;  %v2185_v31 = vld [vmem:[%s2703_s1 + $0x3a0] sm:$0xff]   ;;  %v2190_v36 = vld [vmem:[%s2703_s1 + $0x350] sm:$0xff]  }
  0x4a   :  { %1994 = vmatprep.subr.bf16.mxu1 %v2147_v37  ;;  %v2191_v37 = vld [vmem:[%s2703_s1 + $0x3d0] sm:$0xff]  }
  0x4b   :  { %1379 = vmatmul.mubr.bf16.gmra.mxu0 %v1691_v35  ;;  %v2189_v35 = vld [vmem:[%s2703_s1 + $0x398] sm:$0xff]  }
  0x4c   :  { %1967 = vmatpush3.bf16.msra.mxu0 %v2148_v41  ;;  %1428 = vmatmul.mubr.bf16.gmra.mxu1 %v1693_v42  ;;  %v2195_v41 = vld [vmem:[%s2703_s1 + $0x3c8] sm:$0xff]  }
  0x4d   :  { %1995 = vmatpush3.bf16.msra.mxu1 %v2149_v43  ;;  %1968 = vmatprep.subr.bf16.mxu0 %v2150_v44  ;;  %v2196_v42 = vld [vmem:[%s2703_s1 + $0x308] sm:$0xff]   ;;  %v2198_v44 = vld [vmem:[%s2703_s1 + $0x340] sm:$0xff]  }
  0x4e   :  { %1996 = vmatprep.subr.bf16.mxu1 %v2151_v45  ;;  %1468 = vmatprep.mubr.bf16.mxu0 %v1680_v3  ;;  %v2197_v43 = vld [vmem:[%s2703_s1 + $0x388] sm:$0xff]   ;;  %v2199_v45 = vld [vmem:[%s2703_s1 + $0x3c0] sm:$0xff]  }
  0x4f   :  { %1517 = vmatprep.mubr.bf16.mxu1 %v1682_v7 }
  0x50   :  { %1969 = vmatpush3.bf16.msra.mxu0 %v2152_v46  ;;  %v2200_v46 = vld [vmem:[%s2703_s1 + $0x300] sm:$0xff]  }
  0x51   :  { %1997 = vmatpush3.bf16.msra.mxu1 %v2153_v47  ;;  %1970 = vmatprep.subr.bf16.mxu0 %v2154_v48  ;;  %v2201_v47 = vld [vmem:[%s2703_s1 + $0x380] sm:$0xff]   ;;  %v30_v48 = vld [vmem:[%s2704_s0 + $0x30] sm:$0xff] }
  0x52   :  { %1998 = vmatprep.subr.bf16.mxu1 %v2155_v49  ;;  %v38_v49 = vld [vmem:[%s2704_s0 + $0x70] sm:$0xff] }
  0x54   :  { %1971 = vmatpush3.bf16.msra.mxu0 %v2156_v50  ;;  %v31_v50 = vld [vmem:[%s2704_s0 + $0x38] sm:$0xff] }
  0x55   :  { %1999 = vmatpush3.bf16.msra.mxu1 %v2157_v51  ;;  %1972 = vmatprep.subr.bf16.mxu0 %v2158_v52  ;;  %v1683_v51 = vcombine.low %v30_v48, %v38_v49  ;;  %v1684_v52 = vcombine.high %v30_v48, %v38_v49 }
  0x56   :  { %2000 = vmatprep.subr.bf16.mxu1 %v2159_v53  ;;  %v39_v53 = vld [vmem:[%s2704_s0 + $0x78] sm:$0xff] }
  0x58   :  { %1973 = vmatpush3.bf16.msra.mxu0 %v2160_v54  ;;  %v46_v54 = vld [vmem:[%s2704_s0 + $0xb0] sm:$0xff] }
  0x59   :  { %2001 = vmatpush3.bf16.msra.mxu1 %v2161_v55  ;;  %1974 = vmatprep.subr.bf16.mxu0 %v2162_v56  ;;  %v54_v55 = vld [vmem:[%s2704_s0 + $0xf0] sm:$0xff]  ;;  %v1685_v56 = vcombine.low %v31_v50, %v39_v53 }
  0x5a   :  { %2002 = vmatprep.subr.bf16.mxu1 %v2163_v57  ;;  %v1686_v57 = vcombine.high %v31_v50, %v39_v53 }
  0x5c   :  { %1975 = vmatpush3.bf16.msra.mxu0 %v2164_v58  ;;  %v1700_v58 = vcombine.high %v46_v54, %v54_v55 }
  0x5d   :  { %2003 = vmatpush3.bf16.msra.mxu1 %v2165_v59  ;;  %1976 = vmatprep.subr.bf16.mxu0 %v2166_v60  ;;  %v47_v59 = vld [vmem:[%s2704_s0 + $0xb8] sm:$0xff] }
  0x5e   :  { %2004 = vmatprep.subr.bf16.mxu1 %v2167_v61  ;;  %v55_v60 = vld [vmem:[%s2704_s0 + $0xf8] sm:$0xff] }
  0x5f   :  { %v1702_v61 = vcombine.high %v47_v59, %v55_v60 }
  0x60   :  { %1977 = vmatpush3.bf16.msra.mxu0 %v2168_v62  ;;  %v1699_v62 = vcombine.low %v46_v54, %v54_v55 }
  0x61   :  { %2005 = vmatpush3.bf16.msra.mxu1 %v2169_v63  ;;  %2018 = vmatprep.subr.bf16.mxu0 %v2170_v8  ;;  %v1701_v63 = vcombine.low %v47_v59, %v55_v60 }
  0x62   :  { %2046 = vmatprep.subr.bf16.mxu1 %v2171_v9 }
  0x63   :  { %1469 = vmatmul.mubr.bf16.vlgmr.msra.gmra.mxu0 %v1679_v2 }
  0x64   :  { %1518 = vmatmul.mubr.bf16.vlgmr.msra.gmra.mxu1 %v1681_v6  ;;  %2019 = vmatpush3.bf16.msra.mxu0 %v2172_v10 }
  0x65   :  { %2047 = vmatpush3.bf16.msra.mxu1 %v2173_v11  ;;  %2020 = vmatprep.subr.bf16.mxu0 %v2174_v12 }
  0x66   :  { %2048 = vmatprep.subr.bf16.mxu1 %v2175_v13  ;;  %1476 = vmatprep.mubr.bf16.mxu0 %v1696_v18 }
  0x67   :  { %1525 = vmatprep.mubr.bf16.mxu1 %v1698_v24 }
  0x68   :  { %2021 = vmatpush3.bf16.msra.mxu0 %v2176_v14 }
  0x69   :  { %2049 = vmatpush3.bf16.msra.mxu1 %v2177_v15  ;;  %2022 = vmatprep.subr.bf16.mxu0 %v2178_v20 }
  0x6a   :  { %2050 = vmatprep.subr.bf16.mxu1 %v2179_v21 }
  0x6b   :  { %1477 = vmatmul.mubr.bf16.gmra.mxu0 %v1695_v19 }
  0x6c   :  { %2023 = vmatpush3.bf16.msra.mxu0 %v2180_v25  ;;  %1526 = vmatmul.mubr.bf16.gmra.mxu1 %v1697_v26 }
  0x6d   :  { %2051 = vmatpush3.bf16.msra.mxu1 %v2181_v27  ;;  %2024 = vmatprep.subr.bf16.mxu0 %v2182_v28 }
  0x6e   :  { %2052 = vmatprep.subr.bf16.mxu1 %v2183_v29  ;;  %1566 = vmatprep.mubr.bf16.mxu0 %v1684_v52 }
  0x6f   :  { %1615 = vmatprep.mubr.bf16.mxu1 %v1686_v57 }
  0x70   :  { %2025 = vmatpush3.bf16.msra.mxu0 %v2184_v30 }
  0x71   :  { %2053 = vmatpush3.bf16.msra.mxu1 %v2185_v31  ;;  %2026 = vmatprep.subr.bf16.mxu0 %v2186_v32 }
  0x72   :  { %2054 = vmatprep.subr.bf16.mxu1 %v2187_v33 }
  0x74   :  { %2027 = vmatpush3.bf16.msra.mxu0 %v2188_v34 }
  0x75   :  { %2055 = vmatpush3.bf16.msra.mxu1 %v2189_v35  ;;  %2028 = vmatprep.subr.bf16.mxu0 %v2190_v36 }
  0x76   :  { %2056 = vmatprep.subr.bf16.mxu1 %v2191_v37 }
  0x78   :  { %2029 = vmatpush3.bf16.msra.mxu0 %v2192_v38 }
  0x79   :  { %2057 = vmatpush3.bf16.msra.mxu1 %v2193_v39  ;;  %2030 = vmatprep.subr.bf16.mxu0 %v2194_v40 }
  0x7a   :  { %2058 = vmatprep.subr.bf16.mxu1 %v2195_v41 }
  0x7c   :  { %2031 = vmatpush3.bf16.msra.mxu0 %v2196_v42 }
  0x7d   :  { %2059 = vmatpush3.bf16.msra.mxu1 %v2197_v43  ;;  %2032 = vmatprep.subr.bf16.mxu0 %v2198_v44 }
  0x7e   :  { %2060 = vmatprep.subr.bf16.mxu1 %v2199_v45 }
  0x80   :  { %2033 = vmatpush3.bf16.msra.mxu0 %v2200_v46 }
  0x81   :  { %2061 = vmatpush3.bf16.msra.mxu1 %v2201_v47 }
  0x83   :  { %1567 = vmatmul.mubr.bf16.vlgmr.msra.gmra.mxu0 %v1683_v51 }
  0x84   :  { %1616 = vmatmul.mubr.bf16.vlgmr.msra.gmra.mxu1 %v1685_v56  ;;  %1574 = vmatprep.mubr.bf16.mxu0 %v1700_v58 }
  0x85   :  { %1623 = vmatprep.mubr.bf16.mxu1 %v1702_v61 }
  0x8b   :  { %1575 = vmatmul.mubr.bf16.gmra.mxu0 %v1699_v62 }
  0x8c   :  { %1624 = vmatmul.mubr.bf16.gmra.mxu1 %v1701_v63 }
  0xe3   :  { %v1866_v0 = vpop.f32.mrf.mxu0 }
  0xe4   :  { %v1894_v2 = vpop.f32.mrf.mxu1 }
  0xe5   :  { %v1867_v1 = vpop.f32.mrf.mxu0 }
  0xe6   :  { %v1895_v4 = vpop.f32.mrf.mxu1  ;;  %v1868_v42 = vadd.f32 %v1867_v1, %v1866_v0 }
  0xe7   :  { %v1869_v3 = vpop.f32.mrf.mxu0  ;;  %v1896_v43 = vadd.f32 %v1895_v4, %v1894_v2 }
  0xe8   :  { %v1897_v6 = vpop.f32.mrf.mxu1 }
  0xe9   :  { %v1870_v5 = vpop.f32.mrf.mxu0  ;;  %v1324_v49 = vadd.f32 %v1896_v43, %v1868_v42 }
  0xea   :  { %v1898_v8 = vpop.f32.mrf.mxu1  ;;  %v1871_v45 = vadd.f32 %v1870_v5, %v1869_v3 }
  0xeb   :  { %v1872_v7 = vpop.f32.mrf.mxu0  ;;  %v1899_v46 = vadd.f32 %v1898_v8, %v1897_v6 }
  0xec   :  { %v1900_v10 = vpop.f32.mrf.mxu1 }
  0xed   :  { %v1873_v9 = vpop.f32.mrf.mxu0  ;;  %v1327_v52 = vadd.f32 %v1899_v46, %v1871_v45 }
  0xee   :  { %v1901_v12 = vpop.f32.mrf.mxu1  ;;  %v1874_v56 = vadd.f32 %v1873_v9, %v1872_v7 }
  0xef   :  { %v1875_v11 = vpop.f32.mrf.mxu0  ;;  %v1902_v57 = vadd.f32 %v1901_v12, %v1900_v10 }
  0xf0   :  { %v1903_v14 = vpop.f32.mrf.mxu1 }
  0xf1   :  { %v1876_v13 = vpop.f32.mrf.mxu0  ;;  %v1332_v4 = vadd.f32 %v1902_v57, %v1874_v56 }
  0xf2   :  { %v1904_v16 = vpop.f32.mrf.mxu1  ;;  %v1877_v60 = vadd.f32 %v1876_v13, %v1875_v11 }
  0xf3   :  { %v1905_v61 = vadd.f32 %v1904_v16, %v1903_v14 }
 0x103   :  { %v1922_v15 = vpop.f32.mrf.mxu0 }
 0x104   :  { %v1950_v18 = vpop.f32.mrf.mxu1 }
 0x105   :  { %v1923_v17 = vpop.f32.mrf.mxu0 }
 0x106   :  { %v1951_v20 = vpop.f32.mrf.mxu1  ;;  %v1924_v47 = vadd.f32 %v1923_v17, %v1922_v15 }
 0x107   :  { %v1925_v19 = vpop.f32.mrf.mxu0  ;;  %v1952_v54 = vadd.f32 %v1951_v20, %v1950_v18 }
 0x108   :  { %v1953_v22 = vpop.f32.mrf.mxu1  ;;  %v1373_v53 = vadd.f32 %v1924_v47, %v1324_v49 }
 0x109   :  { %v1926_v21 = vpop.f32.mrf.mxu0 }
 0x10a   :  { %v1954_v24 = vpop.f32.mrf.mxu1  ;;  %v1927_v50 = vadd.f32 %v1926_v21, %v1925_v19  ;;  %v1422_v0 = vadd.f32 %v1952_v54, %v1373_v53  ;;  %v1335_v19 = vadd.f32 %v1905_v61, %v1877_v60 }
 0x10b   :  { %v1928_v23 = vpop.f32.mrf.mxu0  ;;  %v1955_v1 = vadd.f32 %v1954_v24, %v1953_v22 }
 0x10c   :  { %v1956_v25 = vpop.f32.mrf.mxu1  ;;  %v1376_v58 = vadd.f32 %v1927_v50, %v1327_v52 }
 0x10d   :  { %v1929_v26 = vpop.f32.mrf.mxu0 }
 0x10e   :  { %v1957_v27 = vpop.f32.mrf.mxu1  ;;  %v1930_v62 = vadd.f32 %v1929_v26, %v1928_v23  ;;  %v1425_v8 = vadd.f32 %v1955_v1, %v1376_v58 }
 0x10f   :  { %v1931_v28 = vpop.f32.mrf.mxu0  ;;  %v1958_v9 = vadd.f32 %v1957_v27, %v1956_v25 }
 0x110   :  { %v1959_v29 = vpop.f32.mrf.mxu1  ;;  %v1381_v7 = vadd.f32 %v1930_v62, %v1332_v4 }
 0x111   :  { %v1932_v30 = vpop.f32.mrf.mxu0 }
 0x112   :  { %v1960_v32 = vpop.f32.mrf.mxu1  ;;  %v1933_v5 = vadd.f32 %v1932_v30, %v1931_v28  ;;  %v1430_v26 = vadd.f32 %v1958_v9, %v1381_v7 }
 0x113   :  { %v1961_v16 = vadd.f32 %v1960_v32, %v1959_v29 }
 0x114   :  { %v1384_v14 = vadd.f32 %v1933_v5, %v1335_v19 }
 0x123   :  { %v1978_v31 = vpop.f32.mrf.mxu0 }
 0x124   :  { %v2006_v33 = vpop.f32.mrf.mxu1 }
 0x125   :  { %v1979_v34 = vpop.f32.mrf.mxu0 }
 0x126   :  { %v2007_v35 = vpop.f32.mrf.mxu1  ;;  %v1980_v59 = vadd.f32 %v1979_v34, %v1978_v31 }
 0x127   :  { %v1981_v36 = vpop.f32.mrf.mxu0  ;;  %v2008_v17 = vadd.f32 %v2007_v35, %v2006_v33 }
 0x128   :  { %v2009_v37 = vpop.f32.mrf.mxu1  ;;  %v1471_v15 = vadd.f32 %v1980_v59, %v1422_v0 }
 0x129   :  { %v1982_v38 = vpop.f32.mrf.mxu0 }
 0x12a   :  { %v2010_v39 = vpop.f32.mrf.mxu1  ;;  %v1983_v2 = vadd.f32 %v1982_v38, %v1981_v36  ;;  %v1520_v22 = vadd.f32 %v2008_v17, %v1471_v15  ;;  %v1433_v36 = vadd.f32 %v1961_v16, %v1384_v14 }
 0x12b   :  { %v1984_v40 = vpop.f32.mrf.mxu0  ;;  %v2011_v23 = vadd.f32 %v2010_v39, %v2009_v37 }
 0x12c   :  { %v2012_v41 = vpop.f32.mrf.mxu1  ;;  %v1474_v12 = vadd.f32 %v1983_v2, %v1425_v8 }
 0x12d   :  { %v1985_v44 = vpop.f32.mrf.mxu0 }
 0x12e   :  { %v2013_v48 = vpop.f32.mrf.mxu1  ;;  %v1986_v20 = vadd.f32 %v1985_v44, %v1984_v40  ;;  %v1523_v31 = vadd.f32 %v2011_v23, %v1474_v12 }
 0x12f   :  { %v1987_v51 = vpop.f32.mrf.mxu0  ;;  %v2014_v38 = vadd.f32 %v2013_v48, %v2012_v41 }
 0x130   :  { %v2015_v55 = vpop.f32.mrf.mxu1  ;;  %v1479_v25 = vadd.f32 %v1986_v20, %v1430_v26 }
 0x131   :  { %v1988_v63 = vpop.f32.mrf.mxu0 }
 0x132   :  { %v2016_v3 = vpop.f32.mrf.mxu1  ;;  %v1989_v28 = vadd.f32 %v1988_v63, %v1987_v51  ;;  %v1528_v50 = vadd.f32 %v2014_v38, %v1479_v25 }
 0x133   :  { %v2017_v44 = vadd.f32 %v2016_v3, %v2015_v55 }
 0x134   :  { %v1482_v32 = vadd.f32 %v1989_v28, %v1433_v36 }
 0x136   :  { %v1531_v54 = vadd.f32 %v2017_v44, %v1482_v32 }
 0x143   :  { %v2034_v6 = vpop.f32.mrf.mxu0 }
 0x144   :  { %v2062_v18 = vpop.f32.mrf.mxu1 }
 0x145   :  { %v2035_v10 = vpop.f32.mrf.mxu0 }
 0x146   :  { %v2036_v11 = vadd.f32 %v2035_v10, %v2034_v6  ;;  %v2063_v13 = vpop.f32.mrf.mxu1 }
 0x147   :  { %v2037_v21 = vpop.f32.mrf.mxu0  ;;  %v2064_v42 = vadd.f32 %v2063_v13, %v2062_v18 }
 0x148   :  { %v2065_v24 = vpop.f32.mrf.mxu1  ;;  %v1569_v33 = vadd.f32 %v2036_v11, %v1520_v22 }
 0x149   :  { %v2038_v30 = vpop.f32.mrf.mxu0 }
 0x14a   :  { %v2039_v34 = vadd.f32 %v2038_v30, %v2037_v21  ;;  %v2066_v35 = vpop.f32.mrf.mxu1  ;;  %v1618_v37 = vadd.f32 %v2064_v42, %v1569_v33 }
 0x14b   :  { %v2040_v27 = vpop.f32.mrf.mxu0  ;;  %v2067_v45 = vadd.f32 %v2066_v35, %v2065_v24 }
 0x14c   :  { %v1572_v43 = vadd.f32 %v2039_v34, %v1523_v31  ;;  %v2068_v29 = vpop.f32.mrf.mxu1 }
 0x14d   :  { %v2041_v40 = vpop.f32.mrf.mxu0 }
 0x14e   :  { %v1621_v39 = vadd.f32 %v2067_v45, %v1572_v43  ;;  %v2042_v46 = vadd.f32 %v2041_v40, %v2040_v27  ;;  %v2069_v47 = vpop.f32.mrf.mxu1 }
 0x14f   :  { %v2043_v49 = vpop.f32.mrf.mxu0  ;;  %v2070_v57 = vadd.f32 %v2069_v47, %v2068_v29 }
 0x150   :  { %v1842_v51 = vpack.c.bf16 %v1621_v39, %v1618_v37  ;;  %v2071_v52 = vpop.f32.mrf.mxu1  ;;  %v1577_v41 = vadd.f32 %v2042_v46, %v1528_v50 }
 0x151   :  { %v2044_v53 = vpop.f32.mrf.mxu0 }
 0x152   :  { %1843 = vst [vmem:[%s2705_s2] sm:$0xff] %v1842_v51   ;;  %v2045_v48 = vadd.f32 %v2044_v53, %v2043_v49  ;;  %v2072_v56 = vpop.f32.mrf.mxu1  ;;  %v1626_v59 = vadd.f32 %v2070_v57, %v1577_v41 }
 0x153   :  { %v2073_v55 = vadd.f32 %v2072_v56, %v2071_v52 }
 0x154   :  { %v1580_v58 = vadd.f32 %v2045_v48, %v1531_v54 }
 0x156   :  { %v1629_v60 = vadd.f32 %v2073_v55, %v1580_v58 }
 0x158   :  { %v1847_v61 = vpack.c.bf16 %v1629_v60, %v1626_v59 }
 0x15a   :  { %1849 = vst [vmem:[%s2705_s2 + $0x8] sm:$0xff] %v1847_v61  }

// kernel: generator_forward.72
= control target key start
LH: loop header
LB: loop body
LE: loop exit
PB: predicated region body
PF: predicated region fallthrough
CT: control target
= control target key end

     0   :  { %s518_s12 = smov 0   ;;  %s520_s13 = smov 0   ;;  %s557_s0 = inlined_call_operand.vmem [shape: bf16[2,16,128], index: 0, kind: input, shape index: {}]   ;;  %s558_s1 = inlined_call_operand.vmem [shape: f32[2,2,128], index: 1, kind: input, shape index: {}]   ;;  %s559_s2 = inlined_call_operand.vmem [shape: bf16[2,16,128], index: 2, kind: input, shape index: {}]   ;;  %s560_s3 = inlined_call_operand.vmem [shape: bf16[2,16,128], index: 3, kind: output, shape index: {}]  }
   0x1   :  { %s522_s14 = smov 0  }
   0x2 LB: > { %s25_s15 = sadd.s32 1, %s492_s13  ;;  %p418_p0 = scmp.ge.s32.totalorder %s496_s14, 1  ;;  %s496_s14 = sphi %s522_s14, %s13_s14   ;;  %s492_s13 = sphi %s520_s13, %s562_s13   ;;  %s488_s12 = sphi %s518_s12, %s561_s12  }
   0x3   : > { %p27_p1 = scmp.ge.s32.totalorder %s25_s15, 2  ;;  %p184_p2 = scmp.lt.s32.totalorder %s496_s14, 3 }
   0x5   : > { %s564_s15 = smov (%p27_p1, %s25_s15), 0  ;;  %p185_p3 = pnand %p418_p0, %p184_p2 }
   0x6   : > { %p230_p4 = scmp.lt.s32.totalorder (!%p185_p3), %s488_s12, 1 }
   0x7   : > { %188 = sbr.rel (%p185_p3) target bundleno = 27 (0x1b), region = 32 }
   0xc   : > { %s566_s12 = smov (!%p230_p4, %s488_s12), 1 }
   0xd   : > { %s432_s16 = sshll.u32 %s566_s12, 3  ;;  %s421_s17 = sshll.u32 %s566_s12, 1 }
   0xe   : > { %s237_s20 = scalar_lea.vmem %s557_s0, %s432_s16  ;;  %s242_s23 = scalar_lea.vmem %s558_s1, %s421_s17 }
   0xf   : > { %s251_s26 = scalar_lea.vmem %s559_s2, %s432_s16  ;;  %v438_v0 = vld [vmem:[%s237_s20] sm:$0xff]   ;;  %s261_s29 = scalar_lea.vmem %s560_s3, %s432_s16 }
  0x10   : > { %v426_v1 = vld [vmem:[%s242_s23] ss:$0 sm:$0xff]  ;;  %v439_v2 = vunpack.c.l.bf16 %v438_v0  ;;  %v440_v3 = vunpack.c.h.bf16 %v438_v0  ;;  %v427_v5 = vld [vmem:[%s242_s23 + $0x1] ss:$0 sm:$0xff] }
  0x11   : > { %v442_v4 = vld [vmem:[%s251_s26] sm:$0xff]  }
  0x12   : > { %v273_v6 = vmul.f32 %v439_v2, %v426_v1  ;;  %v274_v7 = vmul.f32 %v440_v3, %v426_v1  ;;  %v443_v8 = vunpack.c.l.bf16 %v442_v4  ;;  %v444_v9 = vunpack.c.h.bf16 %v442_v4 }
  0x14   : > { %v279_v10 = vadd.f32 %v427_v5, %v273_v6  ;;  %v280_v11 = vadd.f32 %v427_v5, %v274_v7 }
  0x16   : > { %v285_v12 = vadd.f32 %v443_v8, %v279_v10  ;;  %v286_v13 = vadd.f32 %v444_v9, %v280_v11 }
  0x18   : > { %v448_v14 = vpack.c.bf16 %v286_v13, %v285_v12 }
  0x1a   : > { %449 = vst [vmem:[%s261_s29] sm:$0xff] %v448_v14  }
  0x1b PF: > { %s13_s14 = sadd.s32 1, %s496_s14   ;;  %s561_s12 = smov %s492_s13 }
  0x1c   : > { %p10_p5 = scmp.ge.s32.totalorder %s13_s14, 4   ;;  %s562_s13 = smov %s564_s15 }
  0x1e   :  { %12 = sbr.rel (!%p10_p5) target bundleno = 2 (0x2), region = 68 }

// kernel: generator_forward.67
= control target key start
LH: loop header
LB: loop body
LE: loop exit
PB: predicated region body
PF: predicated region fallthrough
CT: control target
= control target key end

     0   :  { %s1636_s1 = inlined_call_operand.vmem [shape: bf16[1152,128], index: 1, kind: input, shape index: {}]   ;;  %s1637_s0 = inlined_call_operand.vmem [shape: bf16[32,1152], index: 0, kind: input, shape index: {}]   ;;  %s1638_s2 = inlined_call_operand.vmem [shape: bf16[32,128], index: 2, kind: output, shape index: {}]  }
   0x1   :  { %v1247_v0 = vld [vmem:[%s1636_s1 + $0x78] sm:$0xff]   ;;  %v1251_v4 = vld [vmem:[%s1636_s1 + $0x70] sm:$0xff]   ;;  %v1255_v8 = vld [vmem:[%s1636_s1 + $0x68] sm:$0xff]  }
   0x2   :  { %v1248_v1 = vld [vmem:[%s1636_s1 + $0xf8] sm:$0xff]   ;;  %1105 = vmatprep.subr.bf16.mxu0 %v1247_v0  ;;  %v1252_v5 = vld [vmem:[%s1636_s1 + $0xf0] sm:$0xff]   ;;  %v1256_v9 = vld [vmem:[%s1636_s1 + $0xe8] sm:$0xff]  }
   0x3   :  { %v1249_v2 = vld [vmem:[%s1636_s1 + $0x38] sm:$0xff]   ;;  %1133 = vmatprep.subr.bf16.mxu1 %v1248_v1  ;;  %v1253_v6 = vld [vmem:[%s1636_s1 + $0x30] sm:$0xff]   ;;  %v1257_v10 = vld [vmem:[%s1636_s1 + $0x28] sm:$0xff]  }
   0x4   :  { %v1250_v3 = vld [vmem:[%s1636_s1 + $0xb8] sm:$0xff]   ;;  %1106 = vmatpush3.bf16.msra.mxu0 %v1249_v2  ;;  %v1254_v7 = vld [vmem:[%s1636_s1 + $0xb0] sm:$0xff]   ;;  %v1258_v11 = vld [vmem:[%s1636_s1 + $0xa8] sm:$0xff]  }
   0x5   :  { %1134 = vmatpush3.bf16.msra.mxu1 %v1250_v3  ;;  %1107 = vmatprep.subr.bf16.mxu0 %v1251_v4  ;;  %v1259_v12 = vld [vmem:[%s1636_s1 + $0x60] sm:$0xff]   ;;  %v1263_v16 = vld [vmem:[%s1636_s1 + $0x58] sm:$0xff]   ;;  %v1267_v20 = vld [vmem:[%s1636_s1 + $0x50] sm:$0xff]  }
   0x6   :  { %1135 = vmatprep.subr.bf16.mxu1 %v1252_v5  ;;  %v1260_v13 = vld [vmem:[%s1636_s1 + $0xe0] sm:$0xff]   ;;  %v1264_v17 = vld [vmem:[%s1636_s1 + $0xd8] sm:$0xff]   ;;  %v1268_v21 = vld [vmem:[%s1636_s1 + $0xd0] sm:$0xff]  }
   0x7   :  { %v1261_v14 = vld [vmem:[%s1636_s1 + $0x20] sm:$0xff]   ;;  %v1265_v18 = vld [vmem:[%s1636_s1 + $0x18] sm:$0xff]   ;;  %v1269_v22 = vld [vmem:[%s1636_s1 + $0x10] sm:$0xff]  }
   0x8   :  { %1108 = vmatpush3.bf16.msra.mxu0 %v1253_v6  ;;  %v1262_v15 = vld [vmem:[%s1636_s1 + $0xa0] sm:$0xff]   ;;  %v1266_v19 = vld [vmem:[%s1636_s1 + $0x98] sm:$0xff]   ;;  %v1270_v23 = vld [vmem:[%s1636_s1 + $0x90] sm:$0xff]  }
   0x9   :  { %1136 = vmatpush3.bf16.msra.mxu1 %v1254_v7  ;;  %1109 = vmatprep.subr.bf16.mxu0 %v1255_v8  ;;  %v1271_v24 = vld [vmem:[%s1636_s1 + $0x48] sm:$0xff]   ;;  %v1275_v28 = vld [vmem:[%s1636_s1 + $0x40] sm:$0xff]   ;;  %v1285_v36 = vld [vmem:[%s1636_s1 + $0x178] sm:$0xff]  }
   0xa   :  { %1137 = vmatprep.subr.bf16.mxu1 %v1256_v9  ;;  %v1272_v25 = vld [vmem:[%s1636_s1 + $0xc8] sm:$0xff]   ;;  %v1276_v29 = vld [vmem:[%s1636_s1 + $0xc0] sm:$0xff]   ;;  %v1286_v37 = vld [vmem:[%s1636_s1 + $0x138] sm:$0xff]  }
   0xb   :  { %v1273_v26 = vld [vmem:[%s1636_s1 + $0x8] sm:$0xff]   ;;  %v1277_v30 = vld [vmem:[%s1636_s1] sm:$0xff]   ;;  %v1287_v38 = vld [vmem:[%s1636_s1 + $0x1f8] sm:$0xff]  }
   0xc   :  { %1110 = vmatpush3.bf16.msra.mxu0 %v1257_v10  ;;  %v1274_v27 = vld [vmem:[%s1636_s1 + $0x88] sm:$0xff]   ;;  %v1278_v31 = vld [vmem:[%s1636_s1 + $0x80] sm:$0xff]   ;;  %v1288_v39 = vld [vmem:[%s1636_s1 + $0x1b8] sm:$0xff]  }
   0xd   :  { %1138 = vmatpush3.bf16.msra.mxu1 %v1258_v11  ;;  %1111 = vmatprep.subr.bf16.mxu0 %v1259_v12  ;;  %v1279_v32 = vld [vmem:[%s1637_s0] ss:$36 sps:$4 sm:$0xff]   ;;  %v1282_v34 = vld [vmem:[%s1637_s0 + $0x8] ss:$36 sps:$4 sm:$0xff]   ;;  %v1289_v40 = vld [vmem:[%s1636_s1 + $0x170] sm:$0xff]  }
   0xe   :  { %1139 = vmatprep.subr.bf16.mxu1 %v1260_v13  ;;  %v1281_v33 = vld [vmem:[%s1637_s0 + $0x4] ss:$36 sps:$4 sm:$0xff]   ;;  %v1284_v35 = vld [vmem:[%s1637_s0 + $0xc] ss:$36 sps:$4 sm:$0xff]   ;;  %v1301_v52 = vld [vmem:[%s1636_s1 + $0x158] sm:$0xff]  }
   0xf   :  { %744 = vmatprep.mubr.bf16.mxu0 %v1281_v33  ;;  %793 = vmatprep.mubr.bf16.mxu1 %v1284_v35  ;;  %v1290_v41 = vld [vmem:[%s1636_s1 + $0x130] sm:$0xff]   ;;  %v1293_v44 = vld [vmem:[%s1636_s1 + $0x168] sm:$0xff]   ;;  %v1297_v48 = vld [vmem:[%s1636_s1 + $0x160] sm:$0xff]  }
  0x10   :  { %1112 = vmatpush3.bf16.msra.mxu0 %v1261_v14  ;;  %v1291_v42 = vld [vmem:[%s1636_s1 + $0x1f0] sm:$0xff]   ;;  %v1294_v45 = vld [vmem:[%s1636_s1 + $0x128] sm:$0xff]   ;;  %v1298_v49 = vld [vmem:[%s1636_s1 + $0x120] sm:$0xff]  }
  0x11   :  { %1140 = vmatpush3.bf16.msra.mxu1 %v1262_v15  ;;  %1113 = vmatprep.subr.bf16.mxu0 %v1263_v16  ;;  %v1292_v43 = vld [vmem:[%s1636_s1 + $0x1b0] sm:$0xff]   ;;  %v1295_v46 = vld [vmem:[%s1636_s1 + $0x1e8] sm:$0xff]   ;;  %v1299_v50 = vld [vmem:[%s1636_s1 + $0x1e0] sm:$0xff]  }
  0x12   :  { %1141 = vmatprep.subr.bf16.mxu1 %v1264_v17  ;;  %v1296_v47 = vld [vmem:[%s1636_s1 + $0x1a8] sm:$0xff]   ;;  %v1300_v51 = vld [vmem:[%s1636_s1 + $0x1a0] sm:$0xff]   ;;  %v1302_v53 = vld [vmem:[%s1636_s1 + $0x118] sm:$0xff]  }
  0x13   :  { %v1303_v54 = vld [vmem:[%s1637_s0 + $0x4c] ss:$36 sps:$4 sm:$0xff]   ;;  %v1305_v55 = vld [vmem:[%s1637_s0 + $0x54] ss:$36 sps:$4 sm:$0xff]   ;;  %v1319_v4 = vld [vmem:[%s1636_s1 + $0x140] sm:$0xff]  }
  0x14   :  { %1114 = vmatpush3.bf16.msra.mxu0 %v1265_v18  ;;  %v1307_v56 = vld [vmem:[%s1636_s1 + $0x1d8] sm:$0xff]   ;;  %v1308_v57 = vld [vmem:[%s1637_s0 + $0x48] ss:$36 sps:$4 sm:$0xff]   ;;  %v1309_v58 = vld [vmem:[%s1637_s0 + $0x50] ss:$36 sps:$4 sm:$0xff]  }
  0x15   :  { %1142 = vmatpush3.bf16.msra.mxu1 %v1266_v19  ;;  %1115 = vmatprep.subr.bf16.mxu0 %v1267_v20  ;;  %v1310_v59 = vld [vmem:[%s1636_s1 + $0x198] sm:$0xff]   ;;  %v1311_v60 = vld [vmem:[%s1636_s1 + $0x150] sm:$0xff]   ;;  %v1315_v0 = vld [vmem:[%s1636_s1 + $0x148] sm:$0xff]  }
  0x16   :  { %1143 = vmatprep.subr.bf16.mxu1 %v1268_v21  ;;  %v1312_v61 = vld [vmem:[%s1636_s1 + $0x110] sm:$0xff]   ;;  %v1316_v1 = vld [vmem:[%s1636_s1 + $0x108] sm:$0xff]   ;;  %v1320_v5 = vld [vmem:[%s1636_s1 + $0x100] sm:$0xff]  }
  0x17   :  { %v1313_v62 = vld [vmem:[%s1636_s1 + $0x1d0] sm:$0xff]   ;;  %v1317_v2 = vld [vmem:[%s1636_s1 + $0x1c8] sm:$0xff]   ;;  %v1321_v6 = vld [vmem:[%s1636_s1 + $0x1c0] sm:$0xff]  }
  0x18   :  { %1116 = vmatpush3.bf16.msra.mxu0 %v1269_v22  ;;  %v1314_v63 = vld [vmem:[%s1636_s1 + $0x190] sm:$0xff]   ;;  %v1318_v3 = vld [vmem:[%s1636_s1 + $0x188] sm:$0xff]   ;;  %v1325_v9 = vld [vmem:[%s1636_s1 + $0x180] sm:$0xff]  }
  0x19   :  { %1144 = vmatpush3.bf16.msra.mxu1 %v1270_v23  ;;  %1117 = vmatprep.subr.bf16.mxu0 %v1271_v24  ;;  %v1322_v7 = vld [vmem:[%s1637_s0 + $0x10] ss:$36 sps:$4 sm:$0xff]   ;;  %v1326_v10 = vld [vmem:[%s1636_s1 + $0x238] sm:$0xff]   ;;  %v1334_v16 = vld [vmem:[%s1636_s1 + $0x228] sm:$0xff]  }
  0x1a   :  { %1145 = vmatprep.subr.bf16.mxu1 %v1272_v25  ;;  %v1324_v8 = vld [vmem:[%s1637_s0 + $0x14] ss:$36 sps:$4 sm:$0xff]   ;;  %v1329_v12 = vld [vmem:[%s1637_s0 + $0x1c] ss:$36 sps:$4 sm:$0xff]   ;;  %v1335_v17 = vld [vmem:[%s1637_s0 + $0x64] ss:$36 sps:$4 sm:$0xff]  }
  0x1b   :  { %v1327_v11 = vld [vmem:[%s1637_s0 + $0x18] ss:$36 sps:$4 sm:$0xff]   ;;  %v1330_v13 = vld [vmem:[%s1636_s1 + $0x230] sm:$0xff]   ;;  %v1337_v18 = vld [vmem:[%s1637_s0 + $0x60] ss:$36 sps:$4 sm:$0xff]  }
  0x1c   :  { %1118 = vmatpush3.bf16.msra.mxu0 %v1273_v26  ;;  %v1331_v14 = vld [vmem:[%s1637_s0 + $0x5c] ss:$36 sps:$4 sm:$0xff]   ;;  %v1340_v22 = vld [vmem:[%s1636_s1 + $0x210] sm:$0xff]   ;;  %v1341_v23 = vld [vmem:[%s1636_s1 + $0x208] sm:$0xff]  }
  0x1d   :  { %1146 = vmatpush3.bf16.msra.mxu1 %v1274_v27  ;;  %1119 = vmatprep.subr.bf16.mxu0 %v1275_v28  ;;  %v1333_v15 = vld [vmem:[%s1637_s0 + $0x58] ss:$36 sps:$4 sm:$0xff]   ;;  %v1338_v19 = vld [vmem:[%s1636_s1 + $0x220] sm:$0xff]   ;;  %v1344_v25 = vld [vmem:[%s1637_s0 + $0x68] ss:$36 sps:$4 sm:$0xff]  }
  0x1e   :  { %1147 = vmatprep.subr.bf16.mxu1 %v1276_v29  ;;  %v1339_v20 = vld [vmem:[%s1636_s1 + $0x218] sm:$0xff]   ;;  %v1343_v21 = vld [vmem:[%s1637_s0 + $0x20] ss:$36 sps:$4 sm:$0xff]  }
  0x1f   :  { %v1342_v24 = vld [vmem:[%s1636_s1 + $0x200] sm:$0xff]  }
  0x20   :  { %1120 = vmatpush3.bf16.msra.mxu0 %v1277_v30 }
  0x21   :  { %1148 = vmatpush3.bf16.msra.mxu1 %v1278_v31  ;;  %1161 = vmatprep.subr.bf16.mxu0 %v1285_v36 }
  0x22   :  { %1189 = vmatprep.subr.bf16.mxu1 %v1287_v38 }
  0x23   :  { %745 = vmatmul.mubr.bf16.vlgmr.msra.gmra.mxu0 %v1279_v32 }
  0x24   :  { %794 = vmatmul.mubr.bf16.vlgmr.msra.gmra.mxu1 %v1282_v34  ;;  %1162 = vmatpush3.bf16.msra.mxu0 %v1286_v37 }
  0x25   :  { %1190 = vmatpush3.bf16.msra.mxu1 %v1288_v39  ;;  %1163 = vmatprep.subr.bf16.mxu0 %v1289_v40 }
  0x26   :  { %1191 = vmatprep.subr.bf16.mxu1 %v1291_v42  ;;  %752 = vmatprep.mubr.bf16.mxu0 %v1303_v54 }
  0x27   :  { %801 = vmatprep.mubr.bf16.mxu1 %v1305_v55 }
  0x28   :  { %1164 = vmatpush3.bf16.msra.mxu0 %v1290_v41 }
  0x29   :  { %1192 = vmatpush3.bf16.msra.mxu1 %v1292_v43  ;;  %1165 = vmatprep.subr.bf16.mxu0 %v1293_v44 }
  0x2a   :  { %1193 = vmatprep.subr.bf16.mxu1 %v1295_v46 }
  0x2b   :  { %753 = vmatmul.mubr.bf16.gmra.mxu0 %v1308_v57 }
  0x2c   :  { %1166 = vmatpush3.bf16.msra.mxu0 %v1294_v45  ;;  %802 = vmatmul.mubr.bf16.gmra.mxu1 %v1309_v58 }
  0x2d   :  { %1194 = vmatpush3.bf16.msra.mxu1 %v1296_v47  ;;  %1167 = vmatprep.subr.bf16.mxu0 %v1297_v48 }
  0x2e   :  { %1195 = vmatprep.subr.bf16.mxu1 %v1299_v50  ;;  %842 = vmatprep.mubr.bf16.mxu0 %v1324_v8 }
  0x2f   :  { %891 = vmatprep.mubr.bf16.mxu1 %v1329_v12 }
  0x30   :  { %1168 = vmatpush3.bf16.msra.mxu0 %v1298_v49 }
  0x31   :  { %1196 = vmatpush3.bf16.msra.mxu1 %v1300_v51  ;;  %1169 = vmatprep.subr.bf16.mxu0 %v1301_v52 }
  0x32   :  { %1197 = vmatprep.subr.bf16.mxu1 %v1307_v56 }
  0x34   :  { %1170 = vmatpush3.bf16.msra.mxu0 %v1302_v53 }
  0x35   :  { %1198 = vmatpush3.bf16.msra.mxu1 %v1310_v59  ;;  %1171 = vmatprep.subr.bf16.mxu0 %v1311_v60 }
  0x36   :  { %1199 = vmatprep.subr.bf16.mxu1 %v1313_v62 }
  0x38   :  { %1172 = vmatpush3.bf16.msra.mxu0 %v1312_v61 }
  0x39   :  { %1200 = vmatpush3.bf16.msra.mxu1 %v1314_v63  ;;  %1173 = vmatprep.subr.bf16.mxu0 %v1315_v0 }
  0x3a   :  { %1201 = vmatprep.subr.bf16.mxu1 %v1317_v2 }
  0x3c   :  { %1174 = vmatpush3.bf16.msra.mxu0 %v1316_v1 }
  0x3d   :  { %1202 = vmatpush3.bf16.msra.mxu1 %v1318_v3  ;;  %1175 = vmatprep.subr.bf16.mxu0 %v1319_v4 }
  0x3e   :  { %1203 = vmatprep.subr.bf16.mxu1 %v1321_v6 }
  0x40   :  { %1176 = vmatpush3.bf16.msra.mxu0 %v1320_v5 }
  0x41   :  { %1204 = vmatpush3.bf16.msra.mxu1 %v1325_v9  ;;  %1227 = vmatprep.subr.bf16.mxu0 %v1326_v10 }
  0x43   :  { %843 = vmatmul.mubr.bf16.vlgmr.msra.gmra.mxu0 %v1322_v7 }
  0x44   :  { %1228 = vmatpush3.bf16.msra.mxu0 %v1326_v10  ;;  %892 = vmatmul.mubr.bf16.vlgmr.msra.gmra.mxu1 %v1327_v11 }
  0x45   :  { %1229 = vmatprep.subr.bf16.mxu0 %v1330_v13  ;;  %850 = vmatprep.mubr.bf16.mxu0 %v1331_v14 }
  0x46   :  { %899 = vmatprep.mubr.bf16.mxu1 %v1335_v17 }
  0x48   :  { %1230 = vmatpush3.bf16.msra.mxu0 %v1330_v13 }
  0x49   :  { %1231 = vmatprep.subr.bf16.mxu0 %v1334_v16 }
  0x4b   :  { %851 = vmatmul.mubr.bf16.gmra.mxu0 %v1333_v15 }
  0x4c   :  { %1232 = vmatpush3.bf16.msra.mxu0 %v1334_v16  ;;  %900 = vmatmul.mubr.bf16.gmra.mxu1 %v1337_v18 }
  0x4d   :  { %1233 = vmatprep.subr.bf16.mxu0 %v1338_v19  ;;  %1243 = vmatprep.mubr.bf16.mxu0 %v1343_v21 }
  0x50   :  { %1234 = vmatpush3.bf16.msra.mxu0 %v1338_v19 }
  0x51   :  { %1235 = vmatprep.subr.bf16.mxu0 %v1339_v20 }
  0x54   :  { %1236 = vmatpush3.bf16.msra.mxu0 %v1339_v20 }
  0x55   :  { %1237 = vmatprep.subr.bf16.mxu0 %v1340_v22 }
  0x58   :  { %1238 = vmatpush3.bf16.msra.mxu0 %v1340_v22 }
  0x59   :  { %1239 = vmatprep.subr.bf16.mxu0 %v1341_v23 }
  0x5c   :  { %1240 = vmatpush3.bf16.msra.mxu0 %v1341_v23 }
  0x5d   :  { %1241 = vmatprep.subr.bf16.mxu0 %v1342_v24 }
  0x60   :  { %1242 = vmatpush3.bf16.msra.mxu0 %v1342_v24 }
  0x63   :  { %1244 = vmatmul.mubr.bf16.vlgmr.msra.gmra.mxu0 %v1344_v25 }
  0xe3   :  { %v1121_v26 = vpop.f32.mrf.mxu0 }
  0xe4   :  { %v1149_v27 = vpop.f32.mrf.mxu1 }
  0xe5   :  { %v1122_v28 = vpop.f32.mrf.mxu0 }
  0xe6   :  { %v1150_v29 = vpop.f32.mrf.mxu1  ;;  %v1123_v61 = vadd.f32 %v1122_v28, %v1121_v26 }
  0xe7   :  { %v1124_v30 = vpop.f32.mrf.mxu0  ;;  %v1151_v62 = vadd.f32 %v1150_v29, %v1149_v27 }
  0xe8   :  { %v1152_v31 = vpop.f32.mrf.mxu1 }
  0xe9   :  { %v1125_v32 = vpop.f32.mrf.mxu0  ;;  %v796_v8 = vadd.f32 %v1151_v62, %v1123_v61 }
  0xea   :  { %v1153_v34 = vpop.f32.mrf.mxu1  ;;  %v1126_v63 = vadd.f32 %v1125_v32, %v1124_v30 }
  0xeb   :  { %v1127_v33 = vpop.f32.mrf.mxu0  ;;  %v1154_v0 = vadd.f32 %v1153_v34, %v1152_v31 }
  0xec   :  { %v1155_v35 = vpop.f32.mrf.mxu1 }
  0xed   :  { %v1128_v36 = vpop.f32.mrf.mxu0  ;;  %v799_v9 = vadd.f32 %v1154_v0, %v1126_v63 }
  0xee   :  { %v1156_v37 = vpop.f32.mrf.mxu1  ;;  %v1129_v57 = vadd.f32 %v1128_v36, %v1127_v33 }
  0xef   :  { %v1130_v38 = vpop.f32.mrf.mxu0  ;;  %v1157_v58 = vadd.f32 %v1156_v37, %v1155_v35 }
  0xf0   :  { %v1158_v39 = vpop.f32.mrf.mxu1 }
  0xf1   :  { %v1131_v40 = vpop.f32.mrf.mxu0  ;;  %v804_v4 = vadd.f32 %v1157_v58, %v1129_v57 }
  0xf2   :  { %v1159_v42 = vpop.f32.mrf.mxu1  ;;  %v1132_v59 = vadd.f32 %v1131_v40, %v1130_v38 }
  0xf3   :  { %v1160_v60 = vadd.f32 %v1159_v42, %v1158_v39 }
  0xf5   :  { %v807_v5 = vadd.f32 %v1160_v60, %v1132_v59 }
 0x103   :  { %v1177_v41 = vpop.f32.mrf.mxu0 }
 0x104   :  { %v1205_v44 = vpop.f32.mrf.mxu1 }
 0x105   :  { %v1178_v43 = vpop.f32.mrf.mxu0 }
 0x106   :  { %v1206_v46 = vpop.f32.mrf.mxu1  ;;  %v1179_v6 = vadd.f32 %v1178_v43, %v1177_v41 }
 0x107   :  { %v1180_v45 = vpop.f32.mrf.mxu0  ;;  %v1207_v16 = vadd.f32 %v1206_v46, %v1205_v44 }
 0x108   :  { %v1208_v48 = vpop.f32.mrf.mxu1  ;;  %v845_v15 = vadd.f32 %v1179_v6, %v796_v8 }
 0x109   :  { %v1181_v47 = vpop.f32.mrf.mxu0 }
 0x10a   :  { %v1209_v50 = vpop.f32.mrf.mxu1  ;;  %v1182_v7 = vadd.f32 %v1181_v47, %v1180_v45  ;;  %v894_v24 = vadd.f32 %v1207_v16, %v845_v15 }
 0x10b   :  { %v1183_v49 = vpop.f32.mrf.mxu0  ;;  %v1210_v18 = vadd.f32 %v1209_v50, %v1208_v48 }
 0x10c   :  { %v1211_v52 = vpop.f32.mrf.mxu1  ;;  %v848_v17 = vadd.f32 %v1182_v7, %v799_v9 }
 0x10d   :  { %v1184_v51 = vpop.f32.mrf.mxu0 }
 0x10e   :  { %v1212_v54 = vpop.f32.mrf.mxu1  ;;  %v1185_v1 = vadd.f32 %v1184_v51, %v1183_v49  ;;  %v897_v26 = vadd.f32 %v1210_v18, %v848_v17 }
 0x10f   :  { %v1186_v53 = vpop.f32.mrf.mxu0  ;;  %v1213_v11 = vadd.f32 %v1212_v54, %v1211_v52 }
 0x110   :  { %v1214_v56 = vpop.f32.mrf.mxu1  ;;  %v853_v10 = vadd.f32 %v1185_v1, %v804_v4 }
 0x111   :  { %v1187_v55 = vpop.f32.mrf.mxu0 }
 0x112   :  { %v1188_v2 = vadd.f32 %v1187_v55, %v1186_v53  ;;  %v1215_v3 = vpop.f32.mrf.mxu1  ;;  %v902_v20 = vadd.f32 %v1213_v11, %v853_v10 }
 0x113   :  { %v1216_v13 = vadd.f32 %v1215_v3, %v1214_v56 }
 0x114   :  { %v856_v12 = vadd.f32 %v1188_v2, %v807_v5 }
 0x116   :  { %v905_v21 = vadd.f32 %v1216_v13, %v856_v12 }
 0x123   :  { %v1245_v14 = vpop.f32.mrf.mxu0 }
 0x124   :  { %v951_v23 = vadd.f32 %v1245_v14, %v902_v20 }
 0x125   :  { %v942_v19 = vpop.f32.mrf.mxu0 }
 0x126   :  { %v943_v28 = vadd.f32 %v942_v19, %v894_v24 }
 0x127   :  { %v1246_v22 = vpop.f32.mrf.mxu0 }
 0x128   :  { %v954_v25 = vadd.f32 %v1246_v22, %v905_v21 }
 0x129   :  { %v945_v27 = vpop.f32.mrf.mxu0 }
 0x12a   :  { %v1102_v29 = vpack.c.bf16 %v954_v25, %v951_v23  ;;  %v946_v30 = vadd.f32 %v945_v27, %v897_v26 }
 0x12c   :  { %1104 = vst [vmem:[%s1638_s2 + $0x8] sm:$0xff] %v1102_v29   ;;  %v1097_v31 = vpack.c.bf16 %v946_v30, %v943_v28 }
 0x12e   :  { %1098 = vst [vmem:[%s1638_s2] sm:$0xff] %v1097_v31  }

// kernel: generator_forward.103
= control target key start
LH: loop header
LB: loop body
LE: loop exit
PB: predicated region body
PF: predicated region fallthrough
CT: control target
= control target key end

     0   :  { %s765_s1 = inlined_call_operand.vmem [shape: bf16[512,128], index: 1, kind: input, shape index: {}]   ;;  %s766_s0 = inlined_call_operand.vmem [shape: bf16[32,512], index: 0, kind: input, shape index: {}]   ;;  %s767_s2 = inlined_call_operand.vmem [shape: bf16[32,128], index: 2, kind: output, shape index: {}]  }
   0x1   :  { %v580_v0 = vld [vmem:[%s765_s1 + $0x78] sm:$0xff]   ;;  %v584_v4 = vld [vmem:[%s765_s1 + $0x70] sm:$0xff]   ;;  %v588_v8 = vld [vmem:[%s765_s1 + $0x68] sm:$0xff]  }
   0x2   :  { %v581_v1 = vld [vmem:[%s765_s1 + $0xf8] sm:$0xff]   ;;  %524 = vmatprep.subr.bf16.mxu0 %v580_v0  ;;  %v585_v5 = vld [vmem:[%s765_s1 + $0xf0] sm:$0xff]   ;;  %v589_v9 = vld [vmem:[%s765_s1 + $0xe8] sm:$0xff]  }
   0x3   :  { %v582_v2 = vld [vmem:[%s765_s1 + $0x38] sm:$0xff]   ;;  %552 = vmatprep.subr.bf16.mxu1 %v581_v1  ;;  %v586_v6 = vld [vmem:[%s765_s1 + $0x30] sm:$0xff]   ;;  %v590_v10 = vld [vmem:[%s765_s1 + $0x28] sm:$0xff]  }
   0x4   :  { %v583_v3 = vld [vmem:[%s765_s1 + $0xb8] sm:$0xff]   ;;  %525 = vmatpush3.bf16.msra.mxu0 %v582_v2  ;;  %v587_v7 = vld [vmem:[%s765_s1 + $0xb0] sm:$0xff]   ;;  %v591_v11 = vld [vmem:[%s765_s1 + $0xa8] sm:$0xff]  }
   0x5   :  { %553 = vmatpush3.bf16.msra.mxu1 %v583_v3  ;;  %526 = vmatprep.subr.bf16.mxu0 %v584_v4  ;;  %v592_v12 = vld [vmem:[%s765_s1 + $0x60] sm:$0xff]   ;;  %v596_v16 = vld [vmem:[%s765_s1 + $0x58] sm:$0xff]   ;;  %v600_v20 = vld [vmem:[%s765_s1 + $0x50] sm:$0xff]  }
   0x6   :  { %554 = vmatprep.subr.bf16.mxu1 %v585_v5  ;;  %v593_v13 = vld [vmem:[%s765_s1 + $0xe0] sm:$0xff]   ;;  %v597_v17 = vld [vmem:[%s765_s1 + $0xd8] sm:$0xff]   ;;  %v601_v21 = vld [vmem:[%s765_s1 + $0xd0] sm:$0xff]  }
   0x7   :  { %v594_v14 = vld [vmem:[%s765_s1 + $0x20] sm:$0xff]   ;;  %v598_v18 = vld [vmem:[%s765_s1 + $0x18] sm:$0xff]   ;;  %v602_v22 = vld [vmem:[%s765_s1 + $0x10] sm:$0xff]  }
   0x8   :  { %527 = vmatpush3.bf16.msra.mxu0 %v586_v6  ;;  %v595_v15 = vld [vmem:[%s765_s1 + $0xa0] sm:$0xff]   ;;  %v599_v19 = vld [vmem:[%s765_s1 + $0x98] sm:$0xff]   ;;  %v603_v23 = vld [vmem:[%s765_s1 + $0x90] sm:$0xff]  }
   0x9   :  { %555 = vmatpush3.bf16.msra.mxu1 %v587_v7  ;;  %528 = vmatprep.subr.bf16.mxu0 %v588_v8  ;;  %v604_v24 = vld [vmem:[%s765_s1 + $0x48] sm:$0xff]   ;;  %v608_v28 = vld [vmem:[%s765_s1 + $0x40] sm:$0xff]  }
   0xa   :  { %556 = vmatprep.subr.bf16.mxu1 %v589_v9  ;;  %v605_v25 = vld [vmem:[%s765_s1 + $0xc8] sm:$0xff]   ;;  %v609_v29 = vld [vmem:[%s765_s1 + $0xc0] sm:$0xff]  }
   0xb   :  { %v606_v26 = vld [vmem:[%s765_s1 + $0x8] sm:$0xff]   ;;  %v610_v30 = vld [vmem:[%s765_s1] sm:$0xff]  }
   0xc   :  { %529 = vmatpush3.bf16.msra.mxu0 %v590_v10  ;;  %v607_v27 = vld [vmem:[%s765_s1 + $0x88] sm:$0xff]   ;;  %v611_v31 = vld [vmem:[%s765_s1 + $0x80] sm:$0xff]  }
   0xd   :  { %557 = vmatpush3.bf16.msra.mxu1 %v591_v11  ;;  %530 = vmatprep.subr.bf16.mxu0 %v592_v12  ;;  %v612_v32 = vld [vmem:[%s766_s0] ss:$16 sps:$4 sm:$0xff]   ;;  %v614_v33 = vld [vmem:[%s766_s0 + $0x4] ss:$16 sps:$4 sm:$0xff]   ;;  %v615_v34 = vld [vmem:[%s766_s0 + $0x8] ss:$16 sps:$4 sm:$0xff]  }
   0xe   :  { %558 = vmatprep.subr.bf16.mxu1 %v593_v13  ;;  %v617_v35 = vld [vmem:[%s766_s0 + $0xc] ss:$16 sps:$4 sm:$0xff]   ;;  %360 = vmatprep.mubr.bf16.mxu0 %v614_v33  ;;  %v618_v36 = vld [vmem:[%s766_s0 + $0x24] ss:$16 sps:$4 sm:$0xff]   ;;  %v622_v38 = vld [vmem:[%s766_s0 + $0x20] ss:$16 sps:$4 sm:$0xff]  }
   0xf   :  { %409 = vmatprep.mubr.bf16.mxu1 %v617_v35  ;;  %v620_v37 = vld [vmem:[%s766_s0 + $0x2c] ss:$16 sps:$4 sm:$0xff]   ;;  %v623_v39 = vld [vmem:[%s766_s0 + $0x28] ss:$16 sps:$4 sm:$0xff]  }
  0x10   :  { %531 = vmatpush3.bf16.msra.mxu0 %v594_v14 }
  0x11   :  { %559 = vmatpush3.bf16.msra.mxu1 %v595_v15  ;;  %532 = vmatprep.subr.bf16.mxu0 %v596_v16 }
  0x12   :  { %560 = vmatprep.subr.bf16.mxu1 %v597_v17 }
  0x14   :  { %533 = vmatpush3.bf16.msra.mxu0 %v598_v18 }
  0x15   :  { %561 = vmatpush3.bf16.msra.mxu1 %v599_v19  ;;  %534 = vmatprep.subr.bf16.mxu0 %v600_v20 }
  0x16   :  { %562 = vmatprep.subr.bf16.mxu1 %v601_v21 }
  0x18   :  { %535 = vmatpush3.bf16.msra.mxu0 %v602_v22 }
  0x19   :  { %563 = vmatpush3.bf16.msra.mxu1 %v603_v23  ;;  %536 = vmatprep.subr.bf16.mxu0 %v604_v24 }
  0x1a   :  { %564 = vmatprep.subr.bf16.mxu1 %v605_v25 }
  0x1c   :  { %537 = vmatpush3.bf16.msra.mxu0 %v606_v26 }
  0x1d   :  { %565 = vmatpush3.bf16.msra.mxu1 %v607_v27  ;;  %538 = vmatprep.subr.bf16.mxu0 %v608_v28 }
  0x1e   :  { %566 = vmatprep.subr.bf16.mxu1 %v609_v29 }
  0x20   :  { %539 = vmatpush3.bf16.msra.mxu0 %v610_v30 }
  0x21   :  { %567 = vmatpush3.bf16.msra.mxu1 %v611_v31 }
  0x23   :  { %361 = vmatmul.mubr.bf16.vlgmr.msra.gmra.mxu0 %v612_v32 }
  0x24   :  { %410 = vmatmul.mubr.bf16.vlgmr.msra.gmra.mxu1 %v615_v34  ;;  %368 = vmatprep.mubr.bf16.mxu0 %v618_v36 }
  0x25   :  { %417 = vmatprep.mubr.bf16.mxu1 %v620_v37 }
  0x2b   :  { %369 = vmatmul.mubr.bf16.gmra.mxu0 %v622_v38 }
  0x2c   :  { %418 = vmatmul.mubr.bf16.gmra.mxu1 %v623_v39 }
  0xe3   :  { %v540_v40 = vpop.f32.mrf.mxu0 }
  0xe4   :  { %v568_v41 = vpop.f32.mrf.mxu1 }
  0xe5   :  { %v541_v42 = vpop.f32.mrf.mxu0 }
  0xe6   :  { %v569_v43 = vpop.f32.mrf.mxu1  ;;  %v542_v46 = vadd.f32 %v541_v42, %v540_v40 }
  0xe7   :  { %v543_v44 = vpop.f32.mrf.mxu0  ;;  %v570_v47 = vadd.f32 %v569_v43, %v568_v41 }
  0xe8   :  { %v571_v45 = vpop.f32.mrf.mxu1 }
  0xe9   :  { %v544_v48 = vpop.f32.mrf.mxu0  ;;  %v412_v54 = vadd.f32 %v570_v47, %v542_v46 }
  0xea   :  { %v545_v49 = vadd.f32 %v544_v48, %v543_v44  ;;  %v572_v50 = vpop.f32.mrf.mxu1 }
  0xeb   :  { %v573_v51 = vadd.f32 %v572_v50, %v571_v45  ;;  %v546_v52 = vpop.f32.mrf.mxu0 }
  0xec   :  { %v574_v53 = vpop.f32.mrf.mxu1 }
  0xed   :  { %v415_v55 = vadd.f32 %v573_v51, %v545_v49  ;;  %v547_v56 = vpop.f32.mrf.mxu0 }
  0xee   :  { %v575_v57 = vpop.f32.mrf.mxu1  ;;  %v548_v61 = vadd.f32 %v547_v56, %v546_v52 }
  0xef   :  { %v516_v58 = vpack.c.bf16 %v415_v55, %v412_v54  ;;  %v549_v59 = vpop.f32.mrf.mxu0  ;;  %v576_v62 = vadd.f32 %v575_v57, %v574_v53 }
  0xf0   :  { %v577_v60 = vpop.f32.mrf.mxu1 }
  0xf1   :  { %517 = vst [vmem:[%s767_s2] sm:$0xff] %v516_v58   ;;  %v550_v63 = vpop.f32.mrf.mxu0  ;;  %v420_v3 = vadd.f32 %v576_v62, %v548_v61 }
  0xf2   :  { %v551_v0 = vadd.f32 %v550_v63, %v549_v59  ;;  %v578_v1 = vpop.f32.mrf.mxu1 }
  0xf3   :  { %v579_v2 = vadd.f32 %v578_v1, %v577_v60 }
  0xf5   :  { %v423_v4 = vadd.f32 %v579_v2, %v551_v0 }
  0xf7   :  { %v521_v5 = vpack.c.bf16 %v423_v4, %v420_v3 }
  0xf9   :  { %523 = vst [vmem:[%s767_s2 + $0x8] sm:$0xff] %v521_v5  }

// kernel: generator_forward.109
= control target key start
LH: loop header
LB: loop body
LE: loop exit
PB: predicated region body
PF: predicated region fallthrough
CT: control target
= control target key end

     0   :  { %s1407_s1 = inlined_call_operand.vmem [shape: bf16[512,128], index: 1, kind: input, shape index: {}]   ;;  %s1408_s0 = inlined_call_operand.vmem [shape: bf16[128,512], index: 0, kind: input, shape index: {}]   ;;  %s1409_s2 = inlined_call_operand.vmem [shape: bf16[128,128], index: 2, kind: output, shape index: {}]  }
   0x1   :  { %v1096_v0 = vld [vmem:[%s1407_s1 + $0x78] sm:$0xff]   ;;  %v1100_v4 = vld [vmem:[%s1407_s1 + $0x70] sm:$0xff]   ;;  %v1104_v8 = vld [vmem:[%s1407_s1 + $0x68] sm:$0xff]  }
   0x2   :  { %v1097_v1 = vld [vmem:[%s1407_s1 + $0xf8] sm:$0xff]   ;;  %968 = vmatprep.subr.bf16.mxu0 %v1096_v0  ;;  %v1101_v5 = vld [vmem:[%s1407_s1 + $0xf0] sm:$0xff]   ;;  %v1105_v9 = vld [vmem:[%s1407_s1 + $0xe8] sm:$0xff]  }
   0x3   :  { %v1098_v2 = vld [vmem:[%s1407_s1 + $0x38] sm:$0xff]   ;;  %1032 = vmatprep.subr.bf16.mxu1 %v1097_v1  ;;  %v1102_v6 = vld [vmem:[%s1407_s1 + $0x30] sm:$0xff]   ;;  %v1106_v10 = vld [vmem:[%s1407_s1 + $0x28] sm:$0xff]  }
   0x4   :  { %v1099_v3 = vld [vmem:[%s1407_s1 + $0xb8] sm:$0xff]   ;;  %969 = vmatpush3.bf16.msra.mxu0 %v1098_v2  ;;  %v1103_v7 = vld [vmem:[%s1407_s1 + $0xb0] sm:$0xff]   ;;  %v1107_v11 = vld [vmem:[%s1407_s1 + $0xa8] sm:$0xff]  }
   0x5   :  { %1033 = vmatpush3.bf16.msra.mxu1 %v1099_v3  ;;  %970 = vmatprep.subr.bf16.mxu0 %v1100_v4  ;;  %v1108_v12 = vld [vmem:[%s1407_s1 + $0x60] sm:$0xff]   ;;  %v1112_v16 = vld [vmem:[%s1407_s1 + $0x58] sm:$0xff]   ;;  %v1116_v20 = vld [vmem:[%s1407_s1 + $0x50] sm:$0xff]  }
   0x6   :  { %1034 = vmatprep.subr.bf16.mxu1 %v1101_v5  ;;  %v1109_v13 = vld [vmem:[%s1407_s1 + $0xe0] sm:$0xff]   ;;  %v1113_v17 = vld [vmem:[%s1407_s1 + $0xd8] sm:$0xff]   ;;  %v1117_v21 = vld [vmem:[%s1407_s1 + $0xd0] sm:$0xff]  }
   0x7   :  { %v1110_v14 = vld [vmem:[%s1407_s1 + $0x20] sm:$0xff]   ;;  %v1114_v18 = vld [vmem:[%s1407_s1 + $0x18] sm:$0xff]   ;;  %v1118_v22 = vld [vmem:[%s1407_s1 + $0x10] sm:$0xff]  }
   0x8   :  { %971 = vmatpush3.bf16.msra.mxu0 %v1102_v6  ;;  %v1111_v15 = vld [vmem:[%s1407_s1 + $0xa0] sm:$0xff]   ;;  %v1115_v19 = vld [vmem:[%s1407_s1 + $0x98] sm:$0xff]   ;;  %v1119_v23 = vld [vmem:[%s1407_s1 + $0x90] sm:$0xff]  }
   0x9   :  { %1035 = vmatpush3.bf16.msra.mxu1 %v1103_v7  ;;  %972 = vmatprep.subr.bf16.mxu0 %v1104_v8  ;;  %v1120_v24 = vld [vmem:[%s1407_s1 + $0x48] sm:$0xff]   ;;  %v1124_v28 = vld [vmem:[%s1407_s1 + $0x40] sm:$0xff]  }
   0xa   :  { %1036 = vmatprep.subr.bf16.mxu1 %v1105_v9  ;;  %v1121_v25 = vld [vmem:[%s1407_s1 + $0xc8] sm:$0xff]   ;;  %v1125_v29 = vld [vmem:[%s1407_s1 + $0xc0] sm:$0xff]  }
   0xb   :  { %v1122_v26 = vld [vmem:[%s1407_s1 + $0x8] sm:$0xff]   ;;  %v1126_v30 = vld [vmem:[%s1407_s1] sm:$0xff]  }
   0xc   :  { %973 = vmatpush3.bf16.msra.mxu0 %v1106_v10  ;;  %v1123_v27 = vld [vmem:[%s1407_s1 + $0x88] sm:$0xff]   ;;  %v1127_v31 = vld [vmem:[%s1407_s1 + $0x80] sm:$0xff]  }
   0xd   :  { %1037 = vmatpush3.bf16.msra.mxu1 %v1107_v11  ;;  %974 = vmatprep.subr.bf16.mxu0 %v1108_v12  ;;  %v1128_v32 = vld [vmem:[%s1408_s0] ss:$16 sps:$4 sm:$0xff]   ;;  %v1130_v33 = vld [vmem:[%s1408_s0 + $0x4] ss:$16 sps:$4 sm:$0xff]   ;;  %v1131_v34 = vld [vmem:[%s1408_s0 + $0x8] ss:$16 sps:$4 sm:$0xff]  }
   0xe   :  { %1038 = vmatprep.subr.bf16.mxu1 %v1109_v13  ;;  %v1133_v35 = vld [vmem:[%s1408_s0 + $0xc] ss:$16 sps:$4 sm:$0xff]   ;;  %528 = vmatprep.mubr.bf16.mxu0 %v1130_v33  ;;  %v1134_v36 = vld [vmem:[%s1408_s0 + $0x24] ss:$16 sps:$4 sm:$0xff]   ;;  %v1138_v38 = vld [vmem:[%s1408_s0 + $0x20] ss:$16 sps:$4 sm:$0xff]  }
   0xf   :  { %625 = vmatprep.mubr.bf16.mxu1 %v1133_v35  ;;  %v1136_v37 = vld [vmem:[%s1408_s0 + $0x2c] ss:$16 sps:$4 sm:$0xff]   ;;  %v1139_v39 = vld [vmem:[%s1408_s0 + $0x28] ss:$16 sps:$4 sm:$0xff]   ;;  %v1140_v40 = vld [vmem:[%s1408_s0 + $0x44] ss:$16 sps:$4 sm:$0xff]  }
  0x10   :  { %975 = vmatpush3.bf16.msra.mxu0 %v1110_v14  ;;  %v1142_v41 = vld [vmem:[%s1408_s0 + $0x4c] ss:$16 sps:$4 sm:$0xff]   ;;  %v1144_v42 = vld [vmem:[%s1408_s0 + $0x40] ss:$16 sps:$4 sm:$0xff]   ;;  %v1145_v43 = vld [vmem:[%s1408_s0 + $0x48] ss:$16 sps:$4 sm:$0xff]  }
  0x11   :  { %1039 = vmatpush3.bf16.msra.mxu1 %v1111_v15  ;;  %976 = vmatprep.subr.bf16.mxu0 %v1112_v16  ;;  %v1146_v44 = vld [vmem:[%s1408_s0 + $0x64] ss:$16 sps:$4 sm:$0xff]   ;;  %v1148_v45 = vld [vmem:[%s1408_s0 + $0x6c] ss:$16 sps:$4 sm:$0xff]   ;;  %v1150_v46 = vld [vmem:[%s1408_s0 + $0x60] ss:$16 sps:$4 sm:$0xff]  }
  0x12   :  { %1040 = vmatprep.subr.bf16.mxu1 %v1113_v17  ;;  %v1151_v47 = vld [vmem:[%s1408_s0 + $0x68] ss:$16 sps:$4 sm:$0xff]   ;;  %v1152_v48 = vld [vmem:[%s1408_s0 + $0x84] ss:$16 sps:$4 sm:$0xff]   ;;  %v1154_v49 = vld [vmem:[%s1408_s0 + $0x8c] ss:$16 sps:$4 sm:$0xff]  }
  0x13   :  { %v1156_v50 = vld [vmem:[%s1408_s0 + $0x80] ss:$16 sps:$4 sm:$0xff]   ;;  %v1157_v51 = vld [vmem:[%s1408_s0 + $0x88] ss:$16 sps:$4 sm:$0xff]   ;;  %v1158_v52 = vld [vmem:[%s1408_s0 + $0xa4] ss:$16 sps:$4 sm:$0xff]  }
  0x14   :  { %977 = vmatpush3.bf16.msra.mxu0 %v1114_v18  ;;  %v1160_v53 = vld [vmem:[%s1408_s0 + $0xac] ss:$16 sps:$4 sm:$0xff]   ;;  %v1162_v54 = vld [vmem:[%s1408_s0 + $0xa0] ss:$16 sps:$4 sm:$0xff]   ;;  %v1163_v55 = vld [vmem:[%s1408_s0 + $0xa8] ss:$16 sps:$4 sm:$0xff]  }
  0x15   :  { %1041 = vmatpush3.bf16.msra.mxu1 %v1115_v19  ;;  %978 = vmatprep.subr.bf16.mxu0 %v1116_v20  ;;  %v1164_v56 = vld [vmem:[%s1408_s0 + $0xc4] ss:$16 sps:$4 sm:$0xff]   ;;  %v1166_v57 = vld [vmem:[%s1408_s0 + $0xcc] ss:$16 sps:$4 sm:$0xff]   ;;  %v1168_v58 = vld [vmem:[%s1408_s0 + $0xc0] ss:$16 sps:$4 sm:$0xff]  }
  0x16   :  { %1042 = vmatprep.subr.bf16.mxu1 %v1117_v21  ;;  %v1169_v59 = vld [vmem:[%s1408_s0 + $0xc8] ss:$16 sps:$4 sm:$0xff]   ;;  %v1170_v60 = vld [vmem:[%s1408_s0 + $0xe4] ss:$16 sps:$4 sm:$0xff]   ;;  %v1172_v61 = vld [vmem:[%s1408_s0 + $0xec] ss:$16 sps:$4 sm:$0xff]  }
  0x17   :  { %v1174_v62 = vld [vmem:[%s1408_s0 + $0xe0] ss:$16 sps:$4 sm:$0xff]   ;;  %v1175_v63 = vld [vmem:[%s1408_s0 + $0xe8] ss:$16 sps:$4 sm:$0xff]  }
  0x18   :  { %979 = vmatpush3.bf16.msra.mxu0 %v1118_v22 }
  0x19   :  { %1043 = vmatpush3.bf16.msra.mxu1 %v1119_v23  ;;  %980 = vmatprep.subr.bf16.mxu0 %v1120_v24 }
  0x1a   :  { %1044 = vmatprep.subr.bf16.mxu1 %v1121_v25 }
  0x1c   :  { %981 = vmatpush3.bf16.msra.mxu0 %v1122_v26 }
  0x1d   :  { %1045 = vmatpush3.bf16.msra.mxu1 %v1123_v27  ;;  %982 = vmatprep.subr.bf16.mxu0 %v1124_v28 }
  0x1e   :  { %1046 = vmatprep.subr.bf16.mxu1 %v1125_v29 }
  0x20   :  { %983 = vmatpush3.bf16.msra.mxu0 %v1126_v30 }
  0x21   :  { %1047 = vmatpush3.bf16.msra.mxu1 %v1127_v31 }
  0x23   :  { %529 = vmatmul.mubr.bf16.vlgmr.msra.gmra.mxu0 %v1128_v32 }
  0x24   :  { %626 = vmatmul.mubr.bf16.vlgmr.msra.gmra.mxu1 %v1131_v34  ;;  %536 = vmatprep.mubr.bf16.mxu0 %v1134_v36 }
  0x25   :  { %633 = vmatprep.mubr.bf16.mxu1 %v1136_v37 }
  0x2b   :  { %537 = vmatmul.mubr.bf16.gmra.mxu0 %v1138_v38 }
  0x2c   :  { %634 = vmatmul.mubr.bf16.gmra.mxu1 %v1139_v39  ;;  %544 = vmatprep.mubr.bf16.mxu0 %v1140_v40 }
  0x2d   :  { %641 = vmatprep.mubr.bf16.mxu1 %v1142_v41 }
  0x33   :  { %545 = vmatmul.mubr.bf16.gmra.mxu0 %v1144_v42 }
  0x34   :  { %642 = vmatmul.mubr.bf16.gmra.mxu1 %v1145_v43  ;;  %552 = vmatprep.mubr.bf16.mxu0 %v1146_v44 }
  0x35   :  { %649 = vmatprep.mubr.bf16.mxu1 %v1148_v45 }
  0x3b   :  { %553 = vmatmul.mubr.bf16.gmra.mxu0 %v1150_v46 }
  0x3c   :  { %650 = vmatmul.mubr.bf16.gmra.mxu1 %v1151_v47  ;;  %560 = vmatprep.mubr.bf16.mxu0 %v1152_v48 }
  0x3d   :  { %657 = vmatprep.mubr.bf16.mxu1 %v1154_v49 }
  0x43   :  { %561 = vmatmul.mubr.bf16.gmra.mxu0 %v1156_v50 }
  0x44   :  { %658 = vmatmul.mubr.bf16.gmra.mxu1 %v1157_v51  ;;  %568 = vmatprep.mubr.bf16.mxu0 %v1158_v52 }
  0x45   :  { %665 = vmatprep.mubr.bf16.mxu1 %v1160_v53 }
  0x4b   :  { %569 = vmatmul.mubr.bf16.gmra.mxu0 %v1162_v54 }
  0x4c   :  { %666 = vmatmul.mubr.bf16.gmra.mxu1 %v1163_v55  ;;  %576 = vmatprep.mubr.bf16.mxu0 %v1164_v56 }
  0x4d   :  { %673 = vmatprep.mubr.bf16.mxu1 %v1166_v57 }
  0x53   :  { %577 = vmatmul.mubr.bf16.gmra.mxu0 %v1168_v58 }
  0x54   :  { %674 = vmatmul.mubr.bf16.gmra.mxu1 %v1169_v59  ;;  %584 = vmatprep.mubr.bf16.mxu0 %v1170_v60 }
  0x55   :  { %681 = vmatprep.mubr.bf16.mxu1 %v1172_v61 }
  0x5b   :  { %585 = vmatmul.mubr.bf16.gmra.mxu0 %v1174_v62 }
  0x5c   :  { %682 = vmatmul.mubr.bf16.gmra.mxu1 %v1175_v63 }
  0xe3   :  { %v984_v0 = vpop.f32.mrf.mxu0 }
  0xe4   :  { %v1048_v1 = vpop.f32.mrf.mxu1 }
  0xe5   :  { %v985_v2 = vpop.f32.mrf.mxu0 }
  0xe6   :  { %v1049_v3 = vpop.f32.mrf.mxu1  ;;  %v986_v6 = vadd.f32 %v985_v2, %v984_v0 }
  0xe7   :  { %v987_v4 = vpop.f32.mrf.mxu0  ;;  %v1050_v7 = vadd.f32 %v1049_v3, %v1048_v1 }
  0xe8   :  { %v1051_v5 = vpop.f32.mrf.mxu1 }
  0xe9   :  { %v988_v8 = vpop.f32.mrf.mxu0  ;;  %v628_v14 = vadd.f32 %v1050_v7, %v986_v6 }
  0xea   :  { %v989_v9 = vadd.f32 %v988_v8, %v987_v4  ;;  %v1052_v10 = vpop.f32.mrf.mxu1 }
  0xeb   :  { %v1053_v11 = vadd.f32 %v1052_v10, %v1051_v5  ;;  %v990_v12 = vpop.f32.mrf.mxu0 }
  0xec   :  { %v1054_v13 = vpop.f32.mrf.mxu1 }
  0xed   :  { %v631_v15 = vadd.f32 %v1053_v11, %v989_v9  ;;  %v991_v16 = vpop.f32.mrf.mxu0 }
  0xee   :  { %v1055_v17 = vpop.f32.mrf.mxu1  ;;  %v992_v21 = vadd.f32 %v991_v16, %v990_v12 }
  0xef   :  { %v924_v18 = vpack.c.bf16 %v631_v15, %v628_v14  ;;  %v993_v19 = vpop.f32.mrf.mxu0  ;;  %v1056_v22 = vadd.f32 %v1055_v17, %v1054_v13 }
  0xf0   :  { %v1057_v20 = vpop.f32.mrf.mxu1 }
  0xf1   :  { %925 = vst [vmem:[%s1409_s2] sm:$0xff] %v924_v18   ;;  %v994_v23 = vpop.f32.mrf.mxu0  ;;  %v636_v29 = vadd.f32 %v1056_v22, %v992_v21 }
  0xf2   :  { %v995_v24 = vadd.f32 %v994_v23, %v993_v19  ;;  %v1058_v25 = vpop.f32.mrf.mxu1 }
  0xf3   :  { %v1059_v26 = vadd.f32 %v1058_v25, %v1057_v20  ;;  %v996_v27 = vpop.f32.mrf.mxu0 }
  0xf4   :  { %v1060_v28 = vpop.f32.mrf.mxu1 }
  0xf5   :  { %v639_v30 = vadd.f32 %v1059_v26, %v995_v24  ;;  %v997_v31 = vpop.f32.mrf.mxu0 }
  0xf6   :  { %v1061_v32 = vpop.f32.mrf.mxu1  ;;  %v998_v36 = vadd.f32 %v997_v31, %v996_v27 }
  0xf7   :  { %v929_v33 = vpack.c.bf16 %v639_v30, %v636_v29  ;;  %v999_v34 = vpop.f32.mrf.mxu0  ;;  %v1062_v37 = vadd.f32 %v1061_v32, %v1060_v28 }
  0xf8   :  { %v1063_v35 = vpop.f32.mrf.mxu1 }
  0xf9   :  { %961 = vst [vmem:[%s1409_s2 + $0x8] sm:$0xff] %v929_v33   ;;  %v1000_v38 = vpop.f32.mrf.mxu0  ;;  %v644_v44 = vadd.f32 %v1062_v37, %v998_v36 }
  0xfa   :  { %v1001_v39 = vadd.f32 %v1000_v38, %v999_v34  ;;  %v1064_v40 = vpop.f32.mrf.mxu1 }
  0xfb   :  { %v1065_v41 = vadd.f32 %v1064_v40, %v1063_v35  ;;  %v1002_v42 = vpop.f32.mrf.mxu0 }
  0xfc   :  { %v1066_v43 = vpop.f32.mrf.mxu1 }
  0xfd   :  { %v647_v45 = vadd.f32 %v1065_v41, %v1001_v39  ;;  %v1003_v46 = vpop.f32.mrf.mxu0 }
  0xfe   :  { %v1067_v47 = vpop.f32.mrf.mxu1  ;;  %v1004_v51 = vadd.f32 %v1003_v46, %v1002_v42 }
  0xff   :  { %v934_v48 = vpack.c.bf16 %v647_v45, %v644_v44  ;;  %v1005_v49 = vpop.f32.mrf.mxu0  ;;  %v1068_v52 = vadd.f32 %v1067_v47, %v1066_v43 }
 0x100   :  { %v1069_v50 = vpop.f32.mrf.mxu1 }
 0x101   :  { %962 = vst [vmem:[%s1409_s2 + $0x10] sm:$0xff] %v934_v48   ;;  %v1006_v53 = vpop.f32.mrf.mxu0  ;;  %v652_v59 = vadd.f32 %v1068_v52, %v1004_v51 }
 0x102   :  { %v1007_v54 = vadd.f32 %v1006_v53, %v1005_v49  ;;  %v1070_v55 = vpop.f32.mrf.mxu1 }
 0x103   :  { %v1071_v56 = vadd.f32 %v1070_v55, %v1069_v50  ;;  %v1008_v57 = vpop.f32.mrf.mxu0 }
 0x104   :  { %v1072_v58 = vpop.f32.mrf.mxu1 }
 0x105   :  { %v655_v60 = vadd.f32 %v1071_v56, %v1007_v54  ;;  %v1009_v61 = vpop.f32.mrf.mxu0 }
 0x106   :  { %v1073_v62 = vpop.f32.mrf.mxu1  ;;  %v1010_v2 = vadd.f32 %v1009_v61, %v1008_v57 }
 0x107   :  { %v939_v63 = vpack.c.bf16 %v655_v60, %v652_v59  ;;  %v1011_v0 = vpop.f32.mrf.mxu0  ;;  %v1074_v3 = vadd.f32 %v1073_v62, %v1072_v58 }
 0x108   :  { %v1075_v1 = vpop.f32.mrf.mxu1 }
 0x109   :  { %963 = vst [vmem:[%s1409_s2 + $0x18] sm:$0xff] %v939_v63   ;;  %v1012_v4 = vpop.f32.mrf.mxu0  ;;  %v660_v10 = vadd.f32 %v1074_v3, %v1010_v2 }
 0x10a   :  { %v1013_v5 = vadd.f32 %v1012_v4, %v1011_v0  ;;  %v1076_v6 = vpop.f32.mrf.mxu1 }
 0x10b   :  { %v1077_v7 = vadd.f32 %v1076_v6, %v1075_v1  ;;  %v1014_v8 = vpop.f32.mrf.mxu0 }
 0x10c   :  { %v1078_v9 = vpop.f32.mrf.mxu1 }
 0x10d   :  { %v663_v11 = vadd.f32 %v1077_v7, %v1013_v5  ;;  %v1015_v12 = vpop.f32.mrf.mxu0 }
 0x10e   :  { %v1079_v13 = vpop.f32.mrf.mxu1  ;;  %v1016_v17 = vadd.f32 %v1015_v12, %v1014_v8 }
 0x10f   :  { %v944_v14 = vpack.c.bf16 %v663_v11, %v660_v10  ;;  %v1017_v15 = vpop.f32.mrf.mxu0  ;;  %v1080_v18 = vadd.f32 %v1079_v13, %v1078_v9 }
 0x110   :  { %v1081_v16 = vpop.f32.mrf.mxu1 }
 0x111   :  { %964 = vst [vmem:[%s1409_s2 + $0x20] sm:$0xff] %v944_v14   ;;  %v1018_v19 = vpop.f32.mrf.mxu0  ;;  %v668_v25 = vadd.f32 %v1080_v18, %v1016_v17 }
 0x112   :  { %v1019_v20 = vadd.f32 %v1018_v19, %v1017_v15  ;;  %v1082_v21 = vpop.f32.mrf.mxu1 }
 0x113   :  { %v1083_v22 = vadd.f32 %v1082_v21, %v1081_v16  ;;  %v1020_v23 = vpop.f32.mrf.mxu0 }
 0x114   :  { %v1084_v24 = vpop.f32.mrf.mxu1 }
 0x115   :  { %v671_v26 = vadd.f32 %v1083_v22, %v1019_v20  ;;  %v1021_v27 = vpop.f32.mrf.mxu0 }
 0x116   :  { %v1085_v28 = vpop.f32.mrf.mxu1  ;;  %v1022_v32 = vadd.f32 %v1021_v27, %v1020_v23 }
 0x117   :  { %v949_v29 = vpack.c.bf16 %v671_v26, %v668_v25  ;;  %v1023_v30 = vpop.f32.mrf.mxu0  ;;  %v1086_v33 = vadd.f32 %v1085_v28, %v1084_v24 }
 0x118   :  { %v1087_v31 = vpop.f32.mrf.mxu1 }
 0x119   :  { %965 = vst [vmem:[%s1409_s2 + $0x28] sm:$0xff] %v949_v29   ;;  %v1024_v34 = vpop.f32.mrf.mxu0  ;;  %v676_v40 = vadd.f32 %v1086_v33, %v1022_v32 }
 0x11a   :  { %v1025_v35 = vadd.f32 %v1024_v34, %v1023_v30  ;;  %v1088_v36 = vpop.f32.mrf.mxu1 }
 0x11b   :  { %v1089_v37 = vadd.f32 %v1088_v36, %v1087_v31  ;;  %v1026_v38 = vpop.f32.mrf.mxu0 }
 0x11c   :  { %v1090_v39 = vpop.f32.mrf.mxu1 }
 0x11d   :  { %v679_v41 = vadd.f32 %v1089_v37, %v1025_v35  ;;  %v1027_v42 = vpop.f32.mrf.mxu0 }
 0x11e   :  { %v1091_v43 = vpop.f32.mrf.mxu1  ;;  %v1028_v47 = vadd.f32 %v1027_v42, %v1026_v38 }
 0x11f   :  { %v954_v44 = vpack.c.bf16 %v679_v41, %v676_v40  ;;  %v1029_v45 = vpop.f32.mrf.mxu0  ;;  %v1092_v48 = vadd.f32 %v1091_v43, %v1090_v39 }
 0x120   :  { %v1093_v46 = vpop.f32.mrf.mxu1 }
 0x121   :  { %966 = vst [vmem:[%s1409_s2 + $0x30] sm:$0xff] %v954_v44   ;;  %v1030_v49 = vpop.f32.mrf.mxu0  ;;  %v684_v53 = vadd.f32 %v1092_v48, %v1028_v47 }
 0x122   :  { %v1031_v50 = vadd.f32 %v1030_v49, %v1029_v45  ;;  %v1094_v51 = vpop.f32.mrf.mxu1 }
 0x123   :  { %v1095_v52 = vadd.f32 %v1094_v51, %v1093_v46 }
 0x125   :  { %v687_v54 = vadd.f32 %v1095_v52, %v1031_v50 }
 0x127   :  { %v959_v55 = vpack.c.bf16 %v687_v54, %v684_v53 }
 0x129   :  { %967 = vst [vmem:[%s1409_s2 + $0x38] sm:$0xff] %v959_v55  }

// kernel: generator_forward.115
= control target key start
LH: loop header
LB: loop body
LE: loop exit
PB: predicated region body
PF: predicated region fallthrough
CT: control target
= control target key end

     0   :  { %s3717_s9 = smov 0   ;;  %s3719_s10 = smov 0   ;;  %s4541_s0 = inlined_call_operand.vmem [shape: bf16[512,6272], index: 0, kind: input, shape index: {}]   ;;  %s4542_s1 = inlined_call_operand.vmem [shape: bf16[6272,128], index: 1, kind: input, shape index: {}]   ;;  %s4543_s2 = inlined_call_operand.vmem [shape: f32[512,128], index: 2, kind: output, shape index: {}]  }
   0x1   :  { %s3721_s11 = smov 0   ;;  %s3723_s12 = smov 0  }
   0x2   :  { %s3725_s13 = smov 0   ;;  %s3727_s14 = smov 0  }
   0x3   :  { %s3729_s15 = smov 0  }
   0x4 LB: > { %s24_s16 = sadd.s32 1, %s3691_s13  ;;  %s31_s17 = sadd.s32 1, %s3695_s14  ;;  %s3699_s15 = sphi %s3729_s15, %s12_s15   ;;  %s3695_s14 = sphi %s3727_s14, %s4573_s14   ;;  %s3691_s13 = sphi %s3725_s13, %s4572_s13   ;;  %s3687_s12 = sphi %s3723_s12, %s4571_s12   ;;  %s3683_s11 = sphi %s3721_s11, %s4570_s11   ;;  %s3679_s10 = sphi %s3719_s10, %s4569_s10   ;;  %s3675_s9 = sphi %s3717_s9, %s4568_s9  }
   0x5   : > { %p25_p0 = scmp.ge.s32.totalorder %s24_s16, 7  ;;  %p47_p1 = scmp.ne.s32.totalorder %s3679_s10, %s3675_s9 }
   0x6   : > { %p48_p2 = scmp.eq.s32.totalorder %s3699_s15, 0  ;;  %s40_s21 = sadd.s32 1, %s3679_s10 }
   0x7   : > { %s4575_s16 = smov (%p25_p0, %s24_s16), 0  ;;  %s4577_s17 = smov (!%p25_p0, %s31_s17), %s3695_s14 }
   0x8   : > { %p49_p3 = por %p48_p2, %p47_p1  ;;  %p33_p4 = scmp.ge.s32.totalorder %s4577_s17, 2 }
   0x9   : > { %s36_s18 = ssub.s32 %s3691_s13, %s4575_s16  ;;  %p2637_p6 = scmp.ge.s32.totalorder %s3699_s15, 14 }
   0xa   : > { %s4579_s17 = smov (%p33_p4, %s4577_s17), 0 }
   0xb   : > { %s35_s19 = ssub.s32 %s3695_s14, %s4579_s17  ;;  %129 = sbr.rel (%p2637_p6) target bundleno = 94 (0x5e), region = 16 }
   0xc   : > { %s37_s20 = sor.u32 %s36_s18, %s35_s19 }
   0xd   : > { %p38_p5 = scmp.eq.s32.totalorder %s37_s20, 0 }
   0xf   : > { %s3768_s22 = scalar_select %p38_p5, %s3679_s10, %s40_s21  }
  0x10   : > { %132 = sbr.rel (!%p49_p3) target bundleno = 94 (0x5e), region = 20  ;;  %s134_s23 = sand.u32 (%p49_p3), 1, %s3679_s10  }
  0x11   : > { %s138_s24 = smul.u32 (%p49_p3), 7, %s3691_s13 }
  0x12   : > { %s3305_s25 = smul.u32 (%p49_p3), 896, %s134_s23 }
  0x13   : > { %s3306_s26 = smul.u32 (%p49_p3), 1568, %s3695_s14 }
  0x14   : > { %s3782_s4 = scalar_lea.vmem (%p49_p3), [#allocation3], %s3305_s25 }
  0x15   : > { %s140_s27 = sadd.s32 %s3306_s26, %s138_s24 }
  0x16   : > { %s2640_s28 = sshll.u32 %s140_s27, 2 }
  0x17   : > { %s3777_s3 = scalar_lea.vmem %s4541_s0, %s2640_s28 }
  0x18   : > { %v157_v0 = vld [vmem:[%s3777_s3] sm:$0xff]  ;;  %v159_v1 = vld [vmem:[%s3777_s3 + $0x8] sm:$0xff]  ;;  %v161_v2 = vld [vmem:[%s3777_s3 + $0x10] sm:$0xff] }
  0x19   : > { %158 = vst [vmem:[%s3782_s4] sm:$0xff] %v157_v0  ;;  %160 = vst [vmem:[%s3782_s4 + $0x8] sm:$0xff] %v159_v1  ;;  %v163_v3 = vld [vmem:[%s3777_s3 + $0xc4] sm:$0xff]  ;;  %v165_v4 = vld [vmem:[%s3777_s3 + $0xcc] sm:$0xff] }
  0x1a   : > { %162 = vst [vmem:[%s3782_s4 + $0x10] sm:$0xff] %v161_v2  ;;  %v167_v5 = vld [vmem:[%s3777_s3 + $0xd4] sm:$0xff]  ;;  %164 = vst [vmem:[%s3782_s4 + $0x1c] sm:$0xff] %v163_v3  ;;  %v169_v6 = vld [vmem:[%s3777_s3 + $0x188] sm:$0xff] }
  0x1b   : > { %166 = vst [vmem:[%s3782_s4 + $0x24] sm:$0xff] %v165_v4  ;;  %168 = vst [vmem:[%s3782_s4 + $0x2c] sm:$0xff] %v167_v5  ;;  %v171_v7 = vld [vmem:[%s3777_s3 + $0x190] sm:$0xff]  ;;  %v173_v8 = vld [vmem:[%s3777_s3 + $0x198] sm:$0xff] }
  0x1c   : > { %170 = vst [vmem:[%s3782_s4 + $0x38] sm:$0xff] %v169_v6  ;;  %172 = vst [vmem:[%s3782_s4 + $0x40] sm:$0xff] %v171_v7  ;;  %v175_v9 = vld [vmem:[%s3777_s3 + $0x24c] sm:$0xff]  ;;  %v177_v10 = vld [vmem:[%s3777_s3 + $0x254] sm:$0xff] }
  0x1d   : > { %174 = vst [vmem:[%s3782_s4 + $0x48] sm:$0xff] %v173_v8  ;;  %v179_v11 = vld [vmem:[%s3777_s3 + $0x25c] sm:$0xff]  ;;  %176 = vst [vmem:[%s3782_s4 + $0x54] sm:$0xff] %v175_v9  ;;  %v181_v12 = vld [vmem:[%s3777_s3 + $0x310] sm:$0xff] }
  0x1e   : > { %178 = vst [vmem:[%s3782_s4 + $0x5c] sm:$0xff] %v177_v10  ;;  %180 = vst [vmem:[%s3782_s4 + $0x64] sm:$0xff] %v179_v11  ;;  %v183_v13 = vld [vmem:[%s3777_s3 + $0x318] sm:$0xff]  ;;  %v185_v14 = vld [vmem:[%s3777_s3 + $0x320] sm:$0xff] }
  0x1f   : > { %182 = vst [vmem:[%s3782_s4 + $0x70] sm:$0xff] %v181_v12  ;;  %184 = vst [vmem:[%s3782_s4 + $0x78] sm:$0xff] %v183_v13  ;;  %v187_v15 = vld [vmem:[%s3777_s3 + $0x3d4] sm:$0xff]  ;;  %v189_v16 = vld [vmem:[%s3777_s3 + $0x3dc] sm:$0xff] }
  0x20   : > { %186 = vst [vmem:[%s3782_s4 + $0x80] sm:$0xff] %v185_v14  ;;  %v191_v17 = vld [vmem:[%s3777_s3 + $0x3e4] sm:$0xff]  ;;  %188 = vst [vmem:[%s3782_s4 + $0x8c] sm:$0xff] %v187_v15  ;;  %v193_v18 = vld [vmem:[%s3777_s3 + $0x498] sm:$0xff] }
  0x21   : > { %190 = vst [vmem:[%s3782_s4 + $0x94] sm:$0xff] %v189_v16  ;;  %192 = vst [vmem:[%s3782_s4 + $0x9c] sm:$0xff] %v191_v17  ;;  %v195_v19 = vld [vmem:[%s3777_s3 + $0x4a0] sm:$0xff]  ;;  %v197_v20 = vld [vmem:[%s3777_s3 + $0x4a8] sm:$0xff] }
  0x22   : > { %194 = vst [vmem:[%s3782_s4 + $0xa8] sm:$0xff] %v193_v18  ;;  %196 = vst [vmem:[%s3782_s4 + $0xb0] sm:$0xff] %v195_v19  ;;  %v199_v21 = vld [vmem:[%s3777_s3 + $0x55c] sm:$0xff]  ;;  %v201_v22 = vld [vmem:[%s3777_s3 + $0x564] sm:$0xff] }
  0x23   : > { %198 = vst [vmem:[%s3782_s4 + $0xb8] sm:$0xff] %v197_v20  ;;  %v203_v23 = vld [vmem:[%s3777_s3 + $0x56c] sm:$0xff]  ;;  %200 = vst [vmem:[%s3782_s4 + $0xc4] sm:$0xff] %v199_v21  ;;  %v205_v24 = vld [vmem:[%s3777_s3 + $0x620] sm:$0xff] }
  0x24   : > { %202 = vst [vmem:[%s3782_s4 + $0xcc] sm:$0xff] %v201_v22  ;;  %204 = vst [vmem:[%s3782_s4 + $0xd4] sm:$0xff] %v203_v23  ;;  %v207_v25 = vld [vmem:[%s3777_s3 + $0x628] sm:$0xff]  ;;  %v209_v26 = vld [vmem:[%s3777_s3 + $0x630] sm:$0xff] }
  0x25   : > { %206 = vst [vmem:[%s3782_s4 + $0xe0] sm:$0xff] %v205_v24  ;;  %208 = vst [vmem:[%s3782_s4 + $0xe8] sm:$0xff] %v207_v25  ;;  %v211_v27 = vld [vmem:[%s3777_s3 + $0x6e4] sm:$0xff]  ;;  %v213_v28 = vld [vmem:[%s3777_s3 + $0x6ec] sm:$0xff] }
  0x26   : > { %210 = vst [vmem:[%s3782_s4 + $0xf0] sm:$0xff] %v209_v26  ;;  %v215_v29 = vld [vmem:[%s3777_s3 + $0x6f4] sm:$0xff]  ;;  %212 = vst [vmem:[%s3782_s4 + $0xfc] sm:$0xff] %v211_v27  ;;  %v217_v30 = vld [vmem:[%s3777_s3 + $0x7a8] sm:$0xff] }
  0x27   : > { %214 = vst [vmem:[%s3782_s4 + $0x104] sm:$0xff] %v213_v28  ;;  %216 = vst [vmem:[%s3782_s4 + $0x10c] sm:$0xff] %v215_v29  ;;  %v219_v31 = vld [vmem:[%s3777_s3 + $0x7b0] sm:$0xff]  ;;  %v221_v32 = vld [vmem:[%s3777_s3 + $0x7b8] sm:$0xff] }
  0x28   : > { %218 = vst [vmem:[%s3782_s4 + $0x118] sm:$0xff] %v217_v30  ;;  %220 = vst [vmem:[%s3782_s4 + $0x120] sm:$0xff] %v219_v31  ;;  %v223_v33 = vld [vmem:[%s3777_s3 + $0x86c] sm:$0xff]  ;;  %v225_v34 = vld [vmem:[%s3777_s3 + $0x874] sm:$0xff] }
  0x29   : > { %222 = vst [vmem:[%s3782_s4 + $0x128] sm:$0xff] %v221_v32  ;;  %v227_v35 = vld [vmem:[%s3777_s3 + $0x87c] sm:$0xff]  ;;  %224 = vst [vmem:[%s3782_s4 + $0x134] sm:$0xff] %v223_v33  ;;  %v229_v36 = vld [vmem:[%s3777_s3 + $0x930] sm:$0xff] }
  0x2a   : > { %226 = vst [vmem:[%s3782_s4 + $0x13c] sm:$0xff] %v225_v34  ;;  %228 = vst [vmem:[%s3782_s4 + $0x144] sm:$0xff] %v227_v35  ;;  %v231_v37 = vld [vmem:[%s3777_s3 + $0x938] sm:$0xff]  ;;  %v233_v38 = vld [vmem:[%s3777_s3 + $0x940] sm:$0xff] }
  0x2b   : > { %230 = vst [vmem:[%s3782_s4 + $0x150] sm:$0xff] %v229_v36  ;;  %232 = vst [vmem:[%s3782_s4 + $0x158] sm:$0xff] %v231_v37  ;;  %v235_v39 = vld [vmem:[%s3777_s3 + $0x9f4] sm:$0xff]  ;;  %v237_v40 = vld [vmem:[%s3777_s3 + $0x9fc] sm:$0xff] }
  0x2c   : > { %234 = vst [vmem:[%s3782_s4 + $0x160] sm:$0xff] %v233_v38  ;;  %v239_v41 = vld [vmem:[%s3777_s3 + $0xa04] sm:$0xff]  ;;  %236 = vst [vmem:[%s3782_s4 + $0x16c] sm:$0xff] %v235_v39  ;;  %v241_v42 = vld [vmem:[%s3777_s3 + $0xab8] sm:$0xff] }
  0x2d   : > { %238 = vst [vmem:[%s3782_s4 + $0x174] sm:$0xff] %v237_v40  ;;  %240 = vst [vmem:[%s3782_s4 + $0x17c] sm:$0xff] %v239_v41  ;;  %v243_v43 = vld [vmem:[%s3777_s3 + $0xac0] sm:$0xff]  ;;  %v245_v44 = vld [vmem:[%s3777_s3 + $0xac8] sm:$0xff] }
  0x2e   : > { %242 = vst [vmem:[%s3782_s4 + $0x188] sm:$0xff] %v241_v42  ;;  %244 = vst [vmem:[%s3782_s4 + $0x190] sm:$0xff] %v243_v43  ;;  %v247_v45 = vld [vmem:[%s3777_s3 + $0xb7c] sm:$0xff]  ;;  %v249_v46 = vld [vmem:[%s3777_s3 + $0xb84] sm:$0xff] }
  0x2f   : > { %246 = vst [vmem:[%s3782_s4 + $0x198] sm:$0xff] %v245_v44  ;;  %v251_v47 = vld [vmem:[%s3777_s3 + $0xb8c] sm:$0xff]  ;;  %248 = vst [vmem:[%s3782_s4 + $0x1a4] sm:$0xff] %v247_v45  ;;  %v253_v48 = vld [vmem:[%s3777_s3 + $0xc40] sm:$0xff] }
  0x30   : > { %250 = vst [vmem:[%s3782_s4 + $0x1ac] sm:$0xff] %v249_v46  ;;  %252 = vst [vmem:[%s3782_s4 + $0x1b4] sm:$0xff] %v251_v47  ;;  %v255_v49 = vld [vmem:[%s3777_s3 + $0xc48] sm:$0xff]  ;;  %v257_v50 = vld [vmem:[%s3777_s3 + $0xc50] sm:$0xff] }
  0x31   : > { %254 = vst [vmem:[%s3782_s4 + $0x1c0] sm:$0xff] %v253_v48  ;;  %256 = vst [vmem:[%s3782_s4 + $0x1c8] sm:$0xff] %v255_v49  ;;  %v259_v51 = vld [vmem:[%s3777_s3 + $0xd04] sm:$0xff]  ;;  %v261_v52 = vld [vmem:[%s3777_s3 + $0xd0c] sm:$0xff] }
  0x32   : > { %258 = vst [vmem:[%s3782_s4 + $0x1d0] sm:$0xff] %v257_v50  ;;  %v263_v53 = vld [vmem:[%s3777_s3 + $0xd14] sm:$0xff]  ;;  %260 = vst [vmem:[%s3782_s4 + $0x1dc] sm:$0xff] %v259_v51  ;;  %v265_v54 = vld [vmem:[%s3777_s3 + $0xdc8] sm:$0xff] }
  0x33   : > { %262 = vst [vmem:[%s3782_s4 + $0x1e4] sm:$0xff] %v261_v52  ;;  %264 = vst [vmem:[%s3782_s4 + $0x1ec] sm:$0xff] %v263_v53  ;;  %v267_v55 = vld [vmem:[%s3777_s3 + $0xdd0] sm:$0xff]  ;;  %v269_v56 = vld [vmem:[%s3777_s3 + $0xdd8] sm:$0xff] }
  0x34   : > { %266 = vst [vmem:[%s3782_s4 + $0x1f8] sm:$0xff] %v265_v54  ;;  %268 = vst [vmem:[%s3782_s4 + $0x200] sm:$0xff] %v267_v55  ;;  %v271_v57 = vld [vmem:[%s3777_s3 + $0xe8c] sm:$0xff]  ;;  %v273_v58 = vld [vmem:[%s3777_s3 + $0xe94] sm:$0xff] }
  0x35   : > { %270 = vst [vmem:[%s3782_s4 + $0x208] sm:$0xff] %v269_v56  ;;  %v275_v59 = vld [vmem:[%s3777_s3 + $0xe9c] sm:$0xff]  ;;  %272 = vst [vmem:[%s3782_s4 + $0x214] sm:$0xff] %v271_v57  ;;  %v277_v60 = vld [vmem:[%s3777_s3 + $0xf50] sm:$0xff] }
  0x36   : > { %274 = vst [vmem:[%s3782_s4 + $0x21c] sm:$0xff] %v273_v58  ;;  %276 = vst [vmem:[%s3782_s4 + $0x224] sm:$0xff] %v275_v59  ;;  %v279_v61 = vld [vmem:[%s3777_s3 + $0xf58] sm:$0xff]  ;;  %v281_v62 = vld [vmem:[%s3777_s3 + $0xf60] sm:$0xff] }
  0x37   : > { %278 = vst [vmem:[%s3782_s4 + $0x230] sm:$0xff] %v277_v60  ;;  %280 = vst [vmem:[%s3782_s4 + $0x238] sm:$0xff] %v279_v61  ;;  %v283_v63 = vld [vmem:[%s3777_s3 + $0x1014] sm:$0xff]  ;;  %v285_v0 = vld [vmem:[%s3777_s3 + $0x101c] sm:$0xff] }
  0x38   : > { %282 = vst [vmem:[%s3782_s4 + $0x240] sm:$0xff] %v281_v62  ;;  %v287_v1 = vld [vmem:[%s3777_s3 + $0x1024] sm:$0xff]  ;;  %284 = vst [vmem:[%s3782_s4 + $0x24c] sm:$0xff] %v283_v63  ;;  %v289_v2 = vld [vmem:[%s3777_s3 + $0x10d8] sm:$0xff] }
  0x39   : > { %286 = vst [vmem:[%s3782_s4 + $0x254] sm:$0xff] %v285_v0  ;;  %288 = vst [vmem:[%s3782_s4 + $0x25c] sm:$0xff] %v287_v1  ;;  %v291_v3 = vld [vmem:[%s3777_s3 + $0x10e0] sm:$0xff]  ;;  %v293_v4 = vld [vmem:[%s3777_s3 + $0x10e8] sm:$0xff] }
  0x3a   : > { %290 = vst [vmem:[%s3782_s4 + $0x268] sm:$0xff] %v289_v2  ;;  %292 = vst [vmem:[%s3782_s4 + $0x270] sm:$0xff] %v291_v3  ;;  %v295_v5 = vld [vmem:[%s3777_s3 + $0x119c] sm:$0xff]  ;;  %v297_v6 = vld [vmem:[%s3777_s3 + $0x11a4] sm:$0xff] }
  0x3b   : > { %294 = vst [vmem:[%s3782_s4 + $0x278] sm:$0xff] %v293_v4  ;;  %v299_v7 = vld [vmem:[%s3777_s3 + $0x11ac] sm:$0xff]  ;;  %296 = vst [vmem:[%s3782_s4 + $0x284] sm:$0xff] %v295_v5  ;;  %v301_v8 = vld [vmem:[%s3777_s3 + $0x1260] sm:$0xff] }
  0x3c   : > { %298 = vst [vmem:[%s3782_s4 + $0x28c] sm:$0xff] %v297_v6  ;;  %300 = vst [vmem:[%s3782_s4 + $0x294] sm:$0xff] %v299_v7  ;;  %v303_v9 = vld [vmem:[%s3777_s3 + $0x1268] sm:$0xff]  ;;  %v305_v10 = vld [vmem:[%s3777_s3 + $0x1270] sm:$0xff] }
  0x3d   : > { %302 = vst [vmem:[%s3782_s4 + $0x2a0] sm:$0xff] %v301_v8  ;;  %304 = vst [vmem:[%s3782_s4 + $0x2a8] sm:$0xff] %v303_v9  ;;  %v307_v11 = vld [vmem:[%s3777_s3 + $0x1324] sm:$0xff]  ;;  %v309_v12 = vld [vmem:[%s3777_s3 + $0x132c] sm:$0xff] }
  0x3e   : > { %306 = vst [vmem:[%s3782_s4 + $0x2b0] sm:$0xff] %v305_v10  ;;  %v311_v13 = vld [vmem:[%s3777_s3 + $0x1334] sm:$0xff]  ;;  %308 = vst [vmem:[%s3782_s4 + $0x2bc] sm:$0xff] %v307_v11  ;;  %v313_v14 = vld [vmem:[%s3777_s3 + $0x13e8] sm:$0xff] }
  0x3f   : > { %310 = vst [vmem:[%s3782_s4 + $0x2c4] sm:$0xff] %v309_v12  ;;  %312 = vst [vmem:[%s3782_s4 + $0x2cc] sm:$0xff] %v311_v13  ;;  %v315_v15 = vld [vmem:[%s3777_s3 + $0x13f0] sm:$0xff]  ;;  %v317_v16 = vld [vmem:[%s3777_s3 + $0x13f8] sm:$0xff] }
  0x40   : > { %314 = vst [vmem:[%s3782_s4 + $0x2d8] sm:$0xff] %v313_v14  ;;  %316 = vst [vmem:[%s3782_s4 + $0x2e0] sm:$0xff] %v315_v15  ;;  %v319_v17 = vld [vmem:[%s3777_s3 + $0x14ac] sm:$0xff]  ;;  %v321_v18 = vld [vmem:[%s3777_s3 + $0x14b4] sm:$0xff] }
  0x41   : > { %318 = vst [vmem:[%s3782_s4 + $0x2e8] sm:$0xff] %v317_v16  ;;  %v323_v19 = vld [vmem:[%s3777_s3 + $0x14bc] sm:$0xff]  ;;  %320 = vst [vmem:[%s3782_s4 + $0x2f4] sm:$0xff] %v319_v17  ;;  %v325_v20 = vld [vmem:[%s3777_s3 + $0x1570] sm:$0xff] }
  0x42   : > { %322 = vst [vmem:[%s3782_s4 + $0x2fc] sm:$0xff] %v321_v18  ;;  %324 = vst [vmem:[%s3782_s4 + $0x304] sm:$0xff] %v323_v19  ;;  %v327_v21 = vld [vmem:[%s3777_s3 + $0x1578] sm:$0xff]  ;;  %v329_v22 = vld [vmem:[%s3777_s3 + $0x1580] sm:$0xff] }
  0x43   : > { %326 = vst [vmem:[%s3782_s4 + $0x310] sm:$0xff] %v325_v20  ;;  %328 = vst [vmem:[%s3782_s4 + $0x318] sm:$0xff] %v327_v21  ;;  %v331_v23 = vld [vmem:[%s3777_s3 + $0x1634] sm:$0xff]  ;;  %v333_v24 = vld [vmem:[%s3777_s3 + $0x163c] sm:$0xff] }
  0x44   : > { %330 = vst [vmem:[%s3782_s4 + $0x320] sm:$0xff] %v329_v22  ;;  %v335_v25 = vld [vmem:[%s3777_s3 + $0x1644] sm:$0xff]  ;;  %332 = vst [vmem:[%s3782_s4 + $0x32c] sm:$0xff] %v331_v23  ;;  %v337_v26 = vld [vmem:[%s3777_s3 + $0x16f8] sm:$0xff] }
  0x45   : > { %334 = vst [vmem:[%s3782_s4 + $0x334] sm:$0xff] %v333_v24  ;;  %336 = vst [vmem:[%s3782_s4 + $0x33c] sm:$0xff] %v335_v25  ;;  %v339_v27 = vld [vmem:[%s3777_s3 + $0x1700] sm:$0xff]  ;;  %v341_v28 = vld [vmem:[%s3777_s3 + $0x1708] sm:$0xff] }
  0x46   : > { %338 = vst [vmem:[%s3782_s4 + $0x348] sm:$0xff] %v337_v26  ;;  %340 = vst [vmem:[%s3782_s4 + $0x350] sm:$0xff] %v339_v27  ;;  %v343_v29 = vld [vmem:[%s3777_s3 + $0x17bc] sm:$0xff]  ;;  %v345_v30 = vld [vmem:[%s3777_s3 + $0x17c4] sm:$0xff] }
  0x47   : > { %342 = vst [vmem:[%s3782_s4 + $0x358] sm:$0xff] %v341_v28  ;;  %v347_v31 = vld [vmem:[%s3777_s3 + $0x17cc] sm:$0xff]  ;;  %344 = vst [vmem:[%s3782_s4 + $0x364] sm:$0xff] %v343_v29  ;;  %v2641_v32 = vld [vmem:[%s3777_s3 + $0x18] sm:$0xf] }
  0x48   : > { %346 = vst [vmem:[%s3782_s4 + $0x36c] sm:$0xff] %v345_v30  ;;  %348 = vst [vmem:[%s3782_s4 + $0x374] sm:$0xff] %v347_v31  ;;  %v2643_v33 = vld [vmem:[%s3777_s3 + $0xdc] sm:$0xf]  ;;  %v2645_v34 = vld [vmem:[%s3777_s3 + $0x1a0] sm:$0xf] }
  0x49   : > { %2642 = vst [vmem:[%s3782_s4 + $0x18] sm:$0xf] %v2641_v32  ;;  %2644 = vst [vmem:[%s3782_s4 + $0x34] sm:$0xf] %v2643_v33  ;;  %v2647_v35 = vld [vmem:[%s3777_s3 + $0x264] sm:$0xf] }
  0x4a   : > { %2646 = vst [vmem:[%s3782_s4 + $0x50] sm:$0xf] %v2645_v34  ;;  %v2649_v36 = vld [vmem:[%s3777_s3 + $0x328] sm:$0xf]  ;;  %v2651_v37 = vld [vmem:[%s3777_s3 + $0x3ec] sm:$0xf] }
  0x4b   : > { %2648 = vst [vmem:[%s3782_s4 + $0x6c] sm:$0xf] %v2647_v35  ;;  %2650 = vst [vmem:[%s3782_s4 + $0x88] sm:$0xf] %v2649_v36  ;;  %v2653_v38 = vld [vmem:[%s3777_s3 + $0x4b0] sm:$0xf] }
  0x4c   : > { %2652 = vst [vmem:[%s3782_s4 + $0xa4] sm:$0xf] %v2651_v37  ;;  %v2655_v39 = vld [vmem:[%s3777_s3 + $0x574] sm:$0xf]  ;;  %v2657_v40 = vld [vmem:[%s3777_s3 + $0x638] sm:$0xf] }
  0x4d   : > { %2654 = vst [vmem:[%s3782_s4 + $0xc0] sm:$0xf] %v2653_v38  ;;  %2656 = vst [vmem:[%s3782_s4 + $0xdc] sm:$0xf] %v2655_v39  ;;  %v2659_v41 = vld [vmem:[%s3777_s3 + $0x6fc] sm:$0xf] }
  0x4e   : > { %2658 = vst [vmem:[%s3782_s4 + $0xf8] sm:$0xf] %v2657_v40  ;;  %v2661_v42 = vld [vmem:[%s3777_s3 + $0x7c0] sm:$0xf]  ;;  %v2663_v43 = vld [vmem:[%s3777_s3 + $0x884] sm:$0xf] }
  0x4f   : > { %2660 = vst [vmem:[%s3782_s4 + $0x114] sm:$0xf] %v2659_v41  ;;  %2662 = vst [vmem:[%s3782_s4 + $0x130] sm:$0xf] %v2661_v42  ;;  %v2665_v44 = vld [vmem:[%s3777_s3 + $0x948] sm:$0xf] }
  0x50   : > { %2664 = vst [vmem:[%s3782_s4 + $0x14c] sm:$0xf] %v2663_v43  ;;  %v2667_v45 = vld [vmem:[%s3777_s3 + $0xa0c] sm:$0xf]  ;;  %v2669_v46 = vld [vmem:[%s3777_s3 + $0xad0] sm:$0xf] }
  0x51   : > { %2666 = vst [vmem:[%s3782_s4 + $0x168] sm:$0xf] %v2665_v44  ;;  %2668 = vst [vmem:[%s3782_s4 + $0x184] sm:$0xf] %v2667_v45  ;;  %v2671_v47 = vld [vmem:[%s3777_s3 + $0xb94] sm:$0xf] }
  0x52   : > { %2670 = vst [vmem:[%s3782_s4 + $0x1a0] sm:$0xf] %v2669_v46  ;;  %v2673_v48 = vld [vmem:[%s3777_s3 + $0xc58] sm:$0xf]  ;;  %v2675_v49 = vld [vmem:[%s3777_s3 + $0xd1c] sm:$0xf] }
  0x53   : > { %2672 = vst [vmem:[%s3782_s4 + $0x1bc] sm:$0xf] %v2671_v47  ;;  %2674 = vst [vmem:[%s3782_s4 + $0x1d8] sm:$0xf] %v2673_v48  ;;  %v2677_v50 = vld [vmem:[%s3777_s3 + $0xde0] sm:$0xf] }
  0x54   : > { %2676 = vst [vmem:[%s3782_s4 + $0x1f4] sm:$0xf] %v2675_v49  ;;  %v2679_v51 = vld [vmem:[%s3777_s3 + $0xea4] sm:$0xf]  ;;  %v2681_v52 = vld [vmem:[%s3777_s3 + $0xf68] sm:$0xf] }
  0x55   : > { %2678 = vst [vmem:[%s3782_s4 + $0x210] sm:$0xf] %v2677_v50  ;;  %2680 = vst [vmem:[%s3782_s4 + $0x22c] sm:$0xf] %v2679_v51  ;;  %v2683_v53 = vld [vmem:[%s3777_s3 + $0x102c] sm:$0xf] }
  0x56   : > { %2682 = vst [vmem:[%s3782_s4 + $0x248] sm:$0xf] %v2681_v52  ;;  %v2685_v54 = vld [vmem:[%s3777_s3 + $0x10f0] sm:$0xf]  ;;  %v2687_v55 = vld [vmem:[%s3777_s3 + $0x11b4] sm:$0xf] }
  0x57   : > { %2684 = vst [vmem:[%s3782_s4 + $0x264] sm:$0xf] %v2683_v53  ;;  %2686 = vst [vmem:[%s3782_s4 + $0x280] sm:$0xf] %v2685_v54  ;;  %v2689_v56 = vld [vmem:[%s3777_s3 + $0x1278] sm:$0xf] }
  0x58   : > { %2688 = vst [vmem:[%s3782_s4 + $0x29c] sm:$0xf] %v2687_v55  ;;  %v2691_v57 = vld [vmem:[%s3777_s3 + $0x133c] sm:$0xf]  ;;  %v2693_v58 = vld [vmem:[%s3777_s3 + $0x1400] sm:$0xf] }
  0x59   : > { %2690 = vst [vmem:[%s3782_s4 + $0x2b8] sm:$0xf] %v2689_v56  ;;  %2692 = vst [vmem:[%s3782_s4 + $0x2d4] sm:$0xf] %v2691_v57  ;;  %v2695_v59 = vld [vmem:[%s3777_s3 + $0x14c4] sm:$0xf] }
  0x5a   : > { %2694 = vst [vmem:[%s3782_s4 + $0x2f0] sm:$0xf] %v2693_v58  ;;  %v2697_v60 = vld [vmem:[%s3777_s3 + $0x1588] sm:$0xf]  ;;  %v2699_v61 = vld [vmem:[%s3777_s3 + $0x164c] sm:$0xf] }
  0x5b   : > { %2696 = vst [vmem:[%s3782_s4 + $0x30c] sm:$0xf] %v2695_v59  ;;  %2698 = vst [vmem:[%s3782_s4 + $0x328] sm:$0xf] %v2697_v60  ;;  %v2701_v62 = vld [vmem:[%s3777_s3 + $0x1710] sm:$0xf] }
  0x5c   : > { %2700 = vst [vmem:[%s3782_s4 + $0x344] sm:$0xf] %v2699_v61  ;;  %v2703_v63 = vld [vmem:[%s3777_s3 + $0x17d4] sm:$0xf]  ;;  %2702 = vst [vmem:[%s3782_s4 + $0x360] sm:$0xf] %v2701_v62 }
  0x5d   : > { %2704 = vst [vmem:[%s3782_s4 + $0x37c] sm:$0xf] %v2703_v63 }
  0x5e PF: > { %p2705_p7 = scmp.ge.s32.totalorder %s3699_s15, 1  ;;  %p437_p8 = scmp.lt.s32.totalorder %s3699_s15, 15 }
  0x60   : > { %p438_p9 = pnand %p2705_p7, %p437_p8 }
  0x62   : > { %441 = sbr.rel (%p438_p9) target bundleno = 636 (0x27c), region = 50 }
  0x67   : > { %s444_s5 = sand.u32 1, %s3675_s9   ;;  %s478_s6 = smul.u32 112, %s3683_s11 }
  0x68   : > { %s3307_s7 = smul.u32 896, %s444_s5  ;;  %s2707_s8 = sshll.u32 %s3687_s12, 5 }
  0x69   : > { %p479_p10 = scmp.lt.s32.totalorder %s478_s6, 783  ;;  %p488_p11 = scmp.lt.s32.totalorder %s2707_s8, 63 }
  0x6a   : > { %s4052_s9 = scalar_lea.vmem [#allocation3], %s3307_s7  ;;  %p2709_p12 = scmp.ne.s32.totalorder %s3683_s11, 0 }
  0x6b   : > { %s4581_s6 = smov (!%p479_p10, %s478_s6), 783  ;;  %s4583_s8 = smov (!%p488_p11, %s2707_s8), 63 }
  0x6c   : > { %s2706_s18 = sshll.u32 %s4581_s6, 2  ;;  %s2708_s23 = sshll.u32 %s4583_s8, 3 }
  0x6d   : > { %s4045_s21 = scalar_lea.vmem %s4542_s1, %s2706_s18  ;;  %s4050_s26 = scalar_lea.vmem %s4543_s2, %s2708_s23 }
  0x6e   : > { %500 = sbr.rel (%p2709_p12) target bundleno = 132 (0x84), region = 58 }
  0x73   : > { %v3701_v0 = vmov 0.0  }
  0x74   : > { %501 = vst [vmem:[#allocation2 + $0xb0] sm:$0xff] %v3701_v0  ;;  %502 = vst [vmem:[#allocation2] sm:$0xff] %v3701_v0 }
  0x75   : > { %503 = vst [vmem:[#allocation2 + $0xd8] sm:$0xff] %v3701_v0  ;;  %504 = vst [vmem:[#allocation2 + $0x18] sm:$0xff] %v3701_v0 }
  0x76   : > { %505 = vst [vmem:[#allocation2 + $0x50] sm:$0xff] %v3701_v0  ;;  %506 = vst [vmem:[#allocation2 + $0x68] sm:$0xff] %v3701_v0 }
  0x77   : > { %507 = vst [vmem:[#allocation2 + $0x30] sm:$0xff] %v3701_v0  ;;  %508 = vst [vmem:[#allocation2 + $0x48] sm:$0xff] %v3701_v0 }
  0x78   : > { %509 = vst [vmem:[#allocation2 + $0x80] sm:$0xff] %v3701_v0  ;;  %510 = vst [vmem:[#allocation2 + $0x88] sm:$0xff] %v3701_v0 }
  0x79   : > { %511 = vst [vmem:[#allocation2 + $0xe8] sm:$0xff] %v3701_v0  ;;  %512 = vst [vmem:[#allocation2 + $0xb8] sm:$0xff] %v3701_v0 }
  0x7a   : > { %513 = vst [vmem:[#allocation2 + $0x60] sm:$0xff] %v3701_v0  ;;  %514 = vst [vmem:[#allocation2 + $0xf0] sm:$0xff] %v3701_v0 }
  0x7b   : > { %515 = vst [vmem:[#allocation2 + $0x8] sm:$0xff] %v3701_v0  ;;  %516 = vst [vmem:[#allocation2 + $0x78] sm:$0xff] %v3701_v0 }
  0x7c   : > { %517 = vst [vmem:[#allocation2 + $0x38] sm:$0xff] %v3701_v0  ;;  %518 = vst [vmem:[#allocation2 + $0x58] sm:$0xff] %v3701_v0 }
  0x7d   : > { %519 = vst [vmem:[#allocation2 + $0x40] sm:$0xff] %v3701_v0  ;;  %520 = vst [vmem:[#allocation2 + $0xc8] sm:$0xff] %v3701_v0 }
  0x7e   : > { %521 = vst [vmem:[#allocation2 + $0xe0] sm:$0xff] %v3701_v0  ;;  %522 = vst [vmem:[#allocation2 + $0x90] sm:$0xff] %v3701_v0 }
  0x7f   : > { %523 = vst [vmem:[#allocation2 + $0x70] sm:$0xff] %v3701_v0  ;;  %524 = vst [vmem:[#allocation2 + $0xc0] sm:$0xff] %v3701_v0 }
  0x80   : > { %525 = vst [vmem:[#allocation2 + $0xa8] sm:$0xff] %v3701_v0  ;;  %526 = vst [vmem:[#allocation2 + $0xd0] sm:$0xff] %v3701_v0 }
  0x81   : > { %527 = vst [vmem:[#allocation2 + $0x10] sm:$0xff] %v3701_v0  ;;  %528 = vst [vmem:[#allocation2 + $0x28] sm:$0xff] %v3701_v0 }
  0x82   : > { %529 = vst [vmem:[#allocation2 + $0xa0] sm:$0xff] %v3701_v0  ;;  %530 = vst [vmem:[#allocation2 + $0xf8] sm:$0xff] %v3701_v0 }
  0x83   : > { %531 = vst [vmem:[#allocation2 + $0x20] sm:$0xff] %v3701_v0  ;;  %532 = vst [vmem:[#allocation2 + $0x98] sm:$0xff] %v3701_v0 }
  0x84 PF: > { %v3365_v1 = vld [vmem:[%s4045_s21 + $0x78] sm:$0xff]   ;;  %v3367_v3 = vld [vmem:[%s4045_s21 + $0x70] sm:$0xff]   ;;  %v3369_v5 = vld [vmem:[%s4045_s21 + $0x68] sm:$0xff]   ;;  %p2878_p13 = scmp.ne.s32.totalorder %s3683_s11, 6 }
  0x85   : > { %v3366_v2 = vld [vmem:[%s4045_s21 + $0x38] sm:$0xff]   ;;  %2881 = vmatprep.subr.bf16.mxu0 %v3365_v1  ;;  %3289 = vmatprep.subr.bf16.mxu1 %v3365_v1  ;;  %v3368_v4 = vld [vmem:[%s4045_s21 + $0x30] sm:$0xff]   ;;  %v3370_v6 = vld [vmem:[%s4045_s21 + $0x28] sm:$0xff]  }
  0x86   : > { %2882 = vmatpush3.bf16.msra.mxu0 %v3366_v2  ;;  %3297 = vmatpush3.bf16.msra.mxu1 %v3366_v2  ;;  %v3371_v7 = vld [vmem:[%s4045_s21 + $0x60] sm:$0xff]   ;;  %v3373_v9 = vld [vmem:[%s4045_s21 + $0x58] sm:$0xff]   ;;  %v3375_v11 = vld [vmem:[%s4045_s21 + $0x50] sm:$0xff]  }
  0x87   : > { %2883 = vmatprep.subr.bf16.mxu0 %v3367_v3  ;;  %3290 = vmatprep.subr.bf16.mxu1 %v3367_v3  ;;  %v3372_v8 = vld [vmem:[%s4045_s21 + $0x20] sm:$0xff]   ;;  %v3374_v10 = vld [vmem:[%s4045_s21 + $0x18] sm:$0xff]   ;;  %v3376_v14 = vld [vmem:[%s4045_s21 + $0x10] sm:$0xff]  }
  0x88   : > { %v3383_v12 = vld [vmem:[%s4052_s9 + $0x4] ss:$28 sps:$4 sm:$0xff]   ;;  %v3377_v15 = vld [vmem:[%s4045_s21 + $0x48] sm:$0xff]   ;;  %v3387_v19 = vld [vmem:[%s4045_s21 + $0xf8] sm:$0xff]  }
  0x89   : > { %v3386_v13 = vld [vmem:[%s4052_s9 + $0x2a4] ss:$28 sps:$4 sm:$0xff]   ;;  %1749 = vmatprep.mubr.bf16.mxu0 %v3383_v12  ;;  %v3378_v16 = vld [vmem:[%s4045_s21 + $0x8] sm:$0xff]   ;;  %v3388_v22 = vld [vmem:[%s4045_s21 + $0x178] sm:$0xff]  }
  0x8a   : > { %2884 = vmatpush3.bf16.msra.mxu0 %v3368_v4  ;;  %3298 = vmatpush3.bf16.msra.mxu1 %v3368_v4  ;;  %v3379_v17 = vld [vmem:[%s4045_s21 + $0x40] sm:$0xff]   ;;  %v3389_v23 = vld [vmem:[%s4045_s21 + $0xb8] sm:$0xff]   ;;  %v3391_v25 = vld [vmem:[%s4045_s21 + $0xf0] sm:$0xff]  }
  0x8b   : > { %2885 = vmatprep.subr.bf16.mxu0 %v3369_v5  ;;  %3291 = vmatprep.subr.bf16.mxu1 %v3369_v5  ;;  %v3380_v18 = vld [vmem:[%s4045_s21] sm:$0xff]   ;;  %v3390_v24 = vld [vmem:[%s4045_s21 + $0x138] sm:$0xff]   ;;  %v3402_v28 = vld [vmem:[%s4045_s21 + $0x170] sm:$0xff]  }
  0x8c   : > { %1845 = vmatprep.mubr.bf16.mxu1 %v3386_v13  ;;  %v3381_v20 = vld [vmem:[%s4052_s9] ss:$28 sps:$4 sm:$0xff]   ;;  %v3392_v29 = vld [vmem:[%s4045_s21 + $0xb0] sm:$0xff]   ;;  %v3399_v33 = vld [vmem:[%s4045_s21 + $0xe8] sm:$0xff]  }
  0x8d   : > { %v3384_v21 = vld [vmem:[%s4052_s9 + $0x2a0] ss:$28 sps:$4 sm:$0xff]   ;;  %v3404_v30 = vld [vmem:[%s4045_s21 + $0x130] sm:$0xff]   ;;  %v3400_v34 = vld [vmem:[%s4045_s21 + $0xa8] sm:$0xff]  }
  0x8e   : > { %2886 = vmatpush3.bf16.msra.mxu0 %v3370_v6  ;;  %3299 = vmatpush3.bf16.msra.mxu1 %v3370_v6  ;;  %v3393_v26 = vld [vmem:[%s4052_s9 + $0x3c] ss:$28 sps:$4 sm:$0xff]   ;;  %v3401_v35 = vld [vmem:[%s4045_s21 + $0xe0] sm:$0xff]   ;;  %v3405_v36 = vld [vmem:[%s4052_s9 + $0x74] ss:$28 sps:$4 sm:$0xff]  }
  0x8f   : > { %2887 = vmatprep.subr.bf16.mxu0 %v3371_v7  ;;  %3292 = vmatprep.subr.bf16.mxu1 %v3371_v7  ;;  %v3395_v27 = vld [vmem:[%s4052_s9 + $0x2dc] ss:$28 sps:$4 sm:$0xff]   ;;  %v3407_v37 = vld [vmem:[%s4052_s9 + $0x314] ss:$28 sps:$4 sm:$0xff]   ;;  %v3403_v38 = vld [vmem:[%s4045_s21 + $0xa0] sm:$0xff]  }
  0x90   : > { %v3397_v31 = vld [vmem:[%s4052_s9 + $0x38] ss:$28 sps:$4 sm:$0xff]   ;;  %v3409_v40 = vld [vmem:[%s4052_s9 + $0x70] ss:$28 sps:$4 sm:$0xff]   ;;  %v3419_v50 = vld [vmem:[%s4052_s9 + $0xa8] ss:$28 sps:$4 sm:$0xff]  }
  0x91   : > { %v3398_v32 = vld [vmem:[%s4052_s9 + $0x2d8] ss:$28 sps:$4 sm:$0xff]   ;;  %v3410_v41 = vld [vmem:[%s4052_s9 + $0x310] ss:$28 sps:$4 sm:$0xff]   ;;  %v3420_v51 = vld [vmem:[%s4052_s9 + $0x348] ss:$28 sps:$4 sm:$0xff]  }
  0x92   : > { %2888 = vmatpush3.bf16.msra.mxu0 %v3372_v8  ;;  %3300 = vmatpush3.bf16.msra.mxu1 %v3372_v8  ;;  %v3411_v39 = vld [vmem:[%s4045_s21 + $0xd8] sm:$0xff]   ;;  %v3422_v42 = vld [vmem:[%s4045_s21 + $0x168] sm:$0xff]   ;;  %v3413_v44 = vld [vmem:[%s4045_s21 + $0xd0] sm:$0xff]  }
  0x93   : > { %2889 = vmatprep.subr.bf16.mxu0 %v3373_v9  ;;  %3293 = vmatprep.subr.bf16.mxu1 %v3373_v9  ;;  %v3412_v43 = vld [vmem:[%s4045_s21 + $0x98] sm:$0xff]   ;;  %v3424_v45 = vld [vmem:[%s4045_s21 + $0x128] sm:$0xff]   ;;  %v3414_v48 = vld [vmem:[%s4045_s21 + $0x90] sm:$0xff]  }
  0x94   : > { %v3415_v46 = vld [vmem:[%s4052_s9 + $0xac] ss:$28 sps:$4 sm:$0xff]   ;;  %v3433_v52 = vld [vmem:[%s4045_s21 + $0x160] sm:$0xff]   ;;  %v3434_v59 = vld [vmem:[%s4045_s21 + $0x1b8] sm:$0xff]  }
  0x95   : > { %v3417_v47 = vld [vmem:[%s4052_s9 + $0x34c] ss:$28 sps:$4 sm:$0xff]   ;;  %v3435_v54 = vld [vmem:[%s4045_s21 + $0x120] sm:$0xff]   ;;  %v3448_v61 = vld [vmem:[%s4045_s21 + $0x158] sm:$0xff]  }
  0x96   : > { %2890 = vmatpush3.bf16.msra.mxu0 %v3374_v10  ;;  %3301 = vmatpush3.bf16.msra.mxu1 %v3374_v10  ;;  %v3421_v49 = vld [vmem:[%s4045_s21 + $0xc8] sm:$0xff]   ;;  %v3427_v55 = vld [vmem:[%s4052_s9 + $0xe4] ss:$28 sps:$4 sm:$0xff]   ;;  %v3449_v62 = vld [vmem:[%s4045_s21 + $0x118] sm:$0xff]  }
  0x97   : > { %2891 = vmatprep.subr.bf16.mxu0 %v3375_v11  ;;  %3294 = vmatprep.subr.bf16.mxu1 %v3375_v11  ;;  %v3423_v53 = vld [vmem:[%s4045_s21 + $0x88] sm:$0xff]   ;;  %v3425_v56 = vld [vmem:[%s4045_s21 + $0xc0] sm:$0xff]   ;;  %v3436_v0 = vld [vmem:[%s4052_s9 + $0x11c] ss:$28 sps:$4 sm:$0xff]  }
  0x98   : > { %v3431_v57 = vld [vmem:[%s4052_s9 + $0xc] ss:$28 sps:$4 sm:$0xff]   ;;  %v3426_v58 = vld [vmem:[%s4045_s21 + $0x80] sm:$0xff]   ;;  %v3450_v2 = vld [vmem:[%s4045_s21 + $0x1b0] sm:$0xff]  }
  0x99   : > { %v3429_v60 = vld [vmem:[%s4052_s9 + $0x8] ss:$28 sps:$4 sm:$0xff]   ;;  %v3432_v63 = vld [vmem:[%s4052_s9 + $0xe0] ss:$28 sps:$4 sm:$0xff]   ;;  %v3457_v3 = vld [vmem:[%s4045_s21 + $0x150] sm:$0xff]  }
  0x9a   : > { %2892 = vmatpush3.bf16.msra.mxu0 %v3376_v14  ;;  %3302 = vmatpush3.bf16.msra.mxu1 %v3376_v14  ;;  %v3438_v1 = vld [vmem:[%s4052_s9 + $0x44] ss:$28 sps:$4 sm:$0xff]   ;;  %v3458_v4 = vld [vmem:[%s4045_s21 + $0x110] sm:$0xff]   ;;  %v3465_v8 = vld [vmem:[%s4045_s21 + $0x1a8] sm:$0xff]  }
  0x9b   : > { %2893 = vmatprep.subr.bf16.mxu0 %v3377_v15  ;;  %3295 = vmatprep.subr.bf16.mxu1 %v3377_v15  ;;  %v3440_v5 = vld [vmem:[%s4052_s9 + $0x118] ss:$28 sps:$4 sm:$0xff]   ;;  %v3441_v6 = vld [vmem:[%s4052_s9 + $0x40] ss:$28 sps:$4 sm:$0xff]   ;;  %v3472_v10 = vld [vmem:[%s4045_s21 + $0x148] sm:$0xff]  }
  0x9c   : > { %v3442_v7 = vld [vmem:[%s4052_s9 + $0x154] ss:$28 sps:$4 sm:$0xff]   ;;  %v3444_v9 = vld [vmem:[%s4052_s9 + $0x7c] ss:$28 sps:$4 sm:$0xff]   ;;  %v3473_v11 = vld [vmem:[%s4045_s21 + $0x108] sm:$0xff]  }
  0x9d   : > { %v3446_v12 = vld [vmem:[%s4052_s9 + $0x150] ss:$28 sps:$4 sm:$0xff]   ;;  %v3447_v13 = vld [vmem:[%s4052_s9 + $0x78] ss:$28 sps:$4 sm:$0xff]  }
  0x9e   : > { %2894 = vmatpush3.bf16.msra.mxu0 %v3378_v16  ;;  %3303 = vmatpush3.bf16.msra.mxu1 %v3378_v16  ;;  %v3451_v14 = vld [vmem:[%s4052_s9 + $0x18c] ss:$28 sps:$4 sm:$0xff]   ;;  %v3453_v15 = vld [vmem:[%s4052_s9 + $0xb4] ss:$28 sps:$4 sm:$0xff]   ;;  %v3480_v16 = vld [vmem:[%s4045_s21 + $0x140] sm:$0xff]  }
  0x9f   : > { %2895 = vmatprep.subr.bf16.mxu0 %v3379_v17  ;;  %3296 = vmatprep.subr.bf16.mxu1 %v3379_v17  ;;  %v3481_v17 = vld [vmem:[%s4045_s21 + $0x1a0] sm:$0xff]  }
  0xa2   : > { %2896 = vmatpush3.bf16.msra.mxu0 %v3380_v18  ;;  %3304 = vmatpush3.bf16.msra.mxu1 %v3380_v18  ;;  %v3482_v18 = vld [vmem:[%s4045_s21 + $0x100] sm:$0xff]  }
  0xa3   : > { %2993 = vmatprep.subr.bf16.mxu1 %v3387_v19  ;;  %3105 = vmatprep.subr.bf16.mxu0 %v3388_v22  ;;  %v3455_v19 = vld [vmem:[%s4052_s9 + $0x188] ss:$28 sps:$4 sm:$0xff]  }
  0xa4   : > { %v3461_v22 = vld [vmem:[%s4052_s9 + $0xec] ss:$28 sps:$4 sm:$0xff]  }
  0xa5   : > { %1750 = vmatmul.mubr.bf16.vlgmr.msra.gmra.mxu0 %v3381_v20  ;;  %1846 = vmatmul.mubr.bf16.vlgmr.msra.gmra.mxu1 %v3384_v21  ;;  %v3456_v20 = vld [vmem:[%s4052_s9 + $0xb0] ss:$28 sps:$4 sm:$0xff]   ;;  %v3459_v21 = vld [vmem:[%s4052_s9 + $0x1c4] ss:$28 sps:$4 sm:$0xff]  }
  0xa6   : > { %2994 = vmatpush3.bf16.msra.mxu1 %v3389_v23  ;;  %3106 = vmatpush3.bf16.msra.mxu0 %v3390_v24  ;;  %v3495_v23 = vld [vmem:[%s4045_s21 + $0x198] sm:$0xff]  }
  0xa7   : > { %2995 = vmatprep.subr.bf16.mxu1 %v3391_v25  ;;  %1757 = vmatprep.mubr.bf16.mxu0 %v3393_v26  ;;  %v3463_v24 = vld [vmem:[%s4052_s9 + $0x1c0] ss:$28 sps:$4 sm:$0xff]   ;;  %v3464_v25 = vld [vmem:[%s4052_s9 + $0xe8] ss:$28 sps:$4 sm:$0xff]   ;;  %v3508_v26 = vld [vmem:[%s4045_s21 + $0x190] sm:$0xff]  }
  0xa8   : > { %1853 = vmatprep.mubr.bf16.mxu1 %v3395_v27  ;;  %3107 = vmatprep.subr.bf16.mxu0 %v3402_v28  ;;  %v3466_v27 = vld [vmem:[%s4052_s9 + $0x1fc] ss:$28 sps:$4 sm:$0xff]   ;;  %v3468_v28 = vld [vmem:[%s4052_s9 + $0x124] ss:$28 sps:$4 sm:$0xff]  }
  0xaa   : > { %2996 = vmatpush3.bf16.msra.mxu1 %v3392_v29  ;;  %3108 = vmatpush3.bf16.msra.mxu0 %v3404_v30  ;;  %v3521_v29 = vld [vmem:[%s4045_s21 + $0x188] sm:$0xff]   ;;  %v3470_v30 = vld [vmem:[%s4052_s9 + $0x1f8] ss:$28 sps:$4 sm:$0xff]  }
  0xab   : > { %2997 = vmatprep.subr.bf16.mxu1 %v3399_v33  ;;  %3109 = vmatprep.subr.bf16.mxu0 %v3422_v42  ;;  %v3476_v33 = vld [vmem:[%s4052_s9 + $0x15c] ss:$28 sps:$4 sm:$0xff]   ;;  %v3493_v42 = vld [vmem:[%s4052_s9 + $0x14] ss:$28 sps:$4 sm:$0xff]  }
  0xad   : > { %1758 = vmatmul.mubr.bf16.gmra.mxu0 %v3397_v31  ;;  %1854 = vmatmul.mubr.bf16.gmra.mxu1 %v3398_v32  ;;  %v3471_v31 = vld [vmem:[%s4052_s9 + $0x120] ss:$28 sps:$4 sm:$0xff]   ;;  %v3474_v32 = vld [vmem:[%s4052_s9 + $0x234] ss:$28 sps:$4 sm:$0xff]  }
  0xae   : > { %2998 = vmatpush3.bf16.msra.mxu1 %v3400_v34  ;;  %1765 = vmatprep.mubr.bf16.mxu0 %v3405_v36  ;;  %v3534_v34 = vld [vmem:[%s4045_s21 + $0x180] sm:$0xff]   ;;  %v3479_v36 = vld [vmem:[%s4052_s9 + $0x158] ss:$28 sps:$4 sm:$0xff]  }
  0xaf   : > { %2999 = vmatprep.subr.bf16.mxu1 %v3401_v35  ;;  %1861 = vmatprep.mubr.bf16.mxu1 %v3407_v37  ;;  %v3478_v35 = vld [vmem:[%s4052_s9 + $0x230] ss:$28 sps:$4 sm:$0xff]  }
  0xb0   : > { %3110 = vmatpush3.bf16.msra.mxu0 %v3424_v45  ;;  %v3483_v37 = vld [vmem:[%s4052_s9 + $0x26c] ss:$28 sps:$4 sm:$0xff]   ;;  %v3496_v45 = vld [vmem:[%s4052_s9 + $0x204] ss:$28 sps:$4 sm:$0xff]  }
  0xb1   : > { %3111 = vmatprep.subr.bf16.mxu0 %v3433_v52  ;;  %v3507_v52 = vld [vmem:[%s4052_s9 + $0x80] ss:$28 sps:$4 sm:$0xff]  }
  0xb2   : > { %3000 = vmatpush3.bf16.msra.mxu1 %v3403_v38  ;;  %v3485_v38 = vld [vmem:[%s4052_s9 + $0x194] ss:$28 sps:$4 sm:$0xff]  }
  0xb3   : > { %3001 = vmatprep.subr.bf16.mxu1 %v3411_v39  ;;  %v3487_v39 = vld [vmem:[%s4052_s9 + $0x268] ss:$28 sps:$4 sm:$0xff]  }
  0xb4   : > { %3112 = vmatpush3.bf16.msra.mxu0 %v3435_v54  ;;  %v3511_v54 = vld [vmem:[%s4052_s9 + $0xbc] ss:$28 sps:$4 sm:$0xff]  }
  0xb5   : > { %1766 = vmatmul.mubr.bf16.gmra.mxu0 %v3409_v40  ;;  %1862 = vmatmul.mubr.bf16.gmra.mxu1 %v3410_v41  ;;  %v3488_v40 = vld [vmem:[%s4052_s9 + $0x190] ss:$28 sps:$4 sm:$0xff]  }
  0xb6   : > { %3002 = vmatpush3.bf16.msra.mxu1 %v3412_v43  ;;  %1773 = vmatprep.mubr.bf16.mxu0 %v3415_v46  ;;  %v3489_v41 = vld [vmem:[%s4052_s9 + $0x1cc] ss:$28 sps:$4 sm:$0xff]  }
  0xb7   : > { %3003 = vmatprep.subr.bf16.mxu1 %v3413_v44  ;;  %1869 = vmatprep.mubr.bf16.mxu1 %v3417_v47  ;;  %v3491_v43 = vld [vmem:[%s4052_s9 + $0x10] ss:$28 sps:$4 sm:$0xff]   ;;  %v3494_v44 = vld [vmem:[%s4052_s9 + $0x1c8] ss:$28 sps:$4 sm:$0xff]   ;;  %v3500_v47 = vld [vmem:[%s4052_s9 + $0x200] ss:$28 sps:$4 sm:$0xff]  }
  0xb8   : > { %3113 = vmatprep.subr.bf16.mxu0 %v3448_v61  ;;  %v3498_v46 = vld [vmem:[%s4052_s9 + $0x4c] ss:$28 sps:$4 sm:$0xff]   ;;  %v3522_v61 = vld [vmem:[%s4052_s9 + $0x2e4] ss:$28 sps:$4 sm:$0xff]  }
  0xb9   : > { %3114 = vmatpush3.bf16.msra.mxu0 %v3449_v62  ;;  %v3524_v62 = vld [vmem:[%s4052_s9 + $0x12c] ss:$28 sps:$4 sm:$0xff]  }
  0xba   : > { %3004 = vmatpush3.bf16.msra.mxu1 %v3414_v48  ;;  %3115 = vmatprep.subr.bf16.mxu0 %v3457_v3  ;;  %v3501_v48 = vld [vmem:[%s4052_s9 + $0x48] ss:$28 sps:$4 sm:$0xff]   ;;  %v3532_v3 = vld [vmem:[%s4052_s9 + $0x318] ss:$28 sps:$4 sm:$0xff]  }
  0xbb   : > { %3005 = vmatprep.subr.bf16.mxu1 %v3421_v49  ;;  %v3502_v49 = vld [vmem:[%s4052_s9 + $0x23c] ss:$28 sps:$4 sm:$0xff]  }
  0xbd   : > { %1774 = vmatmul.mubr.bf16.gmra.mxu0 %v3419_v50  ;;  %1870 = vmatmul.mubr.bf16.gmra.mxu1 %v3420_v51  ;;  %v3504_v50 = vld [vmem:[%s4052_s9 + $0x84] ss:$28 sps:$4 sm:$0xff]   ;;  %v3506_v51 = vld [vmem:[%s4052_s9 + $0x238] ss:$28 sps:$4 sm:$0xff]  }
  0xbe   : > { %3006 = vmatpush3.bf16.msra.mxu1 %v3423_v53  ;;  %1781 = vmatprep.mubr.bf16.mxu0 %v3427_v55  ;;  %v3509_v53 = vld [vmem:[%s4052_s9 + $0x274] ss:$28 sps:$4 sm:$0xff]  }
  0xbf   : > { %3007 = vmatprep.subr.bf16.mxu1 %v3425_v56  ;;  %1910 = vmatprep.mubr.bf16.mxu1 %v3431_v57  ;;  %v3513_v55 = vld [vmem:[%s4052_s9 + $0x270] ss:$28 sps:$4 sm:$0xff]   ;;  %v3514_v56 = vld [vmem:[%s4052_s9 + $0xb8] ss:$28 sps:$4 sm:$0xff]  }
  0xc0   : > { %3116 = vmatpush3.bf16.msra.mxu0 %v3458_v4  ;;  %v3515_v57 = vld [vmem:[%s4052_s9 + $0x2ac] ss:$28 sps:$4 sm:$0xff]   ;;  %v3533_v4 = vld [vmem:[%s4052_s9 + $0x160] ss:$28 sps:$4 sm:$0xff]  }
  0xc1   : > { %3117 = vmatprep.subr.bf16.mxu0 %v3472_v10  ;;  %v3543_v10 = vld [vmem:[%s4052_s9 + $0x18] ss:$28 sps:$4 sm:$0xff]  }
  0xc2   : > { %3008 = vmatpush3.bf16.msra.mxu1 %v3426_v58  ;;  %v3517_v58 = vld [vmem:[%s4052_s9 + $0xf4] ss:$28 sps:$4 sm:$0xff]  }
  0xc3   : > { %3241 = vmatprep.subr.bf16.mxu1 %v3434_v59 }
  0xc4   : > { %3118 = vmatpush3.bf16.msra.mxu0 %v3473_v11  ;;  %v3544_v11 = vld [vmem:[%s4052_s9 + $0x1d0] ss:$28 sps:$4 sm:$0xff]  }
  0xc5   : > { %1782 = vmatmul.mubr.bf16.gmra.mxu0 %v3432_v63  ;;  %1911 = vmatmul.mubr.bf16.vlgmr.msra.gmra.mxu1 %v3429_v60  ;;  %v3520_v60 = vld [vmem:[%s4052_s9 + $0xf0] ss:$28 sps:$4 sm:$0xff]   ;;  %v3526_v63 = vld [vmem:[%s4052_s9 + $0x2e0] ss:$28 sps:$4 sm:$0xff]  }
  0xc6   : > { %3242 = vmatpush3.bf16.msra.mxu1 %v3434_v59  ;;  %1789 = vmatprep.mubr.bf16.mxu0 %v3436_v0  ;;  %v3519_v59 = vld [vmem:[%s4052_s9 + $0x2a8] ss:$28 sps:$4 sm:$0xff]  }
  0xc7   : > { %1918 = vmatprep.mubr.bf16.mxu1 %v3438_v1  ;;  %3243 = vmatprep.subr.bf16.mxu1 %v3450_v2  ;;  %v3527_v0 = vld [vmem:[%s4052_s9 + $0x128] ss:$28 sps:$4 sm:$0xff]   ;;  %v3528_v1 = vld [vmem:[%s4052_s9 + $0x31c] ss:$28 sps:$4 sm:$0xff]  }
  0xc8   : > { %3119 = vmatprep.subr.bf16.mxu0 %v3480_v16  ;;  %v3550_v16 = vld [vmem:[%s4052_s9 + $0xc0] ss:$28 sps:$4 sm:$0xff]  }
  0xc9   : > { %3120 = vmatpush3.bf16.msra.mxu0 %v3482_v18  ;;  %v3553_v18 = vld [vmem:[%s4052_s9 + $0xf8] ss:$28 sps:$4 sm:$0xff]  }
  0xca   : > { %3244 = vmatpush3.bf16.msra.mxu1 %v3450_v2  ;;  %v3530_v2 = vld [vmem:[%s4052_s9 + $0x164] ss:$28 sps:$4 sm:$0xff]  }
  0xcb   : > { %3245 = vmatprep.subr.bf16.mxu1 %v3465_v8 }
  0xcd   : > { %1790 = vmatmul.mubr.bf16.gmra.mxu0 %v3440_v5  ;;  %1919 = vmatmul.mubr.bf16.gmra.mxu1 %v3441_v6  ;;  %v3535_v5 = vld [vmem:[%s4052_s9 + $0x354] ss:$28 sps:$4 sm:$0xff]   ;;  %v3537_v6 = vld [vmem:[%s4052_s9 + $0x19c] ss:$28 sps:$4 sm:$0xff]  }
  0xce   : > { %1797 = vmatprep.mubr.bf16.mxu0 %v3442_v7  ;;  %1926 = vmatprep.mubr.bf16.mxu1 %v3444_v9  ;;  %v3539_v7 = vld [vmem:[%s4052_s9 + $0x350] ss:$28 sps:$4 sm:$0xff]  }
  0xcf   : > { %3246 = vmatpush3.bf16.msra.mxu1 %v3465_v8  ;;  %v3540_v8 = vld [vmem:[%s4052_s9 + $0x198] ss:$28 sps:$4 sm:$0xff]  }
  0xd0   : > { %3247 = vmatprep.subr.bf16.mxu1 %v3481_v17  ;;  %v3541_v9 = vld [vmem:[%s4052_s9 + $0x1d4] ss:$28 sps:$4 sm:$0xff]  }
  0xd3   : > { %3248 = vmatpush3.bf16.msra.mxu1 %v3481_v17  ;;  %v3551_v17 = vld [vmem:[%s4052_s9 + $0x244] ss:$28 sps:$4 sm:$0xff]  }
  0xd4   : > { %3249 = vmatprep.subr.bf16.mxu1 %v3495_v23 }
  0xd5   : > { %1798 = vmatmul.mubr.bf16.gmra.mxu0 %v3446_v12  ;;  %1927 = vmatmul.mubr.bf16.gmra.mxu1 %v3447_v13  ;;  %v3545_v12 = vld [vmem:[%s4052_s9 + $0x50] ss:$28 sps:$4 sm:$0xff]  }
  0xd6   : > { %1805 = vmatprep.mubr.bf16.mxu0 %v3451_v14  ;;  %1934 = vmatprep.mubr.bf16.mxu1 %v3453_v15  ;;  %v3546_v13 = vld [vmem:[%s4052_s9 + $0x20c] ss:$28 sps:$4 sm:$0xff]  }
  0xd7   : > { %3250 = vmatpush3.bf16.msra.mxu1 %v3495_v23  ;;  %v3548_v14 = vld [vmem:[%s4052_s9 + $0x88] ss:$28 sps:$4 sm:$0xff]   ;;  %v3559_v23 = vld [vmem:[%s4052_s9 + $0x278] ss:$28 sps:$4 sm:$0xff]  }
  0xd8   : > { %3251 = vmatprep.subr.bf16.mxu1 %v3508_v26  ;;  %v3549_v15 = vld [vmem:[%s4052_s9 + $0x208] ss:$28 sps:$4 sm:$0xff]  }
  0xdb   : > { %3252 = vmatpush3.bf16.msra.mxu1 %v3508_v26  ;;  %v3563_v26 = vld [vmem:[%s4052_s9 + $0x1d8] ss:$28 sps:$4 sm:$0xff]  }
  0xdc   : > { %3253 = vmatprep.subr.bf16.mxu1 %v3521_v29 }
  0xdd   : > { %1806 = vmatmul.mubr.bf16.gmra.mxu0 %v3455_v19  ;;  %1935 = vmatmul.mubr.bf16.gmra.mxu1 %v3456_v20  ;;  %v3554_v19 = vld [vmem:[%s4052_s9 + $0x240] ss:$28 sps:$4 sm:$0xff]   ;;  %v3555_v20 = vld [vmem:[%s4052_s9 + $0x130] ss:$28 sps:$4 sm:$0xff]  }
  0xde   : > { %1813 = vmatprep.mubr.bf16.mxu0 %v3459_v21  ;;  %1942 = vmatprep.mubr.bf16.mxu1 %v3461_v22  ;;  %v3556_v21 = vld [vmem:[%s4052_s9 + $0x27c] ss:$28 sps:$4 sm:$0xff]   ;;  %v3558_v22 = vld [vmem:[%s4052_s9 + $0x168] ss:$28 sps:$4 sm:$0xff]  }
  0xdf   : > { %3254 = vmatpush3.bf16.msra.mxu1 %v3521_v29  ;;  %v3566_v29 = vld [vmem:[%s4052_s9 + $0x2ec] ss:$28 sps:$4 sm:$0xff]  }
  0xe0   : > { %3255 = vmatprep.subr.bf16.mxu1 %v3534_v34 }
  0xe3   : > { %3256 = vmatpush3.bf16.msra.mxu1 %v3534_v34 }
  0xe5   : > { %1814 = vmatmul.mubr.bf16.gmra.mxu0 %v3463_v24  ;;  %1943 = vmatmul.mubr.bf16.gmra.mxu1 %v3464_v25  ;;  %v3560_v24 = vld [vmem:[%s4052_s9 + $0x1a0] ss:$28 sps:$4 sm:$0xff]   ;;  %v3561_v25 = vld [vmem:[%s4052_s9 + $0x2b4] ss:$28 sps:$4 sm:$0xff]  }
  0xe6   : > { %1821 = vmatprep.mubr.bf16.mxu0 %v3466_v27  ;;  %1950 = vmatprep.mubr.bf16.mxu1 %v3468_v28  ;;  %v3564_v27 = vld [vmem:[%s4052_s9 + $0x2b0] ss:$28 sps:$4 sm:$0xff]  }
  0xe7   : > { %v3565_v28 = vld [vmem:[%s4052_s9 + $0x210] ss:$28 sps:$4 sm:$0xff]  }
  0xed   : > { %1822 = vmatmul.mubr.bf16.gmra.mxu0 %v3470_v30  ;;  %1951 = vmatmul.mubr.bf16.gmra.mxu1 %v3471_v31  ;;  %v3568_v30 = vld [vmem:[%s4052_s9 + $0x248] ss:$28 sps:$4 sm:$0xff]  }
  0xee   : > { %1829 = vmatprep.mubr.bf16.mxu0 %v3474_v32  ;;  %1958 = vmatprep.mubr.bf16.mxu1 %v3476_v33 }
  0xf5   : > { %1830 = vmatmul.mubr.bf16.gmra.mxu0 %v3478_v35  ;;  %1959 = vmatmul.mubr.bf16.gmra.mxu1 %v3479_v36 }
  0xf6   : > { %1837 = vmatprep.mubr.bf16.mxu0 %v3483_v37  ;;  %1966 = vmatprep.mubr.bf16.mxu1 %v3485_v38 }
  0xfd   : > { %1838 = vmatmul.mubr.bf16.gmra.mxu0 %v3487_v39  ;;  %1967 = vmatmul.mubr.bf16.gmra.mxu1 %v3488_v40  ;;  %v3569_v39 = vld [vmem:[%s4052_s9 + $0x2e8] ss:$28 sps:$4 sm:$0xff]   ;;  %v3570_v40 = vld [vmem:[%s4052_s9 + $0x280] ss:$28 sps:$4 sm:$0xff]  }
  0xfe   : > { %1974 = vmatprep.mubr.bf16.mxu1 %v3489_v41  ;;  %2071 = vmatprep.mubr.bf16.mxu0 %v3493_v42  ;;  %v3571_v41 = vld [vmem:[%s4052_s9 + $0x324] ss:$28 sps:$4 sm:$0xff]   ;;  %v3573_v42 = vld [vmem:[%s4052_s9 + $0x2b8] ss:$28 sps:$4 sm:$0xff]  }
 0x105   : > { %1975 = vmatmul.mubr.bf16.gmra.mxu1 %v3494_v44  ;;  %2072 = vmatmul.mubr.bf16.vlgmr.msra.gmra.mxu0 %v3491_v43 }
 0x106   : > { %1982 = vmatprep.mubr.bf16.mxu1 %v3496_v45  ;;  %2079 = vmatprep.mubr.bf16.mxu0 %v3498_v46 }
 0x10d   : > { %1983 = vmatmul.mubr.bf16.gmra.mxu1 %v3500_v47  ;;  %2080 = vmatmul.mubr.bf16.gmra.mxu0 %v3501_v48 }
 0x10e   : > { %1990 = vmatprep.mubr.bf16.mxu1 %v3502_v49  ;;  %2087 = vmatprep.mubr.bf16.mxu0 %v3504_v50 }
 0x115   : > { %1991 = vmatmul.mubr.bf16.gmra.mxu1 %v3506_v51  ;;  %2088 = vmatmul.mubr.bf16.gmra.mxu0 %v3507_v52 }
 0x116   : > { %1998 = vmatprep.mubr.bf16.mxu1 %v3509_v53  ;;  %2095 = vmatprep.mubr.bf16.mxu0 %v3511_v54 }
 0x11d   : > { %1999 = vmatmul.mubr.bf16.gmra.mxu1 %v3513_v55  ;;  %2096 = vmatmul.mubr.bf16.gmra.mxu0 %v3514_v56  ;;  %v3574_v55 = vld [vmem:[%s4052_s9 + $0x320] ss:$28 sps:$4 sm:$0xff]   ;;  %v3575_v56 = vld [vmem:[%s4052_s9 + $0x2f0] ss:$28 sps:$4 sm:$0xff]  }
 0x11e   : > { %2006 = vmatprep.mubr.bf16.mxu1 %v3515_v57  ;;  %2103 = vmatprep.mubr.bf16.mxu0 %v3517_v58  ;;  %v3576_v57 = vld [vmem:[%s4052_s9 + $0x35c] ss:$28 sps:$4 sm:$0xff]   ;;  %v3578_v58 = vld [vmem:[%s4052_s9 + $0x328] ss:$28 sps:$4 sm:$0xff]  }
 0x125   : > { %2007 = vmatmul.mubr.bf16.gmra.mxu1 %v3519_v59  ;;  %2104 = vmatmul.mubr.bf16.gmra.mxu0 %v3520_v60 }
 0x126   : > { %2014 = vmatprep.mubr.bf16.mxu1 %v3522_v61  ;;  %2111 = vmatprep.mubr.bf16.mxu0 %v3524_v62 }
 0x12d   : > { %2015 = vmatmul.mubr.bf16.gmra.mxu1 %v3526_v63  ;;  %2112 = vmatmul.mubr.bf16.gmra.mxu0 %v3527_v0 }
 0x12e   : > { %2022 = vmatprep.mubr.bf16.mxu1 %v3528_v1  ;;  %2119 = vmatprep.mubr.bf16.mxu0 %v3530_v2 }
 0x135   : > { %2023 = vmatmul.mubr.bf16.gmra.mxu1 %v3532_v3  ;;  %2120 = vmatmul.mubr.bf16.gmra.mxu0 %v3533_v4 }
 0x136   : > { %2030 = vmatprep.mubr.bf16.mxu1 %v3535_v5  ;;  %2127 = vmatprep.mubr.bf16.mxu0 %v3537_v6 }
 0x13d   : > { %2031 = vmatmul.mubr.bf16.gmra.mxu1 %v3539_v7  ;;  %2128 = vmatmul.mubr.bf16.gmra.mxu0 %v3540_v8  ;;  %v3579_v7 = vld [vmem:[%s4052_s9 + $0x358] ss:$28 sps:$4 sm:$0xff]   ;;  %v3580_v8 = vld [vmem:[%s4052_s9 + $0x360] ss:$28 sps:$4 sm:$0xff]  }
 0x13e   : > { %2135 = vmatprep.mubr.bf16.mxu0 %v3541_v9  ;;  %3257 = vmatprep.mubr.bf16.mxu1 %v3543_v10 }
 0x145   : > { %2136 = vmatmul.mubr.bf16.gmra.mxu0 %v3544_v11  ;;  %3258 = vmatmul.mubr.bf16.vlgmr.msra.gmra.mxu1 %v3545_v12 }
 0x146   : > { %2143 = vmatprep.mubr.bf16.mxu0 %v3546_v13  ;;  %3261 = vmatprep.mubr.bf16.mxu1 %v3548_v14 }
 0x14d   : > { %2144 = vmatmul.mubr.bf16.gmra.mxu0 %v3549_v15  ;;  %3262 = vmatmul.mubr.bf16.gmra.mxu1 %v3550_v16 }
 0x14e   : > { %2151 = vmatprep.mubr.bf16.mxu0 %v3551_v17  ;;  %3265 = vmatprep.mubr.bf16.mxu1 %v3553_v18 }
 0x155   : > { %2152 = vmatmul.mubr.bf16.gmra.mxu0 %v3554_v19  ;;  %3266 = vmatmul.mubr.bf16.gmra.mxu1 %v3555_v20 }
 0x156   : > { %2159 = vmatprep.mubr.bf16.mxu0 %v3556_v21  ;;  %3269 = vmatprep.mubr.bf16.mxu1 %v3558_v22 }
 0x15d   : > { %2160 = vmatmul.mubr.bf16.gmra.mxu0 %v3559_v23  ;;  %3270 = vmatmul.mubr.bf16.gmra.mxu1 %v3560_v24 }
 0x15e   : > { %2167 = vmatprep.mubr.bf16.mxu0 %v3561_v25  ;;  %3273 = vmatprep.mubr.bf16.mxu1 %v3563_v26 }
 0x165   : > { %v2897_v31 = vpop.f32.mrf.mxu0  ;;  %v2969_v32 = vpop.f32.mrf.mxu1  ;;  %2168 = vmatmul.mubr.bf16.gmra.mxu0 %v3564_v27  ;;  %3274 = vmatmul.mubr.bf16.gmra.mxu1 %v3565_v28 }
 0x166   : > { %2175 = vmatprep.mubr.bf16.mxu0 %v3566_v29  ;;  %3277 = vmatprep.mubr.bf16.mxu1 %v3568_v30 }
 0x167   : > { %v2898_v33 = vpop.f32.mrf.mxu0  ;;  %v2970_v34 = vpop.f32.mrf.mxu1 }
 0x168   : > { %v4213_v35 = vadd.f32 %v2898_v33, %v2897_v31  ;;  %v4215_v36 = vadd.f32 %v2970_v34, %v2969_v32 }
 0x169   : > { %v2900_v37 = vpop.f32.mrf.mxu0  ;;  %v2972_v38 = vpop.f32.mrf.mxu1 }
 0x16b   : > { %v2901_v43 = vpop.f32.mrf.mxu0  ;;  %v2973_v44 = vpop.f32.mrf.mxu1 }
 0x16c   : > { %v4221_v45 = vadd.f32 %v2901_v43, %v2900_v37  ;;  %v4223_v46 = vadd.f32 %v2973_v44, %v2972_v38 }
 0x16d   : > { %v2903_v47 = vpop.f32.mrf.mxu0  ;;  %v2975_v48 = vpop.f32.mrf.mxu1  ;;  %2176 = vmatmul.mubr.bf16.gmra.mxu0 %v3569_v39  ;;  %3278 = vmatmul.mubr.bf16.gmra.mxu1 %v3570_v40 }
 0x16e   : > { %2183 = vmatprep.mubr.bf16.mxu0 %v3571_v41  ;;  %3281 = vmatprep.mubr.bf16.mxu1 %v3573_v42 }
 0x16f   : > { %v2904_v49 = vpop.f32.mrf.mxu0  ;;  %v2976_v50 = vpop.f32.mrf.mxu1 }
 0x170   : > { %v4225_v51 = vadd.f32 %v2904_v49, %v2903_v47  ;;  %v4227_v52 = vadd.f32 %v2976_v50, %v2975_v48 }
 0x171   : > { %v2906_v53 = vpop.f32.mrf.mxu0  ;;  %v2978_v54 = vpop.f32.mrf.mxu1 }
 0x173   : > { %v2907_v59 = vpop.f32.mrf.mxu0  ;;  %v2979_v60 = vpop.f32.mrf.mxu1 }
 0x174   : > { %v4233_v61 = vadd.f32 %v2907_v59, %v2906_v53  ;;  %v4235_v62 = vadd.f32 %v2979_v60, %v2978_v54 }
 0x175   : > { %v2909_v63 = vpop.f32.mrf.mxu0  ;;  %v2981_v0 = vpop.f32.mrf.mxu1  ;;  %2184 = vmatmul.mubr.bf16.gmra.mxu0 %v3574_v55  ;;  %3282 = vmatmul.mubr.bf16.gmra.mxu1 %v3575_v56 }
 0x176   : > { %2191 = vmatprep.mubr.bf16.mxu0 %v3576_v57  ;;  %3285 = vmatprep.mubr.bf16.mxu1 %v3578_v58 }
 0x177   : > { %v2910_v1 = vpop.f32.mrf.mxu0  ;;  %v2982_v2 = vpop.f32.mrf.mxu1 }
 0x178   : > { %v2911_v3 = vadd.f32 %v2910_v1, %v2909_v63  ;;  %v4237_v4 = vadd.f32 %v2982_v2, %v2981_v0 }
 0x179   : > { %v2912_v5 = vpop.f32.mrf.mxu0  ;;  %v2984_v6 = vpop.f32.mrf.mxu1 }
 0x17b   : > { %v2913_v9 = vpop.f32.mrf.mxu0  ;;  %v2985_v10 = vpop.f32.mrf.mxu1 }
 0x17c   : > { %v2914_v11 = vadd.f32 %v2913_v9, %v2912_v5  ;;  %v4241_v12 = vadd.f32 %v2985_v10, %v2984_v6 }
 0x17d   : > { %v2915_v13 = vpop.f32.mrf.mxu0  ;;  %v2987_v14 = vpop.f32.mrf.mxu1  ;;  %2192 = vmatmul.mubr.bf16.gmra.mxu0 %v3579_v7  ;;  %3286 = vmatmul.mubr.bf16.gmra.mxu1 %v3580_v8 }
 0x17f   : > { %v2916_v15 = vpop.f32.mrf.mxu0  ;;  %v2988_v16 = vpop.f32.mrf.mxu1 }
 0x180   : > { %v2917_v17 = vadd.f32 %v2916_v15, %v2915_v13  ;;  %v4243_v18 = vadd.f32 %v2988_v16, %v2987_v14 }
 0x181   : > { %v2918_v19 = vpop.f32.mrf.mxu0  ;;  %v2990_v20 = vpop.f32.mrf.mxu1 }
 0x183   : > { %v2919_v21 = vpop.f32.mrf.mxu0  ;;  %v2991_v22 = vpop.f32.mrf.mxu1 }
 0x184   : > { %v2920_v23 = vadd.f32 %v2919_v21, %v2918_v19  ;;  %v4245_v24 = vadd.f32 %v2991_v22, %v2990_v20 }
 0x185   : > { %v2921_v25 = vpop.f32.mrf.mxu0  ;;  %v3009_v26 = vpop.f32.mrf.mxu1 }
 0x187   : > { %v2922_v27 = vpop.f32.mrf.mxu0  ;;  %v3010_v28 = vpop.f32.mrf.mxu1 }
 0x188   : > { %v2923_v29 = vadd.f32 %v2922_v27, %v2921_v25  ;;  %v3011_v30 = vadd.f32 %v3010_v28, %v3009_v26 }
 0x189   : > { %v2924_v31 = vpop.f32.mrf.mxu0  ;;  %v3012_v32 = vpop.f32.mrf.mxu1 }
 0x18a   : > { %v4248_v33 = vadd.f32 %v3011_v30, %v4213_v35 }
 0x18b   : > { %v2925_v34 = vpop.f32.mrf.mxu0  ;;  %v3013_v37 = vpop.f32.mrf.mxu1 }
 0x18c   : > { %v2926_v38 = vadd.f32 %v2925_v34, %v2924_v31  ;;  %v3014_v39 = vadd.f32 %v3013_v37, %v3012_v32 }
 0x18d   : > { %v2927_v40 = vpop.f32.mrf.mxu0  ;;  %v3015_v41 = vpop.f32.mrf.mxu1 }
 0x18e   : > { %v4251_v42 = vadd.f32 %v3014_v39, %v4221_v45 }
 0x18f   : > { %v2928_v43 = vpop.f32.mrf.mxu0  ;;  %v3016_v44 = vpop.f32.mrf.mxu1 }
 0x190   : > { %v2929_v47 = vadd.f32 %v2928_v43, %v2927_v40  ;;  %v3017_v48 = vadd.f32 %v3016_v44, %v3015_v41 }
 0x191   : > { %v2930_v49 = vpop.f32.mrf.mxu0  ;;  %v3018_v50 = vpop.f32.mrf.mxu1 }
 0x192   : > { %v4254_v53 = vadd.f32 %v3017_v48, %v4225_v51 }
 0x193   : > { %v2931_v35 = vpop.f32.mrf.mxu0  ;;  %v3019_v54 = vpop.f32.mrf.mxu1 }
 0x194   : > { %v2932_v55 = vadd.f32 %v2931_v35, %v2930_v49  ;;  %v3020_v56 = vadd.f32 %v3019_v54, %v3018_v50 }
 0x195   : > { %v2933_v57 = vpop.f32.mrf.mxu0  ;;  %v3021_v58 = vpop.f32.mrf.mxu1 }
 0x196   : > { %v4257_v59 = vadd.f32 %v3020_v56, %v4233_v61 }
 0x197   : > { %v2934_v45 = vpop.f32.mrf.mxu0  ;;  %v3022_v60 = vpop.f32.mrf.mxu1 }
 0x198   : > { %v2935_v63 = vadd.f32 %v2934_v45, %v2933_v57  ;;  %v3023_v0 = vadd.f32 %v3022_v60, %v3021_v58 }
 0x199   : > { %v2936_v1 = vpop.f32.mrf.mxu0  ;;  %v3024_v2 = vpop.f32.mrf.mxu1 }
 0x19a   : > { %v4259_v5 = vadd.f32 %v3023_v0, %v2911_v3 }
 0x19b   : > { %v2937_v6 = vpop.f32.mrf.mxu0  ;;  %v3025_v51 = vpop.f32.mrf.mxu1 }
 0x19c   : > { %v2938_v7 = vadd.f32 %v2937_v6, %v2936_v1  ;;  %v3026_v8 = vadd.f32 %v3025_v51, %v3024_v2 }
 0x19d   : > { %v2939_v9 = vpop.f32.mrf.mxu0  ;;  %v3027_v10 = vpop.f32.mrf.mxu1 }
 0x19e   : > { %v4261_v13 = vadd.f32 %v3026_v8, %v2914_v11 }
 0x19f   : > { %v2940_v14 = vpop.f32.mrf.mxu0  ;;  %v3028_v15 = vpop.f32.mrf.mxu1 }
 0x1a0   : > { %v2941_v61 = vadd.f32 %v2940_v14, %v2939_v9  ;;  %v3029_v16 = vadd.f32 %v3028_v15, %v3027_v10 }
 0x1a1   : > { %v2942_v19 = vpop.f32.mrf.mxu0  ;;  %v3030_v20 = vpop.f32.mrf.mxu1 }
 0x1a2   : > { %v4263_v21 = vadd.f32 %v3029_v16, %v2917_v17 }
 0x1a3   : > { %v2943_v22 = vpop.f32.mrf.mxu0  ;;  %v3031_v25 = vpop.f32.mrf.mxu1 }
 0x1a4   : > { %v2944_v3 = vadd.f32 %v2943_v22, %v2942_v19  ;;  %v3032_v26 = vadd.f32 %v3031_v25, %v3030_v20 }
 0x1a5   : > { %v2945_v27 = vpop.f32.mrf.mxu0  ;;  %v3033_v28 = vpop.f32.mrf.mxu1 }
 0x1a6   : > { %v4265_v30 = vadd.f32 %v3032_v26, %v2920_v23 }
 0x1a7   : > { %v2946_v31 = vpop.f32.mrf.mxu0  ;;  %v3034_v32 = vpop.f32.mrf.mxu1 }
 0x1a8   : > { %v2947_v11 = vadd.f32 %v2946_v31, %v2945_v27  ;;  %v3035_v34 = vadd.f32 %v3034_v32, %v3033_v28 }
 0x1a9   : > { %v2948_v37 = vpop.f32.mrf.mxu0  ;;  %v3036_v39 = vpop.f32.mrf.mxu1 }
 0x1aa   : > { %v4267_v40 = vadd.f32 %v3035_v34, %v2923_v29 }
 0x1ab   : > { %v2949_v41 = vpop.f32.mrf.mxu0  ;;  %v3037_v43 = vpop.f32.mrf.mxu1 }
 0x1ac   : > { %v2950_v17 = vadd.f32 %v2949_v41, %v2948_v37  ;;  %v3038_v44 = vadd.f32 %v3037_v43, %v3036_v39 }
 0x1ad   : > { %v2951_v48 = vpop.f32.mrf.mxu0  ;;  %v3039_v49 = vpop.f32.mrf.mxu1 }
 0x1ae   : > { %v4269_v50 = vadd.f32 %v3038_v44, %v2926_v38 }
 0x1af   : > { %v2952_v35 = vpop.f32.mrf.mxu0  ;;  %v3040_v54 = vpop.f32.mrf.mxu1 }
 0x1b0   : > { %v2953_v23 = vadd.f32 %v2952_v35, %v2951_v48  ;;  %v3041_v56 = vadd.f32 %v3040_v54, %v3039_v49 }
 0x1b1   : > { %v2954_v57 = vpop.f32.mrf.mxu0  ;;  %v3042_v58 = vpop.f32.mrf.mxu1 }
 0x1b2   : > { %v4271_v45 = vadd.f32 %v3041_v56, %v2929_v47 }
 0x1b3   : > { %v2955_v60 = vpop.f32.mrf.mxu0  ;;  %v3043_v0 = vpop.f32.mrf.mxu1 }
 0x1b4   : > { %v2956_v29 = vadd.f32 %v2955_v60, %v2954_v57  ;;  %v3044_v1 = vadd.f32 %v3043_v0, %v3042_v58 }
 0x1b5   : > { %v2957_v2 = vpop.f32.mrf.mxu0  ;;  %v3045_v6 = vpop.f32.mrf.mxu1 }
 0x1b6   : > { %v4273_v51 = vadd.f32 %v3044_v1, %v2932_v55 }
 0x1b7   : > { %v2958_v8 = vpop.f32.mrf.mxu0  ;;  %v3046_v9 = vpop.f32.mrf.mxu1 }
 0x1b8   : > { %v2959_v38 = vadd.f32 %v2958_v8, %v2957_v2  ;;  %v3047_v10 = vadd.f32 %v3046_v9, %v3045_v6 }
 0x1b9   : > { %v2960_v14 = vpop.f32.mrf.mxu0  ;;  %v3048_v15 = vpop.f32.mrf.mxu1 }
 0x1ba   : > { %v4275_v16 = vadd.f32 %v3047_v10, %v2935_v63 }
 0x1bb   : > { %v2961_v19 = vpop.f32.mrf.mxu0  ;;  %v3049_v20 = vpop.f32.mrf.mxu1 }
 0x1bc   : > { %v2962_v47 = vadd.f32 %v2961_v19, %v2960_v14  ;;  %v3050_v22 = vadd.f32 %v3049_v20, %v3048_v15 }
 0x1bd   : > { %v2963_v25 = vpop.f32.mrf.mxu0  ;;  %v3051_v26 = vpop.f32.mrf.mxu1 }
 0x1be   : > { %v4277_v27 = vadd.f32 %v3050_v22, %v2938_v7 }
 0x1bf   : > { %v2964_v28 = vpop.f32.mrf.mxu0  ;;  %v3052_v31 = vpop.f32.mrf.mxu1 }
 0x1c0   : > { %v2965_v55 = vadd.f32 %v2964_v28, %v2963_v25  ;;  %v3053_v32 = vadd.f32 %v3052_v31, %v3051_v26 }
 0x1c1   : > { %v2966_v34 = vpop.f32.mrf.mxu0  ;;  %v3054_v37 = vpop.f32.mrf.mxu1 }
 0x1c2   : > { %v4279_v39 = vadd.f32 %v3053_v32, %v2941_v61 }
 0x1c3   : > { %v2967_v41 = vpop.f32.mrf.mxu0  ;;  %v3055_v43 = vpop.f32.mrf.mxu1 }
 0x1c4   : > { %v2968_v63 = vadd.f32 %v2967_v41, %v2966_v34  ;;  %v3056_v44 = vadd.f32 %v3055_v43, %v3054_v37 }
 0x1c5   : > { %v3057_v48 = vpop.f32.mrf.mxu1  ;;  %v4281_v49 = vpop.f32.mrf.mxu0 }
 0x1c6   : > { %v4283_v35 = vadd.f32 %v3056_v44, %v2944_v3 }
 0x1c7   : > { %v3058_v54 = vpop.f32.mrf.mxu1  ;;  %v4285_v7 = vpop.f32.mrf.mxu0 }
 0x1c8   : > { %v3059_v56 = vadd.f32 %v3058_v54, %v3057_v48 }
 0x1c9   : > { %v3060_v57 = vpop.f32.mrf.mxu1  ;;  %v4287_v58 = vpop.f32.mrf.mxu0 }
 0x1ca   : > { %v4289_v60 = vadd.f32 %v3059_v56, %v2947_v11 }
 0x1cb   : > { %v3061_v61 = vpop.f32.mrf.mxu1  ;;  %v4291_v0 = vpop.f32.mrf.mxu0 }
 0x1cc   : > { %v3062_v1 = vadd.f32 %v3061_v61, %v3060_v57 }
 0x1cd   : > { %v3063_v2 = vpop.f32.mrf.mxu1  ;;  %v4293_v6 = vpop.f32.mrf.mxu0 }
 0x1ce   : > { %v4295_v8 = vadd.f32 %v3062_v1, %v2950_v17 }
 0x1cf   : > { %v3064_v3 = vpop.f32.mrf.mxu1  ;;  %v4297_v9 = vpop.f32.mrf.mxu0 }
 0x1d0   : > { %4544 = vst [vmem:[#allocation4_spill] sm:$0xff] %v4295_v8  ;;  %v3065_v10 = vadd.f32 %v3064_v3, %v3063_v2 }
 0x1d1   : > { %v3066_v14 = vpop.f32.mrf.mxu1  ;;  %v4299_v15 = vpop.f32.mrf.mxu0 }
 0x1d2   : > { %v4301_v19 = vadd.f32 %v3065_v10, %v2953_v23 }
 0x1d3   : > { %v3067_v11 = vpop.f32.mrf.mxu1  ;;  %v4303_v20 = vpop.f32.mrf.mxu0 }
 0x1d4   : > { %v3068_v22 = vadd.f32 %v3067_v11, %v3066_v14 }
 0x1d5   : > { %v3069_v25 = vpop.f32.mrf.mxu1  ;;  %v4305_v26 = vpop.f32.mrf.mxu0 }
 0x1d6   : > { %v4307_v28 = vadd.f32 %v3068_v22, %v2956_v29 }
 0x1d7   : > { %v3070_v17 = vpop.f32.mrf.mxu1  ;;  %v4309_v31 = vpop.f32.mrf.mxu0 }
 0x1d8   : > { %v3071_v32 = vadd.f32 %v3070_v17, %v3069_v25 }
 0x1d9   : > { %v3072_v34 = vpop.f32.mrf.mxu1  ;;  %v4311_v37 = vpop.f32.mrf.mxu0 }
 0x1da   : > { %v4313_v41 = vadd.f32 %v3071_v32, %v2959_v38 }
 0x1db   : > { %v3073_v23 = vpop.f32.mrf.mxu1  ;;  %v4315_v43 = vpop.f32.mrf.mxu0 }
 0x1dc   : > { %4545 = vst [vmem:[#allocation5_spill] sm:$0xff] %v4313_v41  ;;  %v3074_v44 = vadd.f32 %v3073_v23, %v3072_v34 }
 0x1dd   : > { %v3075_v48 = vpop.f32.mrf.mxu1  ;;  %v4317_v54 = vpop.f32.mrf.mxu0 }
 0x1de   : > { %v4319_v56 = vadd.f32 %v3074_v44, %v2962_v47 }
 0x1df   : > { %v3076_v29 = vpop.f32.mrf.mxu1  ;;  %v4321_v57 = vpop.f32.mrf.mxu0 }
 0x1e0   : > { %4546 = vst [vmem:[#allocation6_spill] sm:$0xff] %v4319_v56  ;;  %v3077_v61 = vadd.f32 %v3076_v29, %v3075_v48 }
 0x1e1   : > { %v3078_v1 = vpop.f32.mrf.mxu1  ;;  %v4323_v2 = vpop.f32.mrf.mxu0 }
 0x1e2   : > { %v4325_v3 = vadd.f32 %v3077_v61, %v2965_v55 }
 0x1e3   : > { %v3079_v38 = vpop.f32.mrf.mxu1  ;;  %v4327_v10 = vpop.f32.mrf.mxu0 }
 0x1e4   : > { %4547 = vst [vmem:[#allocation7_spill] sm:$0xff] %v4325_v3  ;;  %v3080_v14 = vadd.f32 %v3079_v38, %v3078_v1 }
 0x1e5   : > { %v3081_v11 = vpop.f32.mrf.mxu1  ;;  %v4329_v22 = vpop.f32.mrf.mxu0 }
 0x1e6   : > { %v4331_v25 = vadd.f32 %v3080_v14, %v2968_v63 }
 0x1e7   : > { %v3082_v47 = vpop.f32.mrf.mxu1  ;;  %v4333_v17 = vpop.f32.mrf.mxu0 }
 0x1e8   : > { %4548 = vst [vmem:[#allocation8_spill] sm:$0xff] %v4331_v25  ;;  %v3083_v32 = vadd.f32 %v3082_v47, %v3081_v11 }
 0x1e9   : > { %v3084_v34 = vpop.f32.mrf.mxu1  ;;  %v4335_v23 = vpop.f32.mrf.mxu0 }
 0x1ea   : > { %v4338_v44 = vadd.f32 %v3083_v32, %v4215_v36 }
 0x1eb   : > { %v3085_v55 = vpop.f32.mrf.mxu1  ;;  %v4340_v48 = vpop.f32.mrf.mxu0 }
 0x1ec   : > { %4549 = vst [vmem:[#allocation9_spill] sm:$0xff] %v4338_v44  ;;  %v3086_v29 = vadd.f32 %v3085_v55, %v3084_v34 }
 0x1ed   : > { %v3087_v61 = vpop.f32.mrf.mxu1  ;;  %v4342_v1 = vpop.f32.mrf.mxu0 }
 0x1ee   : > { %v4345_v63 = vadd.f32 %v3086_v29, %v4223_v46 }
 0x1ef   : > { %v3088_v38 = vpop.f32.mrf.mxu1  ;;  %v4347_v14 = vpop.f32.mrf.mxu0 }
 0x1f0   : > { %4550 = vst [vmem:[#allocation10_spill] sm:$0xff] %v4345_v63  ;;  %v3089_v11 = vadd.f32 %v3088_v38, %v3087_v61 }
 0x1f1   : > { %v3090_v47 = vpop.f32.mrf.mxu1  ;;  %v4349_v56 = vpop.f32.mrf.mxu0 }
 0x1f2   : > { %v4352_v36 = vadd.f32 %v3089_v11, %v4227_v52 }
 0x1f3   : > { %v3091_v32 = vpop.f32.mrf.mxu1  ;;  %v4354_v44 = vpop.f32.mrf.mxu0 }
 0x1f4   : > { %4551 = vst [vmem:[#allocation11_spill] sm:$0xff] %v4352_v36  ;;  %v3092_v34 = vadd.f32 %v3091_v32, %v3090_v47 }
 0x1f5   : > { %v3093_v55 = vpop.f32.mrf.mxu1  ;;  %v4356_v25 = vpop.f32.mrf.mxu0 }
 0x1f6   : > { %v4359_v46 = vadd.f32 %v3092_v34, %v4235_v62 }
 0x1f7   : > { %v3094_v29 = vpop.f32.mrf.mxu1  ;;  %v4361_v63 = vpop.f32.mrf.mxu0 }
 0x1f8   : > { %4552 = vst [vmem:[#allocation12_spill] sm:$0xff] %v4359_v46  ;;  %v3095_v61 = vadd.f32 %v3094_v29, %v3093_v55  ;;  %v3129_v55 = vadd.f32 %v4297_v9, %v4293_v6  ;;  %v535_v9 = vld [vmem:[#allocation2 + $0xd8] sm:$0xff] }
 0x1f9   : > { %v3096_v38 = vpop.f32.mrf.mxu1  ;;  %v4363_v41 = vpop.f32.mrf.mxu0 }
 0x1fa   : > { %v4366_v52 = vadd.f32 %v3095_v61, %v4237_v4  ;;  %v3123_v61 = vadd.f32 %v4285_v7, %v4281_v49 }
 0x1fb   : > { %v3097_v11 = vpop.f32.mrf.mxu1  ;;  %v4368_v36 = vpop.f32.mrf.mxu0 }
 0x1fc   : > { %4553 = vst [vmem:[#allocation13_spill] sm:$0xff] %v4366_v52  ;;  %v3098_v47 = vadd.f32 %v3097_v11, %v3096_v38  ;;  %v2074_v7 = vadd.f32 %v3123_v61, %v4248_v33 }
 0x1fd   : > { %v3099_v32 = vpop.f32.mrf.mxu1  ;;  %v4370_v3 = vpop.f32.mrf.mxu0 }
 0x1fe   : > { %v4373_v62 = vadd.f32 %v3098_v47, %v4241_v12  ;;  %v3132_v12 = vadd.f32 %v4303_v20, %v4299_v15 }
 0x1ff   : > { %v3100_v34 = vpop.f32.mrf.mxu1  ;;  %v4375_v46 = vpop.f32.mrf.mxu0 }
 0x200   : > { %4554 = vst [vmem:[#allocation14_spill] sm:$0xff] %v4373_v62  ;;  %v3101_v29 = vadd.f32 %v3100_v34, %v3099_v32  ;;  %v2082_v62 = vadd.f32 %v3129_v55, %v4254_v53  ;;  %v3126_v34 = vadd.f32 %v4291_v0, %v4287_v58  ;;  %v3141_v53 = vadd.f32 %v4321_v57, %v4317_v54  ;;  %v536_v58 = vld [vmem:[#allocation2 + $0x18] sm:$0xff] }
 0x201   : > { %v3102_v8 = vpop.f32.mrf.mxu1  ;;  %v4379_v4 = vpop.f32.mrf.mxu0  ;;  %v2085_v55 = vadd.f32 %v3132_v12, %v4257_v59  ;;  %v3144_v57 = vadd.f32 %v4327_v10, %v4323_v2  ;;  %v537_v2 = vld [vmem:[#allocation2 + $0x50] sm:$0xff] }
 0x202   : > { %v4384_v38 = vadd.f32 %v3101_v29, %v4243_v18  ;;  %v2077_v61 = vadd.f32 %v3126_v34, %v4251_v42 }
 0x203   : > { %v3103_v11 = vpop.f32.mrf.mxu1  ;;  %v4386_v52 = vpop.f32.mrf.mxu0 }
 0x204   : > { %4555 = vst [vmem:[#allocation15_spill] sm:$0xff] %v4384_v38  ;;  %v3104_v47 = vadd.f32 %v3103_v11, %v3102_v8  ;;  %v533_v38 = vld [vmem:[#allocation2 + $0xb0] sm:$0xff] }
 0x205   : > { %v4391_v6 = vpop.f32.mrf.mxu0  ;;  %v3259_v32 = vpop.f32.mrf.mxu1 }
 0x206   : > { %v4396_v49 = vadd.f32 %v3104_v47, %v4245_v24  ;;  %v2243_v18 = vadd.f32 %v3259_v32, %v2082_v62  ;;  %v3135_v24 = vadd.f32 %v4309_v31, %v4305_v26  ;;  %v534_v32 = vld [vmem:[#allocation2] sm:$0xff]  ;;  %v539_v26 = vld [vmem:[#allocation2 + $0x30] sm:$0xff] }
 0x207   : > { %v4399_v29 = vpop.f32.mrf.mxu0  ;;  %v2234_v15 = vpop.f32.mrf.mxu1 }
 0x208   : > { %v2363_v8 = vadd.f32 %v2243_v18, %v535_v9  ;;  %v2235_v20 = vadd.f32 %v2234_v15, %v2074_v7  ;;  %v2098_v9 = vadd.f32 %v3141_v53, %v4263_v21  ;;  %v2090_v7 = vadd.f32 %v3135_v24, %v4259_v5 }
 0x209   : > { %v4404_v11 = vpop.f32.mrf.mxu0  ;;  %v3260_v0 = vpop.f32.mrf.mxu1 }
 0x20a   : > { %2395 = vst [vmem:[#allocation2 + $0xd8] sm:$0xff] %v2363_v8  ;;  %v2361_v33 = vadd.f32 %v2235_v20, %v533_v38  ;;  %v2246_v62 = vadd.f32 %v3260_v0, %v2085_v55  ;;  %v3138_v38 = vadd.f32 %v4315_v43, %v4311_v37  ;;  %v3153_v8 = vadd.f32 %v4347_v14, %v4342_v1  ;;  %v540_v37 = vld [vmem:[#allocation2 + $0x48] sm:$0xff] }
 0x20b   : > { %v4409_v47 = vpop.f32.mrf.mxu0  ;;  %v2237_v54 = vpop.f32.mrf.mxu1  ;;  %v2101_v20 = vadd.f32 %v3144_v57, %v4265_v30  ;;  %v538_v1 = vld [vmem:[#allocation2 + $0x68] sm:$0xff]  ;;  %v3150_v57 = vadd.f32 %v4340_v48, %v4335_v23  ;;  %v544_v23 = vld [vmem:[#allocation2 + $0xb8] sm:$0xff] }
 0x20c   : > { %2393 = vst [vmem:[#allocation2 + $0xb0] sm:$0xff] %v2361_v33  ;;  %v2364_v59 = vadd.f32 %v2246_v62, %v536_v58  ;;  %v2238_v12 = vadd.f32 %v2237_v54, %v2077_v61  ;;  %v3147_v58 = vadd.f32 %v4333_v17, %v4329_v22  ;;  %v2093_v24 = vadd.f32 %v3138_v38, %v4261_v13  ;;  %v543_v22 = vld [vmem:[#allocation2 + $0xe8] sm:$0xff] }
 0x20d   : > { %v4414_v18 = vpop.f32.mrf.mxu0  ;;  %v3263_v31 = vpop.f32.mrf.mxu1  ;;  %v3156_v62 = vadd.f32 %v4354_v44, %v4349_v56  ;;  %v541_v56 = vld [vmem:[#allocation2 + $0x80] sm:$0xff] }
 0x20e   : > { %2396 = vst [vmem:[#allocation2 + $0x18] sm:$0xff] %v2364_v59  ;;  %v2362_v42 = vadd.f32 %v2238_v12, %v534_v32  ;;  %v2259_v34 = vadd.f32 %v3263_v31, %v2098_v9  ;;  %v2114_v32 = vadd.f32 %v3153_v8, %v4271_v45  ;;  %v2106_v12 = vadd.f32 %v3147_v58, %v4267_v40 }
 0x20f   : > { %v4419_v15 = vpop.f32.mrf.mxu0  ;;  %v2250_v10 = vpop.f32.mrf.mxu1  ;;  %v2117_v38 = vadd.f32 %v3156_v62, %v4273_v51  ;;  %v3168_v8 = vadd.f32 %v4386_v52, %v4379_v4  ;;  %v548_v62 = vld [vmem:[#allocation2 + $0x78] sm:$0xff] }
 0x210   : > { %2394 = vst [vmem:[#allocation2] sm:$0xff] %v2362_v42  ;;  %v2367_v21 = vadd.f32 %v2259_v34, %v539_v26  ;;  %v2251_v53 = vadd.f32 %v2250_v10, %v2090_v7  ;;  %v3165_v26 = vadd.f32 %v4375_v46, %v4370_v3  ;;  %v3159_v34 = vadd.f32 %v4361_v63, %v4356_v25  ;;  %v542_v3 = vld [vmem:[#allocation2 + $0x88] sm:$0xff] }
 0x211   : > { %v4424_v55 = vpop.f32.mrf.mxu0  ;;  %v3264_v43 = vpop.f32.mrf.mxu1  ;;  %v3162_v63 = vadd.f32 %v4368_v36, %v4363_v41  ;;  %v3177_v52 = vadd.f32 %v4419_v15, %v4414_v18  ;;  %v3171_v41 = vadd.f32 %v4399_v29, %v4391_v6  ;;  %v3174_v6 = vadd.f32 %v4409_v47, %v4404_v11 }
 0x212   : > { %2399 = vst [vmem:[#allocation2 + $0x30] sm:$0xff] %v2367_v21  ;;  %v2365_v5 = vadd.f32 %v2251_v53, %v537_v2  ;;  %v2262_v0 = vadd.f32 %v3264_v43, %v2101_v20  ;;  %v2109_v2 = vadd.f32 %v3150_v57, %v4269_v50  ;;  %v2130_v53 = vadd.f32 %v3165_v26, %v4279_v39  ;;  %v549_v26 = vld [vmem:[#allocation2 + $0x38] sm:$0xff] }
 0x213   : > { %v4429_v33 = vpop.f32.mrf.mxu0  ;;  %v2253_v14 = vpop.f32.mrf.mxu1  ;;  %v2122_v58 = vadd.f32 %v3159_v34, %v4275_v16  ;;  %v2146_v57 = vadd.f32 %v3177_v52, %v4301_v19 }
 0x214   : > { %2397 = vst [vmem:[#allocation2 + $0x50] sm:$0xff] %v2365_v5  ;;  %v2368_v30 = vadd.f32 %v2262_v0, %v540_v37  ;;  %v2254_v61 = vadd.f32 %v2253_v14, %v2093_v24  ;;  %v547_v37 = vld [vmem:[#allocation2 + $0x8] sm:$0xff]  ;;  %v545_v0 = vld [vmem:[#allocation2 + $0x60] sm:$0xff]  ;;  %v3180_v18 = vadd.f32 %v4429_v33, %v4424_v55 }
 0x215   : > { %v4434_v54 = vpop.f32.mrf.mxu0  ;;  %v3267_v17 = vpop.f32.mrf.mxu1 }
 0x216   : > { %2400 = vst [vmem:[#allocation2 + $0x48] sm:$0xff] %v2368_v30  ;;  %v2366_v13 = vadd.f32 %v2254_v61, %v538_v1  ;;  %v2275_v59 = vadd.f32 %v3267_v17, %v2114_v32  ;;  %v2133_v1 = vadd.f32 %v3168_v8, %v4283_v35  ;;  %v2125_v61 = vadd.f32 %v3162_v63, %v4277_v27  ;;  %v4558_v63 = vld [vmem:[#allocation5_spill] sm:$0xff] }
 0x217   : > { %v4439_v9 = vpop.f32.mrf.mxu0  ;;  %v2266_v44 = vpop.f32.mrf.mxu1  ;;  %v2149_v19 = vadd.f32 %v3180_v18, %v4307_v28 }
 0x218   : > { %2398 = vst [vmem:[#allocation2 + $0x68] sm:$0xff] %v2366_v13  ;;  %v2371_v45 = vadd.f32 %v2275_v59, %v543_v22  ;;  %v2267_v31 = vadd.f32 %v2266_v44, %v2106_v12  ;;  %v546_v22 = vld [vmem:[#allocation2 + $0xf0] sm:$0xff]  ;;  %v551_v59 = vld [vmem:[#allocation2 + $0x40] sm:$0xff]  ;;  %v3183_v11 = vadd.f32 %v4439_v9, %v4434_v54 }
 0x219   : > { %v4444_v42 = vpop.f32.mrf.mxu0  ;;  %v3268_v48 = vpop.f32.mrf.mxu1 }
 0x21a   : > { %2403 = vst [vmem:[#allocation2 + $0xe8] sm:$0xff] %v2371_v45  ;;  %v2369_v40 = vadd.f32 %v2267_v31, %v541_v56  ;;  %v2278_v7 = vadd.f32 %v3268_v48, %v2117_v38  ;;  %v2138_v56 = vadd.f32 %v3171_v41, %v4289_v60  ;;  %v4560_v41 = vld [vmem:[#allocation6_spill] sm:$0xff] }
 0x21b   : > { %v4449_v10 = vpop.f32.mrf.mxu0  ;;  %v2269_v46 = vpop.f32.mrf.mxu1 }
 0x21c   : > { %2401 = vst [vmem:[#allocation2 + $0x80] sm:$0xff] %v2369_v40  ;;  %v2372_v51 = vadd.f32 %v2278_v7, %v544_v23  ;;  %v2270_v21 = vadd.f32 %v2269_v46, %v2109_v2  ;;  %v552_v23 = vld [vmem:[#allocation2 + $0xc8] sm:$0xff]  ;;  %v4556_v40 = vld [vmem:[#allocation4_spill] sm:$0xff]  ;;  %v550_v2 = vld [vmem:[#allocation2 + $0x58] sm:$0xff]  ;;  %v3186_v54 = vadd.f32 %v4449_v10, %v4444_v42 }
 0x21d   : > { %v3187_v20 = vpop.f32.mrf.mxu0  ;;  %v3271_v25 = vpop.f32.mrf.mxu1  ;;  %v2141_v60 = vadd.f32 %v3174_v6, %v4556_v40  ;;  %v4564_v40 = vld [vmem:[#allocation10_spill] sm:$0xff] }
 0x21e   : > { %2404 = vst [vmem:[#allocation2 + $0xb8] sm:$0xff] %v2372_v51  ;;  %v2370_v50 = vadd.f32 %v2270_v21, %v542_v3  ;;  %v2291_v43 = vadd.f32 %v3271_v25, %v2130_v53  ;;  %v4557_v21 = vld [vmem:[#allocation7_spill] sm:$0xff] }
 0x21f   : > { %v3188_v5 = vpop.f32.mrf.mxu0  ;;  %v2282_v24 = vpop.f32.mrf.mxu1 }
 0x220   : > { %2402 = vst [vmem:[#allocation2 + $0x88] sm:$0xff] %v2370_v50  ;;  %v2375_v4 = vadd.f32 %v2291_v43, %v547_v37  ;;  %v2283_v39 = vadd.f32 %v2282_v24, %v2122_v58  ;;  %v3189_v55 = vadd.f32 %v3188_v5, %v3187_v20  ;;  %v555_v20 = vld [vmem:[#allocation2 + $0x70] sm:$0xff]  ;;  %v2154_v50 = vadd.f32 %v3183_v11, %v4558_v63  ;;  %v553_v58 = vld [vmem:[#allocation2 + $0xe0] sm:$0xff] }
 0x221   : > { %v3190_v14 = vpop.f32.mrf.mxu0  ;;  %v3272_v30 = vpop.f32.mrf.mxu1 }
 0x222   : > { %2407 = vst [vmem:[#allocation2 + $0x8] sm:$0xff] %v2375_v4  ;;  %v2373_v36 = vadd.f32 %v2283_v39, %v545_v0  ;;  %v2294_v16 = vadd.f32 %v3272_v30, %v2133_v1  ;;  %v2162_v28 = vadd.f32 %v3189_v55, %v4557_v21  ;;  %v4559_v4 = vld [vmem:[#allocation8_spill] sm:$0xff] }
 0x223   : > { %v3191_v32 = vpop.f32.mrf.mxu0  ;;  %v2285_v17 = vpop.f32.mrf.mxu1 }
 0x224   : > { %2405 = vst [vmem:[#allocation2 + $0x60] sm:$0xff] %v2373_v36  ;;  %v2376_v15 = vadd.f32 %v2294_v16, %v548_v62  ;;  %v2286_v35 = vadd.f32 %v2285_v17, %v2125_v61  ;;  %v3192_v46 = vadd.f32 %v3191_v32, %v3190_v14  ;;  %v556_v14 = vld [vmem:[#allocation2 + $0xc0] sm:$0xff]  ;;  %v2157_v36 = vadd.f32 %v3186_v54, %v4560_v41  ;;  %v554_v61 = vld [vmem:[#allocation2 + $0x90] sm:$0xff] }
 0x225   : > { %v3193_v13 = vpop.f32.mrf.mxu0  ;;  %v3275_v12 = vpop.f32.mrf.mxu1 }
 0x226   : > { %2408 = vst [vmem:[#allocation2 + $0x78] sm:$0xff] %v2376_v15  ;;  %v2374_v29 = vadd.f32 %v2286_v35, %v546_v22  ;;  %v2307_v27 = vadd.f32 %v3275_v12, %v2146_v57  ;;  %v2165_v39 = vadd.f32 %v3192_v46, %v4559_v4  ;;  %v4561_v15 = vld [vmem:[#allocation11_spill] sm:$0xff] }
 0x227   : > { %v3194_v44 = vpop.f32.mrf.mxu0  ;;  %v2298_v45 = vpop.f32.mrf.mxu1 }
 0x228   : > { %2406 = vst [vmem:[#allocation2 + $0xf0] sm:$0xff] %v2374_v29  ;;  %v2379_v33 = vadd.f32 %v2307_v27, %v551_v59  ;;  %v2299_v31 = vadd.f32 %v2298_v45, %v2138_v56  ;;  %v3195_v30 = vadd.f32 %v3194_v44, %v3193_v13  ;;  %v559_v59 = vld [vmem:[#allocation2 + $0x10] sm:$0xff]  ;;  %v4562_v27 = vld [vmem:[#allocation9_spill] sm:$0xff] }
 0x229   : > { %v3196_v38 = vpop.f32.mrf.mxu0  ;;  %v3276_v48 = vpop.f32.mrf.mxu1 }
 0x22a   : > { %2411 = vst [vmem:[#allocation2 + $0x40] sm:$0xff] %v2379_v33  ;;  %v2377_v47 = vadd.f32 %v2299_v31, %v549_v26  ;;  %v2310_v34 = vadd.f32 %v3276_v48, %v2149_v19  ;;  %v2170_v56 = vadd.f32 %v3195_v30, %v4562_v27  ;;  %v557_v26 = vld [vmem:[#allocation2 + $0xa8] sm:$0xff]  ;;  %v4563_v31 = vld [vmem:[#allocation12_spill] sm:$0xff] }
 0x22b   : > { %v3197_v7 = vpop.f32.mrf.mxu0  ;;  %v2301_v3 = vpop.f32.mrf.mxu1  ;;  %v560_v48 = vld [vmem:[#allocation2 + $0x28] sm:$0xff] }
 0x22c   : > { %2409 = vst [vmem:[#allocation2 + $0x38] sm:$0xff] %v2377_v47  ;;  %v2380_v8 = vadd.f32 %v2310_v34, %v552_v23  ;;  %v2302_v51 = vadd.f32 %v2301_v3, %v2141_v60  ;;  %v3198_v6 = vadd.f32 %v3197_v7, %v3196_v38 }
 0x22d   : > { %v3199_v53 = vpop.f32.mrf.mxu0  ;;  %v3279_v37 = vpop.f32.mrf.mxu1 }
 0x22e   : > { %2412 = vst [vmem:[#allocation2 + $0xc8] sm:$0xff] %v2380_v8  ;;  %v2378_v9 = vadd.f32 %v2302_v51, %v550_v2  ;;  %v2323_v25 = vadd.f32 %v3279_v37, %v2162_v28  ;;  %v2173_v60 = vadd.f32 %v3198_v6, %v4564_v40  ;;  %v558_v2 = vld [vmem:[#allocation2 + $0xd0] sm:$0xff] }
 0x22f   : > { %v3200_v43 = vpop.f32.mrf.mxu0  ;;  %v2314_v5 = vpop.f32.mrf.mxu1 }
 0x230   : > { %2410 = vst [vmem:[#allocation2 + $0x58] sm:$0xff] %v2378_v9  ;;  %v2383_v0 = vadd.f32 %v2323_v25, %v555_v20  ;;  %v3201_v24 = vadd.f32 %v3200_v43, %v3199_v53  ;;  %v2315_v52 = vadd.f32 %v2314_v5, %v2154_v50  ;;  %v4565_v20 = vld [vmem:[#allocation13_spill] sm:$0xff]  ;;  %v561_v9 = vld [vmem:[#allocation2 + $0xa0] sm:$0xff]  ;;  %v4566_v5 = vld [vmem:[#allocation15_spill] sm:$0xff] }
 0x231   : > { %v3202_v1 = vpop.f32.mrf.mxu0  ;;  %v3280_v62 = vpop.f32.mrf.mxu1 }
 0x232   : > { %2415 = vst [vmem:[#allocation2 + $0x70] sm:$0xff] %v2383_v0  ;;  %v2381_v42 = vadd.f32 %v2315_v52, %v553_v58  ;;  %v2326_v10 = vadd.f32 %v3280_v62, %v2165_v39  ;;  %v2178_v35 = vadd.f32 %v3201_v24, %v4561_v15  ;;  %v4567_v52 = vld [vmem:[#allocation14_spill] sm:$0xff]  ;;  %v563_v39 = vld [vmem:[#allocation2 + $0x20] sm:$0xff] }
 0x233   : > { %v3203_v16 = vpop.f32.mrf.mxu0  ;;  %v2317_v32 = vpop.f32.mrf.mxu1 }
 0x234   : > { %2413 = vst [vmem:[#allocation2 + $0xe0] sm:$0xff] %v2381_v42  ;;  %v2384_v22 = vadd.f32 %v2326_v10, %v556_v14  ;;  %v3204_v17 = vadd.f32 %v3203_v16, %v3202_v1  ;;  %v2318_v18 = vadd.f32 %v2317_v32, %v2157_v36  ;;  %v562_v14 = vld [vmem:[#allocation2 + $0xf8] sm:$0xff] }
 0x235   : > { %v3205_v57 = vpop.f32.mrf.mxu0  ;;  %v3283_v12 = vpop.f32.mrf.mxu1 }
 0x236   : > { %2416 = vst [vmem:[#allocation2 + $0xc0] sm:$0xff] %v2384_v22  ;;  %v2382_v13 = vadd.f32 %v2318_v18, %v554_v61  ;;  %v2339_v29 = vadd.f32 %v3283_v12, %v2178_v35  ;;  %v2181_v19 = vadd.f32 %v3204_v17, %v4563_v31  ;;  %v564_v61 = vld [vmem:[#allocation2 + $0x98] sm:$0xff] }
 0x237   : > { %v3206_v44 = vpop.f32.mrf.mxu0  ;;  %v2330_v45 = vpop.f32.mrf.mxu1 }
 0x238   : > { %2414 = vst [vmem:[#allocation2 + $0x90] sm:$0xff] %v2382_v13  ;;  %v2387_v55 = vadd.f32 %v2339_v29, %v559_v59  ;;  %v2331_v33 = vadd.f32 %v2330_v45, %v2170_v56  ;;  %v3207_v47 = vadd.f32 %v3206_v44, %v3205_v57 }
 0x239   : > { %v3208_v23 = vpop.f32.mrf.mxu0  ;;  %v3284_v11 = vpop.f32.mrf.mxu1 }
 0x23a   : > { %2419 = vst [vmem:[#allocation2 + $0x10] sm:$0xff] %v2387_v55  ;;  %v2385_v34 = vadd.f32 %v2331_v33, %v557_v26  ;;  %v2342_v38 = vadd.f32 %v3284_v11, %v2181_v19  ;;  %v2186_v37 = vadd.f32 %v3207_v47, %v4565_v20 }
 0x23b   : > { %v3209_v7 = vpop.f32.mrf.mxu0  ;;  %v2333_v3 = vpop.f32.mrf.mxu1 }
 0x23c   : > { %2417 = vst [vmem:[#allocation2 + $0xa8] sm:$0xff] %v2385_v34  ;;  %v2388_v46 = vadd.f32 %v2342_v38, %v560_v48  ;;  %v2334_v8 = vadd.f32 %v2333_v3, %v2173_v60  ;;  %v3210_v28 = vadd.f32 %v3209_v7, %v3208_v23 }
 0x23d   : > { %v3211_v51 = vpop.f32.mrf.mxu0  ;;  %v3287_v21 = vpop.f32.mrf.mxu1 }
 0x23e   : > { %2420 = vst [vmem:[#allocation2 + $0x28] sm:$0xff] %v2388_v46  ;;  %v2386_v53 = vadd.f32 %v2334_v8, %v558_v2  ;;  %v2189_v4 = vadd.f32 %v3210_v28, %v4567_v52 }
 0x23f   : > { %v3212_v54 = vpop.f32.mrf.mxu0  ;;  %v2346_v25 = vpop.f32.mrf.mxu1 }
 0x240   : > { %2418 = vst [vmem:[#allocation2 + $0xd0] sm:$0xff] %v2386_v53  ;;  %v3213_v63 = vadd.f32 %v3212_v54, %v3211_v51  ;;  %v2347_v50 = vadd.f32 %v2346_v25, %v2186_v37 }
 0x241   : > { %v3214_v43 = vpop.f32.mrf.mxu0  ;;  %v3288_v58 = vpop.f32.mrf.mxu1 }
 0x242   : > { %v2194_v0 = vadd.f32 %v3213_v63, %v4566_v5  ;;  %v2389_v24 = vadd.f32 %v2347_v50, %v561_v9 }
 0x243   : > { %v3215_v1 = vpop.f32.mrf.mxu0  ;;  %v2349_v62 = vpop.f32.mrf.mxu1 }
 0x244   : > { %v2355_v30 = vadd.f32 %v3287_v21, %v2194_v0  ;;  %2421 = vst [vmem:[#allocation2 + $0xa0] sm:$0xff] %v2389_v24  ;;  %v3216_v42 = vadd.f32 %v3215_v1, %v3214_v43  ;;  %v2350_v10 = vadd.f32 %v2349_v62, %v2189_v4 }
 0x246   : > { %v2391_v41 = vadd.f32 %v2355_v30, %v563_v39  ;;  %v2197_v36 = vadd.f32 %v3216_v42, %v4396_v49  ;;  %v2390_v16 = vadd.f32 %v2350_v10, %v562_v14 }
 0x248   : > { %2423 = vst [vmem:[#allocation2 + $0x20] sm:$0xff] %v2391_v41  ;;  %v2358_v32 = vadd.f32 %v3288_v58, %v2197_v36  ;;  %2422 = vst [vmem:[#allocation2 + $0xf8] sm:$0xff] %v2390_v16  ;;  %2428 = sbr.rel (%p2878_p13) target bundleno = 636 (0x27c), region = 62 }
 0x24a   : > { %v2392_v22 = vadd.f32 %v2358_v32, %v564_v61 }
 0x24c   : > { %2424 = vst [vmem:[#allocation2 + $0x98] sm:$0xff] %v2392_v22 }
 0x24d   : > { %v2429_v17 = vld [vmem:[#allocation2 + $0xb0] sm:$0xff]  ;;  %v2430_v18 = vld [vmem:[#allocation2] sm:$0xff]  ;;  %v2431_v15 = vld [vmem:[#allocation2 + $0xd8] sm:$0xff] }
 0x24e   : > { %3581 = vtanh.f32 %v2429_v17  ;;  %v2432_v35 = vld [vmem:[#allocation2 + $0x18] sm:$0xff]  ;;  %v2433_v57 = vld [vmem:[#allocation2 + $0x50] sm:$0xff]  ;;  %v2434_v59 = vld [vmem:[#allocation2 + $0x68] sm:$0xff] }
 0x24f   : > { %3583 = vtanh.f32 %v2430_v18  ;;  %v2435_v49 = vld [vmem:[#allocation2 + $0x30] sm:$0xff]  ;;  %v2436_v12 = vld [vmem:[#allocation2 + $0x48] sm:$0xff]  ;;  %v2437_v6 = vld [vmem:[#allocation2 + $0x80] sm:$0xff] }
 0x250   : > { %3585 = vtanh.f32 %v2431_v15  ;;  %v2438_v13 = vld [vmem:[#allocation2 + $0x88] sm:$0xff]  ;;  %v2440_v27 = vld [vmem:[#allocation2 + $0xb8] sm:$0xff]  ;;  %v2441_v56 = vld [vmem:[#allocation2 + $0x60] sm:$0xff] }
 0x251   : > { %3587 = vtanh.f32 %v2432_v35  ;;  %v2439_v29 = vld [vmem:[#allocation2 + $0xe8] sm:$0xff]  ;;  %v2442_v44 = vld [vmem:[#allocation2 + $0xf0] sm:$0xff]  ;;  %v2444_v45 = vld [vmem:[#allocation2 + $0x78] sm:$0xff] }
 0x252   : > { %3589 = vtanh.f32 %v2433_v57  ;;  %v2443_v26 = vld [vmem:[#allocation2 + $0x8] sm:$0xff]  ;;  %v2445_v33 = vld [vmem:[#allocation2 + $0x38] sm:$0xff]  ;;  %v2447_v48 = vld [vmem:[#allocation2 + $0x40] sm:$0xff] }
 0x253   : > { %3591 = vtanh.f32 %v2434_v59  ;;  %v2446_v19 = vld [vmem:[#allocation2 + $0x58] sm:$0xff]  ;;  %v2448_v47 = vld [vmem:[#allocation2 + $0xc8] sm:$0xff]  ;;  %v2449_v38 = vld [vmem:[#allocation2 + $0xe0] sm:$0xff] }
 0x254   : > { %3593 = vtanh.f32 %v2435_v49  ;;  %v2450_v60 = vld [vmem:[#allocation2 + $0x90] sm:$0xff]  ;;  %v2452_v46 = vld [vmem:[#allocation2 + $0xc0] sm:$0xff]  ;;  %v2453_v51 = vld [vmem:[#allocation2 + $0xa8] sm:$0xff] }
 0x255   : > { %3595 = vtanh.f32 %v2436_v12  ;;  %v2451_v2 = vld [vmem:[#allocation2 + $0x70] sm:$0xff]  ;;  %v2456_v54 = vld [vmem:[#allocation2 + $0x28] sm:$0xff]  ;;  %v2457_v25 = vld [vmem:[#allocation2 + $0xa0] sm:$0xff] }
 0x256   : > { %3597 = vtanh.f32 %v2437_v6  ;;  %v2454_v28 = vld [vmem:[#allocation2 + $0xd0] sm:$0xff]  ;;  %v2458_v50 = vld [vmem:[#allocation2 + $0xf8] sm:$0xff]  ;;  %v2459_v58 = vld [vmem:[#allocation2 + $0x20] sm:$0xff] }
 0x257   : > { %3599 = vtanh.f32 %v2438_v13  ;;  %v2455_v20 = vld [vmem:[#allocation2 + $0x10] sm:$0xff]  ;;  %v2460_v0 = vld [vmem:[#allocation2 + $0x98] sm:$0xff] }
 0x258   : > { %3601 = vtanh.f32 %v2439_v29 }
 0x259   : > { %3603 = vtanh.f32 %v2440_v27 }
 0x25a   : > { %3605 = vtanh.f32 %v2441_v56 }
 0x25b   : > { %v3582_v55 = vpop.eup %3581  ;;  %3607 = vtanh.f32 %v2442_v44 }
 0x25c   : > { %v3584_v31 = vpop.eup %3583  ;;  %2493 = vst [vmem:[%s4050_s26] sm:$0xff] %v3582_v55  ;;  %3609 = vtanh.f32 %v2443_v26 }
 0x25d   : > { %v3586_v23 = vpop.eup %3585  ;;  %2494 = vst [vmem:[%s4050_s26 + $0x8] sm:$0xff] %v3584_v31  ;;  %3611 = vtanh.f32 %v2444_v45 }
 0x25e   : > { %v3588_v11 = vpop.eup %3587  ;;  %2495 = vst [vmem:[%s4050_s26 + $0x10] sm:$0xff] %v3586_v23  ;;  %3613 = vtanh.f32 %v2445_v33 }
 0x25f   : > { %v3590_v34 = vpop.eup %3589  ;;  %2496 = vst [vmem:[%s4050_s26 + $0x18] sm:$0xff] %v3588_v11  ;;  %3615 = vtanh.f32 %v2446_v19 }
 0x260   : > { %v3592_v40 = vpop.eup %3591  ;;  %2497 = vst [vmem:[%s4050_s26 + $0x20] sm:$0xff] %v3590_v34  ;;  %3617 = vtanh.f32 %v2447_v48 }
 0x261   : > { %v3594_v7 = vpop.eup %3593  ;;  %2498 = vst [vmem:[%s4050_s26 + $0x28] sm:$0xff] %v3592_v40  ;;  %3619 = vtanh.f32 %v2448_v47 }
 0x262   : > { %v3596_v3 = vpop.eup %3595  ;;  %2499 = vst [vmem:[%s4050_s26 + $0x30] sm:$0xff] %v3594_v7  ;;  %3621 = vtanh.f32 %v2449_v38 }
 0x263   : > { %v3598_v8 = vpop.eup %3597  ;;  %2500 = vst [vmem:[%s4050_s26 + $0x38] sm:$0xff] %v3596_v3  ;;  %3623 = vtanh.f32 %v2450_v60 }
 0x264   : > { %v3600_v21 = vpop.eup %3599  ;;  %2501 = vst [vmem:[%s4050_s26 + $0x40] sm:$0xff] %v3598_v8  ;;  %3625 = vtanh.f32 %v2451_v2 }
 0x265   : > { %v3602_v53 = vpop.eup %3601  ;;  %2502 = vst [vmem:[%s4050_s26 + $0x48] sm:$0xff] %v3600_v21  ;;  %3627 = vtanh.f32 %v2452_v46 }
 0x266   : > { %v3604_v37 = vpop.eup %3603  ;;  %2503 = vst [vmem:[%s4050_s26 + $0x50] sm:$0xff] %v3602_v53  ;;  %3629 = vtanh.f32 %v2453_v51 }
 0x267   : > { %v3606_v9 = vpop.eup %3605  ;;  %2504 = vst [vmem:[%s4050_s26 + $0x58] sm:$0xff] %v3604_v37  ;;  %3631 = vtanh.f32 %v2454_v28 }
 0x268   : > { %v3608_v63 = vpop.eup %3607  ;;  %2505 = vst [vmem:[%s4050_s26 + $0x60] sm:$0xff] %v3606_v9  ;;  %3633 = vtanh.f32 %v2455_v20 }
 0x269   : > { %v3610_v43 = vpop.eup %3609  ;;  %2506 = vst [vmem:[%s4050_s26 + $0x68] sm:$0xff] %v3608_v63  ;;  %3635 = vtanh.f32 %v2456_v54 }
 0x26a   : > { %v3612_v5 = vpop.eup %3611  ;;  %2507 = vst [vmem:[%s4050_s26 + $0x70] sm:$0xff] %v3610_v43  ;;  %3637 = vtanh.f32 %v2457_v25 }
 0x26b   : > { %v3614_v24 = vpop.eup %3613  ;;  %2508 = vst [vmem:[%s4050_s26 + $0x78] sm:$0xff] %v3612_v5  ;;  %3639 = vtanh.f32 %v2458_v50 }
 0x26c   : > { %v3616_v52 = vpop.eup %3615  ;;  %2509 = vst [vmem:[%s4050_s26 + $0x80] sm:$0xff] %v3614_v24  ;;  %3641 = vtanh.f32 %v2459_v58 }
 0x26d   : > { %v3618_v4 = vpop.eup %3617  ;;  %2510 = vst [vmem:[%s4050_s26 + $0x88] sm:$0xff] %v3616_v52  ;;  %3643 = vtanh.f32 %v2460_v0 }
 0x26e   : > { %v3620_v39 = vpop.eup %3619  ;;  %2511 = vst [vmem:[%s4050_s26 + $0x90] sm:$0xff] %v3618_v4 }
 0x26f   : > { %v3622_v1 = vpop.eup %3621  ;;  %2512 = vst [vmem:[%s4050_s26 + $0x98] sm:$0xff] %v3620_v39 }
 0x270   : > { %v3624_v14 = vpop.eup %3623  ;;  %2513 = vst [vmem:[%s4050_s26 + $0xa0] sm:$0xff] %v3622_v1 }
 0x271   : > { %v3626_v62 = vpop.eup %3625  ;;  %2514 = vst [vmem:[%s4050_s26 + $0xa8] sm:$0xff] %v3624_v14 }
 0x272   : > { %v3628_v30 = vpop.eup %3627  ;;  %2515 = vst [vmem:[%s4050_s26 + $0xb0] sm:$0xff] %v3626_v62 }
 0x273   : > { %v3630_v42 = vpop.eup %3629  ;;  %2516 = vst [vmem:[%s4050_s26 + $0xb8] sm:$0xff] %v3628_v30 }
 0x274   : > { %v3632_v10 = vpop.eup %3631  ;;  %2517 = vst [vmem:[%s4050_s26 + $0xc0] sm:$0xff] %v3630_v42 }
 0x275   : > { %v3634_v41 = vpop.eup %3633  ;;  %2518 = vst [vmem:[%s4050_s26 + $0xc8] sm:$0xff] %v3632_v10 }
 0x276   : > { %v3636_v36 = vpop.eup %3635  ;;  %2519 = vst [vmem:[%s4050_s26 + $0xd0] sm:$0xff] %v3634_v41 }
 0x277   : > { %v3638_v16 = vpop.eup %3637  ;;  %2520 = vst [vmem:[%s4050_s26 + $0xd8] sm:$0xff] %v3636_v36 }
 0x278   : > { %v3640_v61 = vpop.eup %3639  ;;  %2521 = vst [vmem:[%s4050_s26 + $0xe0] sm:$0xff] %v3638_v16 }
 0x279   : > { %v3642_v32 = vpop.eup %3641  ;;  %2522 = vst [vmem:[%s4050_s26 + $0xe8] sm:$0xff] %v3640_v61 }
 0x27a   : > { %v3644_v22 = vpop.eup %3643  ;;  %2523 = vst [vmem:[%s4050_s26 + $0xf0] sm:$0xff] %v3642_v32 }
 0x27b   : > { %2524 = vst [vmem:[%s4050_s26 + $0xf8] sm:$0xff] %v3644_v22 }
 0x27c PF: > { %s12_s15 = sadd.s32 1, %s3699_s15   ;;  %s4568_s9 = smov %s3679_s10 }
 0x27d   : > { %p9_p0 = scmp.ge.s32.totalorder %s12_s15, 16   ;;  %s4569_s10 = smov %s3768_s22 }
 0x27e   : > { %s4570_s11 = smov %s3691_s13  ;;  %s4571_s12 = smov %s3695_s14 }
 0x27f   : > { %s4572_s13 = smov %s4575_s16  ;;  %s4573_s14 = smov %s4579_s17 }
 0x280   :  { %11 = sbr.rel (!%p9_p0) target bundleno = 4 (0x4), region = 106 }

</bundles_post_ra>
